<compile_context>
chip_gen: v7x
topology: tpu7x:2x2x1
jax: 0.10.0
libtpu: 0.0.40
codegen_flags: <defaults>
</compile_context>

<pallas_src>
import functools

import jax
import jax.numpy as jnp
from jax.experimental import pallas as pl
from jax.experimental.pallas import tpu as pltpu

# Set to jnp.bfloat16 for large-batch throughput on v6e/v7x (MXU bf16 peak and
# half the weight-DMA bytes, f32 accumulation); f32 keeps exact module parity.
COMPUTE_DTYPE = jnp.float32

FC_OUT = 4000       # dec_fc2 true output features (Unflatten -> (10, 20, 20))
FC_OUT_PAD = 4096   # padded to a multiple of 128 so the output dim can be tiled
FC_TILE = 1024      # dec_fc2 output-column tile -> grid of 4, "parallel"


# ---------------------------------------------------------------------------
# Pallas kernel 1: lane-dense conv matmul    out = relu?(W @ patches + b)
#   W: (Cout, K), patches: (K, S), out: (Cout, S), S = oh*ow on the lane axis.
# ---------------------------------------------------------------------------
def _conv_matmul_kernel(p_ref, w_ref, b_ref, o_ref, *, apply_relu):
    acc = jnp.dot(w_ref[...], p_ref[0], preferred_element_type=jnp.float32)
    acc = acc + b_ref[...]                       # (Cout, 1) broadcast over lanes
    if apply_relu:
        acc = jnp.maximum(acc, 0.0)
    o_ref[0] = acc.astype(o_ref.dtype)


def conv2d_nchw(x, w2d, b2d, *, kh=5, kw=5, relu=False):
    """x: (N, Cin, H, W); w2d: (Cout, Cin*kh*kw); b2d: (Cout, 1).

    Returns (N, Cout, oh*ow) f32 (NCHW with spatial flattened onto lanes).
    """
    n, _cin, h, w = x.shape
    cout, k = w2d.shape
    oh, ow = h - kh + 1, w - kw + 1
    s = oh * ow

    # im2col as one fused XLA gather; feature ordering is (c, ki, kj), which
    # matches w.reshape(Cout, Cin*kh*kw).  (N,K,oh,ow)->(N,K,S) is a free
    # trailing-dims reshape.
    patches = jax.lax.conv_general_dilated_patches(
        x, (kh, kw), (1, 1), "VALID",
        dimension_numbers=("NCHW", "OIHW", "NCHW"))
    patches = patches.reshape(n, k, s).astype(w2d.dtype)

    kernel = functools.partial(_conv_matmul_kernel, apply_relu=relu)
    flops = 2 * n * cout * k * s
    bytes_accessed = 4 * (n * k * s + cout * k + cout + n * cout * s)
    return pl.pallas_call(
        kernel,
        out_shape=jax.ShapeDtypeStruct((n, cout, s), jnp.float32),
        grid=(n,),
        in_specs=[
            pl.BlockSpec((1, k, s), lambda i: (i, 0, 0)),   # per-batch patches
            pl.BlockSpec((cout, k), lambda i: (0, 0)),      # resident weight
            pl.BlockSpec((cout, 1), lambda i: (0, 0)),      # resident bias
        ],
        out_specs=pl.BlockSpec((1, cout, s), lambda i: (i, 0, 0)),
        compiler_params=pltpu.CompilerParams(
            dimension_semantics=("parallel",)),
        cost_estimate=pl.CostEstimate(
            flops=int(flops), transcendentals=0,
            bytes_accessed=int(bytes_accessed)),
    )(patches, w2d, b2d)


# ---------------------------------------------------------------------------
# Pallas kernel 2: fused FC chain  enc_fc -> dec_fc1(+ReLU) -> dec_fc2(+ReLU)
# Grid tiles the dec_fc2 output columns; w1/w2/x have constant index maps so
# they are DMA'd once; the tiny h1/h2 intermediates are recomputed per tile so
# every grid step is independent ("parallel" -> megacore-shardable on v7x).
# ---------------------------------------------------------------------------
def _fc_chain_kernel(x_ref, w1_ref, b1_ref, w2_ref, b2_ref, w3_ref, b3_ref, o_ref):
    # enc_fc: Linear(3200, 50)      (no ReLU: encoder ends with the Linear)
    h = jnp.dot(x_ref[...], w1_ref[...], preferred_element_type=jnp.float32)
    h = h + b1_ref[...]
    # dec_fc1: Linear(50, 400) + ReLU
    h = jnp.dot(h.astype(w2_ref.dtype), w2_ref[...],
                preferred_element_type=jnp.float32)
    h = jnp.maximum(h + b2_ref[...], 0.0)
    # dec_fc2 (column tile j): Linear(400, 4096-padded) + ReLU
    h = jnp.dot(h.astype(w3_ref.dtype), w3_ref[...],
                preferred_element_type=jnp.float32)
    h = jnp.maximum(h + b3_ref[...], 0.0)
    o_ref[...] = h.astype(o_ref.dtype)


def fc_chain(x, w1, b1, w2, b2, w3p, b3p):
    """x: (N, 3200) -> (N, FC_OUT_PAD) f32."""
    n, k1 = x.shape
    d1, d2, d3 = w1.shape[1], w2.shape[1], w3p.shape[1]
    assert d3 % FC_TILE == 0
    n_tiles = d3 // FC_TILE
    x = x.astype(w1.dtype)

    flops = 2 * n * (k1 * d1 + d1 * d2 + d2 * d3)
    bytes_accessed = 4 * (n * k1 + k1 * d1 + d1 + d1 * d2 + d2
                          + d2 * d3 + d3 + n * d3)
    return pl.pallas_call(
        _fc_chain_kernel,
        out_shape=jax.ShapeDtypeStruct((n, d3), jnp.float32),
        grid=(n_tiles,),
        in_specs=[
            pl.BlockSpec((n, k1), lambda j: (0, 0)),        # activations, resident
            pl.BlockSpec((k1, d1), lambda j: (0, 0)),       # enc_fc W, resident
            pl.BlockSpec((1, d1), lambda j: (0, 0)),
            pl.BlockSpec((d1, d2), lambda j: (0, 0)),       # dec_fc1 W, resident
            pl.BlockSpec((1, d2), lambda j: (0, 0)),
            pl.BlockSpec((d2, FC_TILE), lambda j: (0, j)),  # dec_fc2 W, pipelined tiles
            pl.BlockSpec((1, FC_TILE), lambda j: (0, j)),
        ],
        out_specs=pl.BlockSpec((n, FC_TILE), lambda j: (0, j)),
        compiler_params=pltpu.CompilerParams(
            dimension_semantics=("parallel",),
            vmem_limit_bytes=32 * 1024 * 1024),
        cost_estimate=pl.CostEstimate(
            flops=int(flops), transcendentals=0,
            bytes_accessed=int(bytes_accessed)),
    )(x, w1, b1, w2, b2, w3p, b3p)


# ---------------------------------------------------------------------------
# Pure-gather ops kept in JAX (no FLOPs)
# ---------------------------------------------------------------------------
def upsample_nearest(x, out_h, out_w):
    """PyTorch nn.Upsample(mode='nearest'): src = floor(dst * in / out)."""
    n, c, h, w = x.shape
    rows = (jnp.arange(out_h) * h) // out_h
    cols = (jnp.arange(out_w) * w) // out_w
    return x[:, :, rows[:, None], cols[None, :]]


# ---------------------------------------------------------------------------
# Parameters: PyTorch-layout synthetic init, then one-time matmul-ready prep
# ---------------------------------------------------------------------------
def init_params(key):
    ks = jax.random.split(key, 14)
    s = 0.05
    return {
        # encoder
        "conv1_w": jax.random.normal(ks[0], (4, 1, 5, 5), jnp.float32) * s,
        "conv1_b": jax.random.normal(ks[1], (4,), jnp.float32) * s,
        "conv2_w": jax.random.normal(ks[2], (8, 4, 5, 5), jnp.float32) * s,
        "conv2_b": jax.random.normal(ks[3], (8,), jnp.float32) * s,
        "enc_fc_w": jax.random.normal(ks[4], (3200, 50), jnp.float32) * s,
        "enc_fc_b": jax.random.normal(ks[5], (50,), jnp.float32) * s,
        # decoder
        "dec_fc1_w": jax.random.normal(ks[6], (50, 400), jnp.float32) * s,
        "dec_fc1_b": jax.random.normal(ks[7], (400,), jnp.float32) * s,
        "dec_fc2_w": jax.random.normal(ks[8], (400, 4000), jnp.float32) * s,
        "dec_fc2_b": jax.random.normal(ks[9], (4000,), jnp.float32) * s,
        "convt1_w": jax.random.normal(ks[10], (10, 10, 5, 5), jnp.float32) * s,
        "convt1_b": jax.random.normal(ks[11], (10,), jnp.float32) * s,
        "convt2_w": jax.random.normal(ks[12], (10, 1, 5, 5), jnp.float32) * s,
        "convt2_b": jax.random.normal(ks[13], (1,), jnp.float32) * s,
    }


def prepare_params(p):
    """One-time conversion to matmul-ready layouts (outside the jitted fwd)."""
    cd = COMPUTE_DTYPE
    # ConvTranspose2d(stride=1) == correlation with a spatially flipped,
    # in/out-channel-swapped kernel applied to an input zero-padded by k-1.
    ct1 = jnp.flip(p["convt1_w"], axis=(2, 3)).transpose(1, 0, 2, 3)
    ct2 = jnp.flip(p["convt2_w"], axis=(2, 3)).transpose(1, 0, 2, 3)
    pad = FC_OUT_PAD - FC_OUT
    return {
        "conv1_w2d": p["conv1_w"].reshape(4, 25).astype(cd),
        "conv1_b2d": p["conv1_b"].reshape(4, 1),
        "conv2_w2d": p["conv2_w"].reshape(8, 100).astype(cd),
        "conv2_b2d": p["conv2_b"].reshape(8, 1),
        "enc_fc_w": p["enc_fc_w"].astype(cd),
        "enc_fc_b2d": p["enc_fc_b"].reshape(1, 50),
        "dec_fc1_w": p["dec_fc1_w"].astype(cd),
        "dec_fc1_b2d": p["dec_fc1_b"].reshape(1, 400),
        "dec_fc2_wp": jnp.pad(p["dec_fc2_w"], ((0, 0), (0, pad))).astype(cd),
        "dec_fc2_bp": jnp.pad(p["dec_fc2_b"], ((0, pad),)).reshape(1, FC_OUT_PAD),
        "convt1_w2d": ct1.reshape(10, 250).astype(cd),
        "convt1_b2d": p["convt1_b"].reshape(10, 1),
        "convt2_w2d": ct2.reshape(1, 250).astype(cd),
        "convt2_b2d": p["convt2_b"].reshape(1, 1),
    }


# ---------------------------------------------------------------------------
# Forward pass (mirrors Autoencoder.forward)
# ---------------------------------------------------------------------------
def autoencoder_forward(p, x):
    n = x.shape[0]

    # --- encoder ---
    h = upsample_nearest(x, 28, 28)                                   # (N, 1, 28, 28)
    h = conv2d_nchw(h, p["conv1_w2d"], p["conv1_b2d"], relu=True)     # (N, 4, 576)
    h = conv2d_nchw(h.reshape(n, 4, 24, 24),
                    p["conv2_w2d"], p["conv2_b2d"], relu=True)        # (N, 8, 400)
    h = h.reshape(n, 8 * 400)                                         # Flatten (C,H,W)

    # --- fused FC chain: enc_fc -> dec_fc1(+ReLU) -> dec_fc2(+ReLU) ---
    h = fc_chain(h, p["enc_fc_w"], p["enc_fc_b2d"],
                 p["dec_fc1_w"], p["dec_fc1_b2d"],
                 p["dec_fc2_wp"], p["dec_fc2_bp"])                    # (N, 4096)
    h = h[:, :FC_OUT].reshape(n, 10, 20, 20)                          # Unflatten

    # --- decoder convs (transpose conv == pad + conv with prepped weights) ---
    h = jnp.pad(h, ((0, 0), (0, 0), (4, 4), (4, 4)))                  # (N, 10, 28, 28)
    h = conv2d_nchw(h, p["convt1_w2d"], p["convt1_b2d"], relu=False)  # (N, 10, 576)
    h = jnp.pad(h.reshape(n, 10, 24, 24),
                ((0, 0), (0, 0), (4, 4), (4, 4)))                     # (N, 10, 32, 32)
    h = conv2d_nchw(h, p["convt2_w2d"], p["convt2_b2d"], relu=False)  # (N, 1, 784)
    h = upsample_nearest(h.reshape(n, 1, 28, 28), 26, 48)             # (N, 1, 26, 48)
    return h


if __name__ == "__main__":
    key = jax.random.PRNGKey(0)
    pkey, xkey = jax.random.split(key)
    params = prepare_params(init_params(pkey))   # matmul-ready weights, built once

    # Small input consistent with the module: 1 input channel (MNIST-like).
    x = jax.random.normal(xkey, (2, 1, 16, 16), jnp.float32)

    fwd = jax.jit(autoencoder_forward)
    out = jax.block_until_ready(fwd(params, x))

    assert out.shape == (2, 1, 26, 48), out.shape
    assert out.dtype == jnp.float32
    print("KERNEL_OK")
</pallas_src>

<mosaic_0001>
module attributes {stable_mosaic.version = 11 : i64} {
  func.func private @main(%arg0: i32) attributes {dimension_semantics = [#tpu.dimension_semantics<core_parallel>], iteration_bounds = array<i64: 2>, tpu.core_type = #tpu.core_type<sc_scalar_subcore>, window_params = []} {
    return
  }
}

module attributes {stable_mosaic.version = 11 : i64} {
  func.func private @main(%arg0: i32) attributes {dimension_semantics = [#tpu.dimension_semantics<core_parallel>], iteration_bounds = array<i64: 2>, tpu.core_type = #tpu.core_type<sc_scalar_subcore>, window_params = []} {
    return
  }
}

module attributes {stable_mosaic.version = 11 : i64} {
  func.func @_conv_matmul_kernel(%arg0: i32, %arg1: memref<1x25x576xf32, #tpu.memory_space<vmem>>, %arg2: memref<4x25xf32, #tpu.memory_space<vmem>>, %arg3: memref<4x1xf32, #tpu.memory_space<vmem>>, %arg4: memref<1x4x576xf32, #tpu.memory_space<vmem>>) attributes {dimension_semantics = [#tpu.dimension_semantics<parallel>], iteration_bounds = array<i64: 2>, scalar_prefetch = 0 : i64, scratch_operands = 0 : i64, tpu.core_type = #tpu.core_type<tc>, window_params = [{transform_indices = @transform_0, window_bounds = array<i64: 1, 25, 576>}, {pipeline_mode = #tpu.pipeline_mode<synchronous>, transform_indices = @transform_1, window_bounds = array<i64: 4, 25>}, {pipeline_mode = #tpu.pipeline_mode<synchronous>, transform_indices = @transform_2, window_bounds = array<i64: 4, 1>}, {transform_indices = @transform_3, window_bounds = array<i64: 1, 4, 576>}]} {
    %c0 = arith.constant 0 : index
    %c0_0 = arith.constant 0 : index
    %0 = vector.load %arg2[%c0, %c0_0] : memref<4x25xf32, #tpu.memory_space<vmem>>, vector<4x25xf32>
    %c0_1 = arith.constant 0 : index
    %c0_2 = arith.constant 0 : index
    %c0_3 = arith.constant 0 : index
    %1 = vector.load %arg1[%c0_1, %c0_2, %c0_3] : memref<1x25x576xf32, #tpu.memory_space<vmem>>, vector<1x25x576xf32>
    %2 = vector.shape_cast %1 : vector<1x25x576xf32> to vector<25x576xf32>
    %cst = arith.constant dense<0.000000e+00> : vector<4x576xf32>
    %3 = tpu.matmul %0, %2, %cst {dimension_numbers = #tpu.dot_dimension_numbers<[1], [0], [0], [1], [0, 0, 1, 1], [], []>} : vector<4x25xf32>, vector<25x576xf32>, vector<4x576xf32> -> vector<4x576xf32>
    %c0_4 = arith.constant 0 : index
    %c0_5 = arith.constant 0 : index
    %4 = vector.load %arg3[%c0_4, %c0_5] : memref<4x1xf32, #tpu.memory_space<vmem>>, vector<4x1xf32>
    %5 = vector.broadcast %4 : vector<4x1xf32> to vector<4x576xf32>
    %6 = arith.addf %3, %5 : vector<4x576xf32>
    %cst_6 = arith.constant 0.000000e+00 : f32
    %7 = vector.broadcast %cst_6 : f32 to vector<4x576xf32>
    %8 = arith.maximumf %6, %7 : vector<4x576xf32>
    %c0_7 = arith.constant 0 : index
    %c0_8 = arith.constant 0 : index
    %c0_9 = arith.constant 0 : index
    %9 = vector.load %arg4[%c0_7, %c0_8, %c0_9] : memref<1x4x576xf32, #tpu.memory_space<vmem>>, vector<1x4x576xf32>
    %10 = vector.shape_cast %9 : vector<1x4x576xf32> to vector<4x576xf32>
    %11 = vector.shape_cast %8 : vector<4x576xf32> to vector<1x4x576xf32>
    tpu.vector_store %arg4[%c0_7, %c0_8, %c0_9], %11 {strides = array<i32>} : memref<1x4x576xf32, #tpu.memory_space<vmem>>, vector<1x4x576xf32>,
    return
  }
  func.func @transform_0(%arg0: i32) -> (i32, i32, i32) {
    %c0_i32 = arith.constant 0 : i32
    %c0_i32_0 = arith.constant 0 : i32
    %c0_i32_1 = arith.constant 0 : i32
    return %arg0, %c0_i32, %c0_i32_0 : i32, i32, i32
  }
  func.func @transform_1(%arg0: i32) -> (i32, i32) {
    %c0_i32 = arith.constant 0 : i32
    %c0_i32_0 = arith.constant 0 : i32
    %c0_i32_1 = arith.constant 0 : i32
    return %c0_i32, %c0_i32_0 : i32, i32
  }
  func.func @transform_2(%arg0: i32) -> (i32, i32) {
    %c0_i32 = arith.constant 0 : i32
    %c0_i32_0 = arith.constant 0 : i32
    %c0_i32_1 = arith.constant 0 : i32
    return %c0_i32, %c0_i32_0 : i32, i32
  }
  func.func @transform_3(%arg0: i32) -> (i32, i32, i32) {
    %c0_i32 = arith.constant 0 : i32
    %c0_i32_0 = arith.constant 0 : i32
    %c0_i32_1 = arith.constant 0 : i32
    return %arg0, %c0_i32, %c0_i32_0 : i32, i32, i32
  }
}

module attributes {stable_mosaic.version = 11 : i64} {
  func.func @_conv_matmul_kernel(%arg0: i32, %arg1: memref<1x100x400xf32, #tpu.memory_space<vmem>>, %arg2: memref<8x100xf32, #tpu.memory_space<vmem>>, %arg3: memref<8x1xf32, #tpu.memory_space<vmem>>, %arg4: memref<1x8x400xf32, #tpu.memory_space<vmem>>) attributes {dimension_semantics = [#tpu.dimension_semantics<parallel>], iteration_bounds = array<i64: 2>, scalar_prefetch = 0 : i64, scratch_operands = 0 : i64, tpu.core_type = #tpu.core_type<tc>, window_params = [{transform_indices = @transform_0, window_bounds = array<i64: 1, 100, 400>}, {pipeline_mode = #tpu.pipeline_mode<synchronous>, transform_indices = @transform_1, window_bounds = array<i64: 8, 100>}, {pipeline_mode = #tpu.pipeline_mode<synchronous>, transform_indices = @transform_2, window_bounds = array<i64: 8, 1>}, {transform_indices = @transform_3, window_bounds = array<i64: 1, 8, 400>}]} {
    %c0 = arith.constant 0 : index
    %c0_0 = arith.constant 0 : index
    %0 = vector.load %arg2[%c0, %c0_0] : memref<8x100xf32, #tpu.memory_space<vmem>>, vector<8x100xf32>
    %c0_1 = arith.constant 0 : index
    %c0_2 = arith.constant 0 : index
    %c0_3 = arith.constant 0 : index
    %1 = vector.load %arg1[%c0_1, %c0_2, %c0_3] : memref<1x100x400xf32, #tpu.memory_space<vmem>>, vector<1x100x400xf32>
    %2 = vector.shape_cast %1 : vector<1x100x400xf32> to vector<100x400xf32>
    %cst = arith.constant dense<0.000000e+00> : vector<8x400xf32>
    %3 = tpu.matmul %0, %2, %cst {dimension_numbers = #tpu.dot_dimension_numbers<[1], [0], [0], [1], [0, 0, 1, 1], [], []>} : vector<8x100xf32>, vector<100x400xf32>, vector<8x400xf32> -> vector<8x400xf32>
    %c0_4 = arith.constant 0 : index
    %c0_5 = arith.constant 0 : index
    %4 = vector.load %arg3[%c0_4, %c0_5] : memref<8x1xf32, #tpu.memory_space<vmem>>, vector<8x1xf32>
    %5 = vector.broadcast %4 : vector<8x1xf32> to vector<8x400xf32>
    %6 = arith.addf %3, %5 : vector<8x400xf32>
    %cst_6 = arith.constant 0.000000e+00 : f32
    %7 = vector.broadcast %cst_6 : f32 to vector<8x400xf32>
    %8 = arith.maximumf %6, %7 : vector<8x400xf32>
    %c0_7 = arith.constant 0 : index
    %c0_8 = arith.constant 0 : index
    %c0_9 = arith.constant 0 : index
    %9 = vector.load %arg4[%c0_7, %c0_8, %c0_9] : memref<1x8x400xf32, #tpu.memory_space<vmem>>, vector<1x8x400xf32>
    %10 = vector.shape_cast %9 : vector<1x8x400xf32> to vector<8x400xf32>
    %11 = vector.shape_cast %8 : vector<8x400xf32> to vector<1x8x400xf32>
    tpu.vector_store %arg4[%c0_7, %c0_8, %c0_9], %11 {strides = array<i32>} : memref<1x8x400xf32, #tpu.memory_space<vmem>>, vector<1x8x400xf32>,
    return
  }
  func.func @transform_0(%arg0: i32) -> (i32, i32, i32) {
    %c0_i32 = arith.constant 0 : i32
    %c0_i32_0 = arith.constant 0 : i32
    %c0_i32_1 = arith.constant 0 : i32
    return %arg0, %c0_i32, %c0_i32_0 : i32, i32, i32
  }
  func.func @transform_1(%arg0: i32) -> (i32, i32) {
    %c0_i32 = arith.constant 0 : i32
    %c0_i32_0 = arith.constant 0 : i32
    %c0_i32_1 = arith.constant 0 : i32
    return %c0_i32, %c0_i32_0 : i32, i32
  }
  func.func @transform_2(%arg0: i32) -> (i32, i32) {
    %c0_i32 = arith.constant 0 : i32
    %c0_i32_0 = arith.constant 0 : i32
    %c0_i32_1 = arith.constant 0 : i32
    return %c0_i32, %c0_i32_0 : i32, i32
  }
  func.func @transform_3(%arg0: i32) -> (i32, i32, i32) {
    %c0_i32 = arith.constant 0 : i32
    %c0_i32_0 = arith.constant 0 : i32
    %c0_i32_1 = arith.constant 0 : i32
    return %arg0, %c0_i32, %c0_i32_0 : i32, i32, i32
  }
}

module attributes {stable_mosaic.version = 11 : i64} {
  func.func @_fc_chain_kernel(%arg0: i32, %arg1: memref<2x3200xf32, #tpu.memory_space<vmem>>, %arg2: memref<3200x50xf32, #tpu.memory_space<vmem>>, %arg3: memref<1x50xf32, #tpu.memory_space<vmem>>, %arg4: memref<50x400xf32, #tpu.memory_space<vmem>>, %arg5: memref<1x400xf32, #tpu.memory_space<vmem>>, %arg6: memref<400x1024xf32, #tpu.memory_space<vmem>>, %arg7: memref<1x1024xf32, #tpu.memory_space<vmem>>, %arg8: memref<2x1024xf32, #tpu.memory_space<vmem>>) attributes {dimension_semantics = [#tpu.dimension_semantics<parallel>], iteration_bounds = array<i64: 4>, scalar_prefetch = 0 : i64, scratch_operands = 0 : i64, tpu.core_type = #tpu.core_type<tc>, window_params = [{pipeline_mode = #tpu.pipeline_mode<synchronous>, transform_indices = @transform_0, window_bounds = array<i64: 2, 3200>}, {pipeline_mode = #tpu.pipeline_mode<synchronous>, transform_indices = @transform_1, window_bounds = array<i64: 3200, 50>}, {pipeline_mode = #tpu.pipeline_mode<synchronous>, transform_indices = @transform_2, window_bounds = array<i64: 1, 50>}, {pipeline_mode = #tpu.pipeline_mode<synchronous>, transform_indices = @transform_3, window_bounds = array<i64: 50, 400>}, {pipeline_mode = #tpu.pipeline_mode<synchronous>, transform_indices = @transform_4, window_bounds = array<i64: 1, 400>}, {transform_indices = @transform_5, window_bounds = array<i64: 400, 1024>}, {transform_indices = @transform_6, window_bounds = array<i64: 1, 1024>}, {transform_indices = @transform_7, window_bounds = array<i64: 2, 1024>}]} {
    %c0 = arith.constant 0 : index
    %c0_0 = arith.constant 0 : index
    %0 = vector.load %arg1[%c0, %c0_0] : memref<2x3200xf32, #tpu.memory_space<vmem>>, vector<2x3200xf32>
    %c0_1 = arith.constant 0 : index
    %c0_2 = arith.constant 0 : index
    %1 = vector.load %arg2[%c0_1, %c0_2] : memref<3200x50xf32, #tpu.memory_space<vmem>>, vector<3200x50xf32>
    %cst = arith.constant dense<0.000000e+00> : vector<2x50xf32>
    %2 = tpu.matmul %0, %1, %cst {dimension_numbers = #tpu.dot_dimension_numbers<[1], [0], [0], [1], [0, 0, 1, 1], [], []>} : vector<2x3200xf32>, vector<3200x50xf32>, vector<2x50xf32> -> vector<2x50xf32>
    %c0_3 = arith.constant 0 : index
    %c0_4 = arith.constant 0 : index
    %3 = vector.load %arg3[%c0_3, %c0_4] : memref<1x50xf32, #tpu.memory_space<vmem>>, vector<1x50xf32>
    %4 = vector.broadcast %3 : vector<1x50xf32> to vector<2x50xf32>
    %5 = arith.addf %2, %4 : vector<2x50xf32>
    %c0_5 = arith.constant 0 : index
    %c0_6 = arith.constant 0 : index
    %6 = vector.load %arg4[%c0_5, %c0_6] : memref<50x400xf32, #tpu.memory_space<vmem>>, vector<50x400xf32>
    %cst_7 = arith.constant dense<0.000000e+00> : vector<2x400xf32>
    %7 = tpu.matmul %5, %6, %cst_7 {dimension_numbers = #tpu.dot_dimension_numbers<[1], [0], [0], [1], [0, 0, 1, 1], [], []>} : vector<2x50xf32>, vector<50x400xf32>, vector<2x400xf32> -> vector<2x400xf32>
    %c0_8 = arith.constant 0 : index
    %c0_9 = arith.constant 0 : index
    %8 = vector.load %arg5[%c0_8, %c0_9] : memref<1x400xf32, #tpu.memory_space<vmem>>, vector<1x400xf32>
    %9 = vector.broadcast %8 : vector<1x400xf32> to vector<2x400xf32>
    %10 = arith.addf %7, %9 : vector<2x400xf32>
    %cst_10 = arith.constant 0.000000e+00 : f32
    %11 = vector.broadcast %cst_10 : f32 to vector<2x400xf32>
    %12 = arith.maximumf %10, %11 : vector<2x400xf32>
    %c0_11 = arith.constant 0 : index
    %c0_12 = arith.constant 0 : index
    %13 = vector.load %arg6[%c0_11, %c0_12] : memref<400x1024xf32, #tpu.memory_space<vmem>>, vector<400x1024xf32>
    %cst_13 = arith.constant dense<0.000000e+00> : vector<2x1024xf32>
    %14 = tpu.matmul %12, %13, %cst_13 {dimension_numbers = #tpu.dot_dimension_numbers<[1], [0], [0], [1], [0, 0, 1, 1], [], []>} : vector<2x400xf32>, vector<400x1024xf32>, vector<2x1024xf32> -> vector<2x1024xf32>
    %c0_14 = arith.constant 0 : index
    %c0_15 = arith.constant 0 : index
    %15 = vector.load %arg7[%c0_14, %c0_15] : memref<1x1024xf32, #tpu.memory_space<vmem>>, vector<1x1024xf32>
    %16 = vector.broadcast %15 : vector<1x1024xf32> to vector<2x1024xf32>
    %17 = arith.addf %14, %16 : vector<2x1024xf32>
    %cst_16 = arith.constant 0.000000e+00 : f32
    %18 = vector.broadcast %cst_16 : f32 to vector<2x1024xf32>
    %19 = arith.maximumf %17, %18 : vector<2x1024xf32>
    %c0_17 = arith.constant 0 : index
    %c0_18 = arith.constant 0 : index
    %20 = vector.load %arg8[%c0_17, %c0_18] : memref<2x1024xf32, #tpu.memory_space<vmem>>, vector<2x1024xf32>
    tpu.vector_store %arg8[%c0_17, %c0_18], %19 {strides = array<i32>} : memref<2x1024xf32, #tpu.memory_space<vmem>>, vector<2x1024xf32>,
    return
  }
  func.func @transform_0(%arg0: i32) -> (i32, i32) {
    %c0_i32 = arith.constant 0 : i32
    %c0_i32_0 = arith.constant 0 : i32
    %c0_i32_1 = arith.constant 0 : i32
    return %c0_i32, %c0_i32_0 : i32, i32
  }
  func.func @transform_1(%arg0: i32) -> (i32, i32) {
    %c0_i32 = arith.constant 0 : i32
    %c0_i32_0 = arith.constant 0 : i32
    %c0_i32_1 = arith.constant 0 : i32
    return %c0_i32, %c0_i32_0 : i32, i32
  }
  func.func @transform_2(%arg0: i32) -> (i32, i32) {
    %c0_i32 = arith.constant 0 : i32
    %c0_i32_0 = arith.constant 0 : i32
    %c0_i32_1 = arith.constant 0 : i32
    return %c0_i32, %c0_i32_0 : i32, i32
  }
  func.func @transform_3(%arg0: i32) -> (i32, i32) {
    %c0_i32 = arith.constant 0 : i32
    %c0_i32_0 = arith.constant 0 : i32
    %c0_i32_1 = arith.constant 0 : i32
    return %c0_i32, %c0_i32_0 : i32, i32
  }
  func.func @transform_4(%arg0: i32) -> (i32, i32) {
    %c0_i32 = arith.constant 0 : i32
    %c0_i32_0 = arith.constant 0 : i32
    %c0_i32_1 = arith.constant 0 : i32
    return %c0_i32, %c0_i32_0 : i32, i32
  }
  func.func @transform_5(%arg0: i32) -> (i32, i32) {
    %c0_i32 = arith.constant 0 : i32
    %c0_i32_0 = arith.constant 0 : i32
    return %c0_i32, %arg0 : i32, i32
  }
  func.func @transform_6(%arg0: i32) -> (i32, i32) {
    %c0_i32 = arith.constant 0 : i32
    %c0_i32_0 = arith.constant 0 : i32
    return %c0_i32, %arg0 : i32, i32
  }
  func.func @transform_7(%arg0: i32) -> (i32, i32) {
    %c0_i32 = arith.constant 0 : i32
    %c0_i32_0 = arith.constant 0 : i32
    return %c0_i32, %arg0 : i32, i32
  }
}

module attributes {stable_mosaic.version = 11 : i64} {
  func.func @_conv_matmul_kernel(%arg0: i32, %arg1: memref<1x250x576xf32, #tpu.memory_space<vmem>>, %arg2: memref<10x250xf32, #tpu.memory_space<vmem>>, %arg3: memref<10x1xf32, #tpu.memory_space<vmem>>, %arg4: memref<1x10x576xf32, #tpu.memory_space<vmem>>) attributes {dimension_semantics = [#tpu.dimension_semantics<parallel>], iteration_bounds = array<i64: 2>, scalar_prefetch = 0 : i64, scratch_operands = 0 : i64, tpu.core_type = #tpu.core_type<tc>, window_params = [{transform_indices = @transform_0, window_bounds = array<i64: 1, 250, 576>}, {pipeline_mode = #tpu.pipeline_mode<synchronous>, transform_indices = @transform_1, window_bounds = array<i64: 10, 250>}, {pipeline_mode = #tpu.pipeline_mode<synchronous>, transform_indices = @transform_2, window_bounds = array<i64: 10, 1>}, {transform_indices = @transform_3, window_bounds = array<i64: 1, 10, 576>}]} {
    %c0 = arith.constant 0 : index
    %c0_0 = arith.constant 0 : index
    %0 = vector.load %arg2[%c0, %c0_0] : memref<10x250xf32, #tpu.memory_space<vmem>>, vector<10x250xf32>
    %c0_1 = arith.constant 0 : index
    %c0_2 = arith.constant 0 : index
    %c0_3 = arith.constant 0 : index
    %1 = vector.load %arg1[%c0_1, %c0_2, %c0_3] : memref<1x250x576xf32, #tpu.memory_space<vmem>>, vector<1x250x576xf32>
    %2 = vector.shape_cast %1 : vector<1x250x576xf32> to vector<250x576xf32>
    %cst = arith.constant dense<0.000000e+00> : vector<10x576xf32>
    %3 = tpu.matmul %0, %2, %cst {dimension_numbers = #tpu.dot_dimension_numbers<[1], [0], [0], [1], [0, 0, 1, 1], [], []>} : vector<10x250xf32>, vector<250x576xf32>, vector<10x576xf32> -> vector<10x576xf32>
    %c0_4 = arith.constant 0 : index
    %c0_5 = arith.constant 0 : index
    %4 = vector.load %arg3[%c0_4, %c0_5] : memref<10x1xf32, #tpu.memory_space<vmem>>, vector<10x1xf32>
    %5 = vector.broadcast %4 : vector<10x1xf32> to vector<10x576xf32>
    %6 = arith.addf %3, %5 : vector<10x576xf32>
    %c0_6 = arith.constant 0 : index
    %c0_7 = arith.constant 0 : index
    %c0_8 = arith.constant 0 : index
    %7 = vector.load %arg4[%c0_6, %c0_7, %c0_8] : memref<1x10x576xf32, #tpu.memory_space<vmem>>, vector<1x10x576xf32>
    %8 = vector.shape_cast %7 : vector<1x10x576xf32> to vector<10x576xf32>
    %9 = vector.shape_cast %6 : vector<10x576xf32> to vector<1x10x576xf32>
    tpu.vector_store %arg4[%c0_6, %c0_7, %c0_8], %9 {strides = array<i32>} : memref<1x10x576xf32, #tpu.memory_space<vmem>>, vector<1x10x576xf32>,
    return
  }
  func.func @transform_0(%arg0: i32) -> (i32, i32, i32) {
    %c0_i32 = arith.constant 0 : i32
    %c0_i32_0 = arith.constant 0 : i32
    %c0_i32_1 = arith.constant 0 : i32
    return %arg0, %c0_i32, %c0_i32_0 : i32, i32, i32
  }
  func.func @transform_1(%arg0: i32) -> (i32, i32) {
    %c0_i32 = arith.constant 0 : i32
    %c0_i32_0 = arith.constant 0 : i32
    %c0_i32_1 = arith.constant 0 : i32
    return %c0_i32, %c0_i32_0 : i32, i32
  }
  func.func @transform_2(%arg0: i32) -> (i32, i32) {
    %c0_i32 = arith.constant 0 : i32
    %c0_i32_0 = arith.constant 0 : i32
    %c0_i32_1 = arith.constant 0 : i32
    return %c0_i32, %c0_i32_0 : i32, i32
  }
  func.func @transform_3(%arg0: i32) -> (i32, i32, i32) {
    %c0_i32 = arith.constant 0 : i32
    %c0_i32_0 = arith.constant 0 : i32
    %c0_i32_1 = arith.constant 0 : i32
    return %arg0, %c0_i32, %c0_i32_0 : i32, i32, i32
  }
}

module attributes {stable_mosaic.version = 11 : i64} {
  func.func @_conv_matmul_kernel(%arg0: i32, %arg1: memref<1x250x784xf32, #tpu.memory_space<vmem>>, %arg2: memref<1x250xf32, #tpu.memory_space<vmem>>, %arg3: memref<1x1xf32, #tpu.memory_space<vmem>>, %arg4: memref<1x1x784xf32, #tpu.memory_space<vmem>>) attributes {dimension_semantics = [#tpu.dimension_semantics<parallel>], iteration_bounds = array<i64: 2>, scalar_prefetch = 0 : i64, scratch_operands = 0 : i64, tpu.core_type = #tpu.core_type<tc>, window_params = [{transform_indices = @transform_0, window_bounds = array<i64: 1, 250, 784>}, {pipeline_mode = #tpu.pipeline_mode<synchronous>, transform_indices = @transform_1, window_bounds = array<i64: 1, 250>}, {pipeline_mode = #tpu.pipeline_mode<synchronous>, transform_indices = @transform_2, window_bounds = array<i64: 1, 1>}, {transform_indices = @transform_3, window_bounds = array<i64: 1, 1, 784>}]} {
    %c0 = arith.constant 0 : index
    %c0_0 = arith.constant 0 : index
    %0 = vector.load %arg2[%c0, %c0_0] : memref<1x250xf32, #tpu.memory_space<vmem>>, vector<1x250xf32>
    %c0_1 = arith.constant 0 : index
    %c0_2 = arith.constant 0 : index
    %c0_3 = arith.constant 0 : index
    %1 = vector.load %arg1[%c0_1, %c0_2, %c0_3] : memref<1x250x784xf32, #tpu.memory_space<vmem>>, vector<1x250x784xf32>
    %2 = vector.shape_cast %1 : vector<1x250x784xf32> to vector<250x784xf32>
    %cst = arith.constant dense<0.000000e+00> : vector<1x784xf32>
    %3 = tpu.matmul %0, %2, %cst {dimension_numbers = #tpu.dot_dimension_numbers<[1], [0], [0], [1], [0, 0, 1, 1], [], []>} : vector<1x250xf32>, vector<250x784xf32>, vector<1x784xf32> -> vector<1x784xf32>
    %c0_4 = arith.constant 0 : index
    %c0_5 = arith.constant 0 : index
    %4 = vector.load %arg3[%c0_4, %c0_5] : memref<1x1xf32, #tpu.memory_space<vmem>>, vector<1x1xf32>
    %5 = vector.broadcast %4 : vector<1x1xf32> to vector<1x784xf32>
    %6 = arith.addf %3, %5 : vector<1x784xf32>
    %c0_6 = arith.constant 0 : index
    %c0_7 = arith.constant 0 : index
    %c0_8 = arith.constant 0 : index
    %7 = vector.load %arg4[%c0_6, %c0_7, %c0_8] : memref<1x1x784xf32, #tpu.memory_space<vmem>>, vector<1x1x784xf32>
    %8 = vector.shape_cast %7 : vector<1x1x784xf32> to vector<1x784xf32>
    %9 = vector.shape_cast %6 : vector<1x784xf32> to vector<1x1x784xf32>
    tpu.vector_store %arg4[%c0_6, %c0_7, %c0_8], %9 {strides = array<i32>} : memref<1x1x784xf32, #tpu.memory_space<vmem>>, vector<1x1x784xf32>,
    return
  }
  func.func @transform_0(%arg0: i32) -> (i32, i32, i32) {
    %c0_i32 = arith.constant 0 : i32
    %c0_i32_0 = arith.constant 0 : i32
    %c0_i32_1 = arith.constant 0 : i32
    return %arg0, %c0_i32, %c0_i32_0 : i32, i32, i32
  }
  func.func @transform_1(%arg0: i32) -> (i32, i32) {
    %c0_i32 = arith.constant 0 : i32
    %c0_i32_0 = arith.constant 0 : i32
    %c0_i32_1 = arith.constant 0 : i32
    return %c0_i32, %c0_i32_0 : i32, i32
  }
  func.func @transform_2(%arg0: i32) -> (i32, i32) {
    %c0_i32 = arith.constant 0 : i32
    %c0_i32_0 = arith.constant 0 : i32
    %c0_i32_1 = arith.constant 0 : i32
    return %c0_i32, %c0_i32_0 : i32, i32
  }
  func.func @transform_3(%arg0: i32) -> (i32, i32, i32) {
    %c0_i32 = arith.constant 0 : i32
    %c0_i32_0 = arith.constant 0 : i32
    %c0_i32_1 = arith.constant 0 : i32
    return %arg0, %c0_i32, %c0_i32_0 : i32, i32, i32
  }
}

</mosaic_0001>

<bundles_post_ra>
// kernel: autoencoder_forward.5
= control target key start
LH: loop header
LB: loop body
LE: loop exit
PB: predicated region body
PF: predicated region fallthrough
CT: control target
= control target key end

     0   :  { %s611_s12 = smov 0   ;;  %s674_s0 = inlined_call_operand.vmem [shape: f32[2,25,576], index: 0, kind: input, shape index: {}]   ;;  %s675_s1 = inlined_call_operand.vmem [shape: f32[4,25], index: 1, kind: input, shape index: {}]   ;;  %s676_s2 = inlined_call_operand.vmem [shape: f32[4,1], index: 2, kind: input, shape index: {}]   ;;  %s677_s3 = inlined_call_operand.vmem [shape: f32[2,4,576], index: 3, kind: output, shape index: {}]  }
   0x1 LB: > { %s502_s13 = sadd.s32 4294967295, %s584_s12   ;;  %p506_p0 = scmp.ge.s32.totalorder %s584_s12, 1  ;;  %s584_s12 = sphi %s611_s12, %s13_s12  }
   0x2   : > { %p137_p1 = scmp.lt.s32.totalorder %s584_s12, 3 }
   0x4   : > { %p138_p2 = pnand %p506_p0, %p137_p1 }
   0x5   : > { %p161_p3 = scmp.lt.s32.totalorder (!%p138_p2), %s502_s13, 1  ;;  %v586_v0 = vmov (!%p138_p2), 0.0   ;;  %v192_v1 = vld [vmem:[%s676_s2] sm:$0xf] (!%p138_p2)  ;;  %v587_v2 = vmov (!%p138_p2), 0   ;;  %vm202_vm0 = vcmask (!%p138_p2), 1040384  }
   0x6   : > { %141 = sbr.rel (%p138_p2) target bundleno = 253 (0xfd), region = 32  ;;  %282 = vmatprep.mubr.f32.mxu0 (!%p138_p2), %v586_v0  ;;  %353 = vmatprep.mubr.f32.mxu1 (!%p138_p2), %v586_v0  ;;  %vm588_vm1 = vmmov (!%p138_p2), 1   ;;  %v171_v30 = vld [vmem:[%s675_s1] sm:$0xf] (!%p138_p2)  ;;  %vm198_vm3 = vcmask (!%p138_p2), 203776   ;;  %v589_v32 = vmov (!%p138_p2), 0.0|0.0  }
   0x7   : > { %577 = vset.pattern.permute.xlu0 (!%p138_p2), %v587_v2  ;;  %vm630_vm2 = vmpackc.low (!%p138_p2), %vm202_vm0, %vm588_vm1  ;;  %vm590_vm4 = vmmov (!%p138_p2), 0   ;;  %vm445_vm5 = vcmask (!%p138_p2), 519168  }
   0x8   : > { %195 = vperm.xlu0 (!%p138_p2), %577, %v192_v1  }
   0xd   : > { %s681_s13 = smov (!%p161_p3, %s502_s13), 1 }
   0xe   : > { %s562_s16 = smul.u32 160, %s681_s13 }
   0xf   : > { %s563_s22 = smul.u32 20, %s681_s13 }
  0x10   : > { %s628_s19 = scalar_lea.vmem %s674_s0, %s562_s16 }
  0x11   : > { %v173_v4 = vld [vmem:[%s628_s19 + $0x8] sm:$0xff]  ;;  %v178_v5 = vld [vmem:[%s628_s19 + $0x30] sm:$0xff]  ;;  %v172_v6 = vld [vmem:[%s628_s19] sm:$0xff]  ;;  %s170_s25 = scalar_lea.vmem %s677_s3, %s563_s22 }
  0x12   : > { %v535_v7 = vpack.c.bf16 %v178_v5, %v173_v4  ;;  %v177_v8 = vld [vmem:[%s628_s19 + $0x28] sm:$0xff]  ;;  %v183_v9 = vld [vmem:[%s628_s19 + $0x58] sm:$0xff]  ;;  %v188_v10 = vld [vmem:[%s628_s19 + $0x80] sm:$0x1] }
  0x13   : > { %v537_v11 = vpack.c.bf16 %v177_v8, %v172_v6  ;;  %v539_v12 = vpack.c.bf16 %v188_v10, %v183_v9  ;;  %v175_v13 = vld [vmem:[%s628_s19 + $0x18] sm:$0xff]  ;;  %v180_v14 = vld [vmem:[%s628_s19 + $0x40] sm:$0xff]  ;;  %v182_v15 = vld [vmem:[%s628_s19 + $0x50] sm:$0xff] }
  0x14   : > { %536 = vmatprep.subr.bf16.mxu0 %v535_v7  ;;  %v545_v16 = vpack.c.bf16 %v180_v14, %v175_v13  ;;  %v187_v17 = vld [vmem:[%s628_s19 + $0x78] sm:$0x1]  ;;  %v174_v18 = vld [vmem:[%s628_s19 + $0x10] sm:$0xff]  ;;  %v185_v22 = vld [vmem:[%s628_s19 + $0x68] sm:$0xff] }
  0x15   : > { %v179_v19 = vld [vmem:[%s628_s19 + $0x38] sm:$0xff]  ;;  %538 = vmatpush1.bf16.msra.mxu0 %v537_v11  ;;  %v542_v20 = vpack.c.bf16 %v187_v17, %v182_v15  ;;  %v190_v23 = vld [vmem:[%s628_s19 + $0x90] sm:$0x1]  ;;  %v184_v24 = vld [vmem:[%s628_s19 + $0x60] sm:$0xff] }
  0x16   : > { %v547_v21 = vpack.c.bf16 %v179_v19, %v174_v18  ;;  %541 = vmatprep.subr.msk.bf16.mxu0 %vm630_vm2, %v539_v12  ;;  %546 = vmatprep.subr.bf16.mxu1 %v545_v16  ;;  %v549_v25 = vpack.c.bf16 %v190_v23, %v185_v22  ;;  %v189_v26 = vld [vmem:[%s628_s19 + $0x88] sm:$0x1]  ;;  %v176_v27 = vld [vmem:[%s628_s19 + $0x20] sm:$0xff]  ;;  %v186_v33 = vld [vmem:[%s628_s19 + $0x70] sm:$0xff] }
  0x17   : > { %v181_v28 = vld [vmem:[%s628_s19 + $0x48] sm:$0xff]  ;;  %v552_v29 = vpack.c.bf16 %v189_v26, %v184_v24  ;;  %v191_v34 = vld [vmem:[%s628_s19 + $0x98] sm:$0x1] }
  0x18   : > { %548 = vmatpush1.bf16.msra.mxu1 %v547_v21  ;;  %v556_v31 = vpack.c.bf16 %v181_v28, %v176_v27  ;;  %v559_v35 = vpack.c.bf16 %v191_v34, %v186_v33 }
  0x19   : > { %551 = vmatprep.subr.msk.bf16.mxu1 %vm630_vm2, %v549_v25  ;;  %544 = vmatpush1.bf16.msk.msra.mxu0 %vm630_vm2, %v542_v20 }
  0x1a   : > { %555 = vmatprep.subr.bf16.mxu0 %v589_v32 }
  0x1c   : > { %554 = vmatpush1.bf16.msk.msra.mxu1 %vm630_vm2, %v552_v29  ;;  %511 = vmatmul.mubr.msk.f32.vlgmr.msra.gmra.mrb[0].mxu0 %vm198_vm3, %v171_v30 }
  0x1d   : > { %557 = vmatpush3.bf16.msra.mxu0 %v556_v31  ;;  %532 = vmatprep.mubr.msk.f32.mxu0 %vm590_vm4, %v586_v0 }
  0x1e   : > { %558 = vmatprep.subr.bf16.mxu0 %v589_v32 }
  0x1f   : > { %514 = vmatmul.mubr.msk.f32.vlgmr.msra.gmra.mrb[0].mxu1 %vm198_vm3, %v171_v30 }
  0x21   : > { %561 = vmatpush3.bf16.msk.msra.mxu0 %vm630_vm2, %v559_v35 }
  0x24   : > { %533 = vmatmul.mubr.msk.f32.vlgmr.msra.gmra.mrb[2].mxu0 %vm198_vm3, %v171_v30 }
  0x87   : > { %v196_v36 = vpop.permute.xlu0 %195 }
  0xef   : > { %v284_v37 = vpop.f32.mrb[0].mxu0 }
  0xf0   : > { %v285_v38 = vadd.f32 %v284_v37, %v196_v36  ;;  %v286_v39 = vpop.f32.mrb[1].mxu0 }
  0xf1   : > { %v287_v40 = vadd.f32 %v286_v39, %v196_v36 }
  0xf2   : > { %v355_v41 = vpop.f32.mrb[0].mxu1  ;;  %v430_v42 = vmax.f32 %v285_v38, 0.0 }
  0xf3   : > { %v356_v43 = vadd.f32 %v355_v41, %v196_v36  ;;  %v357_v44 = vpop.f32.mrb[1].mxu1  ;;  %v431_v45 = vmax.f32 %v287_v40, 0.0 }
  0xf4   : > { %v358_v46 = vadd.f32 %v357_v44, %v196_v36 }
  0xf5   : > { %v432_v47 = vmax.f32 %v356_v43, 0.0  ;;  %v439_v48 = vcombine.low %v430_v42, %v431_v45 }
  0xf6   : > { %v433_v49 = vmax.f32 %v358_v46, 0.0 }
  0xf7   : > { %443 = vst [vmem:[%s170_s25] sm:$0xff] %v439_v48  ;;  %v426_v51 = vpop.f32.mrb[2].mxu0 }
  0xf8   : > { %v440_v50 = vcombine.low %v432_v47, %v433_v49  ;;  %v427_v52 = vadd.f32 %v426_v51, %v196_v36  ;;  %v534_v53 = vpop.f32.mrb[3].mxu0 }
  0xfa   : > { %444 = vst [vmem:[%s170_s25 + $0x8] sm:$0xff] %v440_v50  ;;  %v434_v54 = vmax.f32 %v427_v52, 0.0 }
  0xfc   : > { %446 = vst.msk [vmem:[%s170_s25 + $0x10] sm:$0xf] %vm445_vm5, %v434_v54 }
  0xfd PF: > { %s13_s12 = sadd.s32 1, %s584_s12  }
  0xfe   : > { %p10_p4 = scmp.ge.s32.totalorder %s13_s12, 4  }
 0x100   :  { %12 = sbr.rel (!%p10_p4) target bundleno = 1 (0x1), region = 62 }

// kernel: autoencoder_forward.6
= control target key start
LH: loop header
LB: loop body
LE: loop exit
PB: predicated region body
PF: predicated region fallthrough
CT: control target
= control target key end

     0   :  { %s560_s12 = smov 0   ;;  %s641_s0 = inlined_call_operand.vmem [shape: f32[2,100,400], index: 0, kind: input, shape index: {}]   ;;  %s642_s1 = inlined_call_operand.vmem [shape: f32[8,100], index: 1, kind: input, shape index: {}]   ;;  %s643_s2 = inlined_call_operand.vmem [shape: f32[8,1], index: 2, kind: input, shape index: {}]   ;;  %s644_s3 = inlined_call_operand.vmem [shape: f32[2,8,400], index: 3, kind: output, shape index: {}]  }
   0x1 LB: > { %s453_s13 = sadd.s32 4294967295, %s536_s12   ;;  %p457_p0 = scmp.ge.s32.totalorder %s536_s12, 1  ;;  %s536_s12 = sphi %s560_s12, %s13_s12  }
   0x2   : > { %p137_p1 = scmp.lt.s32.totalorder %s536_s12, 3 }
   0x4   : > { %p138_p2 = pnand %p457_p0, %p137_p1 }
   0x5   : > { %p161_p3 = scmp.lt.s32.totalorder (!%p138_p2), %s453_s13, 1  ;;  %v538_v0 = vmov (!%p138_p2), 0.0   ;;  %v224_v1 = vld [vmem:[%s643_s2] sm:$0xff] (!%p138_p2)  ;;  %v539_v2 = vmov (!%p138_p2), 0   ;;  %vm234_vm0 = vcmask (!%p138_p2), 1043456   ;;  %vm230_vm1 = vcmask (!%p138_p2), 818176  }
   0x6   : > { %141 = sbr.rel (%p138_p2) target bundleno = 266 (0x10a), region = 32  ;;  %311 = vmatprep.mubr.f32.mxu0 (!%p138_p2), %v538_v0  ;;  %382 = vmatprep.mubr.f32.mxu1 (!%p138_p2), %v538_v0  ;;  %vm396_vm2 = vcmask (!%p138_p2), 130048  }
   0x7   : > { %529 = vset.pattern.permute.xlu0 (!%p138_p2), %v539_v2 }
   0x8   : > { %227 = vperm.xlu0 (!%p138_p2), %529, %v224_v1  }
   0xd   : > { %s646_s13 = smov (!%p161_p3, %s453_s13), 1 }
   0xe   : > { %s518_s16 = smul.u32 416, %s646_s13  ;;  %s469_s22 = sshll.u32 %s646_s13, 5 }
   0xf   : > { %s170_s25 = scalar_lea.vmem %s644_s3, %s469_s22 }
  0x10   : > { %s577_s19 = scalar_lea.vmem %s641_s0, %s518_s16 }
  0x11   : > { %v173_v3 = vld [vmem:[%s577_s19 + $0x8] sm:$0xff]  ;;  %v175_v5 = vld [vmem:[%s577_s19 + $0x18] sm:$0xff]  ;;  %v172_v8 = vld [vmem:[%s577_s19] sm:$0xff] }
  0x12   : > { %v177_v4 = vld [vmem:[%s577_s19 + $0x28] sm:$0xff]  ;;  %v179_v7 = vld [vmem:[%s577_s19 + $0x38] sm:$0xff]  ;;  %v176_v9 = vld [vmem:[%s577_s19 + $0x20] sm:$0xff] }
  0x13   : > { %v470_v6 = vpack.c.bf16 %v177_v4, %v173_v3  ;;  %v494_v10 = vpack.c.bf16 %v179_v7, %v175_v5  ;;  %v472_v11 = vpack.c.bf16 %v176_v9, %v172_v8  ;;  %v174_v12 = vld [vmem:[%s577_s19 + $0x10] sm:$0xff]  ;;  %v181_v14 = vld [vmem:[%s577_s19 + $0x48] sm:$0xff]  ;;  %v183_v17 = vld [vmem:[%s577_s19 + $0x58] sm:$0xff] }
  0x14   : > { %v178_v13 = vld [vmem:[%s577_s19 + $0x30] sm:$0xff]  ;;  %v185_v16 = vld [vmem:[%s577_s19 + $0x68] sm:$0xff]  ;;  %v187_v18 = vld [vmem:[%s577_s19 + $0x78] sm:$0xff] }
  0x15   : > { %471 = vmatprep.subr.bf16.mxu0 %v470_v6  ;;  %v496_v15 = vpack.c.bf16 %v178_v13, %v174_v12  ;;  %495 = vmatprep.subr.bf16.mxu1 %v494_v10  ;;  %v474_v19 = vpack.c.bf16 %v185_v16, %v181_v14  ;;  %v498_v20 = vpack.c.bf16 %v187_v18, %v183_v17  ;;  %v180_v21 = vld [vmem:[%s577_s19 + $0x40] sm:$0xff]  ;;  %v182_v23 = vld [vmem:[%s577_s19 + $0x50] sm:$0xff]  ;;  %v189_v26 = vld [vmem:[%s577_s19 + $0x88] sm:$0xff] }
  0x16   : > { %473 = vmatpush1.bf16.msra.mxu0 %v472_v11  ;;  %v184_v22 = vld [vmem:[%s577_s19 + $0x60] sm:$0xff]  ;;  %v186_v25 = vld [vmem:[%s577_s19 + $0x70] sm:$0xff]  ;;  %v193_v27 = vld [vmem:[%s577_s19 + $0xa8] sm:$0xff] }
  0x17   : > { %497 = vmatpush1.bf16.msra.mxu1 %v496_v15  ;;  %v476_v24 = vpack.c.bf16 %v184_v22, %v180_v21  ;;  %475 = vmatprep.subr.bf16.mxu0 %v474_v19  ;;  %v500_v28 = vpack.c.bf16 %v186_v25, %v182_v23  ;;  %v478_v29 = vpack.c.bf16 %v193_v27, %v189_v26  ;;  %v191_v30 = vld [vmem:[%s577_s19 + $0x98] sm:$0xff]  ;;  %v188_v32 = vld [vmem:[%s577_s19 + $0x80] sm:$0xff]  ;;  %v190_v35 = vld [vmem:[%s577_s19 + $0x90] sm:$0xff] }
  0x18   : > { %499 = vmatprep.subr.bf16.mxu1 %v498_v20  ;;  %v195_v31 = vld [vmem:[%s577_s19 + $0xb8] sm:$0xff]  ;;  %v192_v34 = vld [vmem:[%s577_s19 + $0xa0] sm:$0xff]  ;;  %v194_v36 = vld [vmem:[%s577_s19 + $0xb0] sm:$0xff] }
  0x19   : > { %v502_v33 = vpack.c.bf16 %v195_v31, %v191_v30  ;;  %v480_v37 = vpack.c.bf16 %v192_v34, %v188_v32  ;;  %v197_v38 = vld [vmem:[%s577_s19 + $0xc8] sm:$0xff]  ;;  %v199_v40 = vld [vmem:[%s577_s19 + $0xd8] sm:$0xff]  ;;  %v504_v41 = vpack.c.bf16 %v194_v36, %v190_v35  ;;  %v196_v44 = vld [vmem:[%s577_s19 + $0xc0] sm:$0xff] }
  0x1a   : > { %477 = vmatpush1.bf16.msra.mxu0 %v476_v24  ;;  %v201_v39 = vld [vmem:[%s577_s19 + $0xe8] sm:$0xff]  ;;  %v203_v43 = vld [vmem:[%s577_s19 + $0xf8] sm:$0xff]  ;;  %v200_v45 = vld [vmem:[%s577_s19 + $0xe0] sm:$0xff] }
  0x1b   : > { %501 = vmatpush1.bf16.msra.mxu1 %v500_v28  ;;  %479 = vmatprep.subr.bf16.mxu0 %v478_v29  ;;  %v482_v42 = vpack.c.bf16 %v201_v39, %v197_v38  ;;  %v506_v46 = vpack.c.bf16 %v203_v43, %v199_v40  ;;  %v198_v47 = vld [vmem:[%s577_s19 + $0xd0] sm:$0xff]  ;;  %v205_v49 = vld [vmem:[%s577_s19 + $0x108] sm:$0xff]  ;;  %v207_v51 = vld [vmem:[%s577_s19 + $0x118] sm:$0xff]  ;;  %v484_v53 = vpack.c.bf16 %v200_v45, %v196_v44 }
  0x1c   : > { %503 = vmatprep.subr.bf16.mxu1 %v502_v33  ;;  %v202_v48 = vld [vmem:[%s577_s19 + $0xf0] sm:$0xff]  ;;  %v209_v50 = vld [vmem:[%s577_s19 + $0x128] sm:$0xff]  ;;  %v211_v52 = vld [vmem:[%s577_s19 + $0x138] sm:$0xff] }
  0x1d   : > { %v508_v54 = vpack.c.bf16 %v202_v48, %v198_v47  ;;  %v486_v55 = vpack.c.bf16 %v209_v50, %v205_v49  ;;  %v204_v56 = vld [vmem:[%s577_s19 + $0x100] sm:$0xff]  ;;  %v206_v58 = vld [vmem:[%s577_s19 + $0x110] sm:$0xff]  ;;  %v510_v59 = vpack.c.bf16 %v211_v52, %v207_v51  ;;  %v213_v61 = vld [vmem:[%s577_s19 + $0x148] sm:$0xff] }
  0x1e   : > { %481 = vmatpush1.bf16.msra.mxu0 %v480_v37  ;;  %v208_v57 = vld [vmem:[%s577_s19 + $0x120] sm:$0xff]  ;;  %v210_v60 = vld [vmem:[%s577_s19 + $0x130] sm:$0xff]  ;;  %v217_v62 = vld [vmem:[%s577_s19 + $0x168] sm:$0xff] }
  0x1f   : > { %505 = vmatpush1.bf16.msra.mxu1 %v504_v41  ;;  %483 = vmatprep.subr.bf16.mxu0 %v482_v42  ;;  %v215_v63 = vld [vmem:[%s577_s19 + $0x158] sm:$0xff]  ;;  %v488_v1 = vpack.c.bf16 %v208_v57, %v204_v56  ;;  %v512_v2 = vpack.c.bf16 %v210_v60, %v206_v58  ;;  %v490_v3 = vpack.c.bf16 %v217_v62, %v213_v61  ;;  %v212_v4 = vld [vmem:[%s577_s19 + $0x140] sm:$0xff]  ;;  %v214_v7 = vld [vmem:[%s577_s19 + $0x150] sm:$0xff] }
  0x20   : > { %507 = vmatprep.subr.bf16.mxu1 %v506_v46  ;;  %v219_v0 = vld [vmem:[%s577_s19 + $0x178] sm:$0xff]  ;;  %v216_v5 = vld [vmem:[%s577_s19 + $0x160] sm:$0xff]  ;;  %v218_v8 = vld [vmem:[%s577_s19 + $0x170] sm:$0xff] }
  0x21   : > { %v514_v6 = vpack.c.bf16 %v219_v0, %v215_v63  ;;  %v492_v9 = vpack.c.bf16 %v216_v5, %v212_v4  ;;  %v516_v10 = vpack.c.bf16 %v218_v8, %v214_v7  ;;  %v221_v11 = vld [vmem:[%s577_s19 + $0x188] sm:$0xf]  ;;  %v223_v12 = vld [vmem:[%s577_s19 + $0x198] sm:$0xf]  ;;  %v220_v13 = vld [vmem:[%s577_s19 + $0x180] sm:$0xf] }
  0x22   : > { %485 = vmatpush1.bf16.msra.mxu0 %v484_v53  ;;  %v222_v14 = vld [vmem:[%s577_s19 + $0x190] sm:$0xf]  ;;  %v171_v15 = vld [vmem:[%s642_s1] sm:$0xff] }
  0x23   : > { %509 = vmatpush1.bf16.msra.mxu1 %v508_v54  ;;  %487 = vmatprep.subr.bf16.mxu0 %v486_v55 }
  0x24   : > { %511 = vmatprep.subr.bf16.mxu1 %v510_v59 }
  0x26   : > { %489 = vmatpush1.bf16.msra.mxu0 %v488_v1 }
  0x27   : > { %513 = vmatpush1.bf16.msra.mxu1 %v512_v2  ;;  %491 = vmatprep.subr.bf16.mxu0 %v490_v3 }
  0x28   : > { %515 = vmatprep.subr.bf16.mxu1 %v514_v6 }
  0x2a   : > { %493 = vmatpush1.bf16.msra.mxu0 %v492_v9 }
  0x2b   : > { %517 = vmatpush1.bf16.msra.mxu1 %v516_v10  ;;  %461 = vmatprep.subr.msk.mxu0 %vm234_vm0, %v221_v11 }
  0x2c   : > { %464 = vmatprep.subr.msk.mxu1 %vm234_vm0, %v223_v12 }
  0x2e   : > { %462 = vmatpush1.msk.msra.mxu0 %vm234_vm0, %v220_v13 }
  0x2f   : > { %465 = vmatpush1.msk.msra.mxu1 %vm234_vm0, %v222_v14  ;;  %463 = vmatmul.mubr.msk.f32.vlgmr.msra.gmra.mrb[0].mxu0 %vm230_vm1, %v171_v15 }
  0x30   : > { %466 = vmatmul.mubr.msk.f32.vlgmr.msra.gmra.mrb[0].mxu1 %vm230_vm1, %v171_v15 }
  0x87   : > { %v228_v16 = vpop.permute.xlu0 %227 }
 0x102   : > { %v313_v17 = vpop.f32.mrb[0].mxu0 }
 0x103   : > { %v314_v18 = vadd.f32 %v313_v17, %v228_v16  ;;  %v384_v19 = vpop.f32.mrb[0].mxu1  ;;  %v315_v20 = vpop.f32.mrb[1].mxu0 }
 0x104   : > { %v385_v21 = vadd.f32 %v384_v19, %v228_v16  ;;  %v316_v22 = vadd.f32 %v315_v20, %v228_v16  ;;  %v386_v23 = vpop.f32.mrb[1].mxu1 }
 0x105   : > { %v389_v24 = vmax.f32 %v314_v18, 0.0  ;;  %v387_v25 = vadd.f32 %v386_v23, %v228_v16 }
 0x106   : > { %v391_v26 = vmax.f32 %v385_v21, 0.0  ;;  %v390_v27 = vmax.f32 %v316_v22, 0.0 }
 0x107   : > { %393 = vst [vmem:[%s170_s25] sm:$0xff] %v389_v24  ;;  %v392_v28 = vmax.f32 %v387_v25, 0.0 }
 0x108   : > { %395 = vst [vmem:[%s170_s25 + $0x10] sm:$0xff] %v391_v26  ;;  %394 = vst [vmem:[%s170_s25 + $0x8] sm:$0xff] %v390_v27 }
 0x109   : > { %397 = vst.msk [vmem:[%s170_s25 + $0x18] sm:$0xff] %vm396_vm2, %v392_v28 }
 0x10a PF: > { %s13_s12 = sadd.s32 1, %s536_s12  }
 0x10b   : > { %p10_p4 = scmp.ge.s32.totalorder %s13_s12, 4  }
 0x10d   :  { %12 = sbr.rel (!%p10_p4) target bundleno = 1 (0x1), region = 62 }

// kernel: autoencoder_forward.7
= control target key start
LH: loop header
LB: loop body
LE: loop exit
PB: predicated region body
PF: predicated region fallthrough
CT: control target
= control target key end

     0   :  { %s5384_s24 = smov 0   ;;  %s5386_s25 = smov 0   ;;  %s8100_s0 = inlined_call_operand.vmem [shape: f32[2,3200], index: 0, kind: input, shape index: {}]   ;;  %s8101_s1 = inlined_call_operand.vmem [shape: f32[3200,50], index: 1, kind: input, shape index: {}]   ;;  %s8102_s2 = inlined_call_operand.vmem [shape: f32[1,50], index: 2, kind: input, shape index: {}]   ;;  %s8103_s3 = inlined_call_operand.vmem [shape: f32[50,400], index: 3, kind: input, shape index: {}]   ;;  %s8104_s4 = inlined_call_operand.vmem [shape: f32[1,400], index: 4, kind: input, shape index: {}]   ;;  %s8105_s5 = inlined_call_operand.vmem [shape: f32[400,4096], index: 5, kind: input, shape index: {}]   ;;  %s8106_s6 = inlined_call_operand.vmem [shape: f32[1,4096], index: 6, kind: input, shape index: {}]   ;;  %s8107_s7 = inlined_call_operand.vmem [shape: f32[2,4096], index: 7, kind: output, shape index: {}]  }
   0x1   :  { %s5388_s26 = smov 0  }
   0x2 LB: > { %s3935_s27 = sadd.s32 4294967295, %s5338_s26   ;;  %s5401_s28 = sadd.s32 1, %s5338_s26   ;;  %s5338_s26 = sphi %s5388_s26, %s8110_s26   ;;  %s5334_s25 = sphi %s5386_s25, %s8109_s25   ;;  %s5330_s24 = sphi %s5384_s24, %s8108_s24  }
   0x3   : > { %s126_s29 = ssub.s32 %s5338_s26, %s5401_s28  ;;  %s129_s30 = sadd.s32 1, %s5334_s25 }
   0x4   : > { %p127_p0 = scmp.eq.s32.totalorder %s126_s29, 0  ;;  %p136_p1 = scmp.ne.s32.totalorder %s5334_s25, %s5330_s24 }
   0x5   : > { %p137_p2 = scmp.eq.s32.totalorder %s5338_s26, 0  ;;  %p3938_p4 = scmp.ge.s32.totalorder %s5338_s26, 4 }
   0x6   : > { %s5410_s8 = scalar_select %p127_p0, %s5334_s25, %s129_s30  }
   0x7   : > { %p138_p3 = por %p137_p2, %p136_p1  ;;  %229 = sbr.rel (%p3938_p4) target bundleno = 219 (0xdb), region = 36 }
   0xe   : > { %232 = sbr.rel (!%p138_p3) target bundleno = 219 (0xdb), region = 40  ;;  %s234_s9 = sand.u32 (%p138_p3), 1, %s5334_s25  }
   0xf   : > { %s3959_s10 = sshll.u32 (%p138_p3), %s5338_s26, 6  ;;  %s5280_s11 = smul.u32 (%p138_p3), 3200, %s234_s9 }
  0x10   : > { %s5418_s14 = scalar_lea.vmem (%p138_p3), %s8105_s5, %s3959_s10 }
  0x11   : > { %v252_v0 = vld [vmem:[%s5418_s14] sm:$0xff] (%p138_p3)  ;;  %v254_v1 = vld [vmem:[%s5418_s14 + $0x8] sm:$0xff] (%p138_p3)  ;;  %v256_v2 = vld [vmem:[%s5418_s14 + $0x10] sm:$0xff] (%p138_p3)  ;;  %s5426_s15 = scalar_lea.vmem (%p138_p3), [#allocation2], %s5280_s11 }
  0x12   : > { %v258_v3 = vld [vmem:[%s5418_s14 + $0x18] sm:$0xff] (%p138_p3)  ;;  %v260_v4 = vld [vmem:[%s5418_s14 + $0x20] sm:$0xff] (%p138_p3)  ;;  %v262_v5 = vld [vmem:[%s5418_s14 + $0x28] sm:$0xff] (%p138_p3)  ;;  %253 = vst [vmem:[%s5426_s15] sm:$0xff] (%p138_p3), %v252_v0 }
  0x13   : > { %255 = vst [vmem:[%s5426_s15 + $0x8] sm:$0xff] (%p138_p3), %v254_v1  ;;  %257 = vst [vmem:[%s5426_s15 + $0x10] sm:$0xff] (%p138_p3), %v256_v2  ;;  %v264_v6 = vld [vmem:[%s5418_s14 + $0x30] sm:$0xff] (%p138_p3)  ;;  %v266_v7 = vld [vmem:[%s5418_s14 + $0x38] sm:$0xff] (%p138_p3) }
  0x14   : > { %259 = vst [vmem:[%s5426_s15 + $0x18] sm:$0xff] (%p138_p3), %v258_v3  ;;  %261 = vst [vmem:[%s5426_s15 + $0x20] sm:$0xff] (%p138_p3), %v260_v4  ;;  %v268_v8 = vld [vmem:[%s5418_s14 + $0x100] sm:$0xff] (%p138_p3)  ;;  %v270_v9 = vld [vmem:[%s5418_s14 + $0x108] sm:$0xff] (%p138_p3) }
  0x15   : > { %263 = vst [vmem:[%s5426_s15 + $0x28] sm:$0xff] %v262_v5  ;;  %265 = vst [vmem:[%s5426_s15 + $0x30] sm:$0xff] %v264_v6  ;;  %v272_v10 = vld [vmem:[%s5418_s14 + $0x110] sm:$0xff]  ;;  %v274_v11 = vld [vmem:[%s5418_s14 + $0x118] sm:$0xff] }
  0x16   : > { %267 = vst [vmem:[%s5426_s15 + $0x38] sm:$0xff] %v266_v7  ;;  %269 = vst [vmem:[%s5426_s15 + $0x40] sm:$0xff] %v268_v8  ;;  %v276_v12 = vld [vmem:[%s5418_s14 + $0x120] sm:$0xff]  ;;  %v278_v13 = vld [vmem:[%s5418_s14 + $0x128] sm:$0xff] }
  0x17   : > { %271 = vst [vmem:[%s5426_s15 + $0x48] sm:$0xff] %v270_v9  ;;  %273 = vst [vmem:[%s5426_s15 + $0x50] sm:$0xff] %v272_v10  ;;  %v280_v14 = vld [vmem:[%s5418_s14 + $0x130] sm:$0xff]  ;;  %v282_v15 = vld [vmem:[%s5418_s14 + $0x138] sm:$0xff] }
  0x18   : > { %275 = vst [vmem:[%s5426_s15 + $0x58] sm:$0xff] %v274_v11  ;;  %277 = vst [vmem:[%s5426_s15 + $0x60] sm:$0xff] %v276_v12  ;;  %v284_v16 = vld [vmem:[%s5418_s14 + $0x200] sm:$0xff]  ;;  %v286_v17 = vld [vmem:[%s5418_s14 + $0x208] sm:$0xff] }
  0x19   : > { %279 = vst [vmem:[%s5426_s15 + $0x68] sm:$0xff] %v278_v13  ;;  %281 = vst [vmem:[%s5426_s15 + $0x70] sm:$0xff] %v280_v14  ;;  %v288_v18 = vld [vmem:[%s5418_s14 + $0x210] sm:$0xff]  ;;  %v290_v19 = vld [vmem:[%s5418_s14 + $0x218] sm:$0xff] }
  0x1a   : > { %283 = vst [vmem:[%s5426_s15 + $0x78] sm:$0xff] %v282_v15  ;;  %285 = vst [vmem:[%s5426_s15 + $0x80] sm:$0xff] %v284_v16  ;;  %v292_v20 = vld [vmem:[%s5418_s14 + $0x220] sm:$0xff]  ;;  %v294_v21 = vld [vmem:[%s5418_s14 + $0x228] sm:$0xff] }
  0x1b   : > { %287 = vst [vmem:[%s5426_s15 + $0x88] sm:$0xff] %v286_v17  ;;  %289 = vst [vmem:[%s5426_s15 + $0x90] sm:$0xff] %v288_v18  ;;  %v296_v22 = vld [vmem:[%s5418_s14 + $0x230] sm:$0xff]  ;;  %v298_v23 = vld [vmem:[%s5418_s14 + $0x238] sm:$0xff] }
  0x1c   : > { %291 = vst [vmem:[%s5426_s15 + $0x98] sm:$0xff] %v290_v19  ;;  %293 = vst [vmem:[%s5426_s15 + $0xa0] sm:$0xff] %v292_v20  ;;  %v300_v24 = vld [vmem:[%s5418_s14 + $0x300] sm:$0xff]  ;;  %v302_v25 = vld [vmem:[%s5418_s14 + $0x308] sm:$0xff] }
  0x1d   : > { %295 = vst [vmem:[%s5426_s15 + $0xa8] sm:$0xff] %v294_v21  ;;  %297 = vst [vmem:[%s5426_s15 + $0xb0] sm:$0xff] %v296_v22  ;;  %v304_v26 = vld [vmem:[%s5418_s14 + $0x310] sm:$0xff]  ;;  %v306_v27 = vld [vmem:[%s5418_s14 + $0x318] sm:$0xff] }
  0x1e   : > { %299 = vst [vmem:[%s5426_s15 + $0xb8] sm:$0xff] %v298_v23  ;;  %301 = vst [vmem:[%s5426_s15 + $0xc0] sm:$0xff] %v300_v24  ;;  %v308_v28 = vld [vmem:[%s5418_s14 + $0x320] sm:$0xff]  ;;  %v310_v29 = vld [vmem:[%s5418_s14 + $0x328] sm:$0xff] }
  0x1f   : > { %303 = vst [vmem:[%s5426_s15 + $0xc8] sm:$0xff] %v302_v25  ;;  %305 = vst [vmem:[%s5426_s15 + $0xd0] sm:$0xff] %v304_v26  ;;  %v312_v30 = vld [vmem:[%s5418_s14 + $0x330] sm:$0xff]  ;;  %v314_v31 = vld [vmem:[%s5418_s14 + $0x338] sm:$0xff] }
  0x20   : > { %307 = vst [vmem:[%s5426_s15 + $0xd8] sm:$0xff] %v306_v27  ;;  %309 = vst [vmem:[%s5426_s15 + $0xe0] sm:$0xff] %v308_v28  ;;  %v316_v32 = vld [vmem:[%s5418_s14 + $0x400] sm:$0xff]  ;;  %v318_v33 = vld [vmem:[%s5418_s14 + $0x408] sm:$0xff] }
  0x21   : > { %311 = vst [vmem:[%s5426_s15 + $0xe8] sm:$0xff] %v310_v29  ;;  %313 = vst [vmem:[%s5426_s15 + $0xf0] sm:$0xff] %v312_v30  ;;  %v320_v34 = vld [vmem:[%s5418_s14 + $0x410] sm:$0xff]  ;;  %v322_v35 = vld [vmem:[%s5418_s14 + $0x418] sm:$0xff] }
  0x22   : > { %315 = vst [vmem:[%s5426_s15 + $0xf8] sm:$0xff] %v314_v31  ;;  %317 = vst [vmem:[%s5426_s15 + $0x100] sm:$0xff] %v316_v32  ;;  %v324_v36 = vld [vmem:[%s5418_s14 + $0x420] sm:$0xff]  ;;  %v326_v37 = vld [vmem:[%s5418_s14 + $0x428] sm:$0xff] }
  0x23   : > { %319 = vst [vmem:[%s5426_s15 + $0x108] sm:$0xff] %v318_v33  ;;  %321 = vst [vmem:[%s5426_s15 + $0x110] sm:$0xff] %v320_v34  ;;  %v328_v38 = vld [vmem:[%s5418_s14 + $0x430] sm:$0xff]  ;;  %v330_v39 = vld [vmem:[%s5418_s14 + $0x438] sm:$0xff] }
  0x24   : > { %323 = vst [vmem:[%s5426_s15 + $0x118] sm:$0xff] %v322_v35  ;;  %325 = vst [vmem:[%s5426_s15 + $0x120] sm:$0xff] %v324_v36  ;;  %v332_v40 = vld [vmem:[%s5418_s14 + $0x500] sm:$0xff]  ;;  %v334_v41 = vld [vmem:[%s5418_s14 + $0x508] sm:$0xff] }
  0x25   : > { %327 = vst [vmem:[%s5426_s15 + $0x128] sm:$0xff] %v326_v37  ;;  %329 = vst [vmem:[%s5426_s15 + $0x130] sm:$0xff] %v328_v38  ;;  %v336_v42 = vld [vmem:[%s5418_s14 + $0x510] sm:$0xff]  ;;  %v338_v43 = vld [vmem:[%s5418_s14 + $0x518] sm:$0xff] }
  0x26   : > { %331 = vst [vmem:[%s5426_s15 + $0x138] sm:$0xff] %v330_v39  ;;  %333 = vst [vmem:[%s5426_s15 + $0x140] sm:$0xff] %v332_v40  ;;  %v340_v44 = vld [vmem:[%s5418_s14 + $0x520] sm:$0xff]  ;;  %v342_v45 = vld [vmem:[%s5418_s14 + $0x528] sm:$0xff] }
  0x27   : > { %335 = vst [vmem:[%s5426_s15 + $0x148] sm:$0xff] %v334_v41  ;;  %337 = vst [vmem:[%s5426_s15 + $0x150] sm:$0xff] %v336_v42  ;;  %v344_v46 = vld [vmem:[%s5418_s14 + $0x530] sm:$0xff]  ;;  %v346_v47 = vld [vmem:[%s5418_s14 + $0x538] sm:$0xff] }
  0x28   : > { %339 = vst [vmem:[%s5426_s15 + $0x158] sm:$0xff] %v338_v43  ;;  %341 = vst [vmem:[%s5426_s15 + $0x160] sm:$0xff] %v340_v44  ;;  %v348_v48 = vld [vmem:[%s5418_s14 + $0x600] sm:$0xff]  ;;  %v350_v49 = vld [vmem:[%s5418_s14 + $0x608] sm:$0xff] }
  0x29   : > { %343 = vst [vmem:[%s5426_s15 + $0x168] sm:$0xff] %v342_v45  ;;  %345 = vst [vmem:[%s5426_s15 + $0x170] sm:$0xff] %v344_v46  ;;  %v352_v50 = vld [vmem:[%s5418_s14 + $0x610] sm:$0xff]  ;;  %v354_v51 = vld [vmem:[%s5418_s14 + $0x618] sm:$0xff] }
  0x2a   : > { %347 = vst [vmem:[%s5426_s15 + $0x178] sm:$0xff] %v346_v47  ;;  %349 = vst [vmem:[%s5426_s15 + $0x180] sm:$0xff] %v348_v48  ;;  %v356_v52 = vld [vmem:[%s5418_s14 + $0x620] sm:$0xff]  ;;  %v358_v53 = vld [vmem:[%s5418_s14 + $0x628] sm:$0xff] }
  0x2b   : > { %351 = vst [vmem:[%s5426_s15 + $0x188] sm:$0xff] %v350_v49  ;;  %353 = vst [vmem:[%s5426_s15 + $0x190] sm:$0xff] %v352_v50  ;;  %v360_v54 = vld [vmem:[%s5418_s14 + $0x630] sm:$0xff]  ;;  %v362_v55 = vld [vmem:[%s5418_s14 + $0x638] sm:$0xff] }
  0x2c   : > { %355 = vst [vmem:[%s5426_s15 + $0x198] sm:$0xff] %v354_v51  ;;  %357 = vst [vmem:[%s5426_s15 + $0x1a0] sm:$0xff] %v356_v52  ;;  %v364_v56 = vld [vmem:[%s5418_s14 + $0x700] sm:$0xff]  ;;  %v366_v57 = vld [vmem:[%s5418_s14 + $0x708] sm:$0xff] }
  0x2d   : > { %359 = vst [vmem:[%s5426_s15 + $0x1a8] sm:$0xff] %v358_v53  ;;  %361 = vst [vmem:[%s5426_s15 + $0x1b0] sm:$0xff] %v360_v54  ;;  %v368_v58 = vld [vmem:[%s5418_s14 + $0x710] sm:$0xff]  ;;  %v370_v59 = vld [vmem:[%s5418_s14 + $0x718] sm:$0xff] }
  0x2e   : > { %363 = vst [vmem:[%s5426_s15 + $0x1b8] sm:$0xff] %v362_v55  ;;  %365 = vst [vmem:[%s5426_s15 + $0x1c0] sm:$0xff] %v364_v56  ;;  %v372_v60 = vld [vmem:[%s5418_s14 + $0x720] sm:$0xff]  ;;  %v374_v61 = vld [vmem:[%s5418_s14 + $0x728] sm:$0xff] }
  0x2f   : > { %367 = vst [vmem:[%s5426_s15 + $0x1c8] sm:$0xff] %v366_v57  ;;  %369 = vst [vmem:[%s5426_s15 + $0x1d0] sm:$0xff] %v368_v58  ;;  %v376_v62 = vld [vmem:[%s5418_s14 + $0x730] sm:$0xff]  ;;  %v378_v63 = vld [vmem:[%s5418_s14 + $0x738] sm:$0xff] }
  0x30   : > { %371 = vst [vmem:[%s5426_s15 + $0x1d8] sm:$0xff] %v370_v59  ;;  %373 = vst [vmem:[%s5426_s15 + $0x1e0] sm:$0xff] %v372_v60  ;;  %v380_v0 = vld [vmem:[%s5418_s14 + $0x800] sm:$0xff]  ;;  %v382_v1 = vld [vmem:[%s5418_s14 + $0x808] sm:$0xff] }
  0x31   : > { %375 = vst [vmem:[%s5426_s15 + $0x1e8] sm:$0xff] %v374_v61  ;;  %377 = vst [vmem:[%s5426_s15 + $0x1f0] sm:$0xff] %v376_v62  ;;  %v384_v2 = vld [vmem:[%s5418_s14 + $0x810] sm:$0xff]  ;;  %v386_v3 = vld [vmem:[%s5418_s14 + $0x818] sm:$0xff] }
  0x32   : > { %379 = vst [vmem:[%s5426_s15 + $0x1f8] sm:$0xff] %v378_v63  ;;  %381 = vst [vmem:[%s5426_s15 + $0x200] sm:$0xff] %v380_v0  ;;  %v388_v4 = vld [vmem:[%s5418_s14 + $0x820] sm:$0xff]  ;;  %v390_v5 = vld [vmem:[%s5418_s14 + $0x828] sm:$0xff] }
  0x33   : > { %383 = vst [vmem:[%s5426_s15 + $0x208] sm:$0xff] %v382_v1  ;;  %385 = vst [vmem:[%s5426_s15 + $0x210] sm:$0xff] %v384_v2  ;;  %v392_v6 = vld [vmem:[%s5418_s14 + $0x830] sm:$0xff]  ;;  %v394_v7 = vld [vmem:[%s5418_s14 + $0x838] sm:$0xff] }
  0x34   : > { %387 = vst [vmem:[%s5426_s15 + $0x218] sm:$0xff] %v386_v3  ;;  %389 = vst [vmem:[%s5426_s15 + $0x220] sm:$0xff] %v388_v4  ;;  %v396_v8 = vld [vmem:[%s5418_s14 + $0x900] sm:$0xff]  ;;  %v398_v9 = vld [vmem:[%s5418_s14 + $0x908] sm:$0xff] }
  0x35   : > { %391 = vst [vmem:[%s5426_s15 + $0x228] sm:$0xff] %v390_v5  ;;  %393 = vst [vmem:[%s5426_s15 + $0x230] sm:$0xff] %v392_v6  ;;  %v400_v10 = vld [vmem:[%s5418_s14 + $0x910] sm:$0xff]  ;;  %v402_v11 = vld [vmem:[%s5418_s14 + $0x918] sm:$0xff] }
  0x36   : > { %395 = vst [vmem:[%s5426_s15 + $0x238] sm:$0xff] %v394_v7  ;;  %397 = vst [vmem:[%s5426_s15 + $0x240] sm:$0xff] %v396_v8  ;;  %v404_v12 = vld [vmem:[%s5418_s14 + $0x920] sm:$0xff]  ;;  %v406_v13 = vld [vmem:[%s5418_s14 + $0x928] sm:$0xff] }
  0x37   : > { %399 = vst [vmem:[%s5426_s15 + $0x248] sm:$0xff] %v398_v9  ;;  %401 = vst [vmem:[%s5426_s15 + $0x250] sm:$0xff] %v400_v10  ;;  %v408_v14 = vld [vmem:[%s5418_s14 + $0x930] sm:$0xff]  ;;  %v410_v15 = vld [vmem:[%s5418_s14 + $0x938] sm:$0xff] }
  0x38   : > { %403 = vst [vmem:[%s5426_s15 + $0x258] sm:$0xff] %v402_v11  ;;  %405 = vst [vmem:[%s5426_s15 + $0x260] sm:$0xff] %v404_v12  ;;  %v412_v16 = vld [vmem:[%s5418_s14 + $0xa00] sm:$0xff]  ;;  %v414_v17 = vld [vmem:[%s5418_s14 + $0xa08] sm:$0xff] }
  0x39   : > { %407 = vst [vmem:[%s5426_s15 + $0x268] sm:$0xff] %v406_v13  ;;  %409 = vst [vmem:[%s5426_s15 + $0x270] sm:$0xff] %v408_v14  ;;  %v416_v18 = vld [vmem:[%s5418_s14 + $0xa10] sm:$0xff]  ;;  %v418_v19 = vld [vmem:[%s5418_s14 + $0xa18] sm:$0xff] }
  0x3a   : > { %411 = vst [vmem:[%s5426_s15 + $0x278] sm:$0xff] %v410_v15  ;;  %413 = vst [vmem:[%s5426_s15 + $0x280] sm:$0xff] %v412_v16  ;;  %v420_v20 = vld [vmem:[%s5418_s14 + $0xa20] sm:$0xff]  ;;  %v422_v21 = vld [vmem:[%s5418_s14 + $0xa28] sm:$0xff] }
  0x3b   : > { %415 = vst [vmem:[%s5426_s15 + $0x288] sm:$0xff] %v414_v17  ;;  %417 = vst [vmem:[%s5426_s15 + $0x290] sm:$0xff] %v416_v18  ;;  %v424_v22 = vld [vmem:[%s5418_s14 + $0xa30] sm:$0xff]  ;;  %v426_v23 = vld [vmem:[%s5418_s14 + $0xa38] sm:$0xff] }
  0x3c   : > { %419 = vst [vmem:[%s5426_s15 + $0x298] sm:$0xff] %v418_v19  ;;  %421 = vst [vmem:[%s5426_s15 + $0x2a0] sm:$0xff] %v420_v20  ;;  %v428_v24 = vld [vmem:[%s5418_s14 + $0xb00] sm:$0xff]  ;;  %v430_v25 = vld [vmem:[%s5418_s14 + $0xb08] sm:$0xff] }
  0x3d   : > { %423 = vst [vmem:[%s5426_s15 + $0x2a8] sm:$0xff] %v422_v21  ;;  %425 = vst [vmem:[%s5426_s15 + $0x2b0] sm:$0xff] %v424_v22  ;;  %v432_v26 = vld [vmem:[%s5418_s14 + $0xb10] sm:$0xff]  ;;  %v434_v27 = vld [vmem:[%s5418_s14 + $0xb18] sm:$0xff] }
  0x3e   : > { %427 = vst [vmem:[%s5426_s15 + $0x2b8] sm:$0xff] %v426_v23  ;;  %429 = vst [vmem:[%s5426_s15 + $0x2c0] sm:$0xff] %v428_v24  ;;  %v436_v28 = vld [vmem:[%s5418_s14 + $0xb20] sm:$0xff]  ;;  %v438_v29 = vld [vmem:[%s5418_s14 + $0xb28] sm:$0xff] }
  0x3f   : > { %431 = vst [vmem:[%s5426_s15 + $0x2c8] sm:$0xff] %v430_v25  ;;  %433 = vst [vmem:[%s5426_s15 + $0x2d0] sm:$0xff] %v432_v26  ;;  %v440_v30 = vld [vmem:[%s5418_s14 + $0xb30] sm:$0xff]  ;;  %v442_v31 = vld [vmem:[%s5418_s14 + $0xb38] sm:$0xff] }
  0x40   : > { %435 = vst [vmem:[%s5426_s15 + $0x2d8] sm:$0xff] %v434_v27  ;;  %437 = vst [vmem:[%s5426_s15 + $0x2e0] sm:$0xff] %v436_v28  ;;  %v444_v32 = vld [vmem:[%s5418_s14 + $0xc00] sm:$0xff]  ;;  %v446_v33 = vld [vmem:[%s5418_s14 + $0xc08] sm:$0xff] }
  0x41   : > { %439 = vst [vmem:[%s5426_s15 + $0x2e8] sm:$0xff] %v438_v29  ;;  %441 = vst [vmem:[%s5426_s15 + $0x2f0] sm:$0xff] %v440_v30  ;;  %v448_v34 = vld [vmem:[%s5418_s14 + $0xc10] sm:$0xff]  ;;  %v450_v35 = vld [vmem:[%s5418_s14 + $0xc18] sm:$0xff] }
  0x42   : > { %443 = vst [vmem:[%s5426_s15 + $0x2f8] sm:$0xff] %v442_v31  ;;  %445 = vst [vmem:[%s5426_s15 + $0x300] sm:$0xff] %v444_v32  ;;  %v452_v36 = vld [vmem:[%s5418_s14 + $0xc20] sm:$0xff]  ;;  %v454_v37 = vld [vmem:[%s5418_s14 + $0xc28] sm:$0xff] }
  0x43   : > { %447 = vst [vmem:[%s5426_s15 + $0x308] sm:$0xff] %v446_v33  ;;  %449 = vst [vmem:[%s5426_s15 + $0x310] sm:$0xff] %v448_v34  ;;  %v456_v38 = vld [vmem:[%s5418_s14 + $0xc30] sm:$0xff]  ;;  %v458_v39 = vld [vmem:[%s5418_s14 + $0xc38] sm:$0xff] }
  0x44   : > { %451 = vst [vmem:[%s5426_s15 + $0x318] sm:$0xff] %v450_v35  ;;  %453 = vst [vmem:[%s5426_s15 + $0x320] sm:$0xff] %v452_v36  ;;  %v460_v40 = vld [vmem:[%s5418_s14 + $0xd00] sm:$0xff]  ;;  %v462_v41 = vld [vmem:[%s5418_s14 + $0xd08] sm:$0xff] }
  0x45   : > { %455 = vst [vmem:[%s5426_s15 + $0x328] sm:$0xff] %v454_v37  ;;  %457 = vst [vmem:[%s5426_s15 + $0x330] sm:$0xff] %v456_v38  ;;  %v464_v42 = vld [vmem:[%s5418_s14 + $0xd10] sm:$0xff]  ;;  %v466_v43 = vld [vmem:[%s5418_s14 + $0xd18] sm:$0xff] }
  0x46   : > { %459 = vst [vmem:[%s5426_s15 + $0x338] sm:$0xff] %v458_v39  ;;  %461 = vst [vmem:[%s5426_s15 + $0x340] sm:$0xff] %v460_v40  ;;  %v468_v44 = vld [vmem:[%s5418_s14 + $0xd20] sm:$0xff]  ;;  %v470_v45 = vld [vmem:[%s5418_s14 + $0xd28] sm:$0xff] }
  0x47   : > { %463 = vst [vmem:[%s5426_s15 + $0x348] sm:$0xff] %v462_v41  ;;  %465 = vst [vmem:[%s5426_s15 + $0x350] sm:$0xff] %v464_v42  ;;  %v472_v46 = vld [vmem:[%s5418_s14 + $0xd30] sm:$0xff]  ;;  %v474_v47 = vld [vmem:[%s5418_s14 + $0xd38] sm:$0xff] }
  0x48   : > { %467 = vst [vmem:[%s5426_s15 + $0x358] sm:$0xff] %v466_v43  ;;  %469 = vst [vmem:[%s5426_s15 + $0x360] sm:$0xff] %v468_v44  ;;  %v476_v48 = vld [vmem:[%s5418_s14 + $0xe00] sm:$0xff]  ;;  %v478_v49 = vld [vmem:[%s5418_s14 + $0xe08] sm:$0xff] }
  0x49   : > { %471 = vst [vmem:[%s5426_s15 + $0x368] sm:$0xff] %v470_v45  ;;  %473 = vst [vmem:[%s5426_s15 + $0x370] sm:$0xff] %v472_v46  ;;  %v480_v50 = vld [vmem:[%s5418_s14 + $0xe10] sm:$0xff]  ;;  %v482_v51 = vld [vmem:[%s5418_s14 + $0xe18] sm:$0xff] }
  0x4a   : > { %475 = vst [vmem:[%s5426_s15 + $0x378] sm:$0xff] %v474_v47  ;;  %477 = vst [vmem:[%s5426_s15 + $0x380] sm:$0xff] %v476_v48  ;;  %v484_v52 = vld [vmem:[%s5418_s14 + $0xe20] sm:$0xff]  ;;  %v486_v53 = vld [vmem:[%s5418_s14 + $0xe28] sm:$0xff] }
  0x4b   : > { %479 = vst [vmem:[%s5426_s15 + $0x388] sm:$0xff] %v478_v49  ;;  %481 = vst [vmem:[%s5426_s15 + $0x390] sm:$0xff] %v480_v50  ;;  %v488_v54 = vld [vmem:[%s5418_s14 + $0xe30] sm:$0xff]  ;;  %v490_v55 = vld [vmem:[%s5418_s14 + $0xe38] sm:$0xff] }
  0x4c   : > { %483 = vst [vmem:[%s5426_s15 + $0x398] sm:$0xff] %v482_v51  ;;  %485 = vst [vmem:[%s5426_s15 + $0x3a0] sm:$0xff] %v484_v52  ;;  %v492_v56 = vld [vmem:[%s5418_s14 + $0xf00] sm:$0xff]  ;;  %v494_v57 = vld [vmem:[%s5418_s14 + $0xf08] sm:$0xff] }
  0x4d   : > { %487 = vst [vmem:[%s5426_s15 + $0x3a8] sm:$0xff] %v486_v53  ;;  %489 = vst [vmem:[%s5426_s15 + $0x3b0] sm:$0xff] %v488_v54  ;;  %v496_v58 = vld [vmem:[%s5418_s14 + $0xf10] sm:$0xff]  ;;  %v498_v59 = vld [vmem:[%s5418_s14 + $0xf18] sm:$0xff] }
  0x4e   : > { %491 = vst [vmem:[%s5426_s15 + $0x3b8] sm:$0xff] %v490_v55  ;;  %493 = vst [vmem:[%s5426_s15 + $0x3c0] sm:$0xff] %v492_v56  ;;  %v500_v60 = vld [vmem:[%s5418_s14 + $0xf20] sm:$0xff]  ;;  %v502_v61 = vld [vmem:[%s5418_s14 + $0xf28] sm:$0xff] }
  0x4f   : > { %495 = vst [vmem:[%s5426_s15 + $0x3c8] sm:$0xff] %v494_v57  ;;  %497 = vst [vmem:[%s5426_s15 + $0x3d0] sm:$0xff] %v496_v58  ;;  %v504_v62 = vld [vmem:[%s5418_s14 + $0xf30] sm:$0xff]  ;;  %v506_v63 = vld [vmem:[%s5418_s14 + $0xf38] sm:$0xff] }
  0x50   : > { %499 = vst [vmem:[%s5426_s15 + $0x3d8] sm:$0xff] %v498_v59  ;;  %501 = vst [vmem:[%s5426_s15 + $0x3e0] sm:$0xff] %v500_v60  ;;  %v508_v0 = vld [vmem:[%s5418_s14 + $0x1000] sm:$0xff]  ;;  %v510_v1 = vld [vmem:[%s5418_s14 + $0x1008] sm:$0xff] }
  0x51   : > { %503 = vst [vmem:[%s5426_s15 + $0x3e8] sm:$0xff] %v502_v61  ;;  %505 = vst [vmem:[%s5426_s15 + $0x3f0] sm:$0xff] %v504_v62  ;;  %v512_v2 = vld [vmem:[%s5418_s14 + $0x1010] sm:$0xff]  ;;  %v514_v3 = vld [vmem:[%s5418_s14 + $0x1018] sm:$0xff] }
  0x52   : > { %507 = vst [vmem:[%s5426_s15 + $0x3f8] sm:$0xff] %v506_v63  ;;  %509 = vst [vmem:[%s5426_s15 + $0x400] sm:$0xff] %v508_v0  ;;  %v516_v4 = vld [vmem:[%s5418_s14 + $0x1020] sm:$0xff]  ;;  %v518_v5 = vld [vmem:[%s5418_s14 + $0x1028] sm:$0xff] }
  0x53   : > { %511 = vst [vmem:[%s5426_s15 + $0x408] sm:$0xff] %v510_v1  ;;  %513 = vst [vmem:[%s5426_s15 + $0x410] sm:$0xff] %v512_v2  ;;  %v520_v6 = vld [vmem:[%s5418_s14 + $0x1030] sm:$0xff]  ;;  %v522_v7 = vld [vmem:[%s5418_s14 + $0x1038] sm:$0xff] }
  0x54   : > { %515 = vst [vmem:[%s5426_s15 + $0x418] sm:$0xff] %v514_v3  ;;  %517 = vst [vmem:[%s5426_s15 + $0x420] sm:$0xff] %v516_v4  ;;  %v524_v8 = vld [vmem:[%s5418_s14 + $0x1100] sm:$0xff]  ;;  %v526_v9 = vld [vmem:[%s5418_s14 + $0x1108] sm:$0xff] }
  0x55   : > { %519 = vst [vmem:[%s5426_s15 + $0x428] sm:$0xff] %v518_v5  ;;  %521 = vst [vmem:[%s5426_s15 + $0x430] sm:$0xff] %v520_v6  ;;  %v528_v10 = vld [vmem:[%s5418_s14 + $0x1110] sm:$0xff]  ;;  %v530_v11 = vld [vmem:[%s5418_s14 + $0x1118] sm:$0xff] }
  0x56   : > { %523 = vst [vmem:[%s5426_s15 + $0x438] sm:$0xff] %v522_v7  ;;  %525 = vst [vmem:[%s5426_s15 + $0x440] sm:$0xff] %v524_v8  ;;  %v532_v12 = vld [vmem:[%s5418_s14 + $0x1120] sm:$0xff]  ;;  %v534_v13 = vld [vmem:[%s5418_s14 + $0x1128] sm:$0xff] }
  0x57   : > { %527 = vst [vmem:[%s5426_s15 + $0x448] sm:$0xff] %v526_v9  ;;  %529 = vst [vmem:[%s5426_s15 + $0x450] sm:$0xff] %v528_v10  ;;  %v536_v14 = vld [vmem:[%s5418_s14 + $0x1130] sm:$0xff]  ;;  %v538_v15 = vld [vmem:[%s5418_s14 + $0x1138] sm:$0xff] }
  0x58   : > { %531 = vst [vmem:[%s5426_s15 + $0x458] sm:$0xff] %v530_v11  ;;  %533 = vst [vmem:[%s5426_s15 + $0x460] sm:$0xff] %v532_v12  ;;  %v540_v16 = vld [vmem:[%s5418_s14 + $0x1200] sm:$0xff]  ;;  %v542_v17 = vld [vmem:[%s5418_s14 + $0x1208] sm:$0xff] }
  0x59   : > { %535 = vst [vmem:[%s5426_s15 + $0x468] sm:$0xff] %v534_v13  ;;  %537 = vst [vmem:[%s5426_s15 + $0x470] sm:$0xff] %v536_v14  ;;  %v544_v18 = vld [vmem:[%s5418_s14 + $0x1210] sm:$0xff]  ;;  %v546_v19 = vld [vmem:[%s5418_s14 + $0x1218] sm:$0xff] }
  0x5a   : > { %539 = vst [vmem:[%s5426_s15 + $0x478] sm:$0xff] %v538_v15  ;;  %541 = vst [vmem:[%s5426_s15 + $0x480] sm:$0xff] %v540_v16  ;;  %v548_v20 = vld [vmem:[%s5418_s14 + $0x1220] sm:$0xff]  ;;  %v550_v21 = vld [vmem:[%s5418_s14 + $0x1228] sm:$0xff] }
  0x5b   : > { %543 = vst [vmem:[%s5426_s15 + $0x488] sm:$0xff] %v542_v17  ;;  %545 = vst [vmem:[%s5426_s15 + $0x490] sm:$0xff] %v544_v18  ;;  %v552_v22 = vld [vmem:[%s5418_s14 + $0x1230] sm:$0xff]  ;;  %v554_v23 = vld [vmem:[%s5418_s14 + $0x1238] sm:$0xff] }
  0x5c   : > { %547 = vst [vmem:[%s5426_s15 + $0x498] sm:$0xff] %v546_v19  ;;  %549 = vst [vmem:[%s5426_s15 + $0x4a0] sm:$0xff] %v548_v20  ;;  %v556_v24 = vld [vmem:[%s5418_s14 + $0x1300] sm:$0xff]  ;;  %v558_v25 = vld [vmem:[%s5418_s14 + $0x1308] sm:$0xff] }
  0x5d   : > { %551 = vst [vmem:[%s5426_s15 + $0x4a8] sm:$0xff] %v550_v21  ;;  %553 = vst [vmem:[%s5426_s15 + $0x4b0] sm:$0xff] %v552_v22  ;;  %v560_v26 = vld [vmem:[%s5418_s14 + $0x1310] sm:$0xff]  ;;  %v562_v27 = vld [vmem:[%s5418_s14 + $0x1318] sm:$0xff] }
  0x5e   : > { %555 = vst [vmem:[%s5426_s15 + $0x4b8] sm:$0xff] %v554_v23  ;;  %557 = vst [vmem:[%s5426_s15 + $0x4c0] sm:$0xff] %v556_v24  ;;  %v564_v28 = vld [vmem:[%s5418_s14 + $0x1320] sm:$0xff]  ;;  %v566_v29 = vld [vmem:[%s5418_s14 + $0x1328] sm:$0xff] }
  0x5f   : > { %559 = vst [vmem:[%s5426_s15 + $0x4c8] sm:$0xff] %v558_v25  ;;  %561 = vst [vmem:[%s5426_s15 + $0x4d0] sm:$0xff] %v560_v26  ;;  %v568_v30 = vld [vmem:[%s5418_s14 + $0x1330] sm:$0xff]  ;;  %v570_v31 = vld [vmem:[%s5418_s14 + $0x1338] sm:$0xff] }
  0x60   : > { %563 = vst [vmem:[%s5426_s15 + $0x4d8] sm:$0xff] %v562_v27  ;;  %565 = vst [vmem:[%s5426_s15 + $0x4e0] sm:$0xff] %v564_v28  ;;  %v572_v32 = vld [vmem:[%s5418_s14 + $0x1400] sm:$0xff]  ;;  %v574_v33 = vld [vmem:[%s5418_s14 + $0x1408] sm:$0xff] }
  0x61   : > { %567 = vst [vmem:[%s5426_s15 + $0x4e8] sm:$0xff] %v566_v29  ;;  %569 = vst [vmem:[%s5426_s15 + $0x4f0] sm:$0xff] %v568_v30  ;;  %v576_v34 = vld [vmem:[%s5418_s14 + $0x1410] sm:$0xff]  ;;  %v578_v35 = vld [vmem:[%s5418_s14 + $0x1418] sm:$0xff] }
  0x62   : > { %571 = vst [vmem:[%s5426_s15 + $0x4f8] sm:$0xff] %v570_v31  ;;  %573 = vst [vmem:[%s5426_s15 + $0x500] sm:$0xff] %v572_v32  ;;  %v580_v36 = vld [vmem:[%s5418_s14 + $0x1420] sm:$0xff]  ;;  %v582_v37 = vld [vmem:[%s5418_s14 + $0x1428] sm:$0xff] }
  0x63   : > { %575 = vst [vmem:[%s5426_s15 + $0x508] sm:$0xff] %v574_v33  ;;  %577 = vst [vmem:[%s5426_s15 + $0x510] sm:$0xff] %v576_v34  ;;  %v584_v38 = vld [vmem:[%s5418_s14 + $0x1430] sm:$0xff]  ;;  %v586_v39 = vld [vmem:[%s5418_s14 + $0x1438] sm:$0xff] }
  0x64   : > { %579 = vst [vmem:[%s5426_s15 + $0x518] sm:$0xff] %v578_v35  ;;  %581 = vst [vmem:[%s5426_s15 + $0x520] sm:$0xff] %v580_v36  ;;  %v588_v40 = vld [vmem:[%s5418_s14 + $0x1500] sm:$0xff]  ;;  %v590_v41 = vld [vmem:[%s5418_s14 + $0x1508] sm:$0xff] }
  0x65   : > { %583 = vst [vmem:[%s5426_s15 + $0x528] sm:$0xff] %v582_v37  ;;  %585 = vst [vmem:[%s5426_s15 + $0x530] sm:$0xff] %v584_v38  ;;  %v592_v42 = vld [vmem:[%s5418_s14 + $0x1510] sm:$0xff]  ;;  %v594_v43 = vld [vmem:[%s5418_s14 + $0x1518] sm:$0xff] }
  0x66   : > { %587 = vst [vmem:[%s5426_s15 + $0x538] sm:$0xff] %v586_v39  ;;  %589 = vst [vmem:[%s5426_s15 + $0x540] sm:$0xff] %v588_v40  ;;  %v596_v44 = vld [vmem:[%s5418_s14 + $0x1520] sm:$0xff]  ;;  %v598_v45 = vld [vmem:[%s5418_s14 + $0x1528] sm:$0xff] }
  0x67   : > { %591 = vst [vmem:[%s5426_s15 + $0x548] sm:$0xff] %v590_v41  ;;  %593 = vst [vmem:[%s5426_s15 + $0x550] sm:$0xff] %v592_v42  ;;  %v600_v46 = vld [vmem:[%s5418_s14 + $0x1530] sm:$0xff]  ;;  %v602_v47 = vld [vmem:[%s5418_s14 + $0x1538] sm:$0xff] }
  0x68   : > { %595 = vst [vmem:[%s5426_s15 + $0x558] sm:$0xff] %v594_v43  ;;  %597 = vst [vmem:[%s5426_s15 + $0x560] sm:$0xff] %v596_v44  ;;  %v604_v48 = vld [vmem:[%s5418_s14 + $0x1600] sm:$0xff]  ;;  %v606_v49 = vld [vmem:[%s5418_s14 + $0x1608] sm:$0xff] }
  0x69   : > { %599 = vst [vmem:[%s5426_s15 + $0x568] sm:$0xff] %v598_v45  ;;  %601 = vst [vmem:[%s5426_s15 + $0x570] sm:$0xff] %v600_v46  ;;  %v608_v50 = vld [vmem:[%s5418_s14 + $0x1610] sm:$0xff]  ;;  %v610_v51 = vld [vmem:[%s5418_s14 + $0x1618] sm:$0xff] }
  0x6a   : > { %603 = vst [vmem:[%s5426_s15 + $0x578] sm:$0xff] %v602_v47  ;;  %605 = vst [vmem:[%s5426_s15 + $0x580] sm:$0xff] %v604_v48  ;;  %v612_v52 = vld [vmem:[%s5418_s14 + $0x1620] sm:$0xff]  ;;  %v614_v53 = vld [vmem:[%s5418_s14 + $0x1628] sm:$0xff] }
  0x6b   : > { %607 = vst [vmem:[%s5426_s15 + $0x588] sm:$0xff] %v606_v49  ;;  %609 = vst [vmem:[%s5426_s15 + $0x590] sm:$0xff] %v608_v50  ;;  %v616_v54 = vld [vmem:[%s5418_s14 + $0x1630] sm:$0xff]  ;;  %v618_v55 = vld [vmem:[%s5418_s14 + $0x1638] sm:$0xff] }
  0x6c   : > { %611 = vst [vmem:[%s5426_s15 + $0x598] sm:$0xff] %v610_v51  ;;  %613 = vst [vmem:[%s5426_s15 + $0x5a0] sm:$0xff] %v612_v52  ;;  %v620_v56 = vld [vmem:[%s5418_s14 + $0x1700] sm:$0xff]  ;;  %v622_v57 = vld [vmem:[%s5418_s14 + $0x1708] sm:$0xff] }
  0x6d   : > { %615 = vst [vmem:[%s5426_s15 + $0x5a8] sm:$0xff] %v614_v53  ;;  %617 = vst [vmem:[%s5426_s15 + $0x5b0] sm:$0xff] %v616_v54  ;;  %v624_v58 = vld [vmem:[%s5418_s14 + $0x1710] sm:$0xff]  ;;  %v626_v59 = vld [vmem:[%s5418_s14 + $0x1718] sm:$0xff] }
  0x6e   : > { %619 = vst [vmem:[%s5426_s15 + $0x5b8] sm:$0xff] %v618_v55  ;;  %621 = vst [vmem:[%s5426_s15 + $0x5c0] sm:$0xff] %v620_v56  ;;  %v628_v60 = vld [vmem:[%s5418_s14 + $0x1720] sm:$0xff]  ;;  %v630_v61 = vld [vmem:[%s5418_s14 + $0x1728] sm:$0xff] }
  0x6f   : > { %623 = vst [vmem:[%s5426_s15 + $0x5c8] sm:$0xff] %v622_v57  ;;  %625 = vst [vmem:[%s5426_s15 + $0x5d0] sm:$0xff] %v624_v58  ;;  %v632_v62 = vld [vmem:[%s5418_s14 + $0x1730] sm:$0xff]  ;;  %v634_v63 = vld [vmem:[%s5418_s14 + $0x1738] sm:$0xff] }
  0x70   : > { %627 = vst [vmem:[%s5426_s15 + $0x5d8] sm:$0xff] %v626_v59  ;;  %629 = vst [vmem:[%s5426_s15 + $0x5e0] sm:$0xff] %v628_v60  ;;  %v636_v0 = vld [vmem:[%s5418_s14 + $0x1800] sm:$0xff]  ;;  %v638_v1 = vld [vmem:[%s5418_s14 + $0x1808] sm:$0xff] }
  0x71   : > { %631 = vst [vmem:[%s5426_s15 + $0x5e8] sm:$0xff] %v630_v61  ;;  %633 = vst [vmem:[%s5426_s15 + $0x5f0] sm:$0xff] %v632_v62  ;;  %v640_v2 = vld [vmem:[%s5418_s14 + $0x1810] sm:$0xff]  ;;  %v642_v3 = vld [vmem:[%s5418_s14 + $0x1818] sm:$0xff] }
  0x72   : > { %635 = vst [vmem:[%s5426_s15 + $0x5f8] sm:$0xff] %v634_v63  ;;  %637 = vst [vmem:[%s5426_s15 + $0x600] sm:$0xff] %v636_v0  ;;  %v644_v4 = vld [vmem:[%s5418_s14 + $0x1820] sm:$0xff]  ;;  %v646_v5 = vld [vmem:[%s5418_s14 + $0x1828] sm:$0xff] }
  0x73   : > { %639 = vst [vmem:[%s5426_s15 + $0x608] sm:$0xff] %v638_v1  ;;  %641 = vst [vmem:[%s5426_s15 + $0x610] sm:$0xff] %v640_v2  ;;  %v648_v6 = vld [vmem:[%s5418_s14 + $0x1830] sm:$0xff]  ;;  %v650_v7 = vld [vmem:[%s5418_s14 + $0x1838] sm:$0xff] }
  0x74   : > { %643 = vst [vmem:[%s5426_s15 + $0x618] sm:$0xff] %v642_v3  ;;  %645 = vst [vmem:[%s5426_s15 + $0x620] sm:$0xff] %v644_v4  ;;  %v652_v8 = vld [vmem:[%s5418_s14 + $0x1900] sm:$0xff]  ;;  %v654_v9 = vld [vmem:[%s5418_s14 + $0x1908] sm:$0xff] }
  0x75   : > { %647 = vst [vmem:[%s5426_s15 + $0x628] sm:$0xff] %v646_v5  ;;  %649 = vst [vmem:[%s5426_s15 + $0x630] sm:$0xff] %v648_v6  ;;  %v656_v10 = vld [vmem:[%s5418_s14 + $0x1910] sm:$0xff]  ;;  %v658_v11 = vld [vmem:[%s5418_s14 + $0x1918] sm:$0xff] }
  0x76   : > { %651 = vst [vmem:[%s5426_s15 + $0x638] sm:$0xff] %v650_v7  ;;  %653 = vst [vmem:[%s5426_s15 + $0x640] sm:$0xff] %v652_v8  ;;  %v660_v12 = vld [vmem:[%s5418_s14 + $0x1920] sm:$0xff]  ;;  %v662_v13 = vld [vmem:[%s5418_s14 + $0x1928] sm:$0xff] }
  0x77   : > { %655 = vst [vmem:[%s5426_s15 + $0x648] sm:$0xff] %v654_v9  ;;  %657 = vst [vmem:[%s5426_s15 + $0x650] sm:$0xff] %v656_v10  ;;  %v664_v14 = vld [vmem:[%s5418_s14 + $0x1930] sm:$0xff]  ;;  %v666_v15 = vld [vmem:[%s5418_s14 + $0x1938] sm:$0xff] }
  0x78   : > { %659 = vst [vmem:[%s5426_s15 + $0x658] sm:$0xff] %v658_v11  ;;  %661 = vst [vmem:[%s5426_s15 + $0x660] sm:$0xff] %v660_v12  ;;  %v668_v16 = vld [vmem:[%s5418_s14 + $0x1a00] sm:$0xff]  ;;  %v670_v17 = vld [vmem:[%s5418_s14 + $0x1a08] sm:$0xff] }
  0x79   : > { %663 = vst [vmem:[%s5426_s15 + $0x668] sm:$0xff] %v662_v13  ;;  %665 = vst [vmem:[%s5426_s15 + $0x670] sm:$0xff] %v664_v14  ;;  %v672_v18 = vld [vmem:[%s5418_s14 + $0x1a10] sm:$0xff]  ;;  %v674_v19 = vld [vmem:[%s5418_s14 + $0x1a18] sm:$0xff] }
  0x7a   : > { %667 = vst [vmem:[%s5426_s15 + $0x678] sm:$0xff] %v666_v15  ;;  %669 = vst [vmem:[%s5426_s15 + $0x680] sm:$0xff] %v668_v16  ;;  %v676_v20 = vld [vmem:[%s5418_s14 + $0x1a20] sm:$0xff]  ;;  %v678_v21 = vld [vmem:[%s5418_s14 + $0x1a28] sm:$0xff] }
  0x7b   : > { %671 = vst [vmem:[%s5426_s15 + $0x688] sm:$0xff] %v670_v17  ;;  %673 = vst [vmem:[%s5426_s15 + $0x690] sm:$0xff] %v672_v18  ;;  %v680_v22 = vld [vmem:[%s5418_s14 + $0x1a30] sm:$0xff]  ;;  %v682_v23 = vld [vmem:[%s5418_s14 + $0x1a38] sm:$0xff] }
  0x7c   : > { %675 = vst [vmem:[%s5426_s15 + $0x698] sm:$0xff] %v674_v19  ;;  %677 = vst [vmem:[%s5426_s15 + $0x6a0] sm:$0xff] %v676_v20  ;;  %v684_v24 = vld [vmem:[%s5418_s14 + $0x1b00] sm:$0xff]  ;;  %v686_v25 = vld [vmem:[%s5418_s14 + $0x1b08] sm:$0xff] }
  0x7d   : > { %679 = vst [vmem:[%s5426_s15 + $0x6a8] sm:$0xff] %v678_v21  ;;  %681 = vst [vmem:[%s5426_s15 + $0x6b0] sm:$0xff] %v680_v22  ;;  %v688_v26 = vld [vmem:[%s5418_s14 + $0x1b10] sm:$0xff]  ;;  %v690_v27 = vld [vmem:[%s5418_s14 + $0x1b18] sm:$0xff] }
  0x7e   : > { %683 = vst [vmem:[%s5426_s15 + $0x6b8] sm:$0xff] %v682_v23  ;;  %685 = vst [vmem:[%s5426_s15 + $0x6c0] sm:$0xff] %v684_v24  ;;  %v692_v28 = vld [vmem:[%s5418_s14 + $0x1b20] sm:$0xff]  ;;  %v694_v29 = vld [vmem:[%s5418_s14 + $0x1b28] sm:$0xff] }
  0x7f   : > { %687 = vst [vmem:[%s5426_s15 + $0x6c8] sm:$0xff] %v686_v25  ;;  %689 = vst [vmem:[%s5426_s15 + $0x6d0] sm:$0xff] %v688_v26  ;;  %v696_v30 = vld [vmem:[%s5418_s14 + $0x1b30] sm:$0xff]  ;;  %v698_v31 = vld [vmem:[%s5418_s14 + $0x1b38] sm:$0xff] }
  0x80   : > { %691 = vst [vmem:[%s5426_s15 + $0x6d8] sm:$0xff] %v690_v27  ;;  %693 = vst [vmem:[%s5426_s15 + $0x6e0] sm:$0xff] %v692_v28  ;;  %v700_v32 = vld [vmem:[%s5418_s14 + $0x1c00] sm:$0xff]  ;;  %v702_v33 = vld [vmem:[%s5418_s14 + $0x1c08] sm:$0xff] }
  0x81   : > { %695 = vst [vmem:[%s5426_s15 + $0x6e8] sm:$0xff] %v694_v29  ;;  %697 = vst [vmem:[%s5426_s15 + $0x6f0] sm:$0xff] %v696_v30  ;;  %v704_v34 = vld [vmem:[%s5418_s14 + $0x1c10] sm:$0xff]  ;;  %v706_v35 = vld [vmem:[%s5418_s14 + $0x1c18] sm:$0xff] }
  0x82   : > { %699 = vst [vmem:[%s5426_s15 + $0x6f8] sm:$0xff] %v698_v31  ;;  %701 = vst [vmem:[%s5426_s15 + $0x700] sm:$0xff] %v700_v32  ;;  %v708_v36 = vld [vmem:[%s5418_s14 + $0x1c20] sm:$0xff]  ;;  %v710_v37 = vld [vmem:[%s5418_s14 + $0x1c28] sm:$0xff] }
  0x83   : > { %703 = vst [vmem:[%s5426_s15 + $0x708] sm:$0xff] %v702_v33  ;;  %705 = vst [vmem:[%s5426_s15 + $0x710] sm:$0xff] %v704_v34  ;;  %v712_v38 = vld [vmem:[%s5418_s14 + $0x1c30] sm:$0xff]  ;;  %v714_v39 = vld [vmem:[%s5418_s14 + $0x1c38] sm:$0xff] }
  0x84   : > { %707 = vst [vmem:[%s5426_s15 + $0x718] sm:$0xff] %v706_v35  ;;  %709 = vst [vmem:[%s5426_s15 + $0x720] sm:$0xff] %v708_v36  ;;  %v716_v40 = vld [vmem:[%s5418_s14 + $0x1d00] sm:$0xff]  ;;  %v718_v41 = vld [vmem:[%s5418_s14 + $0x1d08] sm:$0xff] }
  0x85   : > { %711 = vst [vmem:[%s5426_s15 + $0x728] sm:$0xff] %v710_v37  ;;  %713 = vst [vmem:[%s5426_s15 + $0x730] sm:$0xff] %v712_v38  ;;  %v720_v42 = vld [vmem:[%s5418_s14 + $0x1d10] sm:$0xff]  ;;  %v722_v43 = vld [vmem:[%s5418_s14 + $0x1d18] sm:$0xff] }
  0x86   : > { %715 = vst [vmem:[%s5426_s15 + $0x738] sm:$0xff] %v714_v39  ;;  %717 = vst [vmem:[%s5426_s15 + $0x740] sm:$0xff] %v716_v40  ;;  %v724_v44 = vld [vmem:[%s5418_s14 + $0x1d20] sm:$0xff]  ;;  %v726_v45 = vld [vmem:[%s5418_s14 + $0x1d28] sm:$0xff] }
  0x87   : > { %719 = vst [vmem:[%s5426_s15 + $0x748] sm:$0xff] %v718_v41  ;;  %721 = vst [vmem:[%s5426_s15 + $0x750] sm:$0xff] %v720_v42  ;;  %v728_v46 = vld [vmem:[%s5418_s14 + $0x1d30] sm:$0xff]  ;;  %v730_v47 = vld [vmem:[%s5418_s14 + $0x1d38] sm:$0xff] }
  0x88   : > { %723 = vst [vmem:[%s5426_s15 + $0x758] sm:$0xff] %v722_v43  ;;  %725 = vst [vmem:[%s5426_s15 + $0x760] sm:$0xff] %v724_v44  ;;  %v732_v48 = vld [vmem:[%s5418_s14 + $0x1e00] sm:$0xff]  ;;  %v734_v49 = vld [vmem:[%s5418_s14 + $0x1e08] sm:$0xff] }
  0x89   : > { %727 = vst [vmem:[%s5426_s15 + $0x768] sm:$0xff] %v726_v45  ;;  %729 = vst [vmem:[%s5426_s15 + $0x770] sm:$0xff] %v728_v46  ;;  %v736_v50 = vld [vmem:[%s5418_s14 + $0x1e10] sm:$0xff]  ;;  %v738_v51 = vld [vmem:[%s5418_s14 + $0x1e18] sm:$0xff] }
  0x8a   : > { %731 = vst [vmem:[%s5426_s15 + $0x778] sm:$0xff] %v730_v47  ;;  %733 = vst [vmem:[%s5426_s15 + $0x780] sm:$0xff] %v732_v48  ;;  %v740_v52 = vld [vmem:[%s5418_s14 + $0x1e20] sm:$0xff]  ;;  %v742_v53 = vld [vmem:[%s5418_s14 + $0x1e28] sm:$0xff] }
  0x8b   : > { %735 = vst [vmem:[%s5426_s15 + $0x788] sm:$0xff] %v734_v49  ;;  %737 = vst [vmem:[%s5426_s15 + $0x790] sm:$0xff] %v736_v50  ;;  %v744_v54 = vld [vmem:[%s5418_s14 + $0x1e30] sm:$0xff]  ;;  %v746_v55 = vld [vmem:[%s5418_s14 + $0x1e38] sm:$0xff] }
  0x8c   : > { %739 = vst [vmem:[%s5426_s15 + $0x798] sm:$0xff] %v738_v51  ;;  %741 = vst [vmem:[%s5426_s15 + $0x7a0] sm:$0xff] %v740_v52  ;;  %v748_v56 = vld [vmem:[%s5418_s14 + $0x1f00] sm:$0xff]  ;;  %v750_v57 = vld [vmem:[%s5418_s14 + $0x1f08] sm:$0xff] }
  0x8d   : > { %743 = vst [vmem:[%s5426_s15 + $0x7a8] sm:$0xff] %v742_v53  ;;  %745 = vst [vmem:[%s5426_s15 + $0x7b0] sm:$0xff] %v744_v54  ;;  %v752_v58 = vld [vmem:[%s5418_s14 + $0x1f10] sm:$0xff]  ;;  %v754_v59 = vld [vmem:[%s5418_s14 + $0x1f18] sm:$0xff] }
  0x8e   : > { %747 = vst [vmem:[%s5426_s15 + $0x7b8] sm:$0xff] %v746_v55  ;;  %749 = vst [vmem:[%s5426_s15 + $0x7c0] sm:$0xff] %v748_v56  ;;  %v756_v60 = vld [vmem:[%s5418_s14 + $0x1f20] sm:$0xff]  ;;  %v758_v61 = vld [vmem:[%s5418_s14 + $0x1f28] sm:$0xff] }
  0x8f   : > { %751 = vst [vmem:[%s5426_s15 + $0x7c8] sm:$0xff] %v750_v57  ;;  %753 = vst [vmem:[%s5426_s15 + $0x7d0] sm:$0xff] %v752_v58  ;;  %v760_v62 = vld [vmem:[%s5418_s14 + $0x1f30] sm:$0xff]  ;;  %v762_v63 = vld [vmem:[%s5418_s14 + $0x1f38] sm:$0xff] }
  0x90   : > { %755 = vst [vmem:[%s5426_s15 + $0x7d8] sm:$0xff] %v754_v59  ;;  %757 = vst [vmem:[%s5426_s15 + $0x7e0] sm:$0xff] %v756_v60  ;;  %v764_v0 = vld [vmem:[%s5418_s14 + $0x2000] sm:$0xff]  ;;  %v766_v1 = vld [vmem:[%s5418_s14 + $0x2008] sm:$0xff] }
  0x91   : > { %759 = vst [vmem:[%s5426_s15 + $0x7e8] sm:$0xff] %v758_v61  ;;  %761 = vst [vmem:[%s5426_s15 + $0x7f0] sm:$0xff] %v760_v62  ;;  %v768_v2 = vld [vmem:[%s5418_s14 + $0x2010] sm:$0xff]  ;;  %v770_v3 = vld [vmem:[%s5418_s14 + $0x2018] sm:$0xff] }
  0x92   : > { %763 = vst [vmem:[%s5426_s15 + $0x7f8] sm:$0xff] %v762_v63  ;;  %765 = vst [vmem:[%s5426_s15 + $0x800] sm:$0xff] %v764_v0  ;;  %v772_v4 = vld [vmem:[%s5418_s14 + $0x2020] sm:$0xff]  ;;  %v774_v5 = vld [vmem:[%s5418_s14 + $0x2028] sm:$0xff] }
  0x93   : > { %767 = vst [vmem:[%s5426_s15 + $0x808] sm:$0xff] %v766_v1  ;;  %769 = vst [vmem:[%s5426_s15 + $0x810] sm:$0xff] %v768_v2  ;;  %v776_v6 = vld [vmem:[%s5418_s14 + $0x2030] sm:$0xff]  ;;  %v778_v7 = vld [vmem:[%s5418_s14 + $0x2038] sm:$0xff] }
  0x94   : > { %771 = vst [vmem:[%s5426_s15 + $0x818] sm:$0xff] %v770_v3  ;;  %773 = vst [vmem:[%s5426_s15 + $0x820] sm:$0xff] %v772_v4  ;;  %v780_v8 = vld [vmem:[%s5418_s14 + $0x2100] sm:$0xff]  ;;  %v782_v9 = vld [vmem:[%s5418_s14 + $0x2108] sm:$0xff] }
  0x95   : > { %775 = vst [vmem:[%s5426_s15 + $0x828] sm:$0xff] %v774_v5  ;;  %777 = vst [vmem:[%s5426_s15 + $0x830] sm:$0xff] %v776_v6  ;;  %v784_v10 = vld [vmem:[%s5418_s14 + $0x2110] sm:$0xff]  ;;  %v786_v11 = vld [vmem:[%s5418_s14 + $0x2118] sm:$0xff] }
  0x96   : > { %779 = vst [vmem:[%s5426_s15 + $0x838] sm:$0xff] %v778_v7  ;;  %781 = vst [vmem:[%s5426_s15 + $0x840] sm:$0xff] %v780_v8  ;;  %v788_v12 = vld [vmem:[%s5418_s14 + $0x2120] sm:$0xff]  ;;  %v790_v13 = vld [vmem:[%s5418_s14 + $0x2128] sm:$0xff] }
  0x97   : > { %783 = vst [vmem:[%s5426_s15 + $0x848] sm:$0xff] %v782_v9  ;;  %785 = vst [vmem:[%s5426_s15 + $0x850] sm:$0xff] %v784_v10  ;;  %v792_v14 = vld [vmem:[%s5418_s14 + $0x2130] sm:$0xff]  ;;  %v794_v15 = vld [vmem:[%s5418_s14 + $0x2138] sm:$0xff] }
  0x98   : > { %787 = vst [vmem:[%s5426_s15 + $0x858] sm:$0xff] %v786_v11  ;;  %789 = vst [vmem:[%s5426_s15 + $0x860] sm:$0xff] %v788_v12  ;;  %v796_v16 = vld [vmem:[%s5418_s14 + $0x2200] sm:$0xff]  ;;  %v798_v17 = vld [vmem:[%s5418_s14 + $0x2208] sm:$0xff] }
  0x99   : > { %791 = vst [vmem:[%s5426_s15 + $0x868] sm:$0xff] %v790_v13  ;;  %793 = vst [vmem:[%s5426_s15 + $0x870] sm:$0xff] %v792_v14  ;;  %v800_v18 = vld [vmem:[%s5418_s14 + $0x2210] sm:$0xff]  ;;  %v802_v19 = vld [vmem:[%s5418_s14 + $0x2218] sm:$0xff] }
  0x9a   : > { %795 = vst [vmem:[%s5426_s15 + $0x878] sm:$0xff] %v794_v15  ;;  %797 = vst [vmem:[%s5426_s15 + $0x880] sm:$0xff] %v796_v16  ;;  %v804_v20 = vld [vmem:[%s5418_s14 + $0x2220] sm:$0xff]  ;;  %v806_v21 = vld [vmem:[%s5418_s14 + $0x2228] sm:$0xff] }
  0x9b   : > { %799 = vst [vmem:[%s5426_s15 + $0x888] sm:$0xff] %v798_v17  ;;  %801 = vst [vmem:[%s5426_s15 + $0x890] sm:$0xff] %v800_v18  ;;  %v808_v22 = vld [vmem:[%s5418_s14 + $0x2230] sm:$0xff]  ;;  %v810_v23 = vld [vmem:[%s5418_s14 + $0x2238] sm:$0xff] }
  0x9c   : > { %803 = vst [vmem:[%s5426_s15 + $0x898] sm:$0xff] %v802_v19  ;;  %805 = vst [vmem:[%s5426_s15 + $0x8a0] sm:$0xff] %v804_v20  ;;  %v812_v24 = vld [vmem:[%s5418_s14 + $0x2300] sm:$0xff]  ;;  %v814_v25 = vld [vmem:[%s5418_s14 + $0x2308] sm:$0xff] }
  0x9d   : > { %807 = vst [vmem:[%s5426_s15 + $0x8a8] sm:$0xff] %v806_v21  ;;  %809 = vst [vmem:[%s5426_s15 + $0x8b0] sm:$0xff] %v808_v22  ;;  %v816_v26 = vld [vmem:[%s5418_s14 + $0x2310] sm:$0xff]  ;;  %v818_v27 = vld [vmem:[%s5418_s14 + $0x2318] sm:$0xff] }
  0x9e   : > { %811 = vst [vmem:[%s5426_s15 + $0x8b8] sm:$0xff] %v810_v23  ;;  %813 = vst [vmem:[%s5426_s15 + $0x8c0] sm:$0xff] %v812_v24  ;;  %v820_v28 = vld [vmem:[%s5418_s14 + $0x2320] sm:$0xff]  ;;  %v822_v29 = vld [vmem:[%s5418_s14 + $0x2328] sm:$0xff] }
  0x9f   : > { %815 = vst [vmem:[%s5426_s15 + $0x8c8] sm:$0xff] %v814_v25  ;;  %817 = vst [vmem:[%s5426_s15 + $0x8d0] sm:$0xff] %v816_v26  ;;  %v824_v30 = vld [vmem:[%s5418_s14 + $0x2330] sm:$0xff]  ;;  %v826_v31 = vld [vmem:[%s5418_s14 + $0x2338] sm:$0xff] }
  0xa0   : > { %819 = vst [vmem:[%s5426_s15 + $0x8d8] sm:$0xff] %v818_v27  ;;  %821 = vst [vmem:[%s5426_s15 + $0x8e0] sm:$0xff] %v820_v28  ;;  %v828_v32 = vld [vmem:[%s5418_s14 + $0x2400] sm:$0xff]  ;;  %v830_v33 = vld [vmem:[%s5418_s14 + $0x2408] sm:$0xff] }
  0xa1   : > { %823 = vst [vmem:[%s5426_s15 + $0x8e8] sm:$0xff] %v822_v29  ;;  %825 = vst [vmem:[%s5426_s15 + $0x8f0] sm:$0xff] %v824_v30  ;;  %v832_v34 = vld [vmem:[%s5418_s14 + $0x2410] sm:$0xff]  ;;  %v834_v35 = vld [vmem:[%s5418_s14 + $0x2418] sm:$0xff] }
  0xa2   : > { %827 = vst [vmem:[%s5426_s15 + $0x8f8] sm:$0xff] %v826_v31  ;;  %829 = vst [vmem:[%s5426_s15 + $0x900] sm:$0xff] %v828_v32  ;;  %v836_v36 = vld [vmem:[%s5418_s14 + $0x2420] sm:$0xff]  ;;  %v838_v37 = vld [vmem:[%s5418_s14 + $0x2428] sm:$0xff] }
  0xa3   : > { %831 = vst [vmem:[%s5426_s15 + $0x908] sm:$0xff] %v830_v33  ;;  %833 = vst [vmem:[%s5426_s15 + $0x910] sm:$0xff] %v832_v34  ;;  %v840_v38 = vld [vmem:[%s5418_s14 + $0x2430] sm:$0xff]  ;;  %v842_v39 = vld [vmem:[%s5418_s14 + $0x2438] sm:$0xff] }
  0xa4   : > { %835 = vst [vmem:[%s5426_s15 + $0x918] sm:$0xff] %v834_v35  ;;  %837 = vst [vmem:[%s5426_s15 + $0x920] sm:$0xff] %v836_v36  ;;  %v844_v40 = vld [vmem:[%s5418_s14 + $0x2500] sm:$0xff]  ;;  %v846_v41 = vld [vmem:[%s5418_s14 + $0x2508] sm:$0xff] }
  0xa5   : > { %839 = vst [vmem:[%s5426_s15 + $0x928] sm:$0xff] %v838_v37  ;;  %841 = vst [vmem:[%s5426_s15 + $0x930] sm:$0xff] %v840_v38  ;;  %v848_v42 = vld [vmem:[%s5418_s14 + $0x2510] sm:$0xff]  ;;  %v850_v43 = vld [vmem:[%s5418_s14 + $0x2518] sm:$0xff] }
  0xa6   : > { %843 = vst [vmem:[%s5426_s15 + $0x938] sm:$0xff] %v842_v39  ;;  %845 = vst [vmem:[%s5426_s15 + $0x940] sm:$0xff] %v844_v40  ;;  %v852_v44 = vld [vmem:[%s5418_s14 + $0x2520] sm:$0xff]  ;;  %v854_v45 = vld [vmem:[%s5418_s14 + $0x2528] sm:$0xff] }
  0xa7   : > { %847 = vst [vmem:[%s5426_s15 + $0x948] sm:$0xff] %v846_v41  ;;  %849 = vst [vmem:[%s5426_s15 + $0x950] sm:$0xff] %v848_v42  ;;  %v856_v46 = vld [vmem:[%s5418_s14 + $0x2530] sm:$0xff]  ;;  %v858_v47 = vld [vmem:[%s5418_s14 + $0x2538] sm:$0xff] }
  0xa8   : > { %851 = vst [vmem:[%s5426_s15 + $0x958] sm:$0xff] %v850_v43  ;;  %853 = vst [vmem:[%s5426_s15 + $0x960] sm:$0xff] %v852_v44  ;;  %v860_v48 = vld [vmem:[%s5418_s14 + $0x2600] sm:$0xff]  ;;  %v862_v49 = vld [vmem:[%s5418_s14 + $0x2608] sm:$0xff] }
  0xa9   : > { %855 = vst [vmem:[%s5426_s15 + $0x968] sm:$0xff] %v854_v45  ;;  %857 = vst [vmem:[%s5426_s15 + $0x970] sm:$0xff] %v856_v46  ;;  %v864_v50 = vld [vmem:[%s5418_s14 + $0x2610] sm:$0xff]  ;;  %v866_v51 = vld [vmem:[%s5418_s14 + $0x2618] sm:$0xff] }
  0xaa   : > { %859 = vst [vmem:[%s5426_s15 + $0x978] sm:$0xff] %v858_v47  ;;  %861 = vst [vmem:[%s5426_s15 + $0x980] sm:$0xff] %v860_v48  ;;  %v868_v52 = vld [vmem:[%s5418_s14 + $0x2620] sm:$0xff]  ;;  %v870_v53 = vld [vmem:[%s5418_s14 + $0x2628] sm:$0xff] }
  0xab   : > { %863 = vst [vmem:[%s5426_s15 + $0x988] sm:$0xff] %v862_v49  ;;  %865 = vst [vmem:[%s5426_s15 + $0x990] sm:$0xff] %v864_v50  ;;  %v872_v54 = vld [vmem:[%s5418_s14 + $0x2630] sm:$0xff]  ;;  %v874_v55 = vld [vmem:[%s5418_s14 + $0x2638] sm:$0xff] }
  0xac   : > { %867 = vst [vmem:[%s5426_s15 + $0x998] sm:$0xff] %v866_v51  ;;  %869 = vst [vmem:[%s5426_s15 + $0x9a0] sm:$0xff] %v868_v52  ;;  %v876_v56 = vld [vmem:[%s5418_s14 + $0x2700] sm:$0xff]  ;;  %v878_v57 = vld [vmem:[%s5418_s14 + $0x2708] sm:$0xff] }
  0xad   : > { %871 = vst [vmem:[%s5426_s15 + $0x9a8] sm:$0xff] %v870_v53  ;;  %873 = vst [vmem:[%s5426_s15 + $0x9b0] sm:$0xff] %v872_v54  ;;  %v880_v58 = vld [vmem:[%s5418_s14 + $0x2710] sm:$0xff]  ;;  %v882_v59 = vld [vmem:[%s5418_s14 + $0x2718] sm:$0xff] }
  0xae   : > { %875 = vst [vmem:[%s5426_s15 + $0x9b8] sm:$0xff] %v874_v55  ;;  %877 = vst [vmem:[%s5426_s15 + $0x9c0] sm:$0xff] %v876_v56  ;;  %v884_v60 = vld [vmem:[%s5418_s14 + $0x2720] sm:$0xff]  ;;  %v886_v61 = vld [vmem:[%s5418_s14 + $0x2728] sm:$0xff] }
  0xaf   : > { %879 = vst [vmem:[%s5426_s15 + $0x9c8] sm:$0xff] %v878_v57  ;;  %881 = vst [vmem:[%s5426_s15 + $0x9d0] sm:$0xff] %v880_v58  ;;  %v888_v62 = vld [vmem:[%s5418_s14 + $0x2730] sm:$0xff]  ;;  %v890_v63 = vld [vmem:[%s5418_s14 + $0x2738] sm:$0xff] }
  0xb0   : > { %883 = vst [vmem:[%s5426_s15 + $0x9d8] sm:$0xff] %v882_v59  ;;  %885 = vst [vmem:[%s5426_s15 + $0x9e0] sm:$0xff] %v884_v60  ;;  %v892_v0 = vld [vmem:[%s5418_s14 + $0x2800] sm:$0xff]  ;;  %v894_v1 = vld [vmem:[%s5418_s14 + $0x2808] sm:$0xff] }
  0xb1   : > { %887 = vst [vmem:[%s5426_s15 + $0x9e8] sm:$0xff] %v886_v61  ;;  %889 = vst [vmem:[%s5426_s15 + $0x9f0] sm:$0xff] %v888_v62  ;;  %v896_v2 = vld [vmem:[%s5418_s14 + $0x2810] sm:$0xff]  ;;  %v898_v3 = vld [vmem:[%s5418_s14 + $0x2818] sm:$0xff] }
  0xb2   : > { %891 = vst [vmem:[%s5426_s15 + $0x9f8] sm:$0xff] %v890_v63  ;;  %893 = vst [vmem:[%s5426_s15 + $0xa00] sm:$0xff] %v892_v0  ;;  %v900_v4 = vld [vmem:[%s5418_s14 + $0x2820] sm:$0xff]  ;;  %v902_v5 = vld [vmem:[%s5418_s14 + $0x2828] sm:$0xff] }
  0xb3   : > { %895 = vst [vmem:[%s5426_s15 + $0xa08] sm:$0xff] %v894_v1  ;;  %897 = vst [vmem:[%s5426_s15 + $0xa10] sm:$0xff] %v896_v2  ;;  %v904_v6 = vld [vmem:[%s5418_s14 + $0x2830] sm:$0xff]  ;;  %v906_v7 = vld [vmem:[%s5418_s14 + $0x2838] sm:$0xff] }
  0xb4   : > { %899 = vst [vmem:[%s5426_s15 + $0xa18] sm:$0xff] %v898_v3  ;;  %901 = vst [vmem:[%s5426_s15 + $0xa20] sm:$0xff] %v900_v4  ;;  %v908_v8 = vld [vmem:[%s5418_s14 + $0x2900] sm:$0xff]  ;;  %v910_v9 = vld [vmem:[%s5418_s14 + $0x2908] sm:$0xff] }
  0xb5   : > { %903 = vst [vmem:[%s5426_s15 + $0xa28] sm:$0xff] %v902_v5  ;;  %905 = vst [vmem:[%s5426_s15 + $0xa30] sm:$0xff] %v904_v6  ;;  %v912_v10 = vld [vmem:[%s5418_s14 + $0x2910] sm:$0xff]  ;;  %v914_v11 = vld [vmem:[%s5418_s14 + $0x2918] sm:$0xff] }
  0xb6   : > { %907 = vst [vmem:[%s5426_s15 + $0xa38] sm:$0xff] %v906_v7  ;;  %909 = vst [vmem:[%s5426_s15 + $0xa40] sm:$0xff] %v908_v8  ;;  %v916_v12 = vld [vmem:[%s5418_s14 + $0x2920] sm:$0xff]  ;;  %v918_v13 = vld [vmem:[%s5418_s14 + $0x2928] sm:$0xff] }
  0xb7   : > { %911 = vst [vmem:[%s5426_s15 + $0xa48] sm:$0xff] %v910_v9  ;;  %913 = vst [vmem:[%s5426_s15 + $0xa50] sm:$0xff] %v912_v10  ;;  %v920_v14 = vld [vmem:[%s5418_s14 + $0x2930] sm:$0xff]  ;;  %v922_v15 = vld [vmem:[%s5418_s14 + $0x2938] sm:$0xff] }
  0xb8   : > { %915 = vst [vmem:[%s5426_s15 + $0xa58] sm:$0xff] %v914_v11  ;;  %917 = vst [vmem:[%s5426_s15 + $0xa60] sm:$0xff] %v916_v12  ;;  %v924_v16 = vld [vmem:[%s5418_s14 + $0x2a00] sm:$0xff]  ;;  %v926_v17 = vld [vmem:[%s5418_s14 + $0x2a08] sm:$0xff] }
  0xb9   : > { %919 = vst [vmem:[%s5426_s15 + $0xa68] sm:$0xff] %v918_v13  ;;  %921 = vst [vmem:[%s5426_s15 + $0xa70] sm:$0xff] %v920_v14  ;;  %v928_v18 = vld [vmem:[%s5418_s14 + $0x2a10] sm:$0xff]  ;;  %v930_v19 = vld [vmem:[%s5418_s14 + $0x2a18] sm:$0xff] }
  0xba   : > { %923 = vst [vmem:[%s5426_s15 + $0xa78] sm:$0xff] %v922_v15  ;;  %925 = vst [vmem:[%s5426_s15 + $0xa80] sm:$0xff] %v924_v16  ;;  %v932_v20 = vld [vmem:[%s5418_s14 + $0x2a20] sm:$0xff]  ;;  %v934_v21 = vld [vmem:[%s5418_s14 + $0x2a28] sm:$0xff] }
  0xbb   : > { %927 = vst [vmem:[%s5426_s15 + $0xa88] sm:$0xff] %v926_v17  ;;  %929 = vst [vmem:[%s5426_s15 + $0xa90] sm:$0xff] %v928_v18  ;;  %v936_v22 = vld [vmem:[%s5418_s14 + $0x2a30] sm:$0xff]  ;;  %v938_v23 = vld [vmem:[%s5418_s14 + $0x2a38] sm:$0xff] }
  0xbc   : > { %931 = vst [vmem:[%s5426_s15 + $0xa98] sm:$0xff] %v930_v19  ;;  %933 = vst [vmem:[%s5426_s15 + $0xaa0] sm:$0xff] %v932_v20  ;;  %v940_v24 = vld [vmem:[%s5418_s14 + $0x2b00] sm:$0xff]  ;;  %v942_v25 = vld [vmem:[%s5418_s14 + $0x2b08] sm:$0xff] }
  0xbd   : > { %935 = vst [vmem:[%s5426_s15 + $0xaa8] sm:$0xff] %v934_v21  ;;  %937 = vst [vmem:[%s5426_s15 + $0xab0] sm:$0xff] %v936_v22  ;;  %v944_v26 = vld [vmem:[%s5418_s14 + $0x2b10] sm:$0xff]  ;;  %v946_v27 = vld [vmem:[%s5418_s14 + $0x2b18] sm:$0xff] }
  0xbe   : > { %939 = vst [vmem:[%s5426_s15 + $0xab8] sm:$0xff] %v938_v23  ;;  %941 = vst [vmem:[%s5426_s15 + $0xac0] sm:$0xff] %v940_v24  ;;  %v948_v28 = vld [vmem:[%s5418_s14 + $0x2b20] sm:$0xff]  ;;  %v950_v29 = vld [vmem:[%s5418_s14 + $0x2b28] sm:$0xff] }
  0xbf   : > { %943 = vst [vmem:[%s5426_s15 + $0xac8] sm:$0xff] %v942_v25  ;;  %945 = vst [vmem:[%s5426_s15 + $0xad0] sm:$0xff] %v944_v26  ;;  %v952_v30 = vld [vmem:[%s5418_s14 + $0x2b30] sm:$0xff]  ;;  %v954_v31 = vld [vmem:[%s5418_s14 + $0x2b38] sm:$0xff] }
  0xc0   : > { %947 = vst [vmem:[%s5426_s15 + $0xad8] sm:$0xff] %v946_v27  ;;  %949 = vst [vmem:[%s5426_s15 + $0xae0] sm:$0xff] %v948_v28  ;;  %v956_v32 = vld [vmem:[%s5418_s14 + $0x2c00] sm:$0xff]  ;;  %v958_v33 = vld [vmem:[%s5418_s14 + $0x2c08] sm:$0xff] }
  0xc1   : > { %951 = vst [vmem:[%s5426_s15 + $0xae8] sm:$0xff] %v950_v29  ;;  %953 = vst [vmem:[%s5426_s15 + $0xaf0] sm:$0xff] %v952_v30  ;;  %v960_v34 = vld [vmem:[%s5418_s14 + $0x2c10] sm:$0xff]  ;;  %v962_v35 = vld [vmem:[%s5418_s14 + $0x2c18] sm:$0xff] }
  0xc2   : > { %955 = vst [vmem:[%s5426_s15 + $0xaf8] sm:$0xff] %v954_v31  ;;  %957 = vst [vmem:[%s5426_s15 + $0xb00] sm:$0xff] %v956_v32  ;;  %v964_v36 = vld [vmem:[%s5418_s14 + $0x2c20] sm:$0xff]  ;;  %v966_v37 = vld [vmem:[%s5418_s14 + $0x2c28] sm:$0xff] }
  0xc3   : > { %959 = vst [vmem:[%s5426_s15 + $0xb08] sm:$0xff] %v958_v33  ;;  %961 = vst [vmem:[%s5426_s15 + $0xb10] sm:$0xff] %v960_v34  ;;  %v968_v38 = vld [vmem:[%s5418_s14 + $0x2c30] sm:$0xff]  ;;  %v970_v39 = vld [vmem:[%s5418_s14 + $0x2c38] sm:$0xff] }
  0xc4   : > { %963 = vst [vmem:[%s5426_s15 + $0xb18] sm:$0xff] %v962_v35  ;;  %965 = vst [vmem:[%s5426_s15 + $0xb20] sm:$0xff] %v964_v36  ;;  %v972_v40 = vld [vmem:[%s5418_s14 + $0x2d00] sm:$0xff]  ;;  %v974_v41 = vld [vmem:[%s5418_s14 + $0x2d08] sm:$0xff] }
  0xc5   : > { %967 = vst [vmem:[%s5426_s15 + $0xb28] sm:$0xff] %v966_v37  ;;  %969 = vst [vmem:[%s5426_s15 + $0xb30] sm:$0xff] %v968_v38  ;;  %v976_v42 = vld [vmem:[%s5418_s14 + $0x2d10] sm:$0xff]  ;;  %v978_v43 = vld [vmem:[%s5418_s14 + $0x2d18] sm:$0xff] }
  0xc6   : > { %971 = vst [vmem:[%s5426_s15 + $0xb38] sm:$0xff] %v970_v39  ;;  %973 = vst [vmem:[%s5426_s15 + $0xb40] sm:$0xff] %v972_v40  ;;  %v980_v44 = vld [vmem:[%s5418_s14 + $0x2d20] sm:$0xff]  ;;  %v982_v45 = vld [vmem:[%s5418_s14 + $0x2d28] sm:$0xff] }
  0xc7   : > { %975 = vst [vmem:[%s5426_s15 + $0xb48] sm:$0xff] %v974_v41  ;;  %977 = vst [vmem:[%s5426_s15 + $0xb50] sm:$0xff] %v976_v42  ;;  %v984_v46 = vld [vmem:[%s5418_s14 + $0x2d30] sm:$0xff]  ;;  %v986_v47 = vld [vmem:[%s5418_s14 + $0x2d38] sm:$0xff] }
  0xc8   : > { %979 = vst [vmem:[%s5426_s15 + $0xb58] sm:$0xff] %v978_v43  ;;  %981 = vst [vmem:[%s5426_s15 + $0xb60] sm:$0xff] %v980_v44  ;;  %v988_v48 = vld [vmem:[%s5418_s14 + $0x2e00] sm:$0xff]  ;;  %v990_v49 = vld [vmem:[%s5418_s14 + $0x2e08] sm:$0xff] }
  0xc9   : > { %983 = vst [vmem:[%s5426_s15 + $0xb68] sm:$0xff] %v982_v45  ;;  %985 = vst [vmem:[%s5426_s15 + $0xb70] sm:$0xff] %v984_v46  ;;  %v992_v50 = vld [vmem:[%s5418_s14 + $0x2e10] sm:$0xff]  ;;  %v994_v51 = vld [vmem:[%s5418_s14 + $0x2e18] sm:$0xff] }
  0xca   : > { %987 = vst [vmem:[%s5426_s15 + $0xb78] sm:$0xff] %v986_v47  ;;  %989 = vst [vmem:[%s5426_s15 + $0xb80] sm:$0xff] %v988_v48  ;;  %v996_v52 = vld [vmem:[%s5418_s14 + $0x2e20] sm:$0xff]  ;;  %v998_v53 = vld [vmem:[%s5418_s14 + $0x2e28] sm:$0xff] }
  0xcb   : > { %991 = vst [vmem:[%s5426_s15 + $0xb88] sm:$0xff] %v990_v49  ;;  %993 = vst [vmem:[%s5426_s15 + $0xb90] sm:$0xff] %v992_v50  ;;  %v1000_v54 = vld [vmem:[%s5418_s14 + $0x2e30] sm:$0xff]  ;;  %v1002_v55 = vld [vmem:[%s5418_s14 + $0x2e38] sm:$0xff] }
  0xcc   : > { %995 = vst [vmem:[%s5426_s15 + $0xb98] sm:$0xff] %v994_v51  ;;  %997 = vst [vmem:[%s5426_s15 + $0xba0] sm:$0xff] %v996_v52  ;;  %v1004_v56 = vld [vmem:[%s5418_s14 + $0x2f00] sm:$0xff]  ;;  %v1006_v57 = vld [vmem:[%s5418_s14 + $0x2f08] sm:$0xff] }
  0xcd   : > { %999 = vst [vmem:[%s5426_s15 + $0xba8] sm:$0xff] %v998_v53  ;;  %1001 = vst [vmem:[%s5426_s15 + $0xbb0] sm:$0xff] %v1000_v54  ;;  %v1008_v58 = vld [vmem:[%s5418_s14 + $0x2f10] sm:$0xff]  ;;  %v1010_v59 = vld [vmem:[%s5418_s14 + $0x2f18] sm:$0xff] }
  0xce   : > { %1003 = vst [vmem:[%s5426_s15 + $0xbb8] sm:$0xff] %v1002_v55  ;;  %1005 = vst [vmem:[%s5426_s15 + $0xbc0] sm:$0xff] %v1004_v56  ;;  %v1012_v60 = vld [vmem:[%s5418_s14 + $0x2f20] sm:$0xff]  ;;  %v1014_v61 = vld [vmem:[%s5418_s14 + $0x2f28] sm:$0xff] }
  0xcf   : > { %1007 = vst [vmem:[%s5426_s15 + $0xbc8] sm:$0xff] %v1006_v57  ;;  %1009 = vst [vmem:[%s5426_s15 + $0xbd0] sm:$0xff] %v1008_v58  ;;  %v1016_v62 = vld [vmem:[%s5418_s14 + $0x2f30] sm:$0xff]  ;;  %v1018_v63 = vld [vmem:[%s5418_s14 + $0x2f38] sm:$0xff] }
  0xd0   : > { %1011 = vst [vmem:[%s5426_s15 + $0xbd8] sm:$0xff] %v1010_v59  ;;  %1013 = vst [vmem:[%s5426_s15 + $0xbe0] sm:$0xff] %v1012_v60  ;;  %v1020_v0 = vld [vmem:[%s5418_s14 + $0x3000] sm:$0xff]  ;;  %v1022_v1 = vld [vmem:[%s5418_s14 + $0x3008] sm:$0xff] }
  0xd1   : > { %1015 = vst [vmem:[%s5426_s15 + $0xbe8] sm:$0xff] %v1014_v61  ;;  %1017 = vst [vmem:[%s5426_s15 + $0xbf0] sm:$0xff] %v1016_v62  ;;  %v1024_v2 = vld [vmem:[%s5418_s14 + $0x3010] sm:$0xff]  ;;  %v1026_v3 = vld [vmem:[%s5418_s14 + $0x3018] sm:$0xff] }
  0xd2   : > { %1019 = vst [vmem:[%s5426_s15 + $0xbf8] sm:$0xff] %v1018_v63  ;;  %1021 = vst [vmem:[%s5426_s15 + $0xc00] sm:$0xff] %v1020_v0  ;;  %v1028_v4 = vld [vmem:[%s5418_s14 + $0x3020] sm:$0xff]  ;;  %v1030_v5 = vld [vmem:[%s5418_s14 + $0x3028] sm:$0xff] }
  0xd3   : > { %1023 = vst [vmem:[%s5426_s15 + $0xc08] sm:$0xff] %v1022_v1  ;;  %1025 = vst [vmem:[%s5426_s15 + $0xc10] sm:$0xff] %v1024_v2  ;;  %v1032_v6 = vld [vmem:[%s5418_s14 + $0x3030] sm:$0xff]  ;;  %v1034_v7 = vld [vmem:[%s5418_s14 + $0x3038] sm:$0xff] }
  0xd4   : > { %1027 = vst [vmem:[%s5426_s15 + $0xc18] sm:$0xff] %v1026_v3  ;;  %1029 = vst [vmem:[%s5426_s15 + $0xc20] sm:$0xff] %v1028_v4  ;;  %v1036_v8 = vld [vmem:[%s5418_s14 + $0x3100] sm:$0xff]  ;;  %v1038_v9 = vld [vmem:[%s5418_s14 + $0x3108] sm:$0xff] }
  0xd5   : > { %1031 = vst [vmem:[%s5426_s15 + $0xc28] sm:$0xff] %v1030_v5  ;;  %1033 = vst [vmem:[%s5426_s15 + $0xc30] sm:$0xff] %v1032_v6  ;;  %v1040_v10 = vld [vmem:[%s5418_s14 + $0x3110] sm:$0xff]  ;;  %v1042_v11 = vld [vmem:[%s5418_s14 + $0x3118] sm:$0xff] }
  0xd6   : > { %1035 = vst [vmem:[%s5426_s15 + $0xc38] sm:$0xff] %v1034_v7  ;;  %1037 = vst [vmem:[%s5426_s15 + $0xc40] sm:$0xff] %v1036_v8  ;;  %v1044_v12 = vld [vmem:[%s5418_s14 + $0x3120] sm:$0xff]  ;;  %v1046_v13 = vld [vmem:[%s5418_s14 + $0x3128] sm:$0xff] }
  0xd7   : > { %1039 = vst [vmem:[%s5426_s15 + $0xc48] sm:$0xff] %v1038_v9  ;;  %1041 = vst [vmem:[%s5426_s15 + $0xc50] sm:$0xff] %v1040_v10  ;;  %v1048_v14 = vld [vmem:[%s5418_s14 + $0x3130] sm:$0xff]  ;;  %v1050_v15 = vld [vmem:[%s5418_s14 + $0x3138] sm:$0xff] }
  0xd8   : > { %1043 = vst [vmem:[%s5426_s15 + $0xc58] sm:$0xff] %v1042_v11  ;;  %1045 = vst [vmem:[%s5426_s15 + $0xc60] sm:$0xff] %v1044_v12 }
  0xd9   : > { %1047 = vst [vmem:[%s5426_s15 + $0xc68] sm:$0xff] %v1046_v13  ;;  %1049 = vst [vmem:[%s5426_s15 + $0xc70] sm:$0xff] %v1048_v14 }
  0xda   : > { %1051 = vst [vmem:[%s5426_s15 + $0xc78] sm:$0xff] %v1050_v15 }
  0xdb PF: > { %p3941_p5 = scmp.ge.s32.totalorder %s5338_s26, 1  ;;  %p1064_p6 = scmp.lt.s32.totalorder %s5338_s26, 5 }
  0xdd   : > { %p1065_p7 = pnand %p3941_p5, %p1064_p6 }
  0xde   : > { %v1141_v16 = vld [vmem:[%s8101_s1 + $0x80] sm:$0xff] (!%p1065_p7)  ;;  %v1142_v17 = vld [vmem:[%s8101_s1 + $0x88] sm:$0xff] (!%p1065_p7)  ;;  %v1143_v27 = vld [vmem:[%s8101_s1 + $0x90] sm:$0xff] (!%p1065_p7)  ;;  %v5340_v59 = vmov (!%p1065_p7), 1983009808   ;;  %v1543_v61 = vlaneseq (!%p1065_p7)  ;;  %vm5342_vm0 = vmmov (!%p1065_p7), 0  }
  0xdf   : > { %1068 = sbr.rel (%p1065_p7) target bundleno = 1242 (0x4da), region = 67  ;;  %v1125_v18 = vld [vmem:[%s8101_s1] sm:$0xff] (!%p1065_p7)  ;;  %v4432_v19 = vpack.c.bf16 (!%p1065_p7), %v1142_v17, %v1141_v16  ;;  %v1126_v20 = vld [vmem:[%s8101_s1 + $0x8] sm:$0xff] (!%p1065_p7)  ;;  %v1144_v29 = vld [vmem:[%s8101_s1 + $0x98] sm:$0xff] (!%p1065_p7)  ;;  %v1541_v60 = vunpack.c.l.s4 (!%p1065_p7), %v5340_v59  ;;  %vm2637_vm1 = vcmask (!%p1065_p7), 1041408   ;;  %s1071_s14 = sand.u32 (!%p1065_p7), 1, %s5330_s24  }
  0xe0   : > { %v1173_v21 = vld [vmem:[%s8101_s1 + $0x180] sm:$0xff] (!%p1065_p7)  ;;  %v1174_v22 = vld [vmem:[%s8101_s1 + $0x188] sm:$0xff] (!%p1065_p7)  ;;  %v4434_v23 = vpack.c.bf16 (!%p1065_p7), %v1126_v20, %v1125_v18  ;;  %v1127_v30 = vld [vmem:[%s8101_s1 + $0x10] sm:$0xff] (!%p1065_p7)  ;;  %v4436_v32 = vpack.c.bf16 (!%p1065_p7), %v1144_v29, %v1143_v27  ;;  %v6341_v12 = vshrl.u32 (!%p1065_p7), %v1543_v61, 7  ;;  %s5281_s15 = smul.u32 (!%p1065_p7), 3200, %s1071_s14  ;;  %vm2633_vm2 = vcmask (!%p1065_p7), 408576  }
  0xe1   : > { %v4464_v24 = vpack.c.bf16 (!%p1065_p7), %v1174_v22, %v1173_v21  ;;  %v1157_v25 = vld [vmem:[%s8101_s1 + $0x100] sm:$0xff] (!%p1065_p7)  ;;  %v1158_v26 = vld [vmem:[%s8101_s1 + $0x108] sm:$0xff] (!%p1065_p7)  ;;  %4433 = vmatprep.subr.bf16.mxu0 (!%p1065_p7), %v4432_v19  ;;  %v1128_v31 = vld [vmem:[%s8101_s1 + $0x18] sm:$0xff] (!%p1065_p7)  ;;  %v1542_v11 = vunpack.c.0.s8 (!%p1065_p7), %v1541_v60  ;;  %vm3238_vm3 = vcmask (!%p1065_p7), 130048   ;;  %s3942_s30 = sshll.u32 (!%p1065_p7), %s3935_s27, 3 }
  0xe2   : > { %v4466_v28 = vpack.c.bf16 (!%p1065_p7), %v1158_v26, %v1157_v25  ;;  %4435 = vmatpush3.bf16.msra.mxu0 (!%p1065_p7), %v4434_v23  ;;  %v4438_v33 = vpack.c.bf16 (!%p1065_p7), %v1128_v31, %v1127_v30  ;;  %v1175_v34 = vld [vmem:[%s8101_s1 + $0x190] sm:$0xff] (!%p1065_p7)  ;;  %v1176_v35 = vld [vmem:[%s8101_s1 + $0x198] sm:$0xff] (!%p1065_p7)  ;;  %v1145_v39 = vld [vmem:[%s8101_s1 + $0xa0] sm:$0xff] (!%p1065_p7)  ;;  %s7568_s16 = scalar_lea.vmem (!%p1065_p7), [#allocation2], %s5281_s15  ;;  %p1108_p8 = scmp.lt.s32.totalorder (!%p1065_p7), %s3942_s30, 31 }
  0xe3   : > { %4465 = vmatprep.subr.bf16.mxu1 (!%p1065_p7), %v4464_v24  ;;  %v1159_v36 = vld [vmem:[%s8101_s1 + $0x110] sm:$0xff] (!%p1065_p7)  ;;  %v4468_v37 = vpack.c.bf16 (!%p1065_p7), %v1176_v35, %v1175_v34  ;;  %v1160_v38 = vld [vmem:[%s8101_s1 + $0x118] sm:$0xff] (!%p1065_p7)  ;;  %v1146_v40 = vld [vmem:[%s8101_s1 + $0xa8] sm:$0xff] (!%p1065_p7)  ;;  %4437 = vmatprep.subr.bf16.mxu0 (!%p1065_p7), %v4436_v32  ;;  %v6371_v26 = vsub.s32 (!%p1065_p7), %v1542_v11, %v6341_v12 }
  0xe4   : > { %4467 = vmatpush3.bf16.msra.mxu1 (!%p1065_p7), %v4466_v28  ;;  %v4470_v41 = vpack.c.bf16 (!%p1065_p7), %v1160_v38, %v1159_v36  ;;  %v4440_v42 = vpack.c.bf16 (!%p1065_p7), %v1146_v40, %v1145_v39  ;;  %v1129_v43 = vld [vmem:[%s8101_s1 + $0x20] sm:$0xff] (!%p1065_p7)  ;;  %v1130_v44 = vld [vmem:[%s8101_s1 + $0x28] sm:$0xff] (!%p1065_p7)  ;;  %v1147_v51 = vld [vmem:[%s8101_s1 + $0xb0] sm:$0xff] (!%p1065_p7) }
  0xe5   : > { %v1177_v45 = vld [vmem:[%s8101_s1 + $0x1a0] sm:$0xff] (!%p1065_p7)  ;;  %4469 = vmatprep.subr.bf16.mxu1 (!%p1065_p7), %v4468_v37  ;;  %v1178_v46 = vld [vmem:[%s8101_s1 + $0x1a8] sm:$0xff] (!%p1065_p7)  ;;  %v4442_v49 = vpack.c.bf16 (!%p1065_p7), %v1130_v44, %v1129_v43  ;;  %v1148_v52 = vld [vmem:[%s8101_s1 + $0xb8] sm:$0xff] (!%p1065_p7) }
  0xe6   : > { %v1161_v47 = vld [vmem:[%s8101_s1 + $0x120] sm:$0xff]  ;;  %v1162_v48 = vld [vmem:[%s8101_s1 + $0x128] sm:$0xff]  ;;  %4439 = vmatpush3.bf16.msra.mxu0 %v4438_v33  ;;  %v4472_v50 = vpack.c.bf16 %v1178_v46, %v1177_v45  ;;  %v1131_v53 = vld [vmem:[%s8101_s1 + $0x30] sm:$0xff]  ;;  %v4444_v55 = vpack.c.bf16 %v1148_v52, %v1147_v51  ;;  %s8112_s30 = smov (!%p1108_p8, %s3942_s30), 31 }
  0xe7   : > { %4441 = vmatprep.subr.bf16.mxu0 %v4440_v42  ;;  %v4474_v54 = vpack.c.bf16 %v1162_v48, %v1161_v47  ;;  %v1132_v56 = vld [vmem:[%s8101_s1 + $0x38] sm:$0xff]  ;;  %v1179_v57 = vld [vmem:[%s8101_s1 + $0x1b0] sm:$0xff]  ;;  %v1149_v1 = vld [vmem:[%s8101_s1 + $0xc0] sm:$0xff]  ;;  %s3944_s26 = sshll.u32 %s8112_s30, 1 }
  0xe8   : > { %4471 = vmatpush3.bf16.msra.mxu1 %v4470_v41  ;;  %v1180_v58 = vld [vmem:[%s8101_s1 + $0x1b8] sm:$0xff]  ;;  %v1163_v63 = vld [vmem:[%s8101_s1 + $0x130] sm:$0xff]  ;;  %v1150_v2 = vld [vmem:[%s8101_s1 + $0xc8] sm:$0xff]  ;;  %v4446_v3 = vpack.c.bf16 %v1132_v56, %v1131_v53  ;;  %s1116_s12 = scalar_lea.vmem %s8107_s7, %s3944_s26 }
  0xe9   : > { %4473 = vmatprep.subr.bf16.mxu1 %v4472_v50  ;;  %v4476_v62 = vpack.c.bf16 %v1180_v58, %v1179_v57  ;;  %v1164_v0 = vld [vmem:[%s8101_s1 + $0x138] sm:$0xff]  ;;  %v1181_v4 = vld [vmem:[%s8101_s1 + $0x1c0] sm:$0xff]  ;;  %v1182_v5 = vld [vmem:[%s8101_s1 + $0x1c8] sm:$0xff]  ;;  %v4448_v7 = vpack.c.bf16 %v1150_v2, %v1149_v1 }
  0xea   : > { %4443 = vmatpush3.bf16.msra.mxu0 %v4442_v49  ;;  %v4478_v6 = vpack.c.bf16 %v1164_v0, %v1163_v63  ;;  %v1133_v8 = vld [vmem:[%s8101_s1 + $0x40] sm:$0xff]  ;;  %v1134_v9 = vld [vmem:[%s8101_s1 + $0x48] sm:$0xff]  ;;  %v4480_v13 = vpack.c.bf16 %v1182_v5, %v1181_v4  ;;  %v1151_v15 = vld [vmem:[%s8101_s1 + $0xd0] sm:$0xff] }
  0xeb   : > { %4445 = vmatprep.subr.bf16.mxu0 %v4444_v55  ;;  %v1165_v10 = vld [vmem:[%s8101_s1 + $0x140] sm:$0xff]  ;;  %v1166_v14 = vld [vmem:[%s8101_s1 + $0x148] sm:$0xff]  ;;  %v1152_v16 = vld [vmem:[%s8101_s1 + $0xd8] sm:$0xff]  ;;  %v4450_v19 = vpack.c.bf16 %v1134_v9, %v1133_v8 }
  0xec   : > { %4475 = vmatpush3.bf16.msra.mxu1 %v4474_v54  ;;  %v1183_v17 = vld [vmem:[%s8101_s1 + $0x1d0] sm:$0xff]  ;;  %v1184_v18 = vld [vmem:[%s8101_s1 + $0x1d8] sm:$0xff]  ;;  %v4482_v21 = vpack.c.bf16 %v1166_v14, %v1165_v10  ;;  %v4452_v22 = vpack.c.bf16 %v1152_v16, %v1151_v15  ;;  %v1153_v28 = vld [vmem:[%s8101_s1 + $0xe0] sm:$0xff] }
  0xed   : > { %4477 = vmatprep.subr.bf16.mxu1 %v4476_v62  ;;  %v1135_v20 = vld [vmem:[%s8101_s1 + $0x50] sm:$0xff]  ;;  %v1136_v23 = vld [vmem:[%s8101_s1 + $0x58] sm:$0xff]  ;;  %v4484_v27 = vpack.c.bf16 %v1184_v18, %v1183_v17  ;;  %v1154_v29 = vld [vmem:[%s8101_s1 + $0xe8] sm:$0xff] }
  0xee   : > { %4447 = vmatpush3.bf16.msra.mxu0 %v4446_v3  ;;  %v1167_v24 = vld [vmem:[%s8101_s1 + $0x150] sm:$0xff]  ;;  %v1168_v25 = vld [vmem:[%s8101_s1 + $0x158] sm:$0xff]  ;;  %v1185_v30 = vld [vmem:[%s8101_s1 + $0x1e0] sm:$0xff]  ;;  %v4454_v32 = vpack.c.bf16 %v1136_v23, %v1135_v20  ;;  %v4456_v35 = vpack.c.bf16 %v1154_v29, %v1153_v28 }
  0xef   : > { %4449 = vmatprep.subr.bf16.mxu0 %v4448_v7  ;;  %v1186_v31 = vld [vmem:[%s8101_s1 + $0x1e8] sm:$0xff]  ;;  %v4486_v33 = vpack.c.bf16 %v1168_v25, %v1167_v24  ;;  %v1118_v34 = vld [vmem:[%s8100_s0] sm:$0xff]  ;;  %v1155_v43 = vld [vmem:[%s8101_s1 + $0xf0] sm:$0xff] }
  0xf0   : > { %4479 = vmatpush3.bf16.msra.mxu1 %v4478_v6  ;;  %v1137_v36 = vld [vmem:[%s8101_s1 + $0x60] sm:$0xff]  ;;  %v1138_v37 = vld [vmem:[%s8101_s1 + $0x68] sm:$0xff]  ;;  %v1546_v39 = vrot.slane %v1118_v34, %v6371_v26  ;;  %v1539_v40 = vcombine.high %v1118_v34, %v1118_v34  ;;  %v4488_v41 = vpack.c.bf16 %v1186_v31, %v1185_v30  ;;  %v1156_v44 = vld [vmem:[%s8101_s1 + $0xf8] sm:$0xff] }
  0xf1   : > { %4481 = vmatprep.subr.bf16.mxu1 %v4480_v13  ;;  %v1169_v38 = vld [vmem:[%s8101_s1 + $0x160] sm:$0xff]  ;;  %v1170_v42 = vld [vmem:[%s8101_s1 + $0x168] sm:$0xff]  ;;  %v1187_v45 = vld [vmem:[%s8101_s1 + $0x1f0] sm:$0xff]  ;;  %v4458_v49 = vpack.c.bf16 %v1138_v37, %v1137_v36  ;;  %v4460_v51 = vpack.c.bf16 %v1156_v44, %v1155_v43 }
  0xf2   : > { %4451 = vmatpush3.bf16.msra.mxu0 %v4450_v19  ;;  %v1188_v46 = vld [vmem:[%s8101_s1 + $0x1f8] sm:$0xff]  ;;  %v1554_v47 = vcombine.high %v1546_v39, %v1546_v39  ;;  %v1553_v48 = vrot.slane %v1539_v40, %v6371_v26  ;;  %v4490_v50 = vpack.c.bf16 %v1170_v42, %v1169_v38  ;;  %v1139_v52 = vld [vmem:[%s8101_s1 + $0x70] sm:$0xff]  ;;  %v1205_v58 = vld [vmem:[%s8101_s1 + $0x280] sm:$0xff] }
  0xf3   : > { %4453 = vmatprep.subr.bf16.mxu0 %v4452_v22  ;;  %v1140_v53 = vld [vmem:[%s8101_s1 + $0x78] sm:$0xff]  ;;  %v1171_v54 = vld [vmem:[%s8101_s1 + $0x170] sm:$0xff]  ;;  %v4492_v56 = vpack.c.bf16 %v1188_v46, %v1187_v45  ;;  %v1206_v59 = vld [vmem:[%s8101_s1 + $0x288] sm:$0xff] }
  0xf4   : > { %4483 = vmatpush3.bf16.msra.mxu1 %v4482_v21  ;;  %v1555_v55 = vcombine.high %v1553_v48, %v1553_v48  ;;  %1737 = vmatprep.mubr.f32.mxu0 %v1554_v47  ;;  %v1172_v57 = vld [vmem:[%s8101_s1 + $0x178] sm:$0xff]  ;;  %v1237_v60 = vld [vmem:[%s8101_s1 + $0x380] sm:$0xff]  ;;  %v1238_v61 = vld [vmem:[%s8101_s1 + $0x388] sm:$0xff]  ;;  %v4462_v62 = vpack.c.bf16 %v1140_v53, %v1139_v52  ;;  %v4496_v0 = vpack.c.bf16 %v1206_v59, %v1205_v58 }
  0xf5   : > { %4485 = vmatprep.subr.bf16.mxu1 %v4484_v27  ;;  %v4494_v63 = vpack.c.bf16 %v1172_v57, %v1171_v54  ;;  %v1189_v1 = vld [vmem:[%s8101_s1 + $0x200] sm:$0xff]  ;;  %v1190_v2 = vld [vmem:[%s8101_s1 + $0x208] sm:$0xff]  ;;  %v4528_v4 = vpack.c.bf16 %v1238_v61, %v1237_v60  ;;  %v1207_v6 = vld [vmem:[%s8101_s1 + $0x290] sm:$0xff] }
  0xf6   : > { %4455 = vmatpush3.bf16.msra.mxu0 %v4454_v32  ;;  %1807 = vmatprep.mubr.f32.mxu1 %v1555_v55  ;;  %v1221_v3 = vld [vmem:[%s8101_s1 + $0x300] sm:$0xff]  ;;  %v1222_v5 = vld [vmem:[%s8101_s1 + $0x308] sm:$0xff]  ;;  %v1208_v7 = vld [vmem:[%s8101_s1 + $0x298] sm:$0xff]  ;;  %v4498_v10 = vpack.c.bf16 %v1190_v2, %v1189_v1 }
  0xf7   : > { %4457 = vmatprep.subr.bf16.mxu0 %v4456_v35  ;;  %v1239_v8 = vld [vmem:[%s8101_s1 + $0x390] sm:$0xff]  ;;  %v1240_v9 = vld [vmem:[%s8101_s1 + $0x398] sm:$0xff]  ;;  %v4530_v11 = vpack.c.bf16 %v1222_v5, %v1221_v3  ;;  %v4500_v13 = vpack.c.bf16 %v1208_v7, %v1207_v6  ;;  %v1209_v19 = vld [vmem:[%s8101_s1 + $0x2a0] sm:$0xff] }
  0xf8   : > { %4487 = vmatpush3.bf16.msra.mxu1 %v4486_v33  ;;  %v1191_v14 = vld [vmem:[%s8101_s1 + $0x210] sm:$0xff]  ;;  %v1192_v15 = vld [vmem:[%s8101_s1 + $0x218] sm:$0xff]  ;;  %v4532_v17 = vpack.c.bf16 %v1240_v9, %v1239_v8  ;;  %v1210_v20 = vld [vmem:[%s8101_s1 + $0x2a8] sm:$0xff] }
  0xf9   : > { %4489 = vmatprep.subr.bf16.mxu1 %v4488_v41  ;;  %v1223_v16 = vld [vmem:[%s8101_s1 + $0x310] sm:$0xff]  ;;  %v1224_v18 = vld [vmem:[%s8101_s1 + $0x318] sm:$0xff]  ;;  %v1241_v21 = vld [vmem:[%s8101_s1 + $0x3a0] sm:$0xff]  ;;  %v4502_v23 = vpack.c.bf16 %v1192_v15, %v1191_v14  ;;  %v4504_v25 = vpack.c.bf16 %v1210_v20, %v1209_v19 }
  0xfa   : > { %4459 = vmatpush3.bf16.msra.mxu0 %v4458_v49  ;;  %v1242_v22 = vld [vmem:[%s8101_s1 + $0x3a8] sm:$0xff]  ;;  %v4534_v24 = vpack.c.bf16 %v1224_v18, %v1223_v16  ;;  %v1193_v27 = vld [vmem:[%s8101_s1 + $0x220] sm:$0xff]  ;;  %v1211_v32 = vld [vmem:[%s8101_s1 + $0x2b0] sm:$0xff] }
  0xfb   : > { %4461 = vmatprep.subr.bf16.mxu0 %v4460_v51  ;;  %v1194_v28 = vld [vmem:[%s8101_s1 + $0x228] sm:$0xff]  ;;  %v1225_v29 = vld [vmem:[%s8101_s1 + $0x320] sm:$0xff]  ;;  %v4536_v30 = vpack.c.bf16 %v1242_v22, %v1241_v21  ;;  %v1212_v33 = vld [vmem:[%s8101_s1 + $0x2b8] sm:$0xff] }
  0xfc   : > { %4491 = vmatpush3.bf16.msra.mxu1 %v4490_v50  ;;  %v1226_v31 = vld [vmem:[%s8101_s1 + $0x328] sm:$0xff]  ;;  %v1243_v34 = vld [vmem:[%s8101_s1 + $0x3b0] sm:$0xff]  ;;  %v1244_v35 = vld [vmem:[%s8101_s1 + $0x3b8] sm:$0xff]  ;;  %v4506_v36 = vpack.c.bf16 %v1194_v28, %v1193_v27 }
  0xfd   : > { %4493 = vmatprep.subr.bf16.mxu1 %v4492_v56  ;;  %v1195_v37 = vld [vmem:[%s8101_s1 + $0x230] sm:$0xff]  ;;  %v4538_v38 = vpack.c.bf16 %v1226_v31, %v1225_v29  ;;  %v1196_v40 = vld [vmem:[%s8101_s1 + $0x238] sm:$0xff]  ;;  %v4540_v43 = vpack.c.bf16 %v1244_v35, %v1243_v34  ;;  %v1213_v44 = vld [vmem:[%s8101_s1 + $0x2c0] sm:$0xff] }
  0xfe   : > { %4463 = vmatpush3.bf16.msra.mxu0 %v4462_v62  ;;  %v1227_v41 = vld [vmem:[%s8101_s1 + $0x330] sm:$0xff]  ;;  %v1228_v42 = vld [vmem:[%s8101_s1 + $0x338] sm:$0xff]  ;;  %v1214_v45 = vld [vmem:[%s8101_s1 + $0x2c8] sm:$0xff]  ;;  %v4510_v51 = vpack.c.bf16 %v1196_v40, %v1195_v37 }
  0xff   : > { %4497 = vmatprep.subr.bf16.mxu0 %v4496_v0  ;;  %v1119_v46 = vld [vmem:[%s8100_s0 + $0x8] sm:$0xff]  ;;  %v1245_v47 = vld [vmem:[%s8101_s1 + $0x3c0] sm:$0xff]  ;;  %v4542_v52 = vpack.c.bf16 %v1228_v42, %v1227_v41  ;;  %v4512_v53 = vpack.c.bf16 %v1214_v45, %v1213_v44  ;;  %v1215_v61 = vld [vmem:[%s8101_s1 + $0x2d0] sm:$0xff] }
 0x100   : > { %4495 = vmatpush3.bf16.msra.mxu1 %v4494_v63  ;;  %v6538_v49 = vrot.slane %v1119_v46, %v6371_v26  ;;  %v1556_v50 = vcombine.high %v1119_v46, %v1119_v46  ;;  %v1197_v54 = vld [vmem:[%s8101_s1 + $0x240] sm:$0xff]  ;;  %v1198_v55 = vld [vmem:[%s8101_s1 + $0x248] sm:$0xff]  ;;  %v1216_v62 = vld [vmem:[%s8101_s1 + $0x2d8] sm:$0xff] }
 0x101   : > { %4529 = vmatprep.subr.bf16.mxu1 %v4528_v4  ;;  %1738 = vmatmul.mubr.f32.vlgmr.msra.gmra.mrb[0].mxu0 %v1546_v39  ;;  %v4508_v39 = vpack.c.bf16 %v1212_v33, %v1211_v32  ;;  %v1229_v56 = vld [vmem:[%s8101_s1 + $0x340] sm:$0xff]  ;;  %v1230_v60 = vld [vmem:[%s8101_s1 + $0x348] sm:$0xff]  ;;  %v1247_v63 = vld [vmem:[%s8101_s1 + $0x3d0] sm:$0xff]  ;;  %v4514_v2 = vpack.c.bf16 %v1198_v55, %v1197_v54  ;;  %v4516_v4 = vpack.c.bf16 %v1216_v62, %v1215_v61 }
 0x102   : > { %4499 = vmatpush3.bf16.msra.mxu0 %v4498_v10  ;;  %v1571_v57 = vcombine.high %v6538_v49, %v6538_v49  ;;  %v6552_v58 = vrot.slane %v1556_v50, %v6371_v26  ;;  %v1248_v0 = vld [vmem:[%s8101_s1 + $0x3d8] sm:$0xff]  ;;  %v4546_v3 = vpack.c.bf16 %v1230_v60, %v1229_v56  ;;  %v1199_v5 = vld [vmem:[%s8101_s1 + $0x250] sm:$0xff]  ;;  %v1217_v10 = vld [vmem:[%s8101_s1 + $0x2e0] sm:$0xff] }
 0x103   : > { %1808 = vmatmul.mubr.f32.vlgmr.msra.gmra.mrb[0].mxu1 %v1553_v48  ;;  %4501 = vmatprep.subr.bf16.mxu0 %v4500_v13  ;;  %v1246_v48 = vld [vmem:[%s8101_s1 + $0x3c8] sm:$0xff]  ;;  %v1200_v6 = vld [vmem:[%s8101_s1 + $0x258] sm:$0xff]  ;;  %v1231_v7 = vld [vmem:[%s8101_s1 + $0x350] sm:$0xff]  ;;  %v4548_v8 = vpack.c.bf16 %v1248_v0, %v1247_v63 }
 0x104   : > { %4531 = vmatpush3.bf16.msra.mxu1 %v4530_v11  ;;  %v4544_v59 = vpack.c.bf16 %v1246_v48, %v1245_v47  ;;  %1877 = vmatprep.mubr.f32.mxu0 %v1571_v57  ;;  %v1572_v1 = vcombine.high %v6552_v58, %v6552_v58  ;;  %v1232_v9 = vld [vmem:[%s8101_s1 + $0x358] sm:$0xff]  ;;  %v1218_v11 = vld [vmem:[%s8101_s1 + $0x2e8] sm:$0xff]  ;;  %v1249_v13 = vld [vmem:[%s8101_s1 + $0x3e0] sm:$0xff]  ;;  %v4518_v15 = vpack.c.bf16 %v1200_v6, %v1199_v5 }
 0x105   : > { %4533 = vmatprep.subr.bf16.mxu1 %v4532_v17  ;;  %v1250_v14 = vld [vmem:[%s8101_s1 + $0x3e8] sm:$0xff]  ;;  %v4550_v16 = vpack.c.bf16 %v1232_v9, %v1231_v7  ;;  %v4520_v17 = vpack.c.bf16 %v1218_v11, %v1217_v10  ;;  %v1201_v18 = vld [vmem:[%s8101_s1 + $0x260] sm:$0xff]  ;;  %v1252_v27 = vld [vmem:[%s8101_s1 + $0x3f8] sm:$0xff] }
 0x106   : > { %4503 = vmatpush3.bf16.msra.mxu0 %v4502_v23  ;;  %1947 = vmatprep.mubr.f32.mxu1 %v1572_v1  ;;  %v1202_v19 = vld [vmem:[%s8101_s1 + $0x268] sm:$0xff]  ;;  %v1233_v20 = vld [vmem:[%s8101_s1 + $0x360] sm:$0xff]  ;;  %v4552_v21 = vpack.c.bf16 %v1250_v14, %v1249_v13  ;;  %v1219_v23 = vld [vmem:[%s8101_s1 + $0x2f0] sm:$0xff] }
 0x107   : > { %4505 = vmatprep.subr.bf16.mxu0 %v4504_v25  ;;  %v1234_v22 = vld [vmem:[%s8101_s1 + $0x368] sm:$0xff]  ;;  %v1251_v25 = vld [vmem:[%s8101_s1 + $0x3f0] sm:$0xff]  ;;  %v4522_v28 = vpack.c.bf16 %v1202_v19, %v1201_v18  ;;  %v1204_v32 = vld [vmem:[%s8101_s1 + $0x278] sm:$0xff] }
 0x108   : > { %4535 = vmatpush3.bf16.msra.mxu1 %v4534_v24  ;;  %v1220_v24 = vld [vmem:[%s8101_s1 + $0x2f8] sm:$0xff]  ;;  %v4554_v29 = vpack.c.bf16 %v1234_v22, %v1233_v20  ;;  %v1203_v31 = vld [vmem:[%s8101_s1 + $0x270] sm:$0xff]  ;;  %v4556_v34 = vpack.c.bf16 %v1252_v27, %v1251_v25  ;;  %v1270_v37 = vld [vmem:[%s8101_s1 + $0x488] sm:$0xff] }
 0x109   : > { %4537 = vmatprep.subr.bf16.mxu1 %v4536_v30  ;;  %v4524_v30 = vpack.c.bf16 %v1220_v24, %v1219_v23  ;;  %v1235_v33 = vld [vmem:[%s8101_s1 + $0x370] sm:$0xff]  ;;  %v1236_v35 = vld [vmem:[%s8101_s1 + $0x378] sm:$0xff]  ;;  %v4526_v40 = vpack.c.bf16 %v1204_v32, %v1203_v31  ;;  %v1253_v41 = vld [vmem:[%s8101_s1 + $0x400] sm:$0xff] }
 0x10a   : > { %4507 = vmatpush3.bf16.msra.mxu0 %v4506_v36  ;;  %v1269_v36 = vld [vmem:[%s8101_s1 + $0x480] sm:$0xff]  ;;  %v4558_v42 = vpack.c.bf16 %v1236_v35, %v1235_v33  ;;  %v1254_v44 = vld [vmem:[%s8101_s1 + $0x408] sm:$0xff]  ;;  %v1271_v48 = vld [vmem:[%s8101_s1 + $0x490] sm:$0xff] }
 0x10b   : > { %4509 = vmatprep.subr.bf16.mxu0 %v4508_v39  ;;  %v1302_v39 = vld [vmem:[%s8101_s1 + $0x588] sm:$0xff]  ;;  %v1285_v45 = vld [vmem:[%s8101_s1 + $0x500] sm:$0xff]  ;;  %v1272_v50 = vld [vmem:[%s8101_s1 + $0x498] sm:$0xff] }
 0x10c   : > { %4539 = vmatpush3.bf16.msra.mxu1 %v4538_v38  ;;  %v1301_v38 = vld [vmem:[%s8101_s1 + $0x580] sm:$0xff]  ;;  %v1286_v46 = vld [vmem:[%s8101_s1 + $0x508] sm:$0xff]  ;;  %v1120_v55 = vld [vmem:[%s8100_s0 + $0x10] sm:$0xff]  ;;  %v4564_v56 = vpack.c.bf16 %v1272_v50, %v1271_v48 }
 0x10d   : > { %4541 = vmatprep.subr.bf16.mxu1 %v4540_v43  ;;  %v4560_v43 = vpack.c.bf16 %v1270_v37, %v1269_v36  ;;  %v4592_v47 = vpack.c.bf16 %v1302_v39, %v1301_v38  ;;  %v4594_v54 = vpack.c.bf16 %v1286_v46, %v1285_v45  ;;  %v1255_v57 = vld [vmem:[%s8101_s1 + $0x410] sm:$0xff]  ;;  %v6680_v61 = vrot.slane %v1120_v55, %v6371_v26  ;;  %v1288_v0 = vld [vmem:[%s8101_s1 + $0x518] sm:$0xff]  ;;  %v1273_v1 = vld [vmem:[%s8101_s1 + $0x4a0] sm:$0xff] }
 0x10e   : > { %4511 = vmatpush3.bf16.msra.mxu0 %v4510_v51  ;;  %v1303_v51 = vld [vmem:[%s8101_s1 + $0x590] sm:$0xff]  ;;  %v1573_v62 = vcombine.high %v1120_v55, %v1120_v55  ;;  %v1257_v9 = vld [vmem:[%s8101_s1 + $0x420] sm:$0xff]  ;;  %v1258_v10 = vld [vmem:[%s8101_s1 + $0x428] sm:$0xff] }
 0x10f   : > { %4513 = vmatprep.subr.bf16.mxu0 %v4512_v53  ;;  %v4562_v53 = vpack.c.bf16 %v1254_v44, %v1253_v41  ;;  %v1287_v60 = vld [vmem:[%s8101_s1 + $0x510] sm:$0xff]  ;;  %v1588_v5 = vcombine.high %v6680_v61, %v6680_v61  ;;  %v1289_v11 = vld [vmem:[%s8101_s1 + $0x520] sm:$0xff]  ;;  %v1290_v14 = vld [vmem:[%s8101_s1 + $0x528] sm:$0xff]  ;;  %v4570_v19 = vpack.c.bf16 %v1258_v10, %v1257_v9 }
 0x110   : > { %4543 = vmatpush3.bf16.msra.mxu1 %v4542_v52  ;;  %v1304_v52 = vld [vmem:[%s8101_s1 + $0x598] sm:$0xff]  ;;  %v6701_v6 = vrot.slane %v1573_v62, %v6371_v26  ;;  %v4602_v20 = vpack.c.bf16 %v1290_v14, %v1289_v11  ;;  %v1259_v22 = vld [vmem:[%s8101_s1 + $0x430] sm:$0xff]  ;;  %v1310_v31 = vld [vmem:[%s8101_s1 + $0x5c8] sm:$0xff] }
 0x111   : > { %4545 = vmatprep.subr.bf16.mxu1 %v4544_v59  ;;  %v1256_v59 = vld [vmem:[%s8101_s1 + $0x418] sm:$0xff]  ;;  %v4596_v63 = vpack.c.bf16 %v1304_v52, %v1303_v51  ;;  %v1291_v24 = vld [vmem:[%s8101_s1 + $0x530] sm:$0xff]  ;;  %v1261_v35 = vld [vmem:[%s8101_s1 + $0x440] sm:$0xff] }
 0x112   : > { %4515 = vmatpush3.bf16.msra.mxu0 %v4514_v2  ;;  %v1274_v2 = vld [vmem:[%s8101_s1 + $0x4a8] sm:$0xff]  ;;  %v4566_v7 = vpack.c.bf16 %v1256_v59, %v1255_v57  ;;  %v1308_v18 = vld [vmem:[%s8101_s1 + $0x5b8] sm:$0xff]  ;;  %v1293_v37 = vld [vmem:[%s8101_s1 + $0x540] sm:$0xff] }
 0x113   : > { %4517 = vmatprep.subr.bf16.mxu0 %v4516_v4  ;;  %v1306_v4 = vld [vmem:[%s8101_s1 + $0x5a8] sm:$0xff]  ;;  %v1260_v23 = vld [vmem:[%s8101_s1 + $0x438] sm:$0xff]  ;;  %v1295_v50 = vld [vmem:[%s8101_s1 + $0x550] sm:$0xff] }
 0x114   : > { %4547 = vmatpush3.bf16.msra.mxu1 %v4546_v3  ;;  %v1305_v3 = vld [vmem:[%s8101_s1 + $0x5a0] sm:$0xff]  ;;  %v1292_v27 = vld [vmem:[%s8101_s1 + $0x538] sm:$0xff]  ;;  %v4574_v32 = vpack.c.bf16 %v1260_v23, %v1259_v22  ;;  %v1262_v36 = vld [vmem:[%s8101_s1 + $0x448] sm:$0xff] }
 0x115   : > { %4549 = vmatprep.subr.bf16.mxu1 %v4548_v8  ;;  %v4568_v8 = vpack.c.bf16 %v1274_v2, %v1273_v1  ;;  %v4600_v13 = vpack.c.bf16 %v1306_v4, %v1305_v3  ;;  %v4606_v33 = vpack.c.bf16 %v1292_v27, %v1291_v24  ;;  %v1294_v39 = vld [vmem:[%s8101_s1 + $0x548] sm:$0xff]  ;;  %v1280_v41 = vld [vmem:[%s8101_s1 + $0x4d8] sm:$0xff]  ;;  %v4578_v44 = vpack.c.bf16 %v1262_v36, %v1261_v35  ;;  %v1313_v55 = vld [vmem:[%s8101_s1 + $0x5e0] sm:$0xff] }
 0x116   : > { %4519 = vmatpush3.bf16.msra.mxu0 %v4518_v15  ;;  %v1275_v15 = vld [vmem:[%s8101_s1 + $0x4b0] sm:$0xff]  ;;  %v4610_v45 = vpack.c.bf16 %v1294_v39, %v1293_v37  ;;  %v1264_v48 = vld [vmem:[%s8101_s1 + $0x458] sm:$0xff]  ;;  %v1265_v62 = vld [vmem:[%s8101_s1 + $0x460] sm:$0xff] }
 0x117   : > { %4521 = vmatprep.subr.bf16.mxu0 %v4520_v17  ;;  %v1307_v17 = vld [vmem:[%s8101_s1 + $0x5b0] sm:$0xff]  ;;  %v1296_v52 = vld [vmem:[%s8101_s1 + $0x558] sm:$0xff]  ;;  %v1298_v2 = vld [vmem:[%s8101_s1 + $0x568] sm:$0xff] }
 0x118   : > { %4551 = vmatpush3.bf16.msra.mxu1 %v4550_v16  ;;  %v1276_v16 = vld [vmem:[%s8101_s1 + $0x4b8] sm:$0xff]  ;;  %v4604_v25 = vpack.c.bf16 %v1308_v18, %v1307_v17  ;;  %v4614_v59 = vpack.c.bf16 %v1296_v52, %v1295_v50  ;;  %v1283_v3 = vld [vmem:[%s8101_s1 + $0x4f0] sm:$0xff]  ;;  %v1334_v17 = vld [vmem:[%s8101_s1 + $0x688] sm:$0xff] }
 0x119   : > { %4553 = vmatprep.subr.bf16.mxu1 %v4552_v21  ;;  %v4572_v21 = vpack.c.bf16 %v1276_v16, %v1275_v15  ;;  %v1284_v4 = vld [vmem:[%s8101_s1 + $0x4f8] sm:$0xff]  ;;  %v1267_v11 = vld [vmem:[%s8101_s1 + $0x470] sm:$0xff]  ;;  %v1333_v16 = vld [vmem:[%s8101_s1 + $0x680] sm:$0xff] }
 0x11a   : > { %4523 = vmatpush3.bf16.msra.mxu0 %v4522_v28  ;;  %v1277_v28 = vld [vmem:[%s8101_s1 + $0x4c0] sm:$0xff]  ;;  %v4588_v10 = vpack.c.bf16 %v1284_v4, %v1283_v3  ;;  %v1300_v15 = vld [vmem:[%s8101_s1 + $0x578] sm:$0xff]  ;;  %v4624_v23 = vpack.c.bf16 %v1334_v17, %v1333_v16  ;;  %v1319_v39 = vld [vmem:[%s8101_s1 + $0x610] sm:$0xff] }
 0x11b   : > { %4525 = vmatprep.subr.bf16.mxu0 %v4524_v30  ;;  %v1309_v30 = vld [vmem:[%s8101_s1 + $0x5c0] sm:$0xff]  ;;  %v1324_v3 = vld [vmem:[%s8101_s1 + $0x638] sm:$0xff]  ;;  %v1355_v4 = vld [vmem:[%s8101_s1 + $0x730] sm:$0xff] }
 0x11c   : > { %4555 = vmatpush3.bf16.msra.mxu1 %v4554_v29  ;;  %v1278_v29 = vld [vmem:[%s8101_s1 + $0x4c8] sm:$0xff]  ;;  %v4608_v38 = vpack.c.bf16 %v1310_v31, %v1309_v30  ;;  %v1365_v18 = vld [vmem:[%s8101_s1 + $0x780] sm:$0xff]  ;;  %v1335_v30 = vld [vmem:[%s8101_s1 + $0x690] sm:$0xff] }
 0x11d   : > { %4557 = vmatprep.subr.bf16.mxu1 %v4556_v34  ;;  %v4576_v34 = vpack.c.bf16 %v1278_v29, %v1277_v28  ;;  %v1317_v24 = vld [vmem:[%s8101_s1 + $0x600] sm:$0xff]  ;;  %v1350_v29 = vld [vmem:[%s8101_s1 + $0x708] sm:$0xff]  ;;  %v1336_v31 = vld [vmem:[%s8101_s1 + $0x698] sm:$0xff] }
 0x11e   : > { %4527 = vmatpush3.bf16.msra.mxu0 %v4526_v40  ;;  %v1279_v40 = vld [vmem:[%s8101_s1 + $0x4d0] sm:$0xff]  ;;  %v1349_v27 = vld [vmem:[%s8101_s1 + $0x700] sm:$0xff] }
 0x11f   : > { %4561 = vmatprep.subr.bf16.mxu0 %v4560_v43  ;;  %v1312_v43 = vld [vmem:[%s8101_s1 + $0x5d8] sm:$0xff]  ;;  %v4580_v46 = vpack.c.bf16 %v1280_v41, %v1279_v40  ;;  %v4658_v37 = vpack.c.bf16 %v1350_v29, %v1349_v27  ;;  %v1351_v41 = vld [vmem:[%s8101_s1 + $0x710] sm:$0xff]  ;;  %v1357_v16 = vld [vmem:[%s8101_s1 + $0x740] sm:$0xff] }
 0x120   : > { %4559 = vmatpush3.bf16.msra.mxu1 %v4558_v42  ;;  %v1311_v42 = vld [vmem:[%s8101_s1 + $0x5d0] sm:$0xff]  ;;  %v1320_v40 = vld [vmem:[%s8101_s1 + $0x618] sm:$0xff] }
 0x121   : > { %4593 = vmatprep.subr.bf16.mxu1 %v4592_v47  ;;  %1878 = vmatmul.mubr.f32.vlgmr.msra.gmra.mrb[2].mxu0 %v6538_v49  ;;  %v4598_v49 = vpack.c.bf16 %v1288_v0, %v1287_v60  ;;  %v1263_v47 = vld [vmem:[%s8101_s1 + $0x450] sm:$0xff]  ;;  %v4612_v51 = vpack.c.bf16 %v1312_v43, %v1311_v42  ;;  %v1297_v0 = vld [vmem:[%s8101_s1 + $0x560] sm:$0xff]  ;;  %v1352_v43 = vld [vmem:[%s8101_s1 + $0x718] sm:$0xff] }
 0x122   : > { %4563 = vmatpush3.bf16.msra.mxu0 %v4562_v53  ;;  %2017 = vmatprep.mubr.f32.mxu0 %v1588_v5  ;;  %v1281_v53 = vld [vmem:[%s8101_s1 + $0x4e0] sm:$0xff]  ;;  %v4582_v57 = vpack.c.bf16 %v1264_v48, %v1263_v47  ;;  %v1315_v5 = vld [vmem:[%s8101_s1 + $0x5f0] sm:$0xff]  ;;  %v4618_v9 = vpack.c.bf16 %v1298_v2, %v1297_v0  ;;  %v1370_v48 = vld [vmem:[%s8101_s1 + $0x7a8] sm:$0xff]  ;;  %v4662_v52 = vpack.c.bf16 %v1352_v43, %v1351_v41 }
 0x123   : > { %1948 = vmatmul.mubr.f32.vlgmr.msra.gmra.mrb[2].mxu1 %v6552_v58  ;;  %4565 = vmatprep.subr.bf16.mxu0 %v4564_v56  ;;  %v1589_v58 = vcombine.high %v6701_v6, %v6701_v6  ;;  %v1314_v56 = vld [vmem:[%s8101_s1 + $0x5e8] sm:$0xff]  ;;  %v1369_v47 = vld [vmem:[%s8101_s1 + $0x7a0] sm:$0xff]  ;;  %v1323_v2 = vld [vmem:[%s8101_s1 + $0x630] sm:$0xff] }
 0x124   : > { %4595 = vmatpush3.bf16.msra.mxu1 %v4594_v54  ;;  %v1282_v54 = vld [vmem:[%s8101_s1 + $0x4e8] sm:$0xff]  ;;  %v4616_v1 = vpack.c.bf16 %v1314_v56, %v1313_v55  ;;  %v1353_v55 = vld [vmem:[%s8101_s1 + $0x720] sm:$0xff]  ;;  %v4664_v56 = vpack.c.bf16 %v1370_v48, %v1369_v47  ;;  %v1327_v27 = vld [vmem:[%s8101_s1 + $0x650] sm:$0xff] }
 0x125   : > { %4597 = vmatprep.subr.bf16.mxu1 %v4596_v63  ;;  %2087 = vmatprep.mubr.f32.mxu1 %v1589_v58  ;;  %v4584_v60 = vpack.c.bf16 %v1282_v54, %v1281_v53  ;;  %v1266_v63 = vld [vmem:[%s8101_s1 + $0x468] sm:$0xff]  ;;  %v1268_v58 = vld [vmem:[%s8101_s1 + $0x478] sm:$0xff]  ;;  %v1359_v29 = vld [vmem:[%s8101_s1 + $0x750] sm:$0xff] }
 0x126   : > { %4567 = vmatpush3.bf16.msra.mxu0 %v4566_v7  ;;  %v1316_v7 = vld [vmem:[%s8101_s1 + $0x5f8] sm:$0xff]  ;;  %v1322_v54 = vld [vmem:[%s8101_s1 + $0x628] sm:$0xff]  ;;  %v1329_v41 = vld [vmem:[%s8101_s1 + $0x660] sm:$0xff] }
 0x127   : > { %4569 = vmatprep.subr.bf16.mxu0 %v4568_v8  ;;  %v1121_v8 = vld [vmem:[%s8100_s0 + $0x18] sm:$0xff]  ;;  %v4620_v14 = vpack.c.bf16 %v1316_v7, %v1315_v5  ;;  %v1361_v43 = vld [vmem:[%s8101_s1 + $0x760] sm:$0xff]  ;;  %v1379_v48 = vld [vmem:[%s8101_s1 + $0x7f0] sm:$0xff] }
 0x128   : > { %4599 = vmatpush3.bf16.msra.mxu1 %v4598_v49  ;;  %v4586_v49 = vpack.c.bf16 %v1266_v63, %v1265_v62  ;;  %v1372_v62 = vld [vmem:[%s8101_s1 + $0x7b8] sm:$0xff] }
 0x129   : > { %4601 = vmatprep.subr.bf16.mxu1 %v4600_v13  ;;  %v1299_v13 = vld [vmem:[%s8101_s1 + $0x570] sm:$0xff]  ;;  %v1356_v7 = vld [vmem:[%s8101_s1 + $0x738] sm:$0xff] }
 0x12a   : > { %4571 = vmatpush3.bf16.msra.mxu0 %v4570_v19  ;;  %v1366_v19 = vld [vmem:[%s8101_s1 + $0x788] sm:$0xff]  ;;  %v4622_v22 = vpack.c.bf16 %v1300_v15, %v1299_v13  ;;  %v1348_v47 = vld [vmem:[%s8101_s1 + $0x6f8] sm:$0xff] }
 0x12b   : > { %4573 = vmatprep.subr.bf16.mxu0 %v4572_v21  ;;  %v4590_v21 = vpack.c.bf16 %v1268_v58, %v1267_v11  ;;  %v4656_v28 = vpack.c.bf16 %v1366_v19, %v1365_v18  ;;  %v4638_v11 = vpack.c.bf16 %v1324_v3, %v1323_v2  ;;  %v4670_v58 = vpack.c.bf16 %v1356_v7, %v1355_v4  ;;  %v1326_v15 = vld [vmem:[%s8101_s1 + $0x648] sm:$0xff]  ;;  %v1343_v19 = vld [vmem:[%s8101_s1 + $0x6d0] sm:$0xff]  ;;  %v1381_v4 = vld [vmem:[%s8101_s1 + $0x800] sm:$0xff] }
 0x12c   : > { %4603 = vmatpush3.bf16.msra.mxu1 %v4602_v20  ;;  %v1590_v20 = vcombine.high %v1121_v8, %v1121_v8  ;;  %v1358_v18 = vld [vmem:[%s8101_s1 + $0x748] sm:$0xff]  ;;  %v1413_v7 = vld [vmem:[%s8101_s1 + $0x900] sm:$0xff] }
 0x12d   : > { %4605 = vmatprep.subr.bf16.mxu1 %v4604_v25  ;;  %v1318_v25 = vld [vmem:[%s8101_s1 + $0x608] sm:$0xff] }
 0x12e   : > { %4575 = vmatpush3.bf16.msra.mxu0 %v4574_v32  ;;  %v6872_v32 = vrot.slane %v1121_v8, %v6371_v26  ;;  %v6881_v35 = vrot.slane %v1590_v20, %v6371_v26  ;;  %v4626_v36 = vpack.c.bf16 %v1318_v25, %v1317_v24  ;;  %v1342_v8 = vld [vmem:[%s8101_s1 + $0x6c8] sm:$0xff]  ;;  %v1344_v20 = vld [vmem:[%s8101_s1 + $0x6d8] sm:$0xff]  ;;  %v4674_v24 = vpack.c.bf16 %v1358_v18, %v1357_v16  ;;  %v1383_v18 = vld [vmem:[%s8101_s1 + $0x810] sm:$0xff] }
 0x12f   : > { %4577 = vmatprep.subr.bf16.mxu0 %v4576_v34  ;;  %v1368_v34 = vld [vmem:[%s8101_s1 + $0x798] sm:$0xff]  ;;  %v4644_v25 = vpack.c.bf16 %v1344_v20, %v1343_v19  ;;  %v1415_v20 = vld [vmem:[%s8101_s1 + $0x910] sm:$0xff] }
 0x130   : > { %4607 = vmatpush3.bf16.msra.mxu1 %v4606_v33  ;;  %v1367_v33 = vld [vmem:[%s8101_s1 + $0x790] sm:$0xff]  ;;  %v1606_v50 = vcombine.high %v6881_v35, %v6881_v35  ;;  %v1384_v19 = vld [vmem:[%s8101_s1 + $0x818] sm:$0xff] }
 0x131   : > { %4609 = vmatprep.subr.bf16.mxu1 %v4608_v38  ;;  %v4628_v38 = vpack.c.bf16 %v1336_v31, %v1335_v30  ;;  %v4660_v42 = vpack.c.bf16 %v1368_v34, %v1367_v33  ;;  %v1360_v31 = vld [vmem:[%s8101_s1 + $0x758] sm:$0xff]  ;;  %v1345_v33 = vld [vmem:[%s8101_s1 + $0x6e0] sm:$0xff]  ;;  %v1346_v34 = vld [vmem:[%s8101_s1 + $0x6e8] sm:$0xff] }
 0x132   : > { %4579 = vmatpush3.bf16.msra.mxu0 %v4578_v44  ;;  %v1337_v44 = vld [vmem:[%s8101_s1 + $0x6a0] sm:$0xff] }
 0x133   : > { %4581 = vmatprep.subr.bf16.mxu0 %v4580_v46  ;;  %v1605_v46 = vcombine.high %v6872_v32, %v6872_v32 }
 0x134   : > { %4611 = vmatpush3.bf16.msra.mxu1 %v4610_v45  ;;  %v1338_v45 = vld [vmem:[%s8101_s1 + $0x6a8] sm:$0xff] }
 0x135   : > { %4613 = vmatprep.subr.bf16.mxu1 %v4612_v51  ;;  %v4630_v51 = vpack.c.bf16 %v1320_v40, %v1319_v39  ;;  %v4632_v53 = vpack.c.bf16 %v1338_v45, %v1337_v44  ;;  %v4678_v39 = vpack.c.bf16 %v1360_v31, %v1359_v29  ;;  %v4648_v40 = vpack.c.bf16 %v1346_v34, %v1345_v33  ;;  %v1362_v45 = vld [vmem:[%s8101_s1 + $0x768] sm:$0xff] }
 0x136   : > { %4583 = vmatpush3.bf16.msra.mxu0 %v4582_v57  ;;  %v1339_v57 = vld [vmem:[%s8101_s1 + $0x6b0] sm:$0xff]  ;;  %v1386_v34 = vld [vmem:[%s8101_s1 + $0x828] sm:$0xff] }
 0x137   : > { %4585 = vmatprep.subr.bf16.mxu0 %v4584_v60  ;;  %v1371_v60 = vld [vmem:[%s8101_s1 + $0x7b0] sm:$0xff] }
 0x138   : > { %4615 = vmatpush3.bf16.msra.mxu1 %v4614_v59  ;;  %v1340_v59 = vld [vmem:[%s8101_s1 + $0x6b8] sm:$0xff]  ;;  %v4668_v5 = vpack.c.bf16 %v1372_v62, %v1371_v60  ;;  %v1398_v60 = vld [vmem:[%s8101_s1 + $0x888] sm:$0xff]  ;;  %v1429_v62 = vld [vmem:[%s8101_s1 + $0x980] sm:$0xff] }
 0x139   : > { %4617 = vmatprep.subr.bf16.mxu1 %v4616_v1  ;;  %v4636_v1 = vpack.c.bf16 %v1340_v59, %v1339_v57  ;;  %v1364_v57 = vld [vmem:[%s8101_s1 + $0x778] sm:$0xff]  ;;  %v1397_v59 = vld [vmem:[%s8101_s1 + $0x880] sm:$0xff] }
 0x13a   : > { %4587 = vmatpush3.bf16.msra.mxu0 %v4586_v49  ;;  %v1341_v49 = vld [vmem:[%s8101_s1 + $0x6c0] sm:$0xff]  ;;  %v4688_v3 = vpack.c.bf16 %v1398_v60, %v1397_v59 }
 0x13b   : > { %4589 = vmatprep.subr.bf16.mxu0 %v4588_v10  ;;  %v1374_v10 = vld [vmem:[%s8101_s1 + $0x7c8] sm:$0xff]  ;;  %v4640_v13 = vpack.c.bf16 %v1342_v8, %v1341_v49  ;;  %v1421_v59 = vld [vmem:[%s8101_s1 + $0x940] sm:$0xff] }
 0x13c   : > { %4619 = vmatpush3.bf16.msra.mxu1 %v4618_v9  ;;  %v1373_v9 = vld [vmem:[%s8101_s1 + $0x7c0] sm:$0xff]  ;;  %v1414_v8 = vld [vmem:[%s8101_s1 + $0x908] sm:$0xff] }
 0x13d   : > { %4621 = vmatprep.subr.bf16.mxu1 %v4620_v14  ;;  %v1325_v14 = vld [vmem:[%s8101_s1 + $0x640] sm:$0xff]  ;;  %v4672_v17 = vpack.c.bf16 %v1374_v10, %v1373_v9  ;;  %v1399_v9 = vld [vmem:[%s8101_s1 + $0x890] sm:$0xff]  ;;  %v1400_v10 = vld [vmem:[%s8101_s1 + $0x898] sm:$0xff]  ;;  %v4722_v16 = vpack.c.bf16 %v1414_v8, %v1413_v7 }
 0x13e   : > { %4591 = vmatpush3.bf16.msra.mxu0 %v4590_v21  ;;  %v1375_v21 = vld [vmem:[%s8101_s1 + $0x7d0] sm:$0xff] }
 0x13f   : > { %4625 = vmatprep.subr.bf16.mxu0 %v4624_v23  ;;  %v4642_v23 = vpack.c.bf16 %v1326_v15, %v1325_v14  ;;  %v1391_v7 = vld [vmem:[%s8101_s1 + $0x850] sm:$0xff] }
 0x140   : > { %4623 = vmatpush3.bf16.msra.mxu1 %v4622_v22  ;;  %v1376_v22 = vld [vmem:[%s8101_s1 + $0x7d8] sm:$0xff]  ;;  %v1423_v8 = vld [vmem:[%s8101_s1 + $0x950] sm:$0xff] }
 0x141   : > { %4657 = vmatprep.subr.bf16.mxu1 %v4656_v28  ;;  %2018 = vmatmul.mubr.f32.vlgmr.msra.gmra.mrb[4].mxu0 %v6680_v61  ;;  %v1321_v61 = vld [vmem:[%s8101_s1 + $0x620] sm:$0xff]  ;;  %v1328_v28 = vld [vmem:[%s8101_s1 + $0x658] sm:$0xff]  ;;  %v4676_v30 = vpack.c.bf16 %v1376_v22, %v1375_v21 }
 0x142   : > { %4627 = vmatpush3.bf16.msra.mxu0 %v4626_v36  ;;  %2157 = vmatprep.mubr.f32.mxu0 %v1605_v46  ;;  %v4634_v63 = vpack.c.bf16 %v1322_v54, %v1321_v61  ;;  %v1377_v36 = vld [vmem:[%s8101_s1 + $0x7e0] sm:$0xff]  ;;  %v1347_v46 = vld [vmem:[%s8101_s1 + $0x6f0] sm:$0xff]  ;;  %v1416_v22 = vld [vmem:[%s8101_s1 + $0x918] sm:$0xff] }
 0x143   : > { %2088 = vmatmul.mubr.f32.vlgmr.msra.gmra.mrb[4].mxu1 %v6701_v6  ;;  %4629 = vmatprep.subr.bf16.mxu0 %v4628_v38  ;;  %v1354_v6 = vld [vmem:[%s8101_s1 + $0x728] sm:$0xff]  ;;  %v4646_v38 = vpack.c.bf16 %v1328_v28, %v1327_v27  ;;  %v4652_v61 = vpack.c.bf16 %v1348_v47, %v1347_v46  ;;  %v1331_v54 = vld [vmem:[%s8101_s1 + $0x670] sm:$0xff]  ;;  %v1433_v27 = vld [vmem:[%s8101_s1 + $0x9a0] sm:$0xff]  ;;  %v4726_v31 = vpack.c.bf16 %v1416_v22, %v1415_v20 }
 0x144   : > { %4659 = vmatpush3.bf16.msra.mxu1 %v4658_v37  ;;  %2227 = vmatprep.mubr.f32.mxu1 %v1606_v50  ;;  %v4666_v0 = vpack.c.bf16 %v1354_v6, %v1353_v55  ;;  %v1378_v37 = vld [vmem:[%s8101_s1 + $0x7e8] sm:$0xff]  ;;  %v1380_v50 = vld [vmem:[%s8101_s1 + $0x7f8] sm:$0xff]  ;;  %v1419_v47 = vld [vmem:[%s8101_s1 + $0x930] sm:$0xff] }
 0x145   : > { %4661 = vmatprep.subr.bf16.mxu1 %v4660_v42  ;;  %v1330_v42 = vld [vmem:[%s8101_s1 + $0x668] sm:$0xff]  ;;  %v4680_v44 = vpack.c.bf16 %v1378_v37, %v1377_v36  ;;  %v1332_v55 = vld [vmem:[%s8101_s1 + $0x678] sm:$0xff]  ;;  %v4684_v6 = vpack.c.bf16 %v1380_v50, %v1379_v48  ;;  %v1417_v36 = vld [vmem:[%s8101_s1 + $0x920] sm:$0xff] }
 0x146   : > { %4631 = vmatpush3.bf16.msra.mxu0 %v4630_v51  ;;  %v4650_v51 = vpack.c.bf16 %v1330_v42, %v1329_v41  ;;  %v1434_v28 = vld [vmem:[%s8101_s1 + $0x9a8] sm:$0xff]  ;;  %v1436_v41 = vld [vmem:[%s8101_s1 + $0x9b8] sm:$0xff]  ;;  %v1393_v20 = vld [vmem:[%s8101_s1 + $0x860] sm:$0xff] }
 0x147   : > { %4633 = vmatprep.subr.bf16.mxu0 %v4632_v53  ;;  %v4682_v53 = vpack.c.bf16 %v1362_v45, %v1361_v43  ;;  %v4728_v37 = vpack.c.bf16 %v1434_v28, %v1433_v27  ;;  %v1387_v45 = vld [vmem:[%s8101_s1 + $0x830] sm:$0xff]  ;;  %v1388_v46 = vld [vmem:[%s8101_s1 + $0x838] sm:$0xff]  ;;  %v1425_v22 = vld [vmem:[%s8101_s1 + $0x960] sm:$0xff] }
 0x148   : > { %4663 = vmatpush3.bf16.msra.mxu1 %v4662_v52  ;;  %v1122_v52 = vld [vmem:[%s8100_s0 + $0x20] sm:$0xff]  ;;  %v1420_v50 = vld [vmem:[%s8101_s1 + $0x938] sm:$0xff]  ;;  %v1443_v28 = vld [vmem:[%s8101_s1 + $0x9f0] sm:$0xff] }
 0x149   : > { %4665 = vmatprep.subr.bf16.mxu1 %v4664_v56  ;;  %v1363_v56 = vld [vmem:[%s8101_s1 + $0x770] sm:$0xff]  ;;  %v1412_v27 = vld [vmem:[%s8101_s1 + $0x8f8] sm:$0xff] }
 0x14a   : > { %4635 = vmatpush3.bf16.msra.mxu0 %v4634_v63  ;;  %v1430_v63 = vld [vmem:[%s8101_s1 + $0x988] sm:$0xff]  ;;  %v4686_v2 = vpack.c.bf16 %v1364_v57, %v1363_v56 }
 0x14b   : > { %4637 = vmatprep.subr.bf16.mxu0 %v4636_v1  ;;  %v4654_v1 = vpack.c.bf16 %v1332_v55, %v1331_v54  ;;  %v4720_v49 = vpack.c.bf16 %v1430_v63, %v1429_v62  ;;  %v4702_v54 = vpack.c.bf16 %v1388_v46, %v1387_v45  ;;  %v4734_v55 = vpack.c.bf16 %v1420_v50, %v1419_v47  ;;  %v1390_v57 = vld [vmem:[%s8101_s1 + $0x848] sm:$0xff]  ;;  %v1407_v63 = vld [vmem:[%s8101_s1 + $0x8d0] sm:$0xff]  ;;  %v1445_v47 = vld [vmem:[%s8101_s1 + $0xa00] sm:$0xff] }
 0x14c   : > { %4667 = vmatpush3.bf16.msra.mxu1 %v4666_v0  ;;  %v1607_v0 = vcombine.high %v1122_v52, %v1122_v52  ;;  %v1422_v62 = vld [vmem:[%s8101_s1 + $0x948] sm:$0xff]  ;;  %v1477_v50 = vld [vmem:[%s8101_s1 + $0xb00] sm:$0xff] }
 0x14d   : > { %4669 = vmatprep.subr.bf16.mxu1 %v4668_v5  ;;  %v1382_v5 = vld [vmem:[%s8101_s1 + $0x808] sm:$0xff] }
 0x14e   : > { %4639 = vmatpush3.bf16.msra.mxu0 %v4638_v11  ;;  %v7079_v11 = vrot.slane %v1122_v52, %v6371_v26  ;;  %v7088_v14 = vrot.slane %v1607_v0, %v6371_v26  ;;  %v4690_v15 = vpack.c.bf16 %v1382_v5, %v1381_v4  ;;  %v1406_v52 = vld [vmem:[%s8101_s1 + $0x8c8] sm:$0xff]  ;;  %v1408_v0 = vld [vmem:[%s8101_s1 + $0x8d8] sm:$0xff]  ;;  %v4738_v4 = vpack.c.bf16 %v1422_v62, %v1421_v59  ;;  %v1447_v62 = vld [vmem:[%s8101_s1 + $0xa10] sm:$0xff] }
 0x14f   : > { %4641 = vmatprep.subr.bf16.mxu0 %v4640_v13  ;;  %v1432_v13 = vld [vmem:[%s8101_s1 + $0x998] sm:$0xff]  ;;  %v4708_v5 = vpack.c.bf16 %v1408_v0, %v1407_v63  ;;  %v1479_v0 = vld [vmem:[%s8101_s1 + $0xb10] sm:$0xff] }
 0x150   : > { %4671 = vmatpush3.bf16.msra.mxu1 %v4670_v58  ;;  %v1431_v58 = vld [vmem:[%s8101_s1 + $0x990] sm:$0xff]  ;;  %v1623_v29 = vcombine.high %v7088_v14, %v7088_v14  ;;  %v1448_v63 = vld [vmem:[%s8101_s1 + $0xa18] sm:$0xff] }
 0x151   : > { %4673 = vmatprep.subr.bf16.mxu1 %v4672_v17  ;;  %v4692_v17 = vpack.c.bf16 %v1400_v10, %v1399_v9  ;;  %v4724_v21 = vpack.c.bf16 %v1432_v13, %v1431_v58  ;;  %v1424_v10 = vld [vmem:[%s8101_s1 + $0x958] sm:$0xff]  ;;  %v1409_v58 = vld [vmem:[%s8101_s1 + $0x8e0] sm:$0xff]  ;;  %v1410_v13 = vld [vmem:[%s8101_s1 + $0x8e8] sm:$0xff] }
 0x152   : > { %4643 = vmatpush3.bf16.msra.mxu0 %v4642_v23  ;;  %v1401_v23 = vld [vmem:[%s8101_s1 + $0x8a0] sm:$0xff] }
 0x153   : > { %4645 = vmatprep.subr.bf16.mxu0 %v4644_v25  ;;  %v1622_v25 = vcombine.high %v7079_v11, %v7079_v11 }
 0x154   : > { %4675 = vmatpush3.bf16.msra.mxu1 %v4674_v24  ;;  %v1402_v24 = vld [vmem:[%s8101_s1 + $0x8a8] sm:$0xff] }
 0x155   : > { %4677 = vmatprep.subr.bf16.mxu1 %v4676_v30  ;;  %v4694_v30 = vpack.c.bf16 %v1384_v19, %v1383_v18  ;;  %v4696_v33 = vpack.c.bf16 %v1402_v24, %v1401_v23  ;;  %v4742_v18 = vpack.c.bf16 %v1424_v10, %v1423_v8  ;;  %v4712_v19 = vpack.c.bf16 %v1410_v13, %v1409_v58  ;;  %v1426_v24 = vld [vmem:[%s8101_s1 + $0x968] sm:$0xff] }
 0x156   : > { %4647 = vmatpush3.bf16.msra.mxu0 %v4646_v38  ;;  %v1403_v38 = vld [vmem:[%s8101_s1 + $0x8b0] sm:$0xff]  ;;  %v1450_v13 = vld [vmem:[%s8101_s1 + $0xa28] sm:$0xff] }
 0x157   : > { %4649 = vmatprep.subr.bf16.mxu0 %v4648_v40  ;;  %v1435_v40 = vld [vmem:[%s8101_s1 + $0x9b0] sm:$0xff] }
 0x158   : > { %4679 = vmatpush3.bf16.msra.mxu1 %v4678_v39  ;;  %v1404_v39 = vld [vmem:[%s8101_s1 + $0x8b8] sm:$0xff]  ;;  %v4732_v48 = vpack.c.bf16 %v1436_v41, %v1435_v40  ;;  %v1462_v40 = vld [vmem:[%s8101_s1 + $0xa88] sm:$0xff]  ;;  %v1493_v41 = vld [vmem:[%s8101_s1 + $0xb80] sm:$0xff] }
 0x159   : > { %4681 = vmatprep.subr.bf16.mxu1 %v4680_v44  ;;  %v4700_v44 = vpack.c.bf16 %v1404_v39, %v1403_v38  ;;  %v1428_v38 = vld [vmem:[%s8101_s1 + $0x978] sm:$0xff]  ;;  %v1461_v39 = vld [vmem:[%s8101_s1 + $0xa80] sm:$0xff] }
 0x15a   : > { %4651 = vmatpush3.bf16.msra.mxu0 %v4650_v51  ;;  %v1405_v51 = vld [vmem:[%s8101_s1 + $0x8c0] sm:$0xff]  ;;  %v4752_v46 = vpack.c.bf16 %v1462_v40, %v1461_v39 }
 0x15b   : > { %4653 = vmatprep.subr.bf16.mxu0 %v4652_v61  ;;  %v1438_v61 = vld [vmem:[%s8101_s1 + $0x9c8] sm:$0xff]  ;;  %v4704_v56 = vpack.c.bf16 %v1406_v52, %v1405_v51  ;;  %v1485_v39 = vld [vmem:[%s8101_s1 + $0xb40] sm:$0xff] }
 0x15c   : > { %4683 = vmatpush3.bf16.msra.mxu1 %v4682_v53  ;;  %v1437_v53 = vld [vmem:[%s8101_s1 + $0x9c0] sm:$0xff]  ;;  %v1478_v52 = vld [vmem:[%s8101_s1 + $0xb08] sm:$0xff] }
 0x15d   : > { %4685 = vmatprep.subr.bf16.mxu1 %v4684_v6  ;;  %v1389_v6 = vld [vmem:[%s8101_s1 + $0x840] sm:$0xff]  ;;  %v4736_v60 = vpack.c.bf16 %v1438_v61, %v1437_v53  ;;  %v1463_v53 = vld [vmem:[%s8101_s1 + $0xa90] sm:$0xff]  ;;  %v1464_v61 = vld [vmem:[%s8101_s1 + $0xa98] sm:$0xff]  ;;  %v4786_v59 = vpack.c.bf16 %v1478_v52, %v1477_v50 }
 0x15e   : > { %4655 = vmatpush3.bf16.msra.mxu0 %v4654_v1  ;;  %v1439_v1 = vld [vmem:[%s8101_s1 + $0x9d0] sm:$0xff] }
 0x15f   : > { %4689 = vmatprep.subr.bf16.mxu0 %v4688_v3  ;;  %v4706_v3 = vpack.c.bf16 %v1390_v57, %v1389_v6  ;;  %v1455_v50 = vld [vmem:[%s8101_s1 + $0xa50] sm:$0xff] }
 0x160   : > { %4687 = vmatpush3.bf16.msra.mxu1 %v4686_v2  ;;  %v1440_v2 = vld [vmem:[%s8101_s1 + $0x9d8] sm:$0xff]  ;;  %v1487_v52 = vld [vmem:[%s8101_s1 + $0xb50] sm:$0xff] }
 0x161   : > { %4721 = vmatprep.subr.bf16.mxu1 %v4720_v49  ;;  %2158 = vmatmul.mubr.f32.vlgmr.msra.gmra.mrb[6].mxu0 %v6872_v32  ;;  %v1385_v32 = vld [vmem:[%s8101_s1 + $0x820] sm:$0xff]  ;;  %v1392_v49 = vld [vmem:[%s8101_s1 + $0x858] sm:$0xff]  ;;  %v4740_v9 = vpack.c.bf16 %v1440_v2, %v1439_v1 }
 0x162   : > { %4691 = vmatpush3.bf16.msra.mxu0 %v4690_v15  ;;  %2297 = vmatprep.mubr.f32.mxu0 %v1622_v25  ;;  %v4698_v42 = vpack.c.bf16 %v1386_v34, %v1385_v32  ;;  %v1441_v15 = vld [vmem:[%s8101_s1 + $0x9e0] sm:$0xff]  ;;  %v1411_v25 = vld [vmem:[%s8101_s1 + $0x8f0] sm:$0xff]  ;;  %v1480_v2 = vld [vmem:[%s8101_s1 + $0xb18] sm:$0xff] }
 0x163   : > { %2228 = vmatmul.mubr.f32.vlgmr.msra.gmra.mrb[6].mxu1 %v6881_v35  ;;  %4693 = vmatprep.subr.bf16.mxu0 %v4692_v17  ;;  %v1418_v35 = vld [vmem:[%s8101_s1 + $0x928] sm:$0xff]  ;;  %v4710_v17 = vpack.c.bf16 %v1392_v49, %v1391_v7  ;;  %v4716_v32 = vpack.c.bf16 %v1412_v27, %v1411_v25  ;;  %v1395_v34 = vld [vmem:[%s8101_s1 + $0x870] sm:$0xff]  ;;  %v1497_v7 = vld [vmem:[%s8101_s1 + $0xba0] sm:$0xff]  ;;  %v4790_v10 = vpack.c.bf16 %v1480_v2, %v1479_v0 }
 0x164   : > { %4723 = vmatpush3.bf16.msra.mxu1 %v4722_v16  ;;  %2367 = vmatprep.mubr.f32.mxu1 %v1623_v29  ;;  %v4730_v43 = vpack.c.bf16 %v1418_v35, %v1417_v36  ;;  %v1442_v16 = vld [vmem:[%s8101_s1 + $0x9e8] sm:$0xff]  ;;  %v1444_v29 = vld [vmem:[%s8101_s1 + $0x9f8] sm:$0xff]  ;;  %v1483_v27 = vld [vmem:[%s8101_s1 + $0xb30] sm:$0xff] }
 0x165   : > { %4725 = vmatprep.subr.bf16.mxu1 %v4724_v21  ;;  %v1394_v21 = vld [vmem:[%s8101_s1 + $0x868] sm:$0xff]  ;;  %v4744_v23 = vpack.c.bf16 %v1442_v16, %v1441_v15  ;;  %v1396_v36 = vld [vmem:[%s8101_s1 + $0x878] sm:$0xff]  ;;  %v4748_v35 = vpack.c.bf16 %v1444_v29, %v1443_v28  ;;  %v1481_v15 = vld [vmem:[%s8101_s1 + $0xb20] sm:$0xff] }
 0x166   : > { %4695 = vmatpush3.bf16.msra.mxu0 %v4694_v30  ;;  %v4714_v30 = vpack.c.bf16 %v1394_v21, %v1393_v20  ;;  %v1498_v49 = vld [vmem:[%s8101_s1 + $0xba8] sm:$0xff]  ;;  %v1500_v20 = vld [vmem:[%s8101_s1 + $0xbb8] sm:$0xff]  ;;  %v1457_v0 = vld [vmem:[%s8101_s1 + $0xa60] sm:$0xff] }
 0x167   : > { %4697 = vmatprep.subr.bf16.mxu0 %v4696_v33  ;;  %v4746_v33 = vpack.c.bf16 %v1426_v24, %v1425_v22  ;;  %v4792_v16 = vpack.c.bf16 %v1498_v49, %v1497_v7  ;;  %v1451_v24 = vld [vmem:[%s8101_s1 + $0xa30] sm:$0xff]  ;;  %v1452_v25 = vld [vmem:[%s8101_s1 + $0xa38] sm:$0xff]  ;;  %v1489_v2 = vld [vmem:[%s8101_s1 + $0xb60] sm:$0xff] }
 0x168   : > { %4727 = vmatpush3.bf16.msra.mxu1 %v4726_v31  ;;  %v1123_v31 = vld [vmem:[%s8100_s0 + $0x28] sm:$0xff]  ;;  %v1484_v29 = vld [vmem:[%s8101_s1 + $0xb38] sm:$0xff]  ;;  %v1507_v49 = vld [vmem:[%s8101_s1 + $0xbf0] sm:$0xff] }
 0x169   : > { %4729 = vmatprep.subr.bf16.mxu1 %v4728_v37  ;;  %v1427_v37 = vld [vmem:[%s8101_s1 + $0x970] sm:$0xff]  ;;  %v1476_v7 = vld [vmem:[%s8101_s1 + $0xaf8] sm:$0xff] }
 0x16a   : > { %4699 = vmatpush3.bf16.msra.mxu0 %v4698_v42  ;;  %v1494_v42 = vld [vmem:[%s8101_s1 + $0xb88] sm:$0xff]  ;;  %v4750_v45 = vpack.c.bf16 %v1428_v38, %v1427_v37 }
 0x16b   : > { %4701 = vmatprep.subr.bf16.mxu0 %v4700_v44  ;;  %v4718_v44 = vpack.c.bf16 %v1396_v36, %v1395_v34  ;;  %v4784_v51 = vpack.c.bf16 %v1494_v42, %v1493_v41  ;;  %v4766_v34 = vpack.c.bf16 %v1452_v25, %v1451_v24  ;;  %v4798_v36 = vpack.c.bf16 %v1484_v29, %v1483_v27  ;;  %v1454_v38 = vld [vmem:[%s8101_s1 + $0xa48] sm:$0xff]  ;;  %v1471_v42 = vld [vmem:[%s8101_s1 + $0xad0] sm:$0xff]  ;;  %v1512_v24 = vld [vmem:[%s8101_s1 + $0xc18] sm:$0xff] }
 0x16c   : > { %4731 = vmatpush3.bf16.msra.mxu1 %v4730_v43  ;;  %v1624_v43 = vcombine.high %v1123_v31, %v1123_v31  ;;  %v1486_v41 = vld [vmem:[%s8101_s1 + $0xb48] sm:$0xff]  ;;  %v1513_v27 = vld [vmem:[%s8101_s1 + $0xc20] sm:$0xff]  ;;  %v5343_v29 = vmov 0.0  }
 0x16d   : > { %4733 = vmatprep.subr.bf16.mxu1 %v4732_v48  ;;  %v1446_v48 = vld [vmem:[%s8101_s1 + $0xa08] sm:$0xff] }
 0x16e   : > { %4703 = vmatpush3.bf16.msra.mxu0 %v4702_v54  ;;  %v7286_v54 = vrot.slane %v1123_v31, %v6371_v26  ;;  %v7295_v6 = vrot.slane %v1624_v43, %v6371_v26  ;;  %v4754_v57 = vpack.c.bf16 %v1446_v48, %v1445_v47  ;;  %v1470_v31 = vld [vmem:[%s8101_s1 + $0xac8] sm:$0xff]  ;;  %v1472_v43 = vld [vmem:[%s8101_s1 + $0xad8] sm:$0xff]  ;;  %v4802_v47 = vpack.c.bf16 %v1486_v41, %v1485_v39  ;;  %v1523_v41 = vld [vmem:[%s8101_s1 + $0xc70] sm:$0xff] }
 0x16f   : > { %4705 = vmatprep.subr.bf16.mxu0 %v4704_v56  ;;  %v1496_v56 = vld [vmem:[%s8101_s1 + $0xb98] sm:$0xff]  ;;  %v4772_v48 = vpack.c.bf16 %v1472_v43, %v1471_v42  ;;  %v1522_v39 = vld [vmem:[%s8101_s1 + $0xc68] sm:$0xff] }
 0x170   : > { %4735 = vmatpush3.bf16.msra.mxu1 %v4734_v55  ;;  %v1495_v55 = vld [vmem:[%s8101_s1 + $0xb90] sm:$0xff]  ;;  %v1640_v8 = vcombine.high %v7295_v6, %v7295_v6  ;;  %v1524_v42 = vld [vmem:[%s8101_s1 + $0xc78] sm:$0xff] }
 0x171   : > { %4737 = vmatprep.subr.bf16.mxu1 %v4736_v60  ;;  %v4756_v60 = vpack.c.bf16 %v1464_v61, %v1463_v53  ;;  %v4788_v1 = vpack.c.bf16 %v1496_v56, %v1495_v55  ;;  %v1488_v61 = vld [vmem:[%s8101_s1 + $0xb58] sm:$0xff]  ;;  %v1473_v55 = vld [vmem:[%s8101_s1 + $0xae0] sm:$0xff]  ;;  %v1474_v56 = vld [vmem:[%s8101_s1 + $0xae8] sm:$0xff]  ;;  %v4838_v43 = vpack.c.bf16 %v1524_v42, %v1523_v41 }
 0x172   : > { %4707 = vmatpush3.bf16.msra.mxu0 %v4706_v3  ;;  %v1465_v3 = vld [vmem:[%s8101_s1 + $0xaa0] sm:$0xff]  ;;  %v2814_v41 = vld [vmem:[%s7568_s16 + $0x90] sm:$0xff] }
 0x173   : > { %4709 = vmatprep.subr.bf16.mxu0 %v4708_v5  ;;  %v1639_v5 = vcombine.high %v7286_v54, %v7286_v54  ;;  %v2822_v42 = vld [vmem:[%s7568_s16 + $0xd0] sm:$0xff] }
 0x174   : > { %4739 = vmatpush3.bf16.msra.mxu1 %v4738_v4  ;;  %v1466_v4 = vld [vmem:[%s8101_s1 + $0xaa8] sm:$0xff] }
 0x175   : > { %4741 = vmatprep.subr.bf16.mxu1 %v4740_v9  ;;  %v4758_v9 = vpack.c.bf16 %v1448_v63, %v1447_v62  ;;  %v4760_v58 = vpack.c.bf16 %v1466_v4, %v1465_v3  ;;  %v4806_v62 = vpack.c.bf16 %v1488_v61, %v1487_v52  ;;  %v4776_v63 = vpack.c.bf16 %v1474_v56, %v1473_v55  ;;  %v1490_v4 = vld [vmem:[%s8101_s1 + $0xb68] sm:$0xff] }
 0x176   : > { %4711 = vmatpush3.bf16.msra.mxu0 %v4710_v17  ;;  %v1467_v17 = vld [vmem:[%s8101_s1 + $0xab0] sm:$0xff] }
 0x177   : > { %4713 = vmatprep.subr.bf16.mxu0 %v4712_v19  ;;  %v1499_v19 = vld [vmem:[%s8101_s1 + $0xbb0] sm:$0xff] }
 0x178   : > { %4743 = vmatpush3.bf16.msra.mxu1 %v4742_v18  ;;  %v1468_v18 = vld [vmem:[%s8101_s1 + $0xab8] sm:$0xff]  ;;  %v4796_v28 = vpack.c.bf16 %v1500_v20, %v1499_v19  ;;  %v1509_v19 = vld [vmem:[%s8101_s1 + $0xc00] sm:$0xff]  ;;  %v1510_v20 = vld [vmem:[%s8101_s1 + $0xc08] sm:$0xff] }
 0x179   : > { %4745 = vmatprep.subr.bf16.mxu1 %v4744_v23  ;;  %v4764_v23 = vpack.c.bf16 %v1468_v18, %v1467_v17 }
 0x17a   : > { %4715 = vmatpush3.bf16.msra.mxu0 %v4714_v30  ;;  %v1469_v30 = vld [vmem:[%s8101_s1 + $0xac0] sm:$0xff] }
 0x17b   : > { %4717 = vmatprep.subr.bf16.mxu0 %v4716_v32  ;;  %v1502_v32 = vld [vmem:[%s8101_s1 + $0xbc8] sm:$0xff]  ;;  %v4768_v37 = vpack.c.bf16 %v1470_v31, %v1469_v30  ;;  %v1516_v30 = vld [vmem:[%s8101_s1 + $0xc38] sm:$0xff] }
 0x17c   : > { %4747 = vmatpush3.bf16.msra.mxu1 %v4746_v33  ;;  %v1501_v33 = vld [vmem:[%s8101_s1 + $0xbc0] sm:$0xff] }
 0x17d   : > { %4749 = vmatprep.subr.bf16.mxu1 %v4748_v35  ;;  %v1453_v35 = vld [vmem:[%s8101_s1 + $0xa40] sm:$0xff]  ;;  %v4800_v40 = vpack.c.bf16 %v1502_v32, %v1501_v33  ;;  %v1518_v32 = vld [vmem:[%s8101_s1 + $0xc48] sm:$0xff] }
 0x17e   : > { %4719 = vmatpush3.bf16.msra.mxu0 %v4718_v44  ;;  %v1503_v44 = vld [vmem:[%s8101_s1 + $0xbd0] sm:$0xff]  ;;  %v1517_v33 = vld [vmem:[%s8101_s1 + $0xc40] sm:$0xff] }
 0x17f   : > { %4753 = vmatprep.subr.bf16.mxu0 %v4752_v46  ;;  %v4770_v46 = vpack.c.bf16 %v1454_v38, %v1453_v35  ;;  %v1521_v38 = vld [vmem:[%s8101_s1 + $0xc60] sm:$0xff] }
 0x180   : > { %4751 = vmatpush3.bf16.msra.mxu1 %v4750_v45  ;;  %v1504_v45 = vld [vmem:[%s8101_s1 + $0xbd8] sm:$0xff] }
 0x181   : > { %4785 = vmatprep.subr.bf16.mxu1 %v4784_v51  ;;  %2298 = vmatmul.mubr.f32.vlgmr.msra.gmra.mrb[8].mxu0 %v7079_v11  ;;  %v1449_v11 = vld [vmem:[%s8101_s1 + $0xa20] sm:$0xff]  ;;  %v1456_v51 = vld [vmem:[%s8101_s1 + $0xa58] sm:$0xff]  ;;  %v4804_v53 = vpack.c.bf16 %v1504_v45, %v1503_v44  ;;  %v3946_v44 = vld.sshfl [vmem:[%s8100_s0 + $0x30] sm:$0x3 pattern:$0x76325410] }
 0x182   : > { %4755 = vmatpush3.bf16.msra.mxu0 %v4754_v57  ;;  %2437 = vmatprep.mubr.f32.mxu0 %v1639_v5  ;;  %v4762_v21 = vpack.c.bf16 %v1450_v13, %v1449_v11  ;;  %v1505_v57 = vld [vmem:[%s8101_s1 + $0xbe0] sm:$0xff]  ;;  %v1475_v5 = vld [vmem:[%s8101_s1 + $0xaf0] sm:$0xff]  ;;  %v1460_v13 = vld [vmem:[%s8101_s1 + $0xa78] sm:$0xff] }
 0x183   : > { %2368 = vmatmul.mubr.f32.vlgmr.msra.gmra.mrb[8].mxu1 %v7088_v14  ;;  %4757 = vmatprep.subr.bf16.mxu0 %v4756_v60  ;;  %v1482_v14 = vld [vmem:[%s8101_s1 + $0xb28] sm:$0xff]  ;;  %v4774_v60 = vpack.c.bf16 %v1456_v51, %v1455_v50  ;;  %v1459_v11 = vld [vmem:[%s8101_s1 + $0xa70] sm:$0xff] }
 0x184   : > { %4787 = vmatpush3.bf16.msra.mxu1 %v4786_v59  ;;  %2507 = vmatprep.mubr.f32.mxu1 %v1640_v8  ;;  %v4794_v22 = vpack.c.bf16 %v1482_v14, %v1481_v15  ;;  %v1506_v59 = vld [vmem:[%s8101_s1 + $0xbe8] sm:$0xff]  ;;  %v1508_v8 = vld [vmem:[%s8101_s1 + $0xbf8] sm:$0xff]  ;;  %v4782_v17 = vpack.c.bf16 %v1460_v13, %v1459_v11 }
 0x185   : > { %4789 = vmatprep.subr.bf16.mxu1 %v4788_v1  ;;  %v1458_v1 = vld [vmem:[%s8101_s1 + $0xa68] sm:$0xff]  ;;  %v4808_v3 = vpack.c.bf16 %v1506_v59, %v1505_v57  ;;  %v4812_v15 = vpack.c.bf16 %v1508_v8, %v1507_v49  ;;  %v1492_v14 = vld [vmem:[%s8101_s1 + $0xb78] sm:$0xff] }
 0x186   : > { %4759 = vmatpush3.bf16.msra.mxu0 %v4758_v9  ;;  %v4778_v9 = vpack.c.bf16 %v1458_v1, %v1457_v0  ;;  %v2584_v0 = vld [vmem:[%s8103_s3 + $0x8] sm:$0xff] }
 0x187   : > { %4761 = vmatprep.subr.bf16.mxu0 %v4760_v58  ;;  %v4780_v58 = vpack.c.bf16 %v1476_v7, %v1475_v5  ;;  %v2588_v1 = vld [vmem:[%s8103_s3 + $0x28] sm:$0xff] }
 0x188   : > { %4791 = vmatpush3.bf16.msra.mxu1 %v4790_v10  ;;  %v4810_v10 = vpack.c.bf16 %v1490_v4, %v1489_v2  ;;  %v2583_v2 = vld [vmem:[%s8103_s3] sm:$0xff]  ;;  %v2592_v5 = vld [vmem:[%s8103_s3 + $0x48] sm:$0xff] }
 0x189   : > { %4793 = vmatprep.subr.bf16.mxu1 %v4792_v16  ;;  %v1491_v16 = vld [vmem:[%s8101_s1 + $0xb70] sm:$0xff]  ;;  %v2587_v4 = vld [vmem:[%s8103_s3 + $0x20] sm:$0xff]  ;;  %v2596_v7 = vld [vmem:[%s8103_s3 + $0x68] sm:$0xff] }
 0x18a   : > { %4763 = vmatpush3.bf16.msra.mxu0 %v4762_v21  ;;  %v4814_v18 = vpack.c.bf16 %v1492_v14, %v1491_v16  ;;  %v4817_v21 = vpack.c.bf16 %v1510_v20, %v1509_v19  ;;  %v4842_v8 = vpack.c.bf16 %v2587_v4, %v2583_v2  ;;  %v2600_v11 = vld [vmem:[%s8103_s3 + $0x88] sm:$0xff]  ;;  %v2599_v14 = vld [vmem:[%s8103_s3 + $0x80] sm:$0xff]  ;;  %v2586_v20 = vld [vmem:[%s8103_s3 + $0x18] sm:$0xff] }
 0x18b   : > { %4765 = vmatprep.subr.bf16.mxu0 %v4764_v23  ;;  %v1511_v23 = vld [vmem:[%s8101_s1 + $0xc10] sm:$0xff]  ;;  %v2604_v13 = vld [vmem:[%s8103_s3 + $0xa8] sm:$0xff] }
 0x18c   : > { %4795 = vmatpush3.bf16.msra.mxu1 %v4794_v22  ;;  %v5341_v22 = vmov 0.0|0.0   ;;  %v4820_v25 = vpack.c.bf16 %v1512_v24, %v1511_v23  ;;  %v4848_v16 = vpack.c.bf16 %v2604_v13, %v2600_v11  ;;  %v2608_v19 = vld [vmem:[%s8103_s3 + $0xc8] sm:$0x3]  ;;  %v2607_v23 = vld [vmem:[%s8103_s3 + $0xc0] sm:$0x3]  ;;  %v2862_v4 = vld [vmem:[%s7568_s16 + $0x210] sm:$0xff] }
 0x18d   : > { %4797 = vmatprep.subr.bf16.mxu1 %v4796_v28  ;;  %v1514_v28 = vld [vmem:[%s8101_s1 + $0xc28] sm:$0xff]  ;;  %v2878_v11 = vld [vmem:[%s7568_s16 + $0x290] sm:$0xff] }
 0x18e   : > { %4767 = vmatpush3.bf16.msra.mxu0 %v4766_v34  ;;  %v4829_v34 = vpack.c.bf16 %v1518_v32, %v1517_v33  ;;  %v2799_v33 = vld [vmem:[%s7568_s16 + $0x18] sm:$0xff]  ;;  %v2886_v13 = vld [vmem:[%s7568_s16 + $0x2d0] sm:$0xff] }
 0x18f   : > { %4769 = vmatprep.subr.bf16.mxu0 %v4768_v37  ;;  %v1520_v37 = vld [vmem:[%s8101_s1 + $0xc58] sm:$0xff] }
 0x190   : > { %4799 = vmatpush3.bf16.msra.mxu1 %v4798_v36  ;;  %v1519_v36 = vld [vmem:[%s8101_s1 + $0xc50] sm:$0xff]  ;;  %v2807_v32 = vld [vmem:[%s7568_s16 + $0x58] sm:$0xff] }
 0x191   : > { %4801 = vmatprep.subr.bf16.mxu1 %v4800_v40  ;;  %v4832_v35 = vpack.c.bf16 %v1520_v37, %v1519_v36  ;;  %v4835_v40 = vpack.c.bf16 %v1522_v39, %v1521_v38  ;;  %v2798_v36 = vld [vmem:[%s7568_s16 + $0x10] sm:$0xff]  ;;  %v2815_v38 = vld [vmem:[%s7568_s16 + $0x98] sm:$0xff] }
 0x192   : > { %4771 = vmatpush3.bf16.msra.mxu0 %v4770_v46  ;;  %v3945_v46 = vld [vmem:[%s8102_s2] ss:$0 sm:$0xff]  ;;  %v2806_v37 = vld [vmem:[%s7568_s16 + $0x50] sm:$0xff]  ;;  %v2823_v39 = vld [vmem:[%s7568_s16 + $0xd8] sm:$0xff] }
 0x193   : > { %4773 = vmatprep.subr.bf16.mxu0 %v4772_v48 }
 0x194   : > { %4803 = vmatpush3.bf16.msra.mxu1 %v4802_v47 }
 0x195   : > { %4805 = vmatprep.subr.bf16.mxu1 %v4804_v53 }
 0x196   : > { %4775 = vmatpush3.bf16.msra.mxu0 %v4774_v60 }
 0x197   : > { %4777 = vmatprep.subr.bf16.mxu0 %v4776_v63 }
 0x198   : > { %4807 = vmatpush3.bf16.msra.mxu1 %v4806_v62 }
 0x199   : > { %4809 = vmatprep.subr.bf16.mxu1 %v4808_v3  ;;  %v4840_v3 = vpack.c.bf16 %v2588_v1, %v2584_v0 }
 0x19a   : > { %4779 = vmatpush3.bf16.msra.mxu0 %v4778_v9  ;;  %v4844_v9 = vpack.c.bf16 %v2596_v7, %v2592_v5  ;;  %v2870_v5 = vld [vmem:[%s7568_s16 + $0x250] sm:$0xff] }
 0x19b   : > { %4781 = vmatprep.subr.bf16.mxu0 %v4780_v58  ;;  %v2595_v58 = vld [vmem:[%s8103_s3 + $0x60] sm:$0xff] }
 0x19c   : > { %4811 = vmatpush3.bf16.msra.mxu1 %v4810_v10  ;;  %v2591_v10 = vld [vmem:[%s8103_s3 + $0x40] sm:$0xff] }
 0x19d   : > { %4813 = vmatprep.subr.bf16.mxu1 %v4812_v15  ;;  %v4846_v15 = vpack.c.bf16 %v2595_v58, %v2591_v10  ;;  %v4982_v10 = vpack.c.bf16 %v2870_v5, %v2862_v4 }
 0x19e   : > { %4783 = vmatpush3.bf16.msra.mxu0 %v4782_v17  ;;  %v2603_v17 = vld [vmem:[%s8103_s3 + $0xa0] sm:$0xff] }
 0x19f   : > { %4816 = vmatprep.subr.bf16.mxu0 %v5341_v22 }
 0x1a0   : > { %4815 = vmatpush3.bf16.msra.mxu1 %v4814_v18  ;;  %v4850_v18 = vpack.c.bf16 %v2603_v17, %v2599_v14  ;;  %v4986_v14 = vpack.c.bf16 %v2886_v13, %v2878_v11 }
 0x1a1   : > { %2438 = vmatmul.mubr.f32.vlgmr.msra.gmra.mrb[10].mxu0 %v7286_v54  ;;  %v4823_v54 = vpack.c.bf16 %v1514_v28, %v1513_v27  ;;  %4841 = vmatprep.subr.bf16.mxu1 %v4840_v3 }
 0x1a2   : > { %4818 = vmatpush3.bf16.msra.mxu0 %v4817_v21  ;;  %4429 = vmatprep.mubr.msk.f32.mxu0 %vm5342_vm0, %v5343_v29  ;;  %v2590_v21 = vld [vmem:[%s8103_s3 + $0x38] sm:$0xff] }
 0x1a3   : > { %2508 = vmatmul.mubr.f32.vlgmr.msra.gmra.mrb[10].mxu1 %v7295_v6  ;;  %4819 = vmatprep.subr.bf16.mxu0 %v5341_v22  ;;  %v1515_v6 = vld [vmem:[%s8101_s1 + $0xc30] sm:$0xff]  ;;  %v4852_v24 = vpack.c.bf16 %v2590_v21, %v2586_v20  ;;  %v2911_v20 = vld [vmem:[%s7568_s16 + $0x398] sm:$0xff] }
 0x1a4   : > { %2714 = vmatprep.mubr.f32.mxu1 %v5343_v29  ;;  %v4826_v31 = vpack.c.bf16 %v1516_v30, %v1515_v6  ;;  %4843 = vmatpush1.bf16.msra.mxu1 %v4842_v8  ;;  %v2887_v8 = vld [vmem:[%s7568_s16 + $0x2d8] sm:$0xff] }
 0x1a5   : > { %4845 = vmatprep.subr.bf16.mxu1 %v4844_v9  ;;  %v2919_v21 = vld [vmem:[%s7568_s16 + $0x3d8] sm:$0xff] }
 0x1a6   : > { %4821 = vmatpush3.bf16.msra.mxu0 %v4820_v25 }
 0x1a7   : > { %4822 = vmatprep.subr.bf16.mxu0 %v5341_v22 }
 0x1a8   : > { %4847 = vmatpush1.bf16.msra.mxu1 %v4846_v15  ;;  %v2895_v15 = vld [vmem:[%s7568_s16 + $0x318] sm:$0xff] }
 0x1a9   : > { %4849 = vmatprep.subr.bf16.mxu1 %v4848_v16  ;;  %v2903_v16 = vld [vmem:[%s7568_s16 + $0x358] sm:$0xff] }
 0x1aa   : > { %4824 = vmatpush3.bf16.msra.mxu0 %v4823_v54  ;;  %v4988_v17 = vpack.c.bf16 %v2903_v16, %v2895_v15  ;;  %v3022_v15 = vld [vmem:[%s7568_s16 + $0x710] sm:$0xff] }
 0x1ab   : > { %4825 = vmatprep.subr.bf16.mxu0 %v5341_v22  ;;  %v3030_v16 = vld [vmem:[%s7568_s16 + $0x750] sm:$0xff] }
 0x1ac   : > { %4851 = vmatpush1.bf16.msra.mxu1 %v4850_v18  ;;  %v2894_v18 = vld [vmem:[%s7568_s16 + $0x310] sm:$0xff] }
 0x1ad   : > { %3947 = vmatprep.subr.msk.mxu1 %vm2637_vm1, %v2608_v19  ;;  %v2902_v19 = vld [vmem:[%s7568_s16 + $0x350] sm:$0xff] }
 0x1ae   : > { %4827 = vmatpush3.bf16.msra.mxu0 %v4826_v31 }
 0x1af   : > { %4828 = vmatprep.subr.bf16.mxu0 %v5341_v22 }
 0x1b0   : > { %3948 = vmatpush1.msk.msra.mxu1 %vm2637_vm1, %v2607_v23  ;;  %v4992_v23 = vpack.c.bf16 %v2919_v21, %v2911_v20 }
 0x1b1   : > { %4853 = vmatprep.subr.bf16.mxu1 %v4852_v24  ;;  %v2910_v24 = vld [vmem:[%s7568_s16 + $0x390] sm:$0xff] }
 0x1b2   : > { %4830 = vmatpush3.bf16.msra.mxu0 %v4829_v34  ;;  %v4964_v34 = vpack.c.bf16 %v2807_v32, %v2799_v33  ;;  %v2943_v33 = vld [vmem:[%s7568_s16 + $0x498] sm:$0xff] }
 0x1b3   : > { %4831 = vmatprep.subr.bf16.mxu0 %v5341_v22  ;;  %v2951_v32 = vld [vmem:[%s7568_s16 + $0x4d8] sm:$0xff] }
 0x1b6   : > { %4833 = vmatpush3.bf16.msra.mxu0 %v4832_v35  ;;  %v4966_v35 = vpack.c.bf16 %v2806_v37, %v2798_v36  ;;  %v5000_v36 = vpack.c.bf16 %v2951_v32, %v2943_v33  ;;  %v2942_v37 = vld [vmem:[%s7568_s16 + $0x490] sm:$0xff] }
 0x1b7   : > { %4834 = vmatprep.subr.bf16.mxu0 %v5341_v22  ;;  %v2593_v32 = vld [vmem:[%s8103_s3 + $0x50] sm:$0xff] }
 0x1ba   : > { %4836 = vmatpush3.bf16.msra.mxu0 %v4835_v40  ;;  %v4968_v40 = vpack.c.bf16 %v2823_v39, %v2815_v38  ;;  %v2959_v38 = vld [vmem:[%s7568_s16 + $0x518] sm:$0xff] }
 0x1bb   : > { %4837 = vmatprep.subr.bf16.mxu0 %v5341_v22  ;;  %v2967_v39 = vld [vmem:[%s7568_s16 + $0x558] sm:$0xff] }
 0x1be   : > { %4839 = vmatpush3.bf16.msra.mxu0 %v4838_v43  ;;  %v4970_v43 = vpack.c.bf16 %v2822_v42, %v2814_v41  ;;  %v5004_v41 = vpack.c.bf16 %v2967_v39, %v2959_v38  ;;  %v2958_v42 = vld [vmem:[%s7568_s16 + $0x510] sm:$0xff] }
 0x1bf   : > { %4965 = vmatprep.subr.bf16.mxu0 %v4964_v34  ;;  %v2601_v39 = vld [vmem:[%s8103_s3 + $0x90] sm:$0xff] }
 0x1c1   : > { %4430 = vmatmul.mubr.f32.vlgmr.msra.gmra.mrb[12].mxu0 %v3946_v44  ;;  %v2831_v44 = vld [vmem:[%s7568_s16 + $0x118] sm:$0xff] }
 0x1c2   : > { %4967 = vmatpush1.bf16.msra.mxu0 %v4966_v35  ;;  %v2950_v35 = vld [vmem:[%s7568_s16 + $0x4d0] sm:$0xff] }
 0x1c3   : > { %4969 = vmatprep.subr.bf16.mxu0 %v4968_v40  ;;  %v5002_v40 = vpack.c.bf16 %v2950_v35, %v2942_v37  ;;  %v2606_v37 = vld [vmem:[%s8103_s3 + $0xb8] sm:$0xff] }
 0x1c6   : > { %4971 = vmatpush1.bf16.msra.mxu0 %v4970_v43  ;;  %v2966_v43 = vld [vmem:[%s7568_s16 + $0x550] sm:$0xff] }
 0x1d4   : > { %v3992_v45 = vpop.f32.mrb[0].mxu0 }
 0x1d5   : > { %v3993_v47 = vpop.f32.mrb[1].mxu0 }
 0x1d6   : > { %v4027_v48 = vpop.f32.mrb[0].mxu1  ;;  %v3994_v50 = vadd.f32 %v3993_v47, %v3992_v45  ;;  %v2839_v45 = vld [vmem:[%s7568_s16 + $0x158] sm:$0xff]  ;;  %v2830_v47 = vld [vmem:[%s7568_s16 + $0x110] sm:$0xff] }
 0x1d7   : > { %v4028_v51 = vpop.f32.mrb[1].mxu1 }
 0x1d8   : > { %v4029_v52 = vadd.f32 %v4028_v51, %v4027_v48  ;;  %v1740_v53 = vadd.f32 %v3994_v50, %v3945_v46  ;;  %v4972_v46 = vpack.c.bf16 %v2839_v45, %v2831_v44  ;;  %v2838_v48 = vld [vmem:[%s7568_s16 + $0x150] sm:$0xff]  ;;  %v2847_v50 = vld [vmem:[%s7568_s16 + $0x198] sm:$0xff] }
 0x1d9   : > { %v4974_v51 = vpack.c.bf16 %v2838_v48, %v2830_v47  ;;  %v2975_v44 = vld [vmem:[%s7568_s16 + $0x598] sm:$0xff]  ;;  %v2974_v48 = vld [vmem:[%s7568_s16 + $0x590] sm:$0xff] }
 0x1da   : > { %v1810_v61 = vadd.f32 %v4029_v52, %v1740_v53  ;;  %v2855_v52 = vld [vmem:[%s7568_s16 + $0x1d8] sm:$0xff]  ;;  %4973 = vmatprep.subr.bf16.mxu0 %v4972_v46  ;;  %v5006_v46 = vpack.c.bf16 %v2966_v43, %v2958_v42  ;;  %v2805_v43 = vld [vmem:[%s7568_s16 + $0x48] sm:$0xff] }
 0x1db   : > { %v4976_v53 = vpack.c.bf16 %v2855_v52, %v2847_v50  ;;  %4975 = vmatpush1.bf16.msra.mxu0 %v4974_v51  ;;  %v2983_v45 = vld [vmem:[%s7568_s16 + $0x5d8] sm:$0xff]  ;;  %v2982_v50 = vld [vmem:[%s7568_s16 + $0x5d0] sm:$0xff] }
 0x1dc   : > { %v5008_v47 = vpack.c.bf16 %v2983_v45, %v2975_v44  ;;  %v2991_v52 = vld [vmem:[%s7568_s16 + $0x618] sm:$0xff]  ;;  %v2796_v44 = vld [vmem:[%s7568_s16] sm:$0xff] }
 0x1dd   : > { %4977 = vmatprep.subr.bf16.mxu0 %v4976_v53  ;;  %v2999_v53 = vld [vmem:[%s7568_s16 + $0x658] sm:$0xff]  ;;  %v2804_v45 = vld [vmem:[%s7568_s16 + $0x40] sm:$0xff] }
 0x1de   : > { %v2610_v42 = vld [vmem:[%s8103_s3 + $0xd8] sm:$0x3] }
 0x1f4   : > { %v4062_v55 = vpop.f32.mrb[2].mxu0 }
 0x1f5   : > { %v4063_v56 = vpop.f32.mrb[3].mxu0 }
 0x1f6   : > { %v4097_v57 = vpop.f32.mrb[2].mxu1  ;;  %v4064_v59 = vadd.f32 %v4063_v56, %v4062_v55  ;;  %v2854_v55 = vld [vmem:[%s7568_s16 + $0x1d0] sm:$0xff] }
 0x1f7   : > { %v4098_v60 = vpop.f32.mrb[3].mxu1 }
 0x1f8   : > { %v4099_v62 = vadd.f32 %v4098_v60, %v4097_v57  ;;  %v1880_v63 = vadd.f32 %v4064_v59, %v1810_v61  ;;  %v2846_v61 = vld [vmem:[%s7568_s16 + $0x190] sm:$0xff]  ;;  %v2863_v57 = vld [vmem:[%s7568_s16 + $0x218] sm:$0xff] }
 0x1f9   : > { %v2871_v59 = vld [vmem:[%s7568_s16 + $0x258] sm:$0xff]  ;;  %v4978_v1 = vpack.c.bf16 %v2854_v55, %v2846_v61 }
 0x1fa   : > { %v1950_v49 = vadd.f32 %v4099_v62, %v1880_v63  ;;  %v4980_v3 = vpack.c.bf16 %v2871_v59, %v2863_v57  ;;  %v5010_v59 = vpack.c.bf16 %v2982_v50, %v2974_v48  ;;  %v2609_v48 = vld [vmem:[%s8103_s3 + $0xd0] sm:$0x3] }
 0x1fb   : > { %4979 = vmatpush1.bf16.msra.mxu0 %v4978_v1 }
 0x1fc   : > { %4981 = vmatprep.subr.bf16.mxu0 %v4980_v3  ;;  %v3015_v3 = vld [vmem:[%s7568_s16 + $0x6d8] sm:$0xff] }
 0x1ff   : > { %4983 = vmatpush1.bf16.msra.mxu0 %v4982_v10  ;;  %v3023_v10 = vld [vmem:[%s7568_s16 + $0x718] sm:$0xff] }
 0x214   : > { %v4132_v22 = vpop.f32.mrb[4].mxu0 }
 0x215   : > { %v4133_v25 = vpop.f32.mrb[5].mxu0 }
 0x216   : > { %v4167_v27 = vpop.f32.mrb[4].mxu1  ;;  %v4134_v28 = vadd.f32 %v4133_v25, %v4132_v22  ;;  %v4990_v22 = vpack.c.bf16 %v2902_v19, %v2894_v18  ;;  %v2918_v25 = vld [vmem:[%s7568_s16 + $0x3d0] sm:$0xff] }
 0x217   : > { %v4168_v54 = vpop.f32.mrb[5].mxu1 }
 0x218   : > { %v4169_v6 = vadd.f32 %v4168_v54, %v4167_v27  ;;  %v2020_v30 = vadd.f32 %v4134_v28, %v1950_v49  ;;  %v2879_v49 = vld [vmem:[%s7568_s16 + $0x298] sm:$0xff]  ;;  %v4994_v54 = vpack.c.bf16 %v2918_v25, %v2910_v24  ;;  %v2585_v24 = vld [vmem:[%s8103_s3 + $0x10] sm:$0xff] }
 0x219   : > { %v4984_v58 = vpack.c.bf16 %v2887_v8, %v2879_v49  ;;  %v2927_v27 = vld [vmem:[%s7568_s16 + $0x418] sm:$0xff]  ;;  %v3006_v49 = vld [vmem:[%s7568_s16 + $0x690] sm:$0xff] }
 0x21a   : > { %v2090_v31 = vadd.f32 %v4169_v6, %v2020_v30  ;;  %v2935_v28 = vld [vmem:[%s7568_s16 + $0x458] sm:$0xff]  ;;  %v2926_v30 = vld [vmem:[%s7568_s16 + $0x410] sm:$0xff] }
 0x21b   : > { %4985 = vmatprep.subr.bf16.mxu0 %v4984_v58  ;;  %v4996_v6 = vpack.c.bf16 %v2935_v28, %v2927_v27  ;;  %v3014_v8 = vld [vmem:[%s7568_s16 + $0x6d0] sm:$0xff]  ;;  %v3031_v58 = vld [vmem:[%s7568_s16 + $0x758] sm:$0xff] }
 0x21c   : > { %4987 = vmatpush1.bf16.msra.mxu0 %v4986_v14  ;;  %v5018_v11 = vpack.c.bf16 %v3014_v8, %v3006_v49  ;;  %v5020_v13 = vpack.c.bf16 %v3031_v58, %v3023_v10  ;;  %v2589_v25 = vld [vmem:[%s8103_s3 + $0x30] sm:$0xff]  ;;  %v2594_v27 = vld [vmem:[%s8103_s3 + $0x58] sm:$0xff]  ;;  %v2860_v10 = vld [vmem:[%s7568_s16 + $0x200] sm:$0xff] }
 0x21d   : > { %4989 = vmatprep.subr.bf16.mxu0 %v4988_v17  ;;  %v2598_v28 = vld [vmem:[%s8103_s3 + $0x78] sm:$0xff]  ;;  %v2868_v58 = vld [vmem:[%s7568_s16 + $0x240] sm:$0xff] }
 0x21e   : > { %v4856_v33 = vpack.c.bf16 %v2598_v28, %v2594_v27  ;;  %v2908_v28 = vld [vmem:[%s7568_s16 + $0x380] sm:$0xff] }
 0x220   : > { %4991 = vmatpush1.bf16.msra.mxu0 %v4990_v22 }
 0x221   : > { %4993 = vmatprep.subr.bf16.mxu0 %v4992_v23 }
 0x224   : > { %4995 = vmatpush1.bf16.msra.mxu0 %v4994_v54 }
 0x225   : > { %4997 = vmatprep.subr.bf16.mxu0 %v4996_v6  ;;  %v4854_v6 = vpack.c.bf16 %v2589_v25, %v2585_v24  ;;  %v2917_v24 = vld [vmem:[%s7568_s16 + $0x3c8] sm:$0xff] }
 0x234   : > { %v4202_v56 = vpop.f32.mrb[6].mxu0 }
 0x235   : > { %v4203_v60 = vpop.f32.mrb[7].mxu0 }
 0x236   : > { %v4237_v62 = vpop.f32.mrb[6].mxu1  ;;  %v4204_v63 = vadd.f32 %v4203_v60, %v4202_v56 }
 0x237   : > { %v4238_v0 = vpop.f32.mrb[7].mxu1 }
 0x238   : > { %v4239_v2 = vadd.f32 %v4238_v0, %v4237_v62  ;;  %v2160_v7 = vadd.f32 %v4204_v63, %v2090_v31  ;;  %v2934_v31 = vld [vmem:[%s7568_s16 + $0x450] sm:$0xff]  ;;  %v5012_v62 = vpack.c.bf16 %v2999_v53, %v2991_v52  ;;  %v2812_v53 = vld [vmem:[%s7568_s16 + $0x80] sm:$0xff] }
 0x239   : > { %v4998_v34 = vpack.c.bf16 %v2934_v31, %v2926_v30  ;;  %v2990_v63 = vld [vmem:[%s7568_s16 + $0x610] sm:$0xff] }
 0x23a   : > { %v7592_v9 = vadd.f32 %v4239_v2, %v2160_v7  ;;  %v2998_v0 = vld [vmem:[%s7568_s16 + $0x650] sm:$0xff]  ;;  %v3007_v2 = vld [vmem:[%s7568_s16 + $0x698] sm:$0xff] }
 0x23b   : > { %4999 = vmatpush1.bf16.msra.mxu0 %v4998_v34  ;;  %v5014_v5 = vpack.c.bf16 %v2998_v0, %v2990_v63  ;;  %v5016_v7 = vpack.c.bf16 %v3015_v3, %v3007_v2  ;;  %v2597_v34 = vld [vmem:[%s8103_s3 + $0x70] sm:$0xff]  ;;  %v2845_v63 = vld [vmem:[%s7568_s16 + $0x188] sm:$0xff]  ;;  %v2844_v3 = vld [vmem:[%s7568_s16 + $0x180] sm:$0xff] }
 0x23c   : > { %5001 = vmatprep.subr.bf16.mxu0 %v5000_v36  ;;  %v2602_v36 = vld [vmem:[%s8103_s3 + $0x98] sm:$0xff]  ;;  %v4858_v35 = vpack.c.bf16 %v2597_v34, %v2593_v32  ;;  %v2853_v0 = vld [vmem:[%s7568_s16 + $0x1c8] sm:$0xff]  ;;  %v2924_v32 = vld [vmem:[%s7568_s16 + $0x400] sm:$0xff] }
 0x23d   : > { %v4860_v38 = vpack.c.bf16 %v2606_v37, %v2602_v36  ;;  %v4876_v2 = vpack.c.bf16 %v2853_v0, %v2845_v63  ;;  %v2932_v34 = vld [vmem:[%s7568_s16 + $0x440] sm:$0xff]  ;;  %v2941_v36 = vld [vmem:[%s7568_s16 + $0x488] sm:$0xff] }
 0x23e   : > { %v2949_v37 = vld [vmem:[%s7568_s16 + $0x4c8] sm:$0xff] }
 0x23f   : > { %5003 = vmatpush1.bf16.msra.mxu0 %v5002_v40  ;;  %v2605_v40 = vld [vmem:[%s8103_s3 + $0xb0] sm:$0xff] }
 0x240   : > { %5005 = vmatprep.subr.bf16.mxu0 %v5004_v41  ;;  %v4862_v41 = vpack.c.bf16 %v2605_v40, %v2601_v39  ;;  %v2940_v39 = vld [vmem:[%s7568_s16 + $0x480] sm:$0xff] }
 0x241   : > { %v2948_v40 = vld [vmem:[%s7568_s16 + $0x4c0] sm:$0xff] }
 0x243   : > { %5007 = vmatpush1.bf16.msra.mxu0 %v5006_v46  ;;  %v2813_v46 = vld [vmem:[%s7568_s16 + $0x88] sm:$0xff] }
 0x244   : > { %5009 = vmatprep.subr.bf16.mxu0 %v5008_v47  ;;  %v2821_v47 = vld [vmem:[%s7568_s16 + $0xc8] sm:$0xff] }
 0x245   : > { %v4868_v52 = vpack.c.bf16 %v2821_v47, %v2813_v46  ;;  %v2973_v46 = vld [vmem:[%s7568_s16 + $0x588] sm:$0xff] }
 0x246   : > { %v2981_v47 = vld [vmem:[%s7568_s16 + $0x5c8] sm:$0xff] }
 0x247   : > { %5011 = vmatpush1.bf16.msra.mxu0 %v5010_v59 }
 0x248   : > { %5013 = vmatprep.subr.bf16.mxu0 %v5012_v62  ;;  %v2836_v62 = vld [vmem:[%s7568_s16 + $0x140] sm:$0xff] }
 0x24b   : > { %5015 = vmatpush1.bf16.msra.mxu0 %v5014_v5  ;;  %v2861_v5 = vld [vmem:[%s7568_s16 + $0x208] sm:$0xff] }
 0x24c   : > { %5017 = vmatprep.subr.bf16.mxu0 %v5016_v7  ;;  %v2869_v7 = vld [vmem:[%s7568_s16 + $0x248] sm:$0xff] }
 0x24d   : > { %v4880_v8 = vpack.c.bf16 %v2869_v7, %v2861_v5 }
 0x24f   : > { %5019 = vmatpush1.bf16.msra.mxu0 %v5018_v11  ;;  %v2877_v11 = vld [vmem:[%s7568_s16 + $0x288] sm:$0xff] }
 0x250   : > { %5021 = vmatprep.subr.bf16.mxu0 %v5020_v13  ;;  %v2885_v13 = vld [vmem:[%s7568_s16 + $0x2c8] sm:$0xff] }
 0x254   : > { %v4272_v51 = vpop.f32.mrb[8].mxu0 }
 0x255   : > { %v4273_v61 = vpop.f32.mrb[9].mxu0 }
 0x256   : > { %v4307_v55 = vpop.f32.mrb[8].mxu1  ;;  %v4274_v56 = vadd.f32 %v4273_v61, %v4272_v51  ;;  %v4866_v51 = vpack.c.bf16 %v2804_v45, %v2796_v44  ;;  %v2820_v61 = vld [vmem:[%s7568_s16 + $0xc0] sm:$0xff] }
 0x257   : > { %v4308_v57 = vpop.f32.mrb[9].mxu1  ;;  %v2956_v44 = vld [vmem:[%s7568_s16 + $0x500] sm:$0xff] }
 0x258   : > { %v4309_v60 = vadd.f32 %v4308_v57, %v4307_v55  ;;  %v2300_v1 = vadd.f32 %v4274_v56, %v7592_v9  ;;  %v5022_v9 = vpack.c.bf16 %v3030_v16, %v3022_v15  ;;  %v2829_v55 = vld [vmem:[%s7568_s16 + $0x108] sm:$0xff]  ;;  %v4870_v57 = vpack.c.bf16 %v2820_v61, %v2812_v53  ;;  %v2964_v45 = vld [vmem:[%s7568_s16 + $0x540] sm:$0xff] }
 0x259   : > { %v2837_v56 = vld [vmem:[%s7568_s16 + $0x148] sm:$0xff]  ;;  %v4882_v15 = vpack.c.bf16 %v2868_v58, %v2860_v10  ;;  %v4884_v16 = vpack.c.bf16 %v2885_v13, %v2877_v11  ;;  %v3039_v13 = vld [vmem:[%s7568_s16 + $0x798] sm:$0xff] }
 0x25a   : > { %v2370_v4 = vadd.f32 %v4309_v60, %v2300_v1  ;;  %5023 = vmatpush1.bf16.msra.mxu0 %v5022_v9  ;;  %v4872_v59 = vpack.c.bf16 %v2837_v56, %v2829_v55  ;;  %v2828_v60 = vld [vmem:[%s7568_s16 + $0x100] sm:$0xff]  ;;  %v2989_v53 = vld [vmem:[%s7568_s16 + $0x608] sm:$0xff] }
 0x25b   : > { %v4874_v1 = vpack.c.bf16 %v2836_v62, %v2828_v60  ;;  %v2876_v9 = vld [vmem:[%s7568_s16 + $0x280] sm:$0xff]  ;;  %v2997_v61 = vld [vmem:[%s7568_s16 + $0x648] sm:$0xff] }
 0x25c   : > { %v4912_v56 = vpack.c.bf16 %v2997_v61, %v2989_v53  ;;  %v3005_v60 = vld [vmem:[%s7568_s16 + $0x688] sm:$0xff]  ;;  %v3070_v53 = vld [vmem:[%s7568_s16 + $0x890] sm:$0xff] }
 0x25d   : > { %v3013_v62 = vld [vmem:[%s7568_s16 + $0x6c8] sm:$0xff]  ;;  %v3078_v61 = vld [vmem:[%s7568_s16 + $0x8d0] sm:$0xff] }
 0x25e   : > { %v4916_v0 = vpack.c.bf16 %v3013_v62, %v3005_v60  ;;  %v3037_v58 = vld [vmem:[%s7568_s16 + $0x788] sm:$0xff]  ;;  %v5034_v62 = vpack.c.bf16 %v3078_v61, %v3070_v53  ;;  %v3151_v61 = vld [vmem:[%s7568_s16 + $0xb18] sm:$0xff] }
 0x25f   : > { %v3045_v11 = vld [vmem:[%s7568_s16 + $0x7c8] sm:$0xff] }
 0x260   : > { %v3157_v53 = vld [vmem:[%s7568_s16 + $0xb48] sm:$0xff] }
 0x274   : > { %v4342_v14 = vpop.f32.mrb[10].mxu0 }
 0x275   : > { %v4343_v17 = vpop.f32.mrb[11].mxu0 }
 0x276   : > { %v4377_v18 = vpop.f32.mrb[10].mxu1  ;;  %v4344_v19 = vadd.f32 %v4343_v17, %v4342_v14  ;;  %v2884_v14 = vld [vmem:[%s7568_s16 + $0x2c0] sm:$0xff]  ;;  %v2893_v17 = vld [vmem:[%s7568_s16 + $0x308] sm:$0xff] }
 0x277   : > { %v4378_v20 = vpop.f32.mrb[11].mxu1 }
 0x278   : > { %v4379_v21 = vadd.f32 %v4378_v20, %v4377_v18  ;;  %v2440_v22 = vadd.f32 %v4344_v19, %v2370_v4  ;;  %v2852_v4 = vld [vmem:[%s7568_s16 + $0x1c0] sm:$0xff]  ;;  %v2901_v18 = vld [vmem:[%s7568_s16 + $0x348] sm:$0xff]  ;;  %v4886_v19 = vpack.c.bf16 %v2884_v14, %v2876_v9 }
 0x279   : > { %v4878_v49 = vpack.c.bf16 %v2852_v4, %v2844_v3  ;;  %v4888_v20 = vpack.c.bf16 %v2901_v18, %v2893_v17  ;;  %v3021_v3 = vld [vmem:[%s7568_s16 + $0x708] sm:$0xff]  ;;  %v3036_v9 = vld [vmem:[%s7568_s16 + $0x780] sm:$0xff] }
 0x27a   : > { %v2510_v23 = vadd.f32 %v4379_v21, %v2440_v22  ;;  %v2892_v21 = vld [vmem:[%s7568_s16 + $0x300] sm:$0xff]  ;;  %v3029_v4 = vld [vmem:[%s7568_s16 + $0x748] sm:$0xff] }
 0x27b   : > { %v2900_v22 = vld [vmem:[%s7568_s16 + $0x340] sm:$0xff]  ;;  %v4920_v7 = vpack.c.bf16 %v3029_v4, %v3021_v3  ;;  %v3086_v4 = vld [vmem:[%s7568_s16 + $0x910] sm:$0xff] }
 0x27c   : > { %v4890_v25 = vpack.c.bf16 %v2900_v22, %v2892_v21  ;;  %v3044_v14 = vld [vmem:[%s7568_s16 + $0x7c0] sm:$0xff]  ;;  %v3053_v22 = vld [vmem:[%s7568_s16 + $0x808] sm:$0xff] }
 0x27d   : > { %v4926_v18 = vpack.c.bf16 %v3044_v14, %v3036_v9  ;;  %v3100_v9 = vld [vmem:[%s7568_s16 + $0x980] sm:$0xff] }
 0x27e   : > { %v3108_v14 = vld [vmem:[%s7568_s16 + $0x9c0] sm:$0xff] }
 0x294   : > { %v2579_v54 = vpop.f32.mrb[12].mxu0 }
 0x295   : > { %v2580_v30 = vadd.f32 %v2579_v54, %v2510_v23  ;;  %v4431_v31 = vpop.f32.mrb[13].mxu0  ;;  %v2909_v23 = vld [vmem:[%s7568_s16 + $0x388] sm:$0xff]  ;;  %v2916_v54 = vld [vmem:[%s7568_s16 + $0x3c0] sm:$0xff] }
 0x296   : > { %v4892_v27 = vpack.c.bf16 %v2917_v24, %v2909_v23  ;;  %v4894_v31 = vpack.c.bf16 %v2916_v54, %v2908_v28  ;;  %v3061_v23 = vld [vmem:[%s7568_s16 + $0x848] sm:$0xff]  ;;  %v3055_v24 = vld [vmem:[%s7568_s16 + $0x818] sm:$0xff]  ;;  %v2615_v54 = vsub.s32 0, %v6341_v12 }
 0x297   : > { %3949 = vmatmul.mubr.msk.f32.vlgmr.msra.gmra.mrb[12].mxu1 %vm2633_vm2, %v2580_v30 }
 0x298   : > { %4855 = vmatpush1.bf16.msra.mxu1 %v4854_v6  ;;  %2785 = vmatprep.mubr.f32.mxu1 %v5343_v29  ;;  %v2797_v29 = vld [vmem:[%s7568_s16 + $0x8] sm:$0xff] }
 0x299   : > { %4857 = vmatprep.subr.bf16.mxu1 %v4856_v33  ;;  %v4864_v50 = vpack.c.bf16 %v2805_v43, %v2797_v29  ;;  %v2925_v6 = vld [vmem:[%s7568_s16 + $0x408] sm:$0xff]  ;;  %v4902_v29 = vpack.c.bf16 %v2948_v40, %v2940_v39  ;;  %v3062_v39 = vld [vmem:[%s7568_s16 + $0x850] sm:$0xff] }
 0x29a   : > { %v3069_v40 = vld [vmem:[%s7568_s16 + $0x888] sm:$0xff] }
 0x29c   : > { %4859 = vmatpush1.bf16.msra.mxu1 %v4858_v35  ;;  %v4898_v35 = vpack.c.bf16 %v2932_v34, %v2924_v32  ;;  %v3052_v34 = vld [vmem:[%s7568_s16 + $0x800] sm:$0xff] }
 0x29d   : > { %4861 = vmatprep.subr.bf16.mxu1 %v4860_v38  ;;  %v4900_v38 = vpack.c.bf16 %v2949_v37, %v2941_v36  ;;  %v3060_v36 = vld [vmem:[%s7568_s16 + $0x840] sm:$0xff] }
 0x2a0   : > { %4863 = vmatpush1.bf16.msra.mxu1 %v4862_v41  ;;  %v2957_v41 = vld [vmem:[%s7568_s16 + $0x508] sm:$0xff] }
 0x2a1   : > { %3950 = vmatprep.subr.msk.mxu1 %vm2637_vm1, %v2610_v42  ;;  %v2965_v42 = vld [vmem:[%s7568_s16 + $0x548] sm:$0xff] }
 0x2a2   : > { %v4904_v43 = vpack.c.bf16 %v2965_v42, %v2957_v41  ;;  %v3077_v42 = vld [vmem:[%s7568_s16 + $0x8c8] sm:$0xff] }
 0x2a4   : > { %3951 = vmatpush1.msk.msra.mxu1 %vm2637_vm1, %v2609_v48  ;;  %v4906_v48 = vpack.c.bf16 %v2964_v45, %v2956_v44  ;;  %v4930_v45 = vpack.c.bf16 %v3060_v36, %v3052_v34 }
 0x2a5   : > { %3952 = vmatmul.mubr.msk.f32.vlgmr.msra.gmra.mrb[14].mxu1 %vm2633_vm2, %v2580_v30  ;;  %4865 = vmatprep.subr.bf16.mxu1 %v4864_v50  ;;  %v2933_v30 = vld [vmem:[%s7568_s16 + $0x448] sm:$0xff]  ;;  %v4908_v50 = vpack.c.bf16 %v2981_v47, %v2973_v46  ;;  %v3068_v47 = vld [vmem:[%s7568_s16 + $0x880] sm:$0xff] }
 0x2a6   : > { %4867 = vmatpush1.bf16.msra.mxu1 %v4866_v51  ;;  %v4896_v33 = vpack.c.bf16 %v2933_v30, %v2925_v6  ;;  %v2972_v51 = vld [vmem:[%s7568_s16 + $0x580] sm:$0xff]  ;;  %v2619_v30 = vsub.s32 1, %v6341_v12 }
 0x2a7   : > { %4869 = vmatprep.subr.bf16.mxu1 %v4868_v52  ;;  %v2980_v52 = vld [vmem:[%s7568_s16 + $0x5c0] sm:$0xff] }
 0x2a8   : > { %v4910_v55 = vpack.c.bf16 %v2980_v52, %v2972_v51  ;;  %v7750_v6 = vld [vmem:[%s8104_s4] sm:$0xf]  ;;  %v4932_v51 = vpack.c.bf16 %v3077_v42, %v3069_v40  ;;  %v3135_v40 = vld [vmem:[%s7568_s16 + $0xa98] sm:$0xff] }
 0x2aa   : > { %4871 = vmatpush1.bf16.msra.mxu1 %v4870_v57  ;;  %v2988_v57 = vld [vmem:[%s7568_s16 + $0x600] sm:$0xff] }
 0x2ab   : > { %4873 = vmatprep.subr.bf16.mxu1 %v4872_v59  ;;  %v2996_v59 = vld [vmem:[%s7568_s16 + $0x640] sm:$0xff] }
 0x2ac   : > { %v4914_v63 = vpack.c.bf16 %v2996_v59, %v2988_v57  ;;  %v3087_v57 = vld [vmem:[%s7568_s16 + $0x918] sm:$0xff] }
 0x2ad   : > { %v3095_v59 = vld [vmem:[%s7568_s16 + $0x958] sm:$0xff] }
 0x2ae   : > { %4875 = vmatpush1.bf16.msra.mxu1 %v4874_v1  ;;  %v3004_v1 = vld [vmem:[%s7568_s16 + $0x680] sm:$0xff]  ;;  %v5036_v3 = vpack.c.bf16 %v3095_v59, %v3087_v57 }
 0x2af   : > { %4877 = vmatprep.subr.bf16.mxu1 %v4876_v2  ;;  %v3012_v2 = vld [vmem:[%s7568_s16 + $0x6c0] sm:$0xff] }
 0x2b0   : > { %v4918_v5 = vpack.c.bf16 %v3012_v2, %v3004_v1  ;;  %v3092_v1 = vld [vmem:[%s7568_s16 + $0x940] sm:$0xff] }
 0x2b2   : > { %4879 = vmatpush1.bf16.msra.mxu1 %v4878_v49  ;;  %v3020_v49 = vld [vmem:[%s7568_s16 + $0x700] sm:$0xff] }
 0x2b3   : > { %4881 = vmatprep.subr.bf16.mxu1 %v4880_v8  ;;  %v3028_v8 = vld [vmem:[%s7568_s16 + $0x740] sm:$0xff] }
 0x2b4   : > { %v4922_v10 = vpack.c.bf16 %v3028_v8, %v3020_v49  ;;  %v3109_v49 = vld [vmem:[%s7568_s16 + $0x9c8] sm:$0xff]  ;;  %v3103_v8 = vld [vmem:[%s7568_s16 + $0x998] sm:$0xff] }
 0x2b6   : > { %4883 = vmatpush1.bf16.msra.mxu1 %v4882_v15  ;;  %v4924_v15 = vpack.c.bf16 %v3045_v11, %v3037_v58 }
 0x2b7   : > { %4885 = vmatprep.subr.bf16.mxu1 %v4884_v16  ;;  %v3047_v16 = vld [vmem:[%s7568_s16 + $0x7d8] sm:$0xff] }
 0x2b8   : > { %v5024_v17 = vpack.c.bf16 %v3047_v16, %v3039_v13 }
 0x2ba   : > { %4887 = vmatpush1.bf16.msra.mxu1 %v4886_v19  ;;  %v3038_v19 = vld [vmem:[%s7568_s16 + $0x790] sm:$0xff]  ;;  %5025 = vmatprep.subr.bf16.mxu0 %v5024_v17 }
 0x2bb   : > { %4889 = vmatprep.subr.bf16.mxu1 %v4888_v20  ;;  %v3046_v20 = vld [vmem:[%s7568_s16 + $0x7d0] sm:$0xff] }
 0x2bc   : > { %v5026_v21 = vpack.c.bf16 %v3046_v20, %v3038_v19  ;;  %v3110_v19 = vld [vmem:[%s7568_s16 + $0x9d0] sm:$0xff]  ;;  %v3117_v20 = vld [vmem:[%s7568_s16 + $0xa08] sm:$0xff] }
 0x2be   : > { %4891 = vmatpush1.bf16.msra.mxu1 %v4890_v25  ;;  %5027 = vmatpush1.bf16.msra.mxu0 %v5026_v21  ;;  %v4928_v25 = vpack.c.bf16 %v3061_v23, %v3053_v22  ;;  %v3125_v22 = vld [vmem:[%s7568_s16 + $0xa48] sm:$0xff]  ;;  %v3119_v23 = vld [vmem:[%s7568_s16 + $0xa18] sm:$0xff] }
 0x2bf   : > { %4893 = vmatprep.subr.bf16.mxu1 %v4892_v27  ;;  %v3063_v27 = vld [vmem:[%s7568_s16 + $0x858] sm:$0xff]  ;;  %v4944_v36 = vpack.c.bf16 %v3125_v22, %v3117_v20 }
 0x2c0   : > { %v5028_v28 = vpack.c.bf16 %v3063_v27, %v3055_v24  ;;  %v3127_v24 = vld [vmem:[%s7568_s16 + $0xa58] sm:$0xff]  ;;  %v4942_v27 = vpack.c.bf16 %v3108_v14, %v3100_v9  ;;  %v3174_v9 = vld [vmem:[%s7568_s16 + $0xbd0] sm:$0xff]  ;;  %v3181_v14 = vld [vmem:[%s7568_s16 + $0xc08] sm:$0xff] }
 0x2c1   : > { %v3191_v20 = vld [vmem:[%s7568_s16 + $0xc58] sm:$0xff] }
 0x2c2   : > { %4895 = vmatpush1.bf16.msra.mxu1 %v4894_v31  ;;  %5029 = vmatprep.subr.bf16.mxu0 %v5028_v28  ;;  %v2616_v31 = vrot.slane %v7750_v6, %v2615_v54 }
 0x2c3   : > { %4897 = vmatprep.subr.bf16.mxu1 %v4896_v33  ;;  %v2620_v33 = vrot.slane %v7750_v6, %v2619_v30 }
 0x2c6   : > { %4899 = vmatpush1.bf16.msra.mxu1 %v4898_v35 }
 0x2c7   : > { %4901 = vmatprep.subr.bf16.mxu1 %v4900_v38  ;;  %v3054_v38 = vld [vmem:[%s7568_s16 + $0x810] sm:$0xff] }
 0x2c8   : > { %v5030_v46 = vpack.c.bf16 %v3062_v39, %v3054_v38  ;;  %v3133_v38 = vld [vmem:[%s7568_s16 + $0xa88] sm:$0xff] }
 0x2c9   : > { %v3141_v39 = vld [vmem:[%s7568_s16 + $0xac8] sm:$0xff] }
 0x2ca   : > { %4903 = vmatpush1.bf16.msra.mxu1 %v4902_v29  ;;  %v3071_v29 = vld [vmem:[%s7568_s16 + $0x898] sm:$0xff] }
 0x2cb   : > { %4905 = vmatprep.subr.bf16.mxu1 %v4904_v43  ;;  %v3079_v43 = vld [vmem:[%s7568_s16 + $0x8d8] sm:$0xff] }
 0x2cc   : > { %v5032_v52 = vpack.c.bf16 %v3079_v43, %v3071_v29  ;;  %v4948_v43 = vpack.c.bf16 %v3141_v39, %v3133_v38 }
 0x2ce   : > { %4907 = vmatpush1.bf16.msra.mxu1 %v4906_v48  ;;  %v3076_v48 = vld [vmem:[%s7568_s16 + $0x8c0] sm:$0xff] }
 0x2cf   : > { %4909 = vmatprep.subr.bf16.mxu1 %v4908_v50  ;;  %v4934_v60 = vpack.c.bf16 %v3076_v48, %v3068_v47  ;;  %v3134_v47 = vld [vmem:[%s7568_s16 + $0xa90] sm:$0xff] }
 0x2d2   : > { %4911 = vmatpush1.bf16.msra.mxu1 %v4910_v55  ;;  %v3085_v55 = vld [vmem:[%s7568_s16 + $0x908] sm:$0xff] }
 0x2d3   : > { %4913 = vmatprep.subr.bf16.mxu1 %v4912_v56  ;;  %v3093_v56 = vld [vmem:[%s7568_s16 + $0x948] sm:$0xff] }
 0x2d4   : > { %v4936_v2 = vpack.c.bf16 %v3093_v56, %v3085_v55  ;;  %v3159_v55 = vld [vmem:[%s7568_s16 + $0xb58] sm:$0xff] }
 0x2d6   : > { %4915 = vmatpush1.bf16.msra.mxu1 %v4914_v63  ;;  %v2627_v63 = vsub.s32 3, %v6341_v12 }
 0x2d7   : > { %4917 = vmatprep.subr.bf16.mxu1 %v4916_v0  ;;  %v3084_v0 = vld [vmem:[%s7568_s16 + $0x900] sm:$0xff] }
 0x2d8   : > { %v2628_v58 = vrot.slane %v7750_v6, %v2627_v63  ;;  %v4938_v11 = vpack.c.bf16 %v3092_v1, %v3084_v0  ;;  %v3150_v0 = vld [vmem:[%s7568_s16 + $0xb10] sm:$0xff]  ;;  %v5052_v1 = vpack.c.bf16 %v3159_v55, %v3151_v61  ;;  %v2816_v61 = vld [vmem:[%s7568_s16 + $0xa0] sm:$0xff] }
 0x2d9   : > { %v2824_v55 = vld [vmem:[%s7568_s16 + $0xe0] sm:$0xff] }
 0x2da   : > { %4919 = vmatpush1.bf16.msra.mxu1 %v4918_v5  ;;  %v3094_v5 = vld [vmem:[%s7568_s16 + $0x950] sm:$0xff] }
 0x2db   : > { %4921 = vmatprep.subr.bf16.mxu1 %v4920_v7  ;;  %v3101_v7 = vld [vmem:[%s7568_s16 + $0x988] sm:$0xff]  ;;  %v5038_v13 = vpack.c.bf16 %v3094_v5, %v3086_v4  ;;  %v3167_v5 = vld [vmem:[%s7568_s16 + $0xb98] sm:$0xff] }
 0x2dc   : > { %v3173_v4 = vld [vmem:[%s7568_s16 + $0xbc8] sm:$0xff] }
 0x2de   : > { %4923 = vmatpush1.bf16.msra.mxu1 %v4922_v10  ;;  %v3111_v10 = vld [vmem:[%s7568_s16 + $0x9d8] sm:$0xff] }
 0x2df   : > { %4925 = vmatprep.subr.bf16.mxu1 %v4924_v15  ;;  %v4940_v15 = vpack.c.bf16 %v3109_v49, %v3101_v7  ;;  %v5040_v16 = vpack.c.bf16 %v3111_v10, %v3103_v8  ;;  %v3175_v7 = vld [vmem:[%s7568_s16 + $0xbd8] sm:$0xff]  ;;  %v2623_v8 = vsub.s32 2, %v6341_v12 }
 0x2e1   : > { %v2624_v22 = vrot.slane %v7750_v6, %v2623_v8  ;;  %v2811_v6 = vld [vmem:[%s7568_s16 + $0x78] sm:$0xff] }
 0x2e2   : > { %4927 = vmatpush1.bf16.msra.mxu1 %v4926_v18  ;;  %v3102_v18 = vld [vmem:[%s7568_s16 + $0x990] sm:$0xff] }
 0x2e3   : > { %4929 = vmatprep.subr.bf16.mxu1 %v4928_v25  ;;  %v5042_v28 = vpack.c.bf16 %v3110_v19, %v3102_v18  ;;  %v3189_v18 = vld [vmem:[%s7568_s16 + $0xc48] sm:$0xff]  ;;  %v3183_v19 = vld [vmem:[%s7568_s16 + $0xc18] sm:$0xff] }
 0x36a   : > { %v2716_v32 = vpop.f32.mrb[12].mxu1 }
 0x36b   : > { %v2717_v37 = vadd.f32 %v2716_v32, %v2616_v31  ;;  %v2718_v35 = vpop.f32.mrb[13].mxu1  ;;  %v3116_v31 = vld [vmem:[%s7568_s16 + $0xa00] sm:$0xff]  ;;  %v3118_v32 = vld [vmem:[%s7568_s16 + $0xa10] sm:$0xff] }
 0x36c   : > { %v2719_v41 = vadd.f32 %v2718_v35, %v2620_v33  ;;  %v3124_v33 = vld [vmem:[%s7568_s16 + $0xa40] sm:$0xff]  ;;  %v3126_v35 = vld [vmem:[%s7568_s16 + $0xa50] sm:$0xff] }
 0x36d   : > { %v7771_v50 = vmax.f32 %v2717_v37, 0.0  ;;  %v5044_v37 = vpack.c.bf16 %v3127_v24, %v3119_v23  ;;  %v4946_v42 = vpack.c.bf16 %v3124_v33, %v3116_v31  ;;  %v5046_v29 = vpack.c.bf16 %v3126_v35, %v3118_v32  ;;  %v3190_v33 = vld [vmem:[%s7568_s16 + $0xc50] sm:$0xff]  ;;  %v2801_v32 = vld [vmem:[%s7568_s16 + $0x28] sm:$0xff] }
 0x36e   : > { %v7767_v44 = vmax.f32 %v2719_v41, 0.0  ;;  %v3143_v41 = vld [vmem:[%s7568_s16 + $0xad8] sm:$0xff]  ;;  %v4960_v24 = vpack.c.bf16 %v3189_v18, %v3181_v14  ;;  %v5060_v31 = vpack.c.bf16 %v3191_v20, %v3183_v19  ;;  %v2848_v19 = vld [vmem:[%s7568_s16 + $0x1a0] sm:$0xff] }
 0x36f   : > { %v5048_v48 = vpack.c.bf16 %v3143_v41, %v3135_v40  ;;  %v2800_v41 = vld [vmem:[%s7568_s16 + $0x20] sm:$0xff] }
 0x370   : > { %3306 = vmatprep.mubr.f32.mxu1 %v7767_v44  ;;  %3448 = vmatprep.mubr.f32.mxu0 %v7767_v44  ;;  %v2856_v20 = vld [vmem:[%s7568_s16 + $0x1e0] sm:$0xff] }
 0x371   : > { %3307 = vmatmul.mubr.f32.vlgmr.msra.gmra.mrb[16].mxu1 %v7771_v50  ;;  %3449 = vmatmul.mubr.f32.vlgmr.msra.gmra.mrb[14].mxu0 %v7771_v50 }
 0x372   : > { %4931 = vmatpush1.bf16.msra.mxu1 %v4930_v45  ;;  %5031 = vmatpush1.bf16.msra.mxu0 %v5030_v46  ;;  %v3132_v45 = vld [vmem:[%s7568_s16 + $0xa80] sm:$0xff] }
 0x373   : > { %4933 = vmatprep.subr.bf16.mxu1 %v4932_v51  ;;  %5033 = vmatprep.subr.bf16.mxu0 %v5032_v52  ;;  %v3140_v46 = vld [vmem:[%s7568_s16 + $0xac0] sm:$0xff]  ;;  %v3142_v51 = vld [vmem:[%s7568_s16 + $0xad0] sm:$0xff]  ;;  %v3149_v52 = vld [vmem:[%s7568_s16 + $0xb08] sm:$0xff] }
 0x374   : > { %v4950_v56 = vpack.c.bf16 %v3140_v46, %v3132_v45  ;;  %v5050_v57 = vpack.c.bf16 %v3142_v51, %v3134_v47  ;;  %v4952_v59 = vpack.c.bf16 %v3157_v53, %v3149_v52  ;;  %v2810_v45 = vld [vmem:[%s7568_s16 + $0x70] sm:$0xff]  ;;  %v2817_v46 = vld [vmem:[%s7568_s16 + $0xa8] sm:$0xff]  ;;  %v2827_v51 = vld [vmem:[%s7568_s16 + $0xf8] sm:$0xff] }
 0x375   : > { %v2825_v47 = vld [vmem:[%s7568_s16 + $0xe8] sm:$0xff] }
 0x376   : > { %4935 = vmatpush1.bf16.msra.mxu1 %v4934_v60  ;;  %5035 = vmatpush1.bf16.msra.mxu0 %v5034_v62  ;;  %v3148_v60 = vld [vmem:[%s7568_s16 + $0xb00] sm:$0xff] }
 0x377   : > { %4937 = vmatprep.subr.bf16.mxu1 %v4936_v2  ;;  %5037 = vmatprep.subr.bf16.mxu0 %v5036_v3  ;;  %v3156_v62 = vld [vmem:[%s7568_s16 + $0xb40] sm:$0xff]  ;;  %v3158_v2 = vld [vmem:[%s7568_s16 + $0xb50] sm:$0xff]  ;;  %v3165_v3 = vld [vmem:[%s7568_s16 + $0xb88] sm:$0xff] }
 0x378   : > { %v7797_v17 = vpop.f32.mrb[14].mxu1  ;;  %v4954_v49 = vpack.c.bf16 %v3156_v62, %v3148_v60  ;;  %v5054_v10 = vpack.c.bf16 %v3158_v2, %v3150_v0  ;;  %v2833_v60 = vld [vmem:[%s7568_s16 + $0x128] sm:$0xff]  ;;  %v2843_v2 = vld [vmem:[%s7568_s16 + $0x178] sm:$0xff] }
 0x379   : > { %v2789_v21 = vpop.f32.mrb[15].mxu1  ;;  %v2788_v38 = vadd.f32 %v7797_v17, %v2624_v22  ;;  %v2841_v62 = vld [vmem:[%s7568_s16 + $0x168] sm:$0xff] }
 0x37a   : > { %v2790_v25 = vadd.f32 %v2789_v21, %v2628_v58  ;;  %4939 = vmatpush1.bf16.msra.mxu1 %v4938_v11  ;;  %5039 = vmatpush1.bf16.msra.mxu0 %v5038_v13  ;;  %v4956_v58 = vpack.c.bf16 %v3173_v4, %v3165_v3  ;;  %v3164_v11 = vld [vmem:[%s7568_s16 + $0xb80] sm:$0xff]  ;;  %v5070_v3 = vpack.c.bf16 %v2824_v55, %v2816_v61  ;;  %v2905_v61 = vld [vmem:[%s7568_s16 + $0x368] sm:$0xff]  ;;  %v2899_v55 = vld [vmem:[%s7568_s16 + $0x338] sm:$0xff] }
 0x37b   : > { %4941 = vmatprep.subr.bf16.mxu1 %v4940_v15  ;;  %5041 = vmatprep.subr.bf16.mxu0 %v5040_v16  ;;  %v3172_v13 = vld [vmem:[%s7568_s16 + $0xbc0] sm:$0xff]  ;;  %v3166_v15 = vld [vmem:[%s7568_s16 + $0xb90] sm:$0xff]  ;;  %v5056_v16 = vpack.c.bf16 %v3175_v7, %v3167_v5  ;;  %v7864_v52 = vmax.f32 %v2788_v38, 0.0  ;;  %v5072_v5 = vpack.c.bf16 %v2841_v62, %v2833_v60 }
 0x37c   : > { %v7808_v34 = vmax.f32 %v2790_v25, 0.0  ;;  %v4958_v21 = vpack.c.bf16 %v3172_v13, %v3164_v11  ;;  %v5058_v23 = vpack.c.bf16 %v3174_v9, %v3166_v15  ;;  %v3180_v25 = vld [vmem:[%s7568_s16 + $0xc00] sm:$0xff]  ;;  %v2842_v11 = vld [vmem:[%s7568_s16 + $0x170] sm:$0xff]  ;;  %v2849_v13 = vld [vmem:[%s7568_s16 + $0x1a8] sm:$0xff] }
 0x37d   : > { %v2832_v7 = vld [vmem:[%s7568_s16 + $0x120] sm:$0xff]  ;;  %v2857_v15 = vld [vmem:[%s7568_s16 + $0x1e8] sm:$0xff]  ;;  %v2859_v9 = vld [vmem:[%s7568_s16 + $0x1f8] sm:$0xff] }
 0x37e   : > { %4943 = vmatpush1.bf16.msra.mxu1 %v4942_v27  ;;  %3953 = vmatprep.mubr.msk.f32.mxu1 %vm3238_vm3, %v7808_v34  ;;  %v3188_v27 = vld [vmem:[%s7568_s16 + $0xc40] sm:$0xff]  ;;  %v5076_v18 = vpack.c.bf16 %v2857_v15, %v2849_v13  ;;  %v2874_v38 = vld [vmem:[%s7568_s16 + $0x270] sm:$0xff] }
 0x37f   : > { %5043 = vmatpush1.bf16.msra.mxu0 %v5042_v28  ;;  %3954 = vmatprep.mubr.msk.f32.mxu0 %vm3238_vm3, %v7808_v34  ;;  %v3182_v28 = vld [vmem:[%s7568_s16 + $0xc10] sm:$0xff]  ;;  %v4962_v35 = vpack.c.bf16 %v3188_v27, %v3180_v25  ;;  %v2873_v25 = vld [vmem:[%s7568_s16 + $0x268] sm:$0xff]  ;;  %v2867_v27 = vld [vmem:[%s7568_s16 + $0x238] sm:$0xff] }
 0x380   : > { %4945 = vmatprep.subr.bf16.mxu1 %v4944_v36  ;;  %5045 = vmatprep.subr.bf16.mxu0 %v5044_v37  ;;  %v2809_v36 = vld [vmem:[%s7568_s16 + $0x68] sm:$0xff]  ;;  %v2803_v37 = vld [vmem:[%s7568_s16 + $0x38] sm:$0xff]  ;;  %v5062_v39 = vpack.c.bf16 %v3190_v33, %v3182_v28  ;;  %v2896_v62 = vld [vmem:[%s7568_s16 + $0x320] sm:$0xff] }
 0x381   : > { %v5064_v40 = vpack.c.bf16 %v2809_v36, %v2801_v32  ;;  %v2875_v28 = vld [vmem:[%s7568_s16 + $0x278] sm:$0xff]  ;;  %v2864_v36 = vld [vmem:[%s7568_s16 + $0x220] sm:$0xff] }
 0x382   : > { %4947 = vmatpush1.bf16.msra.mxu1 %v4946_v42  ;;  %v2808_v42 = vld [vmem:[%s7568_s16 + $0x60] sm:$0xff] }
 0x383   : > { %5047 = vmatpush1.bf16.msra.mxu0 %v5046_v29  ;;  %4949 = vmatprep.subr.bf16.mxu1 %v4948_v43  ;;  %v5164_v29 = vpack.c.bf16 %v2811_v6, %v2803_v37  ;;  %v2802_v43 = vld [vmem:[%s7568_s16 + $0x30] sm:$0xff]  ;;  %v5066_v17 = vpack.c.bf16 %v2808_v42, %v2800_v41  ;;  %v2872_v37 = vld [vmem:[%s7568_s16 + $0x260] sm:$0xff]  ;;  %v2883_v41 = vld [vmem:[%s7568_s16 + $0x2b8] sm:$0xff] }
 0x384   : > { %5049 = vmatprep.subr.bf16.mxu0 %v5048_v48  ;;  %v2819_v48 = vld [vmem:[%s7568_s16 + $0xb8] sm:$0xff]  ;;  %v5166_v53 = vpack.c.bf16 %v2810_v45, %v2802_v43  ;;  %v2866_v6 = vld [vmem:[%s7568_s16 + $0x230] sm:$0xff]  ;;  %v2912_v13 = vld [vmem:[%s7568_s16 + $0x3a0] sm:$0xff] }
 0x385   : > { %v5168_v0 = vpack.c.bf16 %v2827_v51, %v2819_v48  ;;  %v2891_v42 = vld [vmem:[%s7568_s16 + $0x2f8] sm:$0xff]  ;;  %v5182_v43 = vpack.c.bf16 %v2874_v38, %v2866_v6  ;;  %v2890_v51 = vld [vmem:[%s7568_s16 + $0x2f0] sm:$0xff]  ;;  %v2920_v15 = vld [vmem:[%s7568_s16 + $0x3e0] sm:$0xff] }
 0x386   : > { %4951 = vmatpush1.bf16.msra.mxu1 %v4950_v56  ;;  %v2818_v56 = vld [vmem:[%s7568_s16 + $0xb0] sm:$0xff]  ;;  %v5184_v48 = vpack.c.bf16 %v2891_v42, %v2883_v41 }
 0x387   : > { %5051 = vmatpush1.bf16.msra.mxu0 %v5050_v57  ;;  %4953 = vmatprep.subr.bf16.mxu1 %v4952_v59  ;;  %v5068_v57 = vpack.c.bf16 %v2825_v47, %v2817_v46  ;;  %v2826_v59 = vld [vmem:[%s7568_s16 + $0xf0] sm:$0xff]  ;;  %v2880_v46 = vld [vmem:[%s7568_s16 + $0x2a0] sm:$0xff] }
 0x388   : > { %5053 = vmatprep.subr.bf16.mxu0 %v5052_v1  ;;  %v2835_v1 = vld [vmem:[%s7568_s16 + $0x138] sm:$0xff]  ;;  %v5170_v4 = vpack.c.bf16 %v2826_v59, %v2818_v56  ;;  %v2888_v47 = vld [vmem:[%s7568_s16 + $0x2e0] sm:$0xff]  ;;  %v2946_v41 = vld [vmem:[%s7568_s16 + $0x4b0] sm:$0xff] }
 0x389   : > { %v2907_v56 = vld [vmem:[%s7568_s16 + $0x378] sm:$0xff] }
 0x38a   : > { %4955 = vmatpush1.bf16.msra.mxu1 %v4954_v49  ;;  %v2840_v49 = vld [vmem:[%s7568_s16 + $0x160] sm:$0xff] }
 0x38b   : > { %5055 = vmatpush1.bf16.msra.mxu0 %v5054_v10  ;;  %4957 = vmatprep.subr.bf16.mxu1 %v4956_v58  ;;  %v2834_v10 = vld [vmem:[%s7568_s16 + $0x130] sm:$0xff]  ;;  %v5172_v58 = vpack.c.bf16 %v2843_v2, %v2835_v1  ;;  %v5074_v14 = vpack.c.bf16 %v2840_v49, %v2832_v7  ;;  %v5188_v2 = vpack.c.bf16 %v2907_v56, %v2899_v55  ;;  %v2915_v7 = vld [vmem:[%s7568_s16 + $0x3b8] sm:$0xff] }
 0x38c   : > { %5057 = vmatprep.subr.bf16.mxu0 %v5056_v16  ;;  %v2851_v16 = vld [vmem:[%s7568_s16 + $0x1b8] sm:$0xff]  ;;  %v2898_v1 = vld [vmem:[%s7568_s16 + $0x330] sm:$0xff] }
 0x38d   : > { %v5176_v22 = vpack.c.bf16 %v2859_v9, %v2851_v16  ;;  %v2923_v49 = vld [vmem:[%s7568_s16 + $0x3f8] sm:$0xff]  ;;  %v2914_v16 = vld [vmem:[%s7568_s16 + $0x3b0] sm:$0xff] }
 0x38e   : > { %4959 = vmatpush1.bf16.msra.mxu1 %v4958_v21  ;;  %v2850_v21 = vld [vmem:[%s7568_s16 + $0x1b0] sm:$0xff]  ;;  %v5192_v9 = vpack.c.bf16 %v2923_v49, %v2915_v7 }
 0x38f   : > { %5059 = vmatpush1.bf16.msra.mxu0 %v5058_v23  ;;  %4961 = vmatprep.subr.bf16.mxu1 %v4960_v24  ;;  %v2858_v23 = vld [vmem:[%s7568_s16 + $0x1f0] sm:$0xff]  ;;  %v2865_v24 = vld [vmem:[%s7568_s16 + $0x228] sm:$0xff] }
 0x390   : > { %5061 = vmatprep.subr.bf16.mxu0 %v5060_v31  ;;  %v5078_v31 = vpack.c.bf16 %v2856_v20, %v2848_v19  ;;  %v5178_v33 = vpack.c.bf16 %v2858_v23, %v2850_v21  ;;  %v5080_v32 = vpack.c.bf16 %v2873_v25, %v2865_v24  ;;  %v2931_v19 = vld [vmem:[%s7568_s16 + $0x438] sm:$0xff]  ;;  %v5094_v21 = vpack.c.bf16 %v2920_v15, %v2912_v13  ;;  %v2928_v24 = vld [vmem:[%s7568_s16 + $0x420] sm:$0xff]  ;;  %v2962_v55 = vld [vmem:[%s7568_s16 + $0x530] sm:$0xff] }
 0x391   : > { %v2939_v20 = vld [vmem:[%s7568_s16 + $0x478] sm:$0xff]  ;;  %v2936_v25 = vld [vmem:[%s7568_s16 + $0x460] sm:$0xff]  ;;  %v2978_v7 = vld [vmem:[%s7568_s16 + $0x5b0] sm:$0xff] }
 0x392   : > { %4963 = vmatpush1.bf16.msra.mxu1 %v4962_v35  ;;  %v5180_v35 = vpack.c.bf16 %v2875_v28, %v2867_v27  ;;  %v2930_v27 = vld [vmem:[%s7568_s16 + $0x430] sm:$0xff]  ;;  %v5196_v28 = vpack.c.bf16 %v2939_v20, %v2931_v19  ;;  %v5098_v6 = vpack.c.bf16 %v2936_v25, %v2928_v24  ;;  %v2995_v13 = vld [vmem:[%s7568_s16 + $0x638] sm:$0xff] }
 0x393   : > { %5063 = vmatpush1.bf16.msra.mxu0 %v5062_v39  ;;  %5065 = vmatprep.subr.bf16.mxu1 %v5064_v40  ;;  %v2881_v39 = vld [vmem:[%s7568_s16 + $0x2a8] sm:$0xff]  ;;  %v3003_v15 = vld [vmem:[%s7568_s16 + $0x678] sm:$0xff]  ;;  %v2994_v19 = vld [vmem:[%s7568_s16 + $0x630] sm:$0xff] }
 0x394   : > { %5165 = vmatprep.subr.bf16.mxu0 %v5164_v29  ;;  %v2889_v40 = vld [vmem:[%s7568_s16 + $0x2e8] sm:$0xff]  ;;  %v5082_v29 = vpack.c.bf16 %v2872_v37, %v2864_v36  ;;  %v2947_v36 = vld [vmem:[%s7568_s16 + $0x4b8] sm:$0xff]  ;;  %v5212_v20 = vpack.c.bf16 %v3003_v15, %v2995_v13  ;;  %v3058_v15 = vld [vmem:[%s7568_s16 + $0x830] sm:$0xff] }
 0x395   : > { %3378 = vmatmul.mubr.f32.vlgmr.msra.gmra.mrb[16].mxu1 %v7864_v52  ;;  %v5084_v45 = vpack.c.bf16 %v2889_v40, %v2881_v39  ;;  %v2955_v37 = vld [vmem:[%s7568_s16 + $0x4f8] sm:$0xff]  ;;  %v2944_v39 = vld [vmem:[%s7568_s16 + $0x4a0] sm:$0xff] }
 0x396   : > { %3520 = vmatmul.mubr.f32.vlgmr.msra.gmra.mrb[14].mxu0 %v7864_v52  ;;  %5067 = vmatpush1.bf16.msra.mxu1 %v5066_v17  ;;  %v2882_v17 = vld [vmem:[%s7568_s16 + $0x2b0] sm:$0xff]  ;;  %v2952_v40 = vld [vmem:[%s7568_s16 + $0x4e0] sm:$0xff]  ;;  %v5200_v42 = vpack.c.bf16 %v2955_v37, %v2947_v36  ;;  %v3011_v24 = vld [vmem:[%s7568_s16 + $0x6b8] sm:$0xff] }
 0x397   : > { %3590 = vmatprep.mubr.f32.mxu1 %v7767_v44  ;;  %5167 = vmatpush1.bf16.msra.mxu0 %v5166_v53  ;;  %v2897_v53 = vld [vmem:[%s7568_s16 + $0x328] sm:$0xff]  ;;  %v5186_v59 = vpack.c.bf16 %v2890_v51, %v2882_v17  ;;  %v5102_v17 = vpack.c.bf16 %v2952_v40, %v2944_v39  ;;  %v3019_v25 = vld [vmem:[%s7568_s16 + $0x6f8] sm:$0xff]  ;;  %v3010_v36 = vld [vmem:[%s7568_s16 + $0x6b0] sm:$0xff] }
 0x398   : > { %3732 = vmatprep.mubr.f32.mxu0 %v7767_v44  ;;  %5069 = vmatprep.subr.bf16.mxu1 %v5068_v57  ;;  %v5174_v44 = vpack.c.bf16 %v2842_v11, %v2834_v10  ;;  %v5086_v57 = vpack.c.bf16 %v2888_v47, %v2880_v46  ;;  %v5088_v60 = vpack.c.bf16 %v2905_v61, %v2897_v53  ;;  %v2963_v46 = vld [vmem:[%s7568_s16 + $0x538] sm:$0xff]  ;;  %v2960_v53 = vld [vmem:[%s7568_s16 + $0x520] sm:$0xff] }
 0x399   : > { %5169 = vmatprep.subr.bf16.mxu0 %v5168_v0  ;;  %v2904_v0 = vld [vmem:[%s7568_s16 + $0x360] sm:$0xff]  ;;  %v2971_v47 = vld [vmem:[%s7568_s16 + $0x578] sm:$0xff]  ;;  %v5216_v37 = vpack.c.bf16 %v3019_v25, %v3011_v24  ;;  %v3082_v25 = vld [vmem:[%s7568_s16 + $0x8f0] sm:$0xff] }
 0x39a   : > { %5071 = vmatpush1.bf16.msra.mxu1 %v5070_v3  ;;  %v2906_v3 = vld [vmem:[%s7568_s16 + $0x370] sm:$0xff]  ;;  %v5090_v10 = vpack.c.bf16 %v2904_v0, %v2896_v62  ;;  %v2968_v61 = vld [vmem:[%s7568_s16 + $0x560] sm:$0xff]  ;;  %v5204_v56 = vpack.c.bf16 %v2971_v47, %v2963_v46  ;;  %v2979_v62 = vld [vmem:[%s7568_s16 + $0x5b8] sm:$0xff] }
 0x39b   : > { %5171 = vmatpush1.bf16.msra.mxu0 %v5170_v4  ;;  %5073 = vmatprep.subr.bf16.mxu1 %v5072_v5  ;;  %v2913_v4 = vld [vmem:[%s7568_s16 + $0x3a8] sm:$0xff]  ;;  %v2987_v0 = vld [vmem:[%s7568_s16 + $0x5f8] sm:$0xff]  ;;  %v3026_v46 = vld [vmem:[%s7568_s16 + $0x730] sm:$0xff] }
 0x39c   : > { %5173 = vmatprep.subr.bf16.mxu0 %v5172_v58  ;;  %v2921_v5 = vld [vmem:[%s7568_s16 + $0x3e8] sm:$0xff]  ;;  %v5190_v58 = vpack.c.bf16 %v2906_v3, %v2898_v1  ;;  %v5106_v1 = vpack.c.bf16 %v2968_v61, %v2960_v53  ;;  %v5208_v49 = vpack.c.bf16 %v2987_v0, %v2979_v62  ;;  %v3027_v39 = vld [vmem:[%s7568_s16 + $0x738] sm:$0xff]  ;;  %v3042_v62 = vld [vmem:[%s7568_s16 + $0x7b0] sm:$0xff] }
 0x39d   : > { %v5092_v11 = vpack.c.bf16 %v2921_v5, %v2913_v4  ;;  %v2976_v4 = vld [vmem:[%s7568_s16 + $0x5a0] sm:$0xff]  ;;  %v3035_v40 = vld [vmem:[%s7568_s16 + $0x778] sm:$0xff] }
 0x39e   : > { %5075 = vmatpush1.bf16.msra.mxu1 %v5074_v14  ;;  %v2922_v14 = vld [vmem:[%s7568_s16 + $0x3f0] sm:$0xff]  ;;  %v2984_v5 = vld [vmem:[%s7568_s16 + $0x5e0] sm:$0xff]  ;;  %v5220_v47 = vpack.c.bf16 %v3035_v40, %v3027_v39  ;;  %v3043_v53 = vld [vmem:[%s7568_s16 + $0x7b8] sm:$0xff] }
 0x39f   : > { %5175 = vmatpush1.bf16.msra.mxu0 %v5174_v44  ;;  %5077 = vmatprep.subr.bf16.mxu1 %v5076_v18  ;;  %v2929_v44 = vld [vmem:[%s7568_s16 + $0x428] sm:$0xff]  ;;  %v3051_v61 = vld [vmem:[%s7568_s16 + $0x7f8] sm:$0xff]  ;;  %v3090_v39 = vld [vmem:[%s7568_s16 + $0x930] sm:$0xff] }
 0x3a0   : > { %5177 = vmatprep.subr.bf16.mxu0 %v5176_v22  ;;  %v2937_v18 = vld [vmem:[%s7568_s16 + $0x468] sm:$0xff]  ;;  %v5194_v22 = vpack.c.bf16 %v2922_v14, %v2914_v16  ;;  %v5110_v16 = vpack.c.bf16 %v2984_v5, %v2976_v4  ;;  %v5224_v0 = vpack.c.bf16 %v3051_v61, %v3043_v53  ;;  %v3059_v4 = vld [vmem:[%s7568_s16 + $0x838] sm:$0xff]  ;;  %v3098_v40 = vld [vmem:[%s7568_s16 + $0x970] sm:$0xff] }
 0x3a1   : > { %v5096_v23 = vpack.c.bf16 %v2937_v18, %v2929_v44  ;;  %v2992_v44 = vld [vmem:[%s7568_s16 + $0x620] sm:$0xff]  ;;  %v3067_v5 = vld [vmem:[%s7568_s16 + $0x878] sm:$0xff]  ;;  %v3114_v53 = vld [vmem:[%s7568_s16 + $0x9f0] sm:$0xff] }
 0x3a2   : > { %5079 = vmatpush1.bf16.msra.mxu1 %v5078_v31  ;;  %v2938_v31 = vld [vmem:[%s7568_s16 + $0x470] sm:$0xff]  ;;  %v3000_v18 = vld [vmem:[%s7568_s16 + $0x660] sm:$0xff]  ;;  %v5228_v13 = vpack.c.bf16 %v3067_v5, %v3059_v4  ;;  %v3121_v61 = vld [vmem:[%s7568_s16 + $0xa28] sm:$0xff] }
 0x3a3   : > { %5179 = vmatpush1.bf16.msra.mxu0 %v5178_v33  ;;  %5081 = vmatprep.subr.bf16.mxu1 %v5080_v32  ;;  %v2945_v33 = vld [vmem:[%s7568_s16 + $0x4a8] sm:$0xff]  ;;  %v3130_v4 = vld [vmem:[%s7568_s16 + $0xa70] sm:$0xff] }
 0x3a4   : > { %5181 = vmatprep.subr.bf16.mxu0 %v5180_v35  ;;  %v2953_v32 = vld [vmem:[%s7568_s16 + $0x4e8] sm:$0xff]  ;;  %v5198_v35 = vpack.c.bf16 %v2938_v31, %v2930_v27  ;;  %v5114_v27 = vpack.c.bf16 %v3000_v18, %v2992_v44  ;;  %v3075_v18 = vld [vmem:[%s7568_s16 + $0x8b8] sm:$0xff] }
 0x3a5   : > { %v5100_v38 = vpack.c.bf16 %v2953_v32, %v2945_v33  ;;  %v3008_v33 = vld [vmem:[%s7568_s16 + $0x6a0] sm:$0xff]  ;;  %v3137_v5 = vld [vmem:[%s7568_s16 + $0xaa8] sm:$0xff] }
 0x3a6   : > { %5083 = vmatpush1.bf16.msra.mxu1 %v5082_v29  ;;  %v2954_v29 = vld [vmem:[%s7568_s16 + $0x4f0] sm:$0xff]  ;;  %v3016_v32 = vld [vmem:[%s7568_s16 + $0x6e0] sm:$0xff] }
 0x3a7   : > { %5183 = vmatpush1.bf16.msra.mxu0 %v5182_v43  ;;  %5085 = vmatprep.subr.bf16.mxu1 %v5084_v45  ;;  %v2961_v43 = vld [vmem:[%s7568_s16 + $0x528] sm:$0xff] }
 0x3a8   : > { %5185 = vmatprep.subr.bf16.mxu0 %v5184_v48  ;;  %v2969_v45 = vld [vmem:[%s7568_s16 + $0x568] sm:$0xff]  ;;  %v5202_v48 = vpack.c.bf16 %v2954_v29, %v2946_v41  ;;  %v5118_v41 = vpack.c.bf16 %v3016_v32, %v3008_v33  ;;  %v3091_v33 = vld [vmem:[%s7568_s16 + $0x938] sm:$0xff] }
 0x3a9   : > { %v5104_v51 = vpack.c.bf16 %v2969_v45, %v2961_v43  ;;  %v3024_v43 = vld [vmem:[%s7568_s16 + $0x720] sm:$0xff]  ;;  %v3099_v32 = vld [vmem:[%s7568_s16 + $0x978] sm:$0xff] }
 0x3aa   : > { %5087 = vmatpush1.bf16.msra.mxu1 %v5086_v57  ;;  %v2970_v57 = vld [vmem:[%s7568_s16 + $0x570] sm:$0xff]  ;;  %v3032_v45 = vld [vmem:[%s7568_s16 + $0x760] sm:$0xff] }
 0x3ab   : > { %5187 = vmatpush1.bf16.msra.mxu0 %v5186_v59  ;;  %5089 = vmatprep.subr.bf16.mxu1 %v5088_v60  ;;  %v2977_v59 = vld [vmem:[%s7568_s16 + $0x5a8] sm:$0xff] }
 0x3ac   : > { %5189 = vmatprep.subr.bf16.mxu0 %v5188_v2  ;;  %v2985_v60 = vld [vmem:[%s7568_s16 + $0x5e8] sm:$0xff]  ;;  %v5206_v2 = vpack.c.bf16 %v2970_v57, %v2962_v55  ;;  %v5122_v55 = vpack.c.bf16 %v3032_v45, %v3024_v43  ;;  %v3115_v43 = vld [vmem:[%s7568_s16 + $0x9f8] sm:$0xff] }
 0x3ad   : > { %v5108_v3 = vpack.c.bf16 %v2985_v60, %v2977_v59  ;;  %v3040_v59 = vld [vmem:[%s7568_s16 + $0x7a0] sm:$0xff] }
 0x3ae   : > { %5091 = vmatpush1.bf16.msra.mxu1 %v5090_v10  ;;  %v2986_v10 = vld [vmem:[%s7568_s16 + $0x5f0] sm:$0xff]  ;;  %v3048_v60 = vld [vmem:[%s7568_s16 + $0x7e0] sm:$0xff] }
 0x3af   : > { %5191 = vmatpush1.bf16.msra.mxu0 %v5190_v58  ;;  %5093 = vmatprep.subr.bf16.mxu1 %v5092_v11  ;;  %v2993_v58 = vld [vmem:[%s7568_s16 + $0x628] sm:$0xff] }
 0x3b0   : > { %5193 = vmatprep.subr.bf16.mxu0 %v5192_v9  ;;  %v3001_v11 = vld [vmem:[%s7568_s16 + $0x668] sm:$0xff]  ;;  %v5210_v9 = vpack.c.bf16 %v2986_v10, %v2978_v7  ;;  %v5126_v7 = vpack.c.bf16 %v3048_v60, %v3040_v59 }
 0x3b1   : > { %v5112_v14 = vpack.c.bf16 %v3001_v11, %v2993_v58  ;;  %v3056_v58 = vld [vmem:[%s7568_s16 + $0x820] sm:$0xff] }
 0x3b2   : > { %5095 = vmatpush1.bf16.msra.mxu1 %v5094_v21  ;;  %v3002_v21 = vld [vmem:[%s7568_s16 + $0x670] sm:$0xff]  ;;  %v3064_v11 = vld [vmem:[%s7568_s16 + $0x860] sm:$0xff] }
 0x3b3   : > { %5195 = vmatpush1.bf16.msra.mxu0 %v5194_v22  ;;  %5097 = vmatprep.subr.bf16.mxu1 %v5096_v23  ;;  %v3009_v22 = vld [vmem:[%s7568_s16 + $0x6a8] sm:$0xff]  ;;  %v5130_v44 = vpack.c.bf16 %v3064_v11, %v3056_v58 }
 0x3b4   : > { %5197 = vmatprep.subr.bf16.mxu0 %v5196_v28  ;;  %v3017_v23 = vld [vmem:[%s7568_s16 + $0x6e8] sm:$0xff]  ;;  %v5214_v28 = vpack.c.bf16 %v3002_v21, %v2994_v19  ;;  %v3083_v19 = vld [vmem:[%s7568_s16 + $0x8f8] sm:$0xff]  ;;  %v3072_v21 = vld [vmem:[%s7568_s16 + $0x8a0] sm:$0xff] }
 0x3b5   : > { %v5116_v31 = vpack.c.bf16 %v3017_v23, %v3009_v22  ;;  %v3080_v22 = vld [vmem:[%s7568_s16 + $0x8e0] sm:$0xff]  ;;  %v3074_v23 = vld [vmem:[%s7568_s16 + $0x8b0] sm:$0xff] }
 0x3b6   : > { %5099 = vmatpush1.bf16.msra.mxu1 %v5098_v6  ;;  %v3018_v6 = vld [vmem:[%s7568_s16 + $0x6f0] sm:$0xff] }
 0x3b7   : > { %5199 = vmatpush1.bf16.msra.mxu0 %v5198_v35  ;;  %5101 = vmatprep.subr.bf16.mxu1 %v5100_v38  ;;  %v3025_v35 = vld [vmem:[%s7568_s16 + $0x728] sm:$0xff] }
 0x3b8   : > { %5201 = vmatprep.subr.bf16.mxu0 %v5200_v42  ;;  %v3033_v38 = vld [vmem:[%s7568_s16 + $0x768] sm:$0xff]  ;;  %v5218_v42 = vpack.c.bf16 %v3018_v6, %v3010_v36  ;;  %v5134_v36 = vpack.c.bf16 %v3080_v22, %v3072_v21  ;;  %v3163_v21 = vld [vmem:[%s7568_s16 + $0xb78] sm:$0xff] }
 0x3b9   : > { %v5120_v29 = vpack.c.bf16 %v3033_v38, %v3025_v35  ;;  %v3088_v35 = vld [vmem:[%s7568_s16 + $0x920] sm:$0xff] }
 0x3ba   : > { %5103 = vmatpush1.bf16.msra.mxu1 %v5102_v17  ;;  %v3034_v17 = vld [vmem:[%s7568_s16 + $0x770] sm:$0xff]  ;;  %v3096_v38 = vld [vmem:[%s7568_s16 + $0x960] sm:$0xff] }
 0x3bb   : > { %5203 = vmatpush1.bf16.msra.mxu0 %v5202_v48  ;;  %5105 = vmatprep.subr.bf16.mxu1 %v5104_v51  ;;  %v3041_v48 = vld [vmem:[%s7568_s16 + $0x7a8] sm:$0xff]  ;;  %v5138_v45 = vpack.c.bf16 %v3096_v38, %v3088_v35 }
 0x3bc   : > { %5205 = vmatprep.subr.bf16.mxu0 %v5204_v56  ;;  %v3049_v51 = vld [vmem:[%s7568_s16 + $0x7e8] sm:$0xff]  ;;  %v5222_v56 = vpack.c.bf16 %v3034_v17, %v3026_v46  ;;  %v3112_v17 = vld [vmem:[%s7568_s16 + $0x9e0] sm:$0xff] }
 0x3bd   : > { %v5124_v57 = vpack.c.bf16 %v3049_v51, %v3041_v48  ;;  %v3106_v48 = vld [vmem:[%s7568_s16 + $0x9b0] sm:$0xff] }
 0x3be   : > { %5107 = vmatpush1.bf16.msra.mxu1 %v5106_v1  ;;  %v3050_v1 = vld [vmem:[%s7568_s16 + $0x7f0] sm:$0xff]  ;;  %v5242_v60 = vpack.c.bf16 %v3114_v53, %v3106_v48  ;;  %v3192_v53 = vld [vmem:[%s7568_s16 + $0xc60] sm:$0xff] }
 0x3bf   : > { %5207 = vmatpush1.bf16.msra.mxu0 %v5206_v2  ;;  %5109 = vmatprep.subr.bf16.mxu1 %v5108_v3  ;;  %v3057_v2 = vld [vmem:[%s7568_s16 + $0x828] sm:$0xff] }
 0x3c0   : > { %5209 = vmatprep.subr.bf16.mxu0 %v5208_v49  ;;  %v3065_v3 = vld [vmem:[%s7568_s16 + $0x868] sm:$0xff]  ;;  %v5226_v49 = vpack.c.bf16 %v3050_v1, %v3042_v62  ;;  %v3128_v1 = vld [vmem:[%s7568_s16 + $0xa60] sm:$0xff] }
 0x3c1   : > { %v5128_v10 = vpack.c.bf16 %v3065_v3, %v3057_v2  ;;  %v3122_v2 = vld [vmem:[%s7568_s16 + $0xa30] sm:$0xff] }
 0x3c2   : > { %5111 = vmatpush1.bf16.msra.mxu1 %v5110_v16  ;;  %v3066_v16 = vld [vmem:[%s7568_s16 + $0x870] sm:$0xff]  ;;  %v5246_v11 = vpack.c.bf16 %v3130_v4, %v3122_v2 }
 0x3c3   : > { %5211 = vmatpush1.bf16.msra.mxu0 %v5210_v9  ;;  %5113 = vmatprep.subr.bf16.mxu1 %v5112_v14  ;;  %v3073_v9 = vld [vmem:[%s7568_s16 + $0x8a8] sm:$0xff] }
 0x3c4   : > { %5213 = vmatprep.subr.bf16.mxu0 %v5212_v20  ;;  %v3081_v14 = vld [vmem:[%s7568_s16 + $0x8e8] sm:$0xff]  ;;  %v5230_v20 = vpack.c.bf16 %v3066_v16, %v3058_v15  ;;  %v3136_v15 = vld [vmem:[%s7568_s16 + $0xaa0] sm:$0xff] }
 0x3c5   : > { %v5132_v24 = vpack.c.bf16 %v3081_v14, %v3073_v9  ;;  %v3144_v16 = vld [vmem:[%s7568_s16 + $0xae0] sm:$0xff]  ;;  %v3138_v9 = vld [vmem:[%s7568_s16 + $0xab0] sm:$0xff] }
 0x3c6   : > { %5115 = vmatpush1.bf16.msra.mxu1 %v5114_v27  ;;  %v3089_v27 = vld [vmem:[%s7568_s16 + $0x928] sm:$0xff]  ;;  %v5150_v22 = vpack.c.bf16 %v3144_v16, %v3136_v15 }
 0x3c7   : > { %5215 = vmatpush1.bf16.msra.mxu0 %v5214_v28  ;;  %5117 = vmatprep.subr.bf16.mxu1 %v5116_v31  ;;  %v3097_v28 = vld [vmem:[%s7568_s16 + $0x968] sm:$0xff]  ;;  %v5232_v31 = vpack.c.bf16 %v3083_v19, %v3075_v18 }
 0x3c8   : > { %5217 = vmatprep.subr.bf16.mxu0 %v5216_v37  ;;  %v5234_v37 = vpack.c.bf16 %v3082_v25, %v3074_v23  ;;  %v5136_v6 = vpack.c.bf16 %v3097_v28, %v3089_v27  ;;  %v3153_v18 = vld [vmem:[%s7568_s16 + $0xb28] sm:$0xff]  ;;  %v3152_v25 = vld [vmem:[%s7568_s16 + $0xb20] sm:$0xff]  ;;  %v3154_v28 = vld [vmem:[%s7568_s16 + $0xb30] sm:$0xff] }
 0x3c9   : > { %v3161_v19 = vld [vmem:[%s7568_s16 + $0xb68] sm:$0xff]  ;;  %v3160_v27 = vld [vmem:[%s7568_s16 + $0xb60] sm:$0xff] }
 0x3ca   : > { %5119 = vmatpush1.bf16.msra.mxu1 %v5118_v41  ;;  %v3105_v41 = vld [vmem:[%s7568_s16 + $0x9a8] sm:$0xff]  ;;  %v5154_v35 = vpack.c.bf16 %v3160_v27, %v3152_v25 }
 0x3cb   : > { %5219 = vmatpush1.bf16.msra.mxu0 %v5218_v42  ;;  %5121 = vmatprep.subr.bf16.mxu1 %v5120_v29  ;;  %v3113_v42 = vld [vmem:[%s7568_s16 + $0x9e8] sm:$0xff]  ;;  %v3107_v29 = vld [vmem:[%s7568_s16 + $0x9b8] sm:$0xff] }
 0x3cc   : > { %5221 = vmatprep.subr.bf16.mxu0 %v5220_v47  ;;  %v5140_v46 = vpack.c.bf16 %v3113_v42, %v3105_v41  ;;  %v3104_v47 = vld [vmem:[%s7568_s16 + $0x9a0] sm:$0xff]  ;;  %v5240_v51 = vpack.c.bf16 %v3115_v43, %v3107_v29  ;;  %v3170_v41 = vld [vmem:[%s7568_s16 + $0xbb0] sm:$0xff]  ;;  %v3185_v43 = vld [vmem:[%s7568_s16 + $0xc28] sm:$0xff] }
 0x3cd   : > { %v5142_v59 = vpack.c.bf16 %v3112_v17, %v3104_v47  ;;  %v3178_v29 = vld [vmem:[%s7568_s16 + $0xbf0] sm:$0xff] }
 0x3ce   : > { %5123 = vmatpush1.bf16.msra.mxu1 %v5122_v55  ;;  %v3129_v55 = vld [vmem:[%s7568_s16 + $0xa68] sm:$0xff]  ;;  %v5258_v17 = vpack.c.bf16 %v3178_v29, %v3170_v41 }
 0x3cf   : > { %5223 = vmatpush1.bf16.msra.mxu0 %v5222_v56  ;;  %5125 = vmatprep.subr.bf16.mxu1 %v5124_v57  ;;  %v3123_v56 = vld [vmem:[%s7568_s16 + $0xa38] sm:$0xff]  ;;  %v5144_v62 = vpack.c.bf16 %v3129_v55, %v3121_v61  ;;  %v3186_v55 = vld [vmem:[%s7568_s16 + $0xc30] sm:$0xff] }
 0x3d0   : > { %5225 = vmatprep.subr.bf16.mxu0 %v5224_v0  ;;  %v3131_v57 = vld [vmem:[%s7568_s16 + $0xa78] sm:$0xff]  ;;  %v3120_v0 = vld [vmem:[%s7568_s16 + $0xa20] sm:$0xff] }
 0x3d1   : > { %v5244_v3 = vpack.c.bf16 %v3131_v57, %v3123_v56  ;;  %v5146_v58 = vpack.c.bf16 %v3128_v1, %v3120_v0  ;;  %v3194_v56 = vld [vmem:[%s7568_s16 + $0xc70] sm:$0xff] }
 0x3d2   : > { %5127 = vmatpush1.bf16.msra.mxu1 %v5126_v7  ;;  %v3145_v7 = vld [vmem:[%s7568_s16 + $0xae8] sm:$0xff] }
 0x3d3   : > { %5227 = vmatpush1.bf16.msra.mxu0 %v5226_v49  ;;  %5129 = vmatprep.subr.bf16.mxu1 %v5128_v10  ;;  %v3139_v49 = vld [vmem:[%s7568_s16 + $0xab8] sm:$0xff] }
 0x3d4   : > { %5229 = vmatprep.subr.bf16.mxu0 %v5228_v13  ;;  %v3147_v10 = vld [vmem:[%s7568_s16 + $0xaf8] sm:$0xff]  ;;  %v5148_v13 = vpack.c.bf16 %v3145_v7, %v3137_v5 }
 0x3d5   : > { %3591 = vmatmul.mubr.f32.vlgmr.msra.gmra.mrb[18].mxu1 %v7771_v50  ;;  %v5248_v14 = vpack.c.bf16 %v3147_v10, %v3139_v49 }
 0x3d6   : > { %3733 = vmatmul.mubr.f32.vlgmr.msra.gmra.mrb[16].mxu0 %v7771_v50  ;;  %5131 = vmatpush1.bf16.msra.mxu1 %v5130_v44  ;;  %v5236_v50 = vpack.c.bf16 %v3099_v32, %v3091_v33  ;;  %v3146_v44 = vld [vmem:[%s7568_s16 + $0xaf0] sm:$0xff]  ;;  %v3169_v32 = vld [vmem:[%s7568_s16 + $0xba8] sm:$0xff] }
 0x3d7   : > { %3955 = vmatprep.mubr.msk.f32.mxu1 %vm3238_vm3, %v7808_v34  ;;  %5231 = vmatpush1.bf16.msra.mxu0 %v5230_v20  ;;  %v3155_v20 = vld [vmem:[%s7568_s16 + $0xb38] sm:$0xff]  ;;  %v5250_v23 = vpack.c.bf16 %v3146_v44, %v3138_v9  ;;  %v3162_v33 = vld [vmem:[%s7568_s16 + $0xb70] sm:$0xff]  ;;  %v3224_v44 = vsub.s32 6, %v6341_v12 }
 0x3d8   : > { %3956 = vmatprep.mubr.msk.f32.mxu0 %vm3238_vm3, %v7808_v34  ;;  %5133 = vmatprep.subr.bf16.mxu1 %v5132_v24  ;;  %v5238_v34 = vpack.c.bf16 %v3098_v40, %v3090_v39  ;;  %v5152_v24 = vpack.c.bf16 %v3161_v19, %v3153_v18  ;;  %v5254_v38 = vpack.c.bf16 %v3162_v33, %v3154_v28  ;;  %v3176_v40 = vld [vmem:[%s7568_s16 + $0xbe0] sm:$0xff]  ;;  %v3220_v18 = vsub.s32 5, %v6341_v12 }
 0x3d9   : > { %5233 = vmatprep.subr.bf16.mxu0 %v5232_v31  ;;  %v5252_v31 = vpack.c.bf16 %v3163_v21, %v3155_v20  ;;  %v3228_v19 = vsub.s32 7, %v6341_v12 }
 0x3da   : > { %5135 = vmatpush1.bf16.msra.mxu1 %v5134_v36  ;;  %v3177_v36 = vld [vmem:[%s7568_s16 + $0xbe8] sm:$0xff] }
 0x3db   : > { %5235 = vmatpush1.bf16.msra.mxu0 %v5234_v37  ;;  %5137 = vmatprep.subr.bf16.mxu1 %v5136_v6  ;;  %v3171_v37 = vld [vmem:[%s7568_s16 + $0xbb8] sm:$0xff]  ;;  %v5156_v39 = vpack.c.bf16 %v3177_v36, %v3169_v32 }
 0x3dc   : > { %5237 = vmatprep.subr.bf16.mxu0 %v5236_v50  ;;  %v3179_v6 = vld [vmem:[%s7568_s16 + $0xbf8] sm:$0xff]  ;;  %v3168_v50 = vld [vmem:[%s7568_s16 + $0xba0] sm:$0xff] }
 0x3dd   : > { %v5256_v42 = vpack.c.bf16 %v3179_v6, %v3171_v37  ;;  %v5158_v47 = vpack.c.bf16 %v3176_v40, %v3168_v50 }
 0x3de   : > { %5139 = vmatpush1.bf16.msra.mxu1 %v5138_v45  ;;  %v3193_v45 = vld [vmem:[%s7568_s16 + $0xc68] sm:$0xff] }
 0x3df   : > { %5239 = vmatpush1.bf16.msra.mxu0 %v5238_v34  ;;  %5141 = vmatprep.subr.bf16.mxu1 %v5140_v46  ;;  %v3187_v34 = vld [vmem:[%s7568_s16 + $0xc38] sm:$0xff]  ;;  %v5160_v48 = vpack.c.bf16 %v3193_v45, %v3185_v43 }
 0x3e0   : > { %5241 = vmatprep.subr.bf16.mxu0 %v5240_v51  ;;  %v3195_v46 = vld [vmem:[%s7568_s16 + $0xc78] sm:$0xff]  ;;  %v3184_v51 = vld [vmem:[%s7568_s16 + $0xc20] sm:$0xff]  ;;  %s1110_s16 = scalar_lea.vmem %s8106_s6, %s8112_s30 }
 0x3e1   : > { %v5260_v61 = vpack.c.bf16 %v3195_v46, %v3187_v34  ;;  %v5162_v57 = vpack.c.bf16 %v3192_v53, %v3184_v51 }
 0x3e2   : > { %5143 = vmatpush1.bf16.msra.mxu1 %v5142_v59  ;;  %v5262_v59 = vpack.c.bf16 %v3194_v56, %v3186_v55 }
 0x3e3   : > { %5243 = vmatpush1.bf16.msra.mxu0 %v5242_v60  ;;  %5145 = vmatprep.subr.bf16.mxu1 %v5144_v62  ;;  %v3196_v60 = vld [vmem:[%s1110_s16] sm:$0xff] }
 0x3e4   : > { %5245 = vmatprep.subr.bf16.mxu0 %v5244_v3  ;;  %v3201_v62 = vrot.slane %v3196_v60, %v2615_v54  ;;  %v3209_v0 = vrot.slane %v3196_v60, %v2623_v8  ;;  %v3205_v1 = vrot.slane %v3196_v60, %v2619_v30  ;;  %v3225_v21 = vrot.slane %v3196_v60, %v3224_v44 }
 0x3e6   : > { %5147 = vmatpush1.bf16.msra.mxu1 %v5146_v58 }
 0x3e7   : > { %5247 = vmatpush1.bf16.msra.mxu0 %v5246_v11  ;;  %5149 = vmatprep.subr.bf16.mxu1 %v5148_v13 }
 0x3e8   : > { %5249 = vmatprep.subr.bf16.mxu0 %v5248_v14  ;;  %v3216_v14 = vsub.s32 4, %v6341_v12 }
 0x3ea   : > { %5151 = vmatpush1.bf16.msra.mxu1 %v5150_v22  ;;  %v3217_v20 = vrot.slane %v3196_v60, %v3216_v14  ;;  %v3221_v22 = vrot.slane %v3196_v60, %v3220_v18 }
 0x3eb   : > { %5251 = vmatpush1.bf16.msra.mxu0 %v5250_v23  ;;  %5153 = vmatprep.subr.bf16.mxu1 %v5152_v24  ;;  %v3229_v23 = vrot.slane %v3196_v60, %v3228_v19 }
 0x3ec   : > { %5253 = vmatprep.subr.bf16.mxu0 %v5252_v31 }
 0x3ee   : > { %5155 = vmatpush1.bf16.msra.mxu1 %v5154_v35 }
 0x3ef   : > { %5255 = vmatpush1.bf16.msra.mxu0 %v5254_v38  ;;  %5157 = vmatprep.subr.bf16.mxu1 %v5156_v39 }
 0x3f0   : > { %5257 = vmatprep.subr.bf16.mxu0 %v5256_v42 }
 0x3f2   : > { %5159 = vmatpush1.bf16.msra.mxu1 %v5158_v47 }
 0x3f3   : > { %5259 = vmatpush1.bf16.msra.mxu0 %v5258_v17  ;;  %5161 = vmatprep.subr.bf16.mxu1 %v5160_v48 }
 0x3f4   : > { %5261 = vmatprep.subr.bf16.mxu0 %v5260_v61 }
 0x3f6   : > { %5163 = vmatpush1.bf16.msra.mxu1 %v5162_v57 }
 0x3f7   : > { %5263 = vmatpush1.bf16.msra.mxu0 %v5262_v59 }
 0x3f9   : > { %3662 = vmatmul.mubr.f32.vlgmr.msra.gmra.mrb[18].mxu1 %v7864_v52 }
 0x3fa   : > { %3804 = vmatmul.mubr.f32.vlgmr.msra.gmra.mrb[16].mxu0 %v7864_v52  ;;  %v3213_v52 = vrot.slane %v3196_v60, %v2627_v63 }
 0x468   : > { %v3379_v2 = vpop.f32.mrb[16].mxu1 }
 0x469   : > { %v5264_v3 = vadd.f32 %v3379_v2, %v3201_v62  ;;  %v3521_v4 = vpop.f32.mrb[14].mxu0  ;;  %v3381_v5 = vpop.f32.mrb[17].mxu1 }
 0x46a   : > { %v5266_v7 = vadd.f32 %v3521_v4, %v3209_v0  ;;  %v5265_v49 = vadd.f32 %v3381_v5, %v3205_v1  ;;  %v3523_v10 = vpop.f32.mrb[15].mxu0 }
 0x46b   : > { %v3810_v58 = vmax.f32 %v5264_v3, 0.0  ;;  %v5267_v11 = vadd.f32 %v3523_v10, %v3213_v52 }
 0x46c   : > { %v3812_v13 = vmax.f32 %v5266_v7, 0.0  ;;  %v3811_v54 = vmax.f32 %v5265_v49, 0.0 }
 0x46d   : > { %v3813_v15 = vmax.f32 %v5267_v11, 0.0 }
 0x46e   : > { %v3826_v16 = vcombine.low %v3810_v58, %v3811_v54 }
 0x46f   : > { %v3827_v8 = vcombine.low %v3812_v13, %v3813_v15 }
 0x470   : > { %v3834_v30 = vrot.slane %v3826_v16, %v6371_v26 }
 0x471   : > { %v3841_v9 = vrot.slane %v3827_v8, %v6371_v26 }
 0x473   : > { %v3842_v63 = vcombine.low %v3834_v30, %v3841_v9 }
 0x475   : > { %3862 = vst [vmem:[%s1116_s12] sm:$0xff] %v3842_v63 }
 0x4cc   : > { %v3663_v24 = vpop.f32.mrb[18].mxu1 }
 0x4cd   : > { %v5268_v25 = vadd.f32 %v3663_v24, %v3217_v20  ;;  %v3805_v27 = vpop.f32.mrb[16].mxu0  ;;  %v3665_v28 = vpop.f32.mrb[19].mxu1 }
 0x4ce   : > { %v5270_v31 = vadd.f32 %v3805_v27, %v3225_v21  ;;  %v5269_v33 = vadd.f32 %v3665_v28, %v3221_v22  ;;  %v3807_v32 = vpop.f32.mrb[17].mxu0 }
 0x4cf   : > { %v3814_v36 = vmax.f32 %v5268_v25, 0.0  ;;  %v5271_v37 = vadd.f32 %v3807_v32, %v3229_v23 }
 0x4d0   : > { %v3816_v6 = vmax.f32 %v5270_v31, 0.0  ;;  %v3815_v35 = vmax.f32 %v5269_v33, 0.0 }
 0x4d1   : > { %v3817_v38 = vmax.f32 %v5271_v37, 0.0 }
 0x4d2   : > { %v3843_v39 = vcombine.low %v3814_v36, %v3815_v35 }
 0x4d3   : > { %v3844_v50 = vcombine.low %v3816_v6, %v3817_v38 }
 0x4d4   : > { %v3851_v12 = vrot.slane %v3843_v39, %v6371_v26 }
 0x4d5   : > { %v3858_v40 = vrot.slane %v3844_v50, %v6371_v26 }
 0x4d7   : > { %v3859_v41 = vcombine.low %v3851_v12, %v3858_v40 }
 0x4d9   : > { %3863 = vst [vmem:[%s1116_s12 + $0x8] sm:$0xff] %v3859_v41 }
 0x4da PF: > { %p14_p9 = scmp.ge.s32.totalorder %s5401_s28, 6   ;;  %s8108_s24 = smov %s5334_s25 }
 0x4db   : > { %s8109_s25 = smov %s5410_s8  ;;  %s8110_s26 = smov %s5401_s28 }
 0x4dc   :  { %16 = sbr.rel (!%p14_p9) target bundleno = 2 (0x2), region = 109 }

// kernel: autoencoder_forward.8
= control target key start
LH: loop header
LB: loop body
LE: loop exit
PB: predicated region body
PF: predicated region fallthrough
CT: control target
= control target key end

     0   :  { %s948_s12 = smov 0   ;;  %s1198_s0 = inlined_call_operand.vmem [shape: f32[2,250,576], index: 0, kind: input, shape index: {}]   ;;  %s1199_s1 = inlined_call_operand.vmem [shape: f32[10,250], index: 1, kind: input, shape index: {}]   ;;  %s1200_s2 = inlined_call_operand.vmem [shape: f32[10,1], index: 2, kind: input, shape index: {}]   ;;  %s1201_s3 = inlined_call_operand.vmem [shape: f32[2,10,576], index: 3, kind: output, shape index: {}]  }
   0x1 LB: > { %s666_s13 = sadd.s32 4294967295, %s924_s12   ;;  %p670_p0 = scmp.ge.s32.totalorder %s924_s12, 1  ;;  %s924_s12 = sphi %s948_s12, %s13_s12  }
   0x2   : > { %p137_p1 = scmp.lt.s32.totalorder %s924_s12, 3 }
   0x4   : > { %p138_p2 = pnand %p670_p0, %p137_p1 }
   0x5   : > { %p161_p3 = scmp.lt.s32.totalorder (!%p138_p2), %s666_s13, 1  ;;  %v959_v0 = vld [vmem:[%s1199_s1 + $0x8] sm:$0xff] (!%p138_p2)  ;;  %vm347_vm0 = vcmask (!%p138_p2), 998400   ;;  %v926_v1 = vmov (!%p138_p2), 0   ;;  %v335_v2 = vld [vmem:[%s1200_s2] sm:$0xff] (!%p138_p2)  ;;  %vm354_vm1 = vcmask (!%p138_p2), 1041408  }
   0x6   : > { %141 = sbr.rel (%p138_p2) target bundleno = 336 (0x150), region = 32  ;;  %675 = vmatprep.mubr.msk.f32.mxu0 (!%p138_p2), %vm347_vm0, %v959_v0  ;;  %679 = vmatprep.mubr.msk.f32.mxu1 (!%p138_p2), %vm347_vm0, %v959_v0  ;;  %v336_v3 = vld [vmem:[%s1200_s2 + $0x8] sm:$0x3] (!%p138_p2)  ;;  %vm927_vm2 = vmmov (!%p138_p2), 1   ;;  %vm603_vm4 = vcmask (!%p138_p2), 523264   ;;  %vm609_vm5 = vcmask (!%p138_p2), 517120  }
   0x7   : > { %917 = vset.pattern.permute.xlu0 (!%p138_p2), %v926_v1  ;;  %vm1103_vm3 = vmpackc.low (!%p138_p2), %vm354_vm1, %vm927_vm2 }
   0x8   : > { %339 = vperm.xlu0 (!%p138_p2), %917, %v335_v2  }
   0xc   : > { %344 = vperm.xlu0 (!%p138_p2), %917, %v336_v3  }
   0xd   : > { %s1205_s13 = smov (!%p161_p3, %s666_s13), 1 }
   0xe   : > { %s905_s18 = smul.u32 1280, %s1205_s13 }
   0xf   : > { %s906_s30 = smul.u32 80, %s1205_s13 }
  0x10   : > { %s977_s23 = scalar_lea.vmem %s1198_s0, %s905_s18 }
  0x11   : > { %v176_v4 = vld [vmem:[%s977_s23 + $0x8] sm:$0xff]  ;;  %v181_v5 = vld [vmem:[%s977_s23 + $0x30] sm:$0xff]  ;;  %v178_v6 = vld [vmem:[%s977_s23 + $0x18] sm:$0xff]  ;;  %s1183_s6 = scalar_lea.vmem %s1201_s3, %s906_s30 }
  0x12   : > { %v724_v7 = vpack.c.bf16 %v181_v5, %v176_v4  ;;  %v183_v8 = vld [vmem:[%s977_s23 + $0x40] sm:$0xff]  ;;  %v180_v10 = vld [vmem:[%s977_s23 + $0x28] sm:$0xff]  ;;  %v177_v13 = vld [vmem:[%s977_s23 + $0x10] sm:$0xff] }
  0x13   : > { %v175_v9 = vld [vmem:[%s977_s23] sm:$0xff]  ;;  %v790_v11 = vpack.c.bf16 %v183_v8, %v178_v6  ;;  %v182_v14 = vld [vmem:[%s977_s23 + $0x38] sm:$0xff]  ;;  %v188_v18 = vld [vmem:[%s977_s23 + $0x68] sm:$0xff] }
  0x14   : > { %v726_v12 = vpack.c.bf16 %v180_v10, %v175_v9  ;;  %v186_v15 = vld [vmem:[%s977_s23 + $0x58] sm:$0xff]  ;;  %725 = vmatprep.subr.bf16.mxu0 %v724_v7  ;;  %v792_v16 = vpack.c.bf16 %v182_v14, %v177_v13  ;;  %v191_v17 = vld [vmem:[%s977_s23 + $0x80] sm:$0xff]  ;;  %v193_v19 = vld [vmem:[%s977_s23 + $0x90] sm:$0xff] }
  0x15   : > { %791 = vmatprep.subr.bf16.mxu1 %v790_v11  ;;  %v728_v20 = vpack.c.bf16 %v191_v17, %v186_v15  ;;  %v794_v21 = vpack.c.bf16 %v193_v19, %v188_v18  ;;  %v185_v22 = vld [vmem:[%s977_s23 + $0x50] sm:$0xff]  ;;  %v190_v23 = vld [vmem:[%s977_s23 + $0x78] sm:$0xff]  ;;  %v187_v24 = vld [vmem:[%s977_s23 + $0x60] sm:$0xff] }
  0x16   : > { %727 = vmatpush1.bf16.msra.mxu0 %v726_v12  ;;  %793 = vmatpush1.bf16.msra.mxu1 %v792_v16  ;;  %v730_v25 = vpack.c.bf16 %v190_v23, %v185_v22  ;;  %v192_v26 = vld [vmem:[%s977_s23 + $0x88] sm:$0xff]  ;;  %v201_v28 = vld [vmem:[%s977_s23 + $0xd0] sm:$0xff]  ;;  %v198_v31 = vld [vmem:[%s977_s23 + $0xb8] sm:$0xff] }
  0x17   : > { %v196_v27 = vld [vmem:[%s977_s23 + $0xa8] sm:$0xff]  ;;  %729 = vmatprep.subr.bf16.mxu0 %v728_v20  ;;  %795 = vmatprep.subr.bf16.mxu1 %v794_v21  ;;  %v796_v29 = vpack.c.bf16 %v192_v26, %v187_v24  ;;  %v203_v32 = vld [vmem:[%s977_s23 + $0xe0] sm:$0xff]  ;;  %v197_v36 = vld [vmem:[%s977_s23 + $0xb0] sm:$0xff] }
  0x18   : > { %v732_v30 = vpack.c.bf16 %v201_v28, %v196_v27  ;;  %v195_v33 = vld [vmem:[%s977_s23 + $0xa0] sm:$0xff]  ;;  %v798_v34 = vpack.c.bf16 %v203_v32, %v198_v31  ;;  %v200_v35 = vld [vmem:[%s977_s23 + $0xc8] sm:$0xff]  ;;  %v202_v37 = vld [vmem:[%s977_s23 + $0xd8] sm:$0xff] }
  0x19   : > { %v734_v38 = vpack.c.bf16 %v200_v35, %v195_v33  ;;  %v206_v39 = vld [vmem:[%s977_s23 + $0xf8] sm:$0xff]  ;;  %v211_v40 = vld [vmem:[%s977_s23 + $0x120] sm:$0xff]  ;;  %v208_v41 = vld [vmem:[%s977_s23 + $0x108] sm:$0xff]  ;;  %v800_v42 = vpack.c.bf16 %v202_v37, %v197_v36 }
  0x1a   : > { %731 = vmatpush1.bf16.msra.mxu0 %v730_v25  ;;  %797 = vmatpush1.bf16.msra.mxu1 %v796_v29  ;;  %v736_v43 = vpack.c.bf16 %v211_v40, %v206_v39  ;;  %v213_v44 = vld [vmem:[%s977_s23 + $0x130] sm:$0xff]  ;;  %v210_v46 = vld [vmem:[%s977_s23 + $0x118] sm:$0xff]  ;;  %v207_v48 = vld [vmem:[%s977_s23 + $0x100] sm:$0xff] }
  0x1b   : > { %733 = vmatprep.subr.bf16.mxu0 %v732_v30  ;;  %v205_v45 = vld [vmem:[%s977_s23 + $0xf0] sm:$0xff]  ;;  %799 = vmatprep.subr.bf16.mxu1 %v798_v34  ;;  %v802_v47 = vpack.c.bf16 %v213_v44, %v208_v41  ;;  %v212_v49 = vld [vmem:[%s977_s23 + $0x128] sm:$0xff]  ;;  %v218_v52 = vld [vmem:[%s977_s23 + $0x158] sm:$0xff] }
  0x1c   : > { %v216_v50 = vld [vmem:[%s977_s23 + $0x148] sm:$0xff]  ;;  %v221_v51 = vld [vmem:[%s977_s23 + $0x170] sm:$0xff]  ;;  %v223_v53 = vld [vmem:[%s977_s23 + $0x180] sm:$0xff]  ;;  %v738_v54 = vpack.c.bf16 %v210_v46, %v205_v45  ;;  %v804_v55 = vpack.c.bf16 %v212_v49, %v207_v48 }
  0x1d   : > { %v740_v56 = vpack.c.bf16 %v221_v51, %v216_v50  ;;  %v215_v57 = vld [vmem:[%s977_s23 + $0x140] sm:$0xff]  ;;  %v220_v58 = vld [vmem:[%s977_s23 + $0x168] sm:$0xff]  ;;  %v217_v59 = vld [vmem:[%s977_s23 + $0x150] sm:$0xff]  ;;  %v806_v60 = vpack.c.bf16 %v223_v53, %v218_v52 }
  0x1e   : > { %735 = vmatpush1.bf16.msra.mxu0 %v734_v38  ;;  %801 = vmatpush1.bf16.msra.mxu1 %v800_v42  ;;  %v222_v61 = vld [vmem:[%s977_s23 + $0x178] sm:$0xff]  ;;  %v231_v63 = vld [vmem:[%s977_s23 + $0x1c0] sm:$0xff]  ;;  %v228_v1 = vld [vmem:[%s977_s23 + $0x1a8] sm:$0xff]  ;;  %v742_v3 = vpack.c.bf16 %v220_v58, %v215_v57 }
  0x1f   : > { %737 = vmatprep.subr.bf16.mxu0 %v736_v43  ;;  %803 = vmatprep.subr.bf16.mxu1 %v802_v47  ;;  %v226_v62 = vld [vmem:[%s977_s23 + $0x198] sm:$0xff]  ;;  %v233_v2 = vld [vmem:[%s977_s23 + $0x1d0] sm:$0xff]  ;;  %v808_v4 = vpack.c.bf16 %v222_v61, %v217_v59  ;;  %v227_v8 = vld [vmem:[%s977_s23 + $0x1a0] sm:$0xff] }
  0x20   : > { %v744_v5 = vpack.c.bf16 %v231_v63, %v226_v62  ;;  %v225_v6 = vld [vmem:[%s977_s23 + $0x190] sm:$0xff]  ;;  %v230_v7 = vld [vmem:[%s977_s23 + $0x1b8] sm:$0xff]  ;;  %v810_v9 = vpack.c.bf16 %v233_v2, %v228_v1  ;;  %v232_v10 = vld [vmem:[%s977_s23 + $0x1c8] sm:$0xff] }
  0x21   : > { %v236_v11 = vld [vmem:[%s977_s23 + $0x1e8] sm:$0xff]  ;;  %v241_v12 = vld [vmem:[%s977_s23 + $0x210] sm:$0xff]  ;;  %v238_v13 = vld [vmem:[%s977_s23 + $0x1f8] sm:$0xff]  ;;  %v746_v15 = vpack.c.bf16 %v230_v7, %v225_v6  ;;  %v812_v16 = vpack.c.bf16 %v232_v10, %v227_v8 }
  0x22   : > { %739 = vmatpush1.bf16.msra.mxu0 %v738_v54  ;;  %805 = vmatpush1.bf16.msra.mxu1 %v804_v55  ;;  %v243_v14 = vld [vmem:[%s977_s23 + $0x220] sm:$0xff]  ;;  %v748_v17 = vpack.c.bf16 %v241_v12, %v236_v11  ;;  %v240_v19 = vld [vmem:[%s977_s23 + $0x208] sm:$0xff]  ;;  %v237_v20 = vld [vmem:[%s977_s23 + $0x1f0] sm:$0xff] }
  0x23   : > { %741 = vmatprep.subr.bf16.mxu0 %v740_v56  ;;  %807 = vmatprep.subr.bf16.mxu1 %v806_v60  ;;  %v235_v18 = vld [vmem:[%s977_s23 + $0x1e0] sm:$0xff]  ;;  %v814_v21 = vpack.c.bf16 %v243_v14, %v238_v13  ;;  %v242_v22 = vld [vmem:[%s977_s23 + $0x218] sm:$0xff]  ;;  %v248_v25 = vld [vmem:[%s977_s23 + $0x248] sm:$0xff] }
  0x24   : > { %v246_v23 = vld [vmem:[%s977_s23 + $0x238] sm:$0xff]  ;;  %v251_v24 = vld [vmem:[%s977_s23 + $0x260] sm:$0xff]  ;;  %v253_v26 = vld [vmem:[%s977_s23 + $0x270] sm:$0xff]  ;;  %v750_v27 = vpack.c.bf16 %v240_v19, %v235_v18  ;;  %v816_v28 = vpack.c.bf16 %v242_v22, %v237_v20 }
  0x25   : > { %v752_v29 = vpack.c.bf16 %v251_v24, %v246_v23  ;;  %v245_v30 = vld [vmem:[%s977_s23 + $0x230] sm:$0xff]  ;;  %v250_v31 = vld [vmem:[%s977_s23 + $0x258] sm:$0xff]  ;;  %v247_v32 = vld [vmem:[%s977_s23 + $0x240] sm:$0xff]  ;;  %v818_v33 = vpack.c.bf16 %v253_v26, %v248_v25 }
  0x26   : > { %743 = vmatpush1.bf16.msra.mxu0 %v742_v3  ;;  %809 = vmatpush1.bf16.msra.mxu1 %v808_v4  ;;  %v252_v34 = vld [vmem:[%s977_s23 + $0x268] sm:$0xff]  ;;  %v261_v36 = vld [vmem:[%s977_s23 + $0x2b0] sm:$0xff]  ;;  %v258_v37 = vld [vmem:[%s977_s23 + $0x298] sm:$0xff]  ;;  %v754_v39 = vpack.c.bf16 %v250_v31, %v245_v30 }
  0x27   : > { %745 = vmatprep.subr.bf16.mxu0 %v744_v5  ;;  %811 = vmatprep.subr.bf16.mxu1 %v810_v9  ;;  %v256_v35 = vld [vmem:[%s977_s23 + $0x288] sm:$0xff]  ;;  %v263_v38 = vld [vmem:[%s977_s23 + $0x2c0] sm:$0xff]  ;;  %v820_v40 = vpack.c.bf16 %v252_v34, %v247_v32  ;;  %v257_v44 = vld [vmem:[%s977_s23 + $0x290] sm:$0xff] }
  0x28   : > { %v756_v41 = vpack.c.bf16 %v261_v36, %v256_v35  ;;  %v255_v42 = vld [vmem:[%s977_s23 + $0x280] sm:$0xff]  ;;  %v260_v43 = vld [vmem:[%s977_s23 + $0x2a8] sm:$0xff]  ;;  %v822_v45 = vpack.c.bf16 %v263_v38, %v258_v37  ;;  %v262_v46 = vld [vmem:[%s977_s23 + $0x2b8] sm:$0xff] }
  0x29   : > { %v266_v47 = vld [vmem:[%s977_s23 + $0x2d8] sm:$0xff]  ;;  %v271_v48 = vld [vmem:[%s977_s23 + $0x300] sm:$0xff]  ;;  %v268_v49 = vld [vmem:[%s977_s23 + $0x2e8] sm:$0xff]  ;;  %v758_v51 = vpack.c.bf16 %v260_v43, %v255_v42  ;;  %v824_v52 = vpack.c.bf16 %v262_v46, %v257_v44 }
  0x2a   : > { %747 = vmatpush1.bf16.msra.mxu0 %v746_v15  ;;  %813 = vmatpush1.bf16.msra.mxu1 %v812_v16  ;;  %v273_v50 = vld [vmem:[%s977_s23 + $0x310] sm:$0xff]  ;;  %v760_v53 = vpack.c.bf16 %v271_v48, %v266_v47  ;;  %v270_v55 = vld [vmem:[%s977_s23 + $0x2f8] sm:$0xff]  ;;  %v267_v56 = vld [vmem:[%s977_s23 + $0x2e0] sm:$0xff] }
  0x2b   : > { %749 = vmatprep.subr.bf16.mxu0 %v748_v17  ;;  %815 = vmatprep.subr.bf16.mxu1 %v814_v21  ;;  %v265_v54 = vld [vmem:[%s977_s23 + $0x2d0] sm:$0xff]  ;;  %v826_v57 = vpack.c.bf16 %v273_v50, %v268_v49  ;;  %v272_v58 = vld [vmem:[%s977_s23 + $0x308] sm:$0xff]  ;;  %v278_v61 = vld [vmem:[%s977_s23 + $0x338] sm:$0xff] }
  0x2c   : > { %v276_v59 = vld [vmem:[%s977_s23 + $0x328] sm:$0xff]  ;;  %v281_v60 = vld [vmem:[%s977_s23 + $0x350] sm:$0xff]  ;;  %v283_v62 = vld [vmem:[%s977_s23 + $0x360] sm:$0xff]  ;;  %v762_v63 = vpack.c.bf16 %v270_v55, %v265_v54  ;;  %v828_v1 = vpack.c.bf16 %v272_v58, %v267_v56 }
  0x2d   : > { %v764_v2 = vpack.c.bf16 %v281_v60, %v276_v59  ;;  %v275_v3 = vld [vmem:[%s977_s23 + $0x320] sm:$0xff]  ;;  %v280_v4 = vld [vmem:[%s977_s23 + $0x348] sm:$0xff]  ;;  %v277_v5 = vld [vmem:[%s977_s23 + $0x330] sm:$0xff]  ;;  %v830_v6 = vpack.c.bf16 %v283_v62, %v278_v61 }
  0x2e   : > { %751 = vmatpush1.bf16.msra.mxu0 %v750_v27  ;;  %817 = vmatpush1.bf16.msra.mxu1 %v816_v28  ;;  %v282_v7 = vld [vmem:[%s977_s23 + $0x358] sm:$0xff]  ;;  %v291_v9 = vld [vmem:[%s977_s23 + $0x3a0] sm:$0xff]  ;;  %v288_v10 = vld [vmem:[%s977_s23 + $0x388] sm:$0xff]  ;;  %v766_v12 = vpack.c.bf16 %v280_v4, %v275_v3 }
  0x2f   : > { %753 = vmatprep.subr.bf16.mxu0 %v752_v29  ;;  %819 = vmatprep.subr.bf16.mxu1 %v818_v33  ;;  %v286_v8 = vld [vmem:[%s977_s23 + $0x378] sm:$0xff]  ;;  %v293_v11 = vld [vmem:[%s977_s23 + $0x3b0] sm:$0xff]  ;;  %v832_v13 = vpack.c.bf16 %v282_v7, %v277_v5  ;;  %v287_v17 = vld [vmem:[%s977_s23 + $0x380] sm:$0xff] }
  0x30   : > { %v768_v14 = vpack.c.bf16 %v291_v9, %v286_v8  ;;  %v285_v15 = vld [vmem:[%s977_s23 + $0x370] sm:$0xff]  ;;  %v290_v16 = vld [vmem:[%s977_s23 + $0x398] sm:$0xff]  ;;  %v834_v18 = vpack.c.bf16 %v293_v11, %v288_v10  ;;  %v292_v19 = vld [vmem:[%s977_s23 + $0x3a8] sm:$0xff] }
  0x31   : > { %v296_v20 = vld [vmem:[%s977_s23 + $0x3c8] sm:$0xff]  ;;  %v301_v21 = vld [vmem:[%s977_s23 + $0x3f0] sm:$0xff]  ;;  %v298_v22 = vld [vmem:[%s977_s23 + $0x3d8] sm:$0xff]  ;;  %v770_v24 = vpack.c.bf16 %v290_v16, %v285_v15  ;;  %v836_v25 = vpack.c.bf16 %v292_v19, %v287_v17 }
  0x32   : > { %755 = vmatpush1.bf16.msra.mxu0 %v754_v39  ;;  %821 = vmatpush1.bf16.msra.mxu1 %v820_v40  ;;  %v303_v23 = vld [vmem:[%s977_s23 + $0x400] sm:$0xff]  ;;  %v772_v26 = vpack.c.bf16 %v301_v21, %v296_v20  ;;  %v300_v28 = vld [vmem:[%s977_s23 + $0x3e8] sm:$0xff]  ;;  %v297_v29 = vld [vmem:[%s977_s23 + $0x3d0] sm:$0xff] }
  0x33   : > { %757 = vmatprep.subr.bf16.mxu0 %v756_v41  ;;  %823 = vmatprep.subr.bf16.mxu1 %v822_v45  ;;  %v295_v27 = vld [vmem:[%s977_s23 + $0x3c0] sm:$0xff]  ;;  %v838_v30 = vpack.c.bf16 %v303_v23, %v298_v22  ;;  %v302_v31 = vld [vmem:[%s977_s23 + $0x3f8] sm:$0xff]  ;;  %v308_v34 = vld [vmem:[%s977_s23 + $0x428] sm:$0xff] }
  0x34   : > { %v306_v32 = vld [vmem:[%s977_s23 + $0x418] sm:$0xff]  ;;  %v311_v33 = vld [vmem:[%s977_s23 + $0x440] sm:$0xff]  ;;  %v313_v35 = vld [vmem:[%s977_s23 + $0x450] sm:$0xff]  ;;  %v774_v36 = vpack.c.bf16 %v300_v28, %v295_v27  ;;  %v840_v37 = vpack.c.bf16 %v302_v31, %v297_v29 }
  0x35   : > { %v776_v38 = vpack.c.bf16 %v311_v33, %v306_v32  ;;  %v305_v39 = vld [vmem:[%s977_s23 + $0x410] sm:$0xff]  ;;  %v310_v40 = vld [vmem:[%s977_s23 + $0x438] sm:$0xff]  ;;  %v307_v41 = vld [vmem:[%s977_s23 + $0x420] sm:$0xff]  ;;  %v842_v42 = vpack.c.bf16 %v313_v35, %v308_v34 }
  0x36   : > { %759 = vmatpush1.bf16.msra.mxu0 %v758_v51  ;;  %825 = vmatpush1.bf16.msra.mxu1 %v824_v52  ;;  %v312_v43 = vld [vmem:[%s977_s23 + $0x448] sm:$0xff]  ;;  %v321_v45 = vld [vmem:[%s977_s23 + $0x490] sm:$0xff]  ;;  %v318_v46 = vld [vmem:[%s977_s23 + $0x478] sm:$0xff]  ;;  %v778_v48 = vpack.c.bf16 %v310_v40, %v305_v39 }
  0x37   : > { %761 = vmatprep.subr.bf16.mxu0 %v760_v53  ;;  %827 = vmatprep.subr.bf16.mxu1 %v826_v57  ;;  %v316_v44 = vld [vmem:[%s977_s23 + $0x468] sm:$0xff]  ;;  %v323_v47 = vld [vmem:[%s977_s23 + $0x4a0] sm:$0xff]  ;;  %v844_v49 = vpack.c.bf16 %v312_v43, %v307_v41  ;;  %v317_v53 = vld [vmem:[%s977_s23 + $0x470] sm:$0xff] }
  0x38   : > { %v780_v50 = vpack.c.bf16 %v321_v45, %v316_v44  ;;  %v315_v51 = vld [vmem:[%s977_s23 + $0x460] sm:$0xff]  ;;  %v320_v52 = vld [vmem:[%s977_s23 + $0x488] sm:$0xff]  ;;  %v846_v54 = vpack.c.bf16 %v323_v47, %v318_v46  ;;  %v322_v55 = vld [vmem:[%s977_s23 + $0x498] sm:$0xff] }
  0x39   : > { %v326_v56 = vld [vmem:[%s977_s23 + $0x4b8] sm:$0xff]  ;;  %v331_v57 = vld [vmem:[%s977_s23 + $0x4e0] sm:$0x3]  ;;  %v328_v58 = vld [vmem:[%s977_s23 + $0x4c8] sm:$0xff]  ;;  %v782_v60 = vpack.c.bf16 %v320_v52, %v315_v51  ;;  %v848_v62 = vpack.c.bf16 %v322_v55, %v317_v53 }
  0x3a   : > { %763 = vmatpush1.bf16.msra.mxu0 %v762_v63  ;;  %829 = vmatpush1.bf16.msra.mxu1 %v828_v1  ;;  %v333_v59 = vld [vmem:[%s977_s23 + $0x4f0] sm:$0x3]  ;;  %v784_v63 = vpack.c.bf16 %v331_v57, %v326_v56  ;;  %v327_v3 = vld [vmem:[%s977_s23 + $0x4c0] sm:$0xff]  ;;  %v332_v5 = vld [vmem:[%s977_s23 + $0x4e8] sm:$0x3] }
  0x3b   : > { %765 = vmatprep.subr.bf16.mxu0 %v764_v2  ;;  %831 = vmatprep.subr.bf16.mxu1 %v830_v6  ;;  %v325_v1 = vld [vmem:[%s977_s23 + $0x4b0] sm:$0xff]  ;;  %v330_v2 = vld [vmem:[%s977_s23 + $0x4d8] sm:$0x3]  ;;  %v850_v4 = vpack.c.bf16 %v333_v59, %v328_v58  ;;  %v259_v6 = vld [vmem:[%s977_s23 + $0x2a0] sm:$0xff]  ;;  %v853_v9 = vpack.c.bf16 %v332_v5, %v327_v3 }
  0x3c   : > { %v264_v7 = vld [vmem:[%s977_s23 + $0x2c8] sm:$0xff]  ;;  %v787_v8 = vpack.c.bf16 %v330_v2, %v325_v1  ;;  %v179_v11 = vld [vmem:[%s977_s23 + $0x20] sm:$0xff]  ;;  %v194_v19 = vld [vmem:[%s977_s23 + $0x98] sm:$0xff] }
  0x3d   : > { %v856_v10 = vpack.c.bf16 %v264_v7, %v259_v6  ;;  %v1126_v15 = vld [vmem:[%s1199_s1] sm:$0xff]  ;;  %v284_v21 = vld [vmem:[%s977_s23 + $0x368] sm:$0xff]  ;;  %v174_v22 = vld [vmem:[%s1199_s1 + $0x18] sm:$0x3] }
  0x3e   : > { %767 = vmatpush1.bf16.msra.mxu0 %v766_v12  ;;  %833 = vmatpush1.bf16.msra.mxu1 %v832_v13  ;;  %v184_v12 = vld [vmem:[%s977_s23 + $0x48] sm:$0xff]  ;;  %v269_v13 = vld [vmem:[%s977_s23 + $0x2f0] sm:$0xff]  ;;  %v279_v20 = vld [vmem:[%s977_s23 + $0x340] sm:$0xff] }
  0x3f   : > { %769 = vmatprep.subr.bf16.mxu0 %v768_v14  ;;  %835 = vmatprep.subr.bf16.mxu1 %v834_v18  ;;  %v274_v14 = vld [vmem:[%s977_s23 + $0x318] sm:$0xff]  ;;  %v858_v16 = vpack.c.bf16 %v184_v12, %v179_v11  ;;  %v189_v18 = vld [vmem:[%s977_s23 + $0x70] sm:$0xff]  ;;  %v204_v27 = vld [vmem:[%s977_s23 + $0xe8] sm:$0xff] }
  0x40   : > { %v860_v17 = vpack.c.bf16 %v274_v14, %v269_v13  ;;  %v862_v23 = vpack.c.bf16 %v194_v19, %v189_v18  ;;  %v289_v28 = vld [vmem:[%s977_s23 + $0x390] sm:$0xff]  ;;  %v294_v29 = vld [vmem:[%s977_s23 + $0x3b8] sm:$0xff]  ;;  %v299_v34 = vld [vmem:[%s977_s23 + $0x3e0] sm:$0xff] }
  0x41   : > { %v868_v31 = vpack.c.bf16 %v294_v29, %v289_v28  ;;  %v209_v32 = vld [vmem:[%s977_s23 + $0x110] sm:$0xff]  ;;  %v214_v33 = vld [vmem:[%s977_s23 + $0x138] sm:$0xff]  ;;  %v304_v35 = vld [vmem:[%s977_s23 + $0x408] sm:$0xff] }
  0x42   : > { %771 = vmatpush1.bf16.msra.mxu0 %v770_v24  ;;  %837 = vmatpush1.bf16.msra.mxu1 %v836_v25  ;;  %v1142_v24 = vld [vmem:[%s1199_s1 + $0x10] sm:$0x3]  ;;  %v864_v25 = vpack.c.bf16 %v284_v21, %v279_v20  ;;  %v224_v39 = vld [vmem:[%s977_s23 + $0x188] sm:$0xff]  ;;  %v314_v41 = vld [vmem:[%s977_s23 + $0x458] sm:$0xff] }
  0x43   : > { %773 = vmatprep.subr.bf16.mxu0 %v772_v26  ;;  %839 = vmatprep.subr.bf16.mxu1 %v838_v30  ;;  %v199_v26 = vld [vmem:[%s977_s23 + $0xc0] sm:$0xff]  ;;  %v309_v40 = vld [vmem:[%s977_s23 + $0x430] sm:$0xff]  ;;  %v234_v44 = vld [vmem:[%s977_s23 + $0x1d8] sm:$0xff] }
  0x44   : > { %v866_v30 = vpack.c.bf16 %v204_v27, %v199_v26  ;;  %v229_v43 = vld [vmem:[%s977_s23 + $0x1b0] sm:$0xff]  ;;  %v319_v45 = vld [vmem:[%s977_s23 + $0x480] sm:$0xff]  ;;  %v324_v46 = vld [vmem:[%s977_s23 + $0x4a8] sm:$0xff] }
  0x45   : > { %v878_v47 = vpack.c.bf16 %v234_v44, %v229_v43  ;;  %v329_v51 = vld [vmem:[%s977_s23 + $0x4d0] sm:$0xff]  ;;  %v334_v52 = vld [vmem:[%s977_s23 + $0x4f8] sm:$0x3] }
  0x46   : > { %775 = vmatpush1.bf16.msra.mxu0 %v774_v36  ;;  %841 = vmatpush1.bf16.msra.mxu1 %v840_v37  ;;  %v870_v36 = vpack.c.bf16 %v214_v33, %v209_v32  ;;  %v872_v37 = vpack.c.bf16 %v304_v35, %v299_v34  ;;  %v249_v55 = vld [vmem:[%s977_s23 + $0x250] sm:$0xff]  ;;  %v254_v56 = vld [vmem:[%s977_s23 + $0x278] sm:$0xff] }
  0x47   : > { %777 = vmatprep.subr.bf16.mxu0 %v776_v38  ;;  %843 = vmatprep.subr.bf16.mxu1 %v842_v42  ;;  %v219_v38 = vld [vmem:[%s977_s23 + $0x160] sm:$0xff]  ;;  %v876_v42 = vpack.c.bf16 %v314_v41, %v309_v40  ;;  %v887_v57 = vpack.c.bf16 %v254_v56, %v249_v55 }
  0x4a   : > { %779 = vmatpush1.bf16.msra.mxu0 %v778_v48  ;;  %845 = vmatpush1.bf16.msra.mxu1 %v844_v49  ;;  %v880_v48 = vpack.c.bf16 %v324_v46, %v319_v45  ;;  %v239_v49 = vld [vmem:[%s977_s23 + $0x200] sm:$0xff] }
  0x4b   : > { %781 = vmatprep.subr.bf16.mxu0 %v780_v50  ;;  %847 = vmatprep.subr.bf16.mxu1 %v846_v54  ;;  %v244_v50 = vld [vmem:[%s977_s23 + $0x228] sm:$0xff]  ;;  %v884_v54 = vpack.c.bf16 %v334_v52, %v329_v51 }
  0x4c   : > { %v882_v53 = vpack.c.bf16 %v244_v50, %v239_v49 }
  0x4e   : > { %783 = vmatpush1.bf16.msra.mxu0 %v782_v60  ;;  %849 = vmatpush1.bf16.msra.mxu1 %v848_v62 }
  0x4f   : > { %786 = vmatprep.subr.msk.bf16.mxu0 %vm1103_vm3, %v784_v63  ;;  %852 = vmatprep.subr.msk.bf16.mxu1 %vm1103_vm3, %v850_v4 }
  0x52   : > { %789 = vmatpush1.bf16.msk.msra.mxu0 %vm1103_vm3, %v787_v8  ;;  %855 = vmatpush1.bf16.msk.msra.mxu1 %vm1103_vm3, %v853_v9 }
  0x53   : > { %857 = vmatprep.subr.bf16.mxu0 %v856_v10  ;;  %889 = vmatprep.subr.bf16.mxu1 %v856_v10 }
  0x55   : > { %435 = vmatmul.mubr.f32.vlgmr.msra.gmra.mrb[0].mxu0 %v1126_v15  ;;  %512 = vmatmul.mubr.f32.vlgmr.msra.gmra.mrb[0].mxu1 %v1126_v15 }
  0x56   : > { %859 = vmatpush3.bf16.msra.mxu0 %v858_v16  ;;  %897 = vmatpush3.bf16.msra.mxu1 %v858_v16 }
  0x57   : > { %861 = vmatprep.subr.bf16.mxu0 %v860_v17  ;;  %890 = vmatprep.subr.bf16.mxu1 %v860_v17 }
  0x58   : > { %676 = vmatprep.mubr.msk.f32.mxu0 %vm347_vm0, %v174_v22  ;;  %680 = vmatprep.mubr.msk.f32.mxu1 %vm347_vm0, %v174_v22 }
  0x59   : > { %441 = vmatmul.mubr.f32.gmra.mrb[2].mxu0 %v1142_v24  ;;  %518 = vmatmul.mubr.f32.gmra.mrb[2].mxu1 %v1142_v24 }
  0x5a   : > { %863 = vmatpush3.bf16.msra.mxu0 %v862_v23  ;;  %898 = vmatpush3.bf16.msra.mxu1 %v862_v23 }
  0x5b   : > { %865 = vmatprep.subr.bf16.mxu0 %v864_v25  ;;  %891 = vmatprep.subr.bf16.mxu1 %v864_v25 }
  0x5c   : > { %682 = vmatprep.mubr.msk.f32.mxu0 %vm347_vm0, %v959_v0  ;;  %683 = vmatprep.mubr.msk.f32.mxu1 %vm347_vm0, %v174_v22  ;;  %v874_v0 = vpack.c.bf16 %v224_v39, %v219_v38 }
  0x5e   : > { %867 = vmatpush3.bf16.msra.mxu0 %v866_v30  ;;  %899 = vmatpush3.bf16.msra.mxu1 %v866_v30 }
  0x5f   : > { %869 = vmatprep.subr.bf16.mxu0 %v868_v31  ;;  %892 = vmatprep.subr.bf16.mxu1 %v868_v31 }
  0x62   : > { %871 = vmatpush3.bf16.msra.mxu0 %v870_v36  ;;  %900 = vmatpush3.bf16.msra.mxu1 %v870_v36 }
  0x63   : > { %873 = vmatprep.subr.bf16.mxu0 %v872_v37  ;;  %893 = vmatprep.subr.bf16.mxu1 %v872_v37 }
  0x66   : > { %875 = vmatpush3.bf16.msra.mxu0 %v874_v0  ;;  %901 = vmatpush3.bf16.msra.mxu1 %v874_v0 }
  0x67   : > { %877 = vmatprep.subr.bf16.mxu0 %v876_v42  ;;  %894 = vmatprep.subr.bf16.mxu1 %v876_v42 }
  0x6a   : > { %879 = vmatpush3.bf16.msra.mxu0 %v878_v47  ;;  %902 = vmatpush3.bf16.msra.mxu1 %v878_v47 }
  0x6b   : > { %881 = vmatprep.subr.bf16.mxu0 %v880_v48  ;;  %895 = vmatprep.subr.bf16.mxu1 %v880_v48 }
  0x6e   : > { %883 = vmatpush3.bf16.msra.mxu0 %v882_v53  ;;  %903 = vmatpush3.bf16.msra.mxu1 %v882_v53 }
  0x6f   : > { %886 = vmatprep.subr.msk.bf16.mxu0 %vm1103_vm3, %v884_v54  ;;  %896 = vmatprep.subr.msk.bf16.mxu1 %vm1103_vm3, %v884_v54 }
  0x72   : > { %888 = vmatpush3.bf16.msra.mxu0 %v887_v57  ;;  %904 = vmatpush3.bf16.msra.mxu1 %v887_v57 }
  0x75   : > { %589 = vmatmul.mubr.f32.vlgmr.msra.gmra.mrb[4].mxu0 %v1126_v15  ;;  %594 = vmatmul.mubr.f32.vlgmr.msra.gmra.mrb[4].mxu1 %v1142_v24 }
  0x87   : > { %v340_v58 = vpop.permute.xlu0 %339 }
  0x8b   : > { %v345_v3 = vpop.permute.xlu0 %344 }
 0x128   : > { %v436_v59 = vpop.f32.mrb[0].mxu0  ;;  %v513_v60 = vpop.f32.mrb[0].mxu1 }
 0x129   : > { %v437_v61 = vadd.f32 %v436_v59, %v340_v58  ;;  %v438_v62 = vpop.f32.mrb[1].mxu0  ;;  %v514_v63 = vadd.f32 %v513_v60, %v340_v58  ;;  %v515_v2 = vpop.f32.mrb[1].mxu1 }
 0x12a   : > { %v439_v1 = vadd.f32 %v438_v62, %v340_v58  ;;  %v516_v4 = vadd.f32 %v515_v2, %v340_v58 }
 0x12b   : > { %599 = vst [vmem:[%s1183_s6] sm:$0xff] %v437_v61  ;;  %601 = vst [vmem:[%s1183_s6 + $0x10] sm:$0xff] %v514_v63 }
 0x12c   : > { %600 = vst [vmem:[%s1183_s6 + $0x8] sm:$0xff] %v439_v1  ;;  %v442_v5 = vpop.f32.mrb[2].mxu0  ;;  %602 = vst [vmem:[%s1183_s6 + $0x18] sm:$0xff] %v516_v4  ;;  %v519_v6 = vpop.f32.mrb[2].mxu1 }
 0x12d   : > { %v443_v7 = vadd.f32 %v442_v5, %v345_v3  ;;  %v444_v8 = vpop.f32.mrb[3].mxu0  ;;  %v520_v9 = vadd.f32 %v519_v6, %v345_v3  ;;  %v521_v11 = vpop.f32.mrb[3].mxu1 }
 0x12e   : > { %v445_v10 = vadd.f32 %v444_v8, %v345_v3  ;;  %v522_v12 = vadd.f32 %v521_v11, %v345_v3 }
 0x12f   : > { %605 = vst [vmem:[%s1183_s6 + $0x28] sm:$0x3] %v443_v7  ;;  %607 = vst [vmem:[%s1183_s6 + $0x38] sm:$0x3] %v520_v9 }
 0x130   : > { %606 = vst [vmem:[%s1183_s6 + $0x30] sm:$0x3] %v445_v10  ;;  %608 = vst [vmem:[%s1183_s6 + $0x40] sm:$0x3] %v522_v12 }
 0x148   : > { %v718_v13 = vpop.f32.mrb[4].mxu0  ;;  %v721_v14 = vpop.f32.mrb[4].mxu1 }
 0x149   : > { %v719_v15 = vpop.f32.mrb[5].mxu0  ;;  %v722_v17 = vpop.f32.mrb[5].mxu1 }
 0x14a   : > { %v720_v16 = vadd.f32 %v719_v15, %v718_v13  ;;  %v723_v18 = vadd.f32 %v722_v17, %v721_v14 }
 0x14c   : > { %v591_v19 = vadd.f32 %v720_v16, %v340_v58  ;;  %v596_v20 = vadd.f32 %v723_v18, %v345_v3 }
 0x14e   : > { %604 = vst.msk [vmem:[%s1183_s6 + $0x20] sm:$0xff] %vm603_vm4, %v591_v19 }
 0x14f   : > { %610 = vst.msk [vmem:[%s1183_s6 + $0x48] sm:$0x3] %vm609_vm5, %v596_v20 }
 0x150 PF: > { %s13_s12 = sadd.s32 1, %s924_s12  }
 0x151   : > { %p10_p4 = scmp.ge.s32.totalorder %s13_s12, 4  }
 0x153   :  { %12 = sbr.rel (!%p10_p4) target bundleno = 1 (0x1), region = 62 }

// kernel: autoencoder_forward.9
= control target key start
LH: loop header
LB: loop body
LE: loop exit
PB: predicated region body
PF: predicated region fallthrough
CT: control target
= control target key end

     0   :  { %s1171_s14 = smov 0   ;;  %s1470_s0 = inlined_call_operand.vmem [shape: f32[2,250,784], index: 0, kind: input, shape index: {}]   ;;  %s1471_s1 = inlined_call_operand.vmem [shape: f32[1,250], index: 1, kind: input, shape index: {}]   ;;  %s1472_s2 = inlined_call_operand.<no memory space> [shape: f32[1,1], index: 2, kind: input, shape index: {}]   ;;  %s1473_s3 = inlined_call_operand.vmem [shape: f32[2,1,784], index: 3, kind: output, shape index: {}]  }
   0x1   :  { %v8_v0 = vstv %s1472_s2 }
   0x2   :  { %9 = vst [vmem:[#allocation2] sm:$0x1] %v8_v0 }
   0x3 LB: > { %s838_s15 = sadd.s32 4294967295, %s1143_s14   ;;  %p842_p0 = scmp.ge.s32.totalorder %s1143_s14, 1  ;;  %s1143_s14 = sphi %s1171_s14, %s15_s14  }
   0x4   : > { %p139_p1 = scmp.lt.s32.totalorder %s1143_s14, 3 }
   0x6   : > { %p140_p2 = pnand %p842_p0, %p139_p1 }
   0x7   : > { %p162_p3 = scmp.lt.s32.totalorder (!%p140_p2), %s838_s15, 1  ;;  %v402_v1 = vlaneseq (!%p140_p2)  ;;  %v1187_v3 = vld [vmem:[%s1471_s1] sm:$0x3] (!%p140_p2)  ;;  %vm416_vm0 = vcmask (!%p140_p2), 998400   ;;  %v1145_v31 = vmov (!%p140_p2), 0   ;;  %vm419_vm1 = vcmask (!%p140_p2), 1041408  }
   0x8   : > { %143 = sbr.rel (%p140_p2) target bundleno = 376 (0x178), region = 32  ;;  %1136 = vset.pattern.permute.xlu0 (!%p140_p2), %v1145_v31  ;;  %vm1146_vm2 = vmmov (!%p140_p2), 1  }
   0x9   : > { %v1182_v2 = vshrl.u32 (!%p140_p2), %v402_v1, 7  ;;  %vm1327_vm3 = vmpackc.low (!%p140_p2), %vm419_vm1, %vm1146_vm2  ;;  %vm782_vm4 = vcmp.lt.s32.totalorder (!%p140_p2), %v402_v1, 784 }
   0xb   : > { %v413_v4 = vsub.s32 (!%p140_p2), 1, %v1182_v2 }
   0xd   : > { %v1197_v5 = vrot.slane (!%p140_p2), %v1187_v3, %v413_v4 }
   0xf   : > { %s1477_s15 = smov (!%p162_p3, %s838_s15), 1  ;;  %846 = vmatprep.mubr.msk.f32.mxu0 %vm416_vm0, %v1197_v5  ;;  %849 = vmatprep.mubr.msk.f32.mxu1 %vm416_vm0, %v1197_v5 }
  0x10   : > { %s1123_s17 = smul.u32 1792, %s1477_s15 }
  0x11   : > { %s1124_s21 = smul.u32 7, %s1477_s15 }
  0x12   : > { %s1194_s20 = scalar_lea.vmem %s1470_s0, %s1123_s17 }
  0x13   : > { %v173_v6 = vld [vmem:[%s1194_s20 + $0x8] sm:$0xff]  ;;  %v180_v7 = vld [vmem:[%s1194_s20 + $0x40] sm:$0xff]  ;;  %v175_v8 = vld [vmem:[%s1194_s20 + $0x18] sm:$0xff]  ;;  %s170_s24 = scalar_lea.vmem %s1473_s3, %s1124_s21 }
  0x14   : > { %v892_v9 = vpack.c.bf16 %v180_v7, %v173_v6  ;;  %v182_v10 = vld [vmem:[%s1194_s20 + $0x50] sm:$0xff]  ;;  %v172_v11 = vld [vmem:[%s1194_s20] sm:$0xff]  ;;  %v179_v12 = vld [vmem:[%s1194_s20 + $0x38] sm:$0xff] }
  0x15   : > { %v958_v13 = vpack.c.bf16 %v182_v10, %v175_v8  ;;  %v894_v14 = vpack.c.bf16 %v179_v12, %v172_v11  ;;  %v174_v15 = vld [vmem:[%s1194_s20 + $0x10] sm:$0xff]  ;;  %v181_v16 = vld [vmem:[%s1194_s20 + $0x48] sm:$0xff]  ;;  %v187_v17 = vld [vmem:[%s1194_s20 + $0x78] sm:$0xff] }
  0x16   : > { %893 = vmatprep.subr.bf16.mxu0 %v892_v9  ;;  %v960_v18 = vpack.c.bf16 %v181_v16, %v174_v15  ;;  %v194_v19 = vld [vmem:[%s1194_s20 + $0xb0] sm:$0xff]  ;;  %v189_v20 = vld [vmem:[%s1194_s20 + $0x88] sm:$0xff]  ;;  %v196_v21 = vld [vmem:[%s1194_s20 + $0xc0] sm:$0xff] }
  0x17   : > { %959 = vmatprep.subr.bf16.mxu1 %v958_v13  ;;  %895 = vmatpush1.bf16.msra.mxu0 %v894_v14  ;;  %v896_v22 = vpack.c.bf16 %v194_v19, %v187_v17  ;;  %v962_v23 = vpack.c.bf16 %v196_v21, %v189_v20  ;;  %v186_v24 = vld [vmem:[%s1194_s20 + $0x70] sm:$0xff]  ;;  %v193_v25 = vld [vmem:[%s1194_s20 + $0xa8] sm:$0xff]  ;;  %v188_v26 = vld [vmem:[%s1194_s20 + $0x80] sm:$0xff] }
  0x18   : > { %961 = vmatpush1.bf16.msra.mxu1 %v960_v18  ;;  %v898_v27 = vpack.c.bf16 %v193_v25, %v186_v24  ;;  %v195_v28 = vld [vmem:[%s1194_s20 + $0xb8] sm:$0xff]  ;;  %v201_v29 = vld [vmem:[%s1194_s20 + $0xe8] sm:$0xff]  ;;  %v208_v30 = vld [vmem:[%s1194_s20 + $0x120] sm:$0xff] }
  0x19   : > { %897 = vmatprep.subr.bf16.mxu0 %v896_v22  ;;  %963 = vmatprep.subr.bf16.mxu1 %v962_v23  ;;  %v964_v32 = vpack.c.bf16 %v195_v28, %v188_v26  ;;  %v900_v33 = vpack.c.bf16 %v208_v30, %v201_v29  ;;  %v203_v34 = vld [vmem:[%s1194_s20 + $0xf8] sm:$0xff]  ;;  %v210_v35 = vld [vmem:[%s1194_s20 + $0x130] sm:$0xff]  ;;  %v200_v36 = vld [vmem:[%s1194_s20 + $0xe0] sm:$0xff] }
  0x1a   : > { %v966_v37 = vpack.c.bf16 %v210_v35, %v203_v34  ;;  %v207_v38 = vld [vmem:[%s1194_s20 + $0x118] sm:$0xff]  ;;  %v202_v39 = vld [vmem:[%s1194_s20 + $0xf0] sm:$0xff]  ;;  %v209_v40 = vld [vmem:[%s1194_s20 + $0x128] sm:$0xff] }
  0x1b   : > { %899 = vmatpush1.bf16.msra.mxu0 %v898_v27  ;;  %v902_v41 = vpack.c.bf16 %v207_v38, %v200_v36  ;;  %v215_v42 = vld [vmem:[%s1194_s20 + $0x158] sm:$0xff]  ;;  %v222_v43 = vld [vmem:[%s1194_s20 + $0x190] sm:$0xff]  ;;  %v217_v44 = vld [vmem:[%s1194_s20 + $0x168] sm:$0xff]  ;;  %v968_v45 = vpack.c.bf16 %v209_v40, %v202_v39 }
  0x1c   : > { %965 = vmatpush1.bf16.msra.mxu1 %v964_v32  ;;  %901 = vmatprep.subr.bf16.mxu0 %v900_v33  ;;  %v904_v46 = vpack.c.bf16 %v222_v43, %v215_v42  ;;  %v224_v47 = vld [vmem:[%s1194_s20 + $0x1a0] sm:$0xff]  ;;  %v214_v48 = vld [vmem:[%s1194_s20 + $0x150] sm:$0xff]  ;;  %v221_v49 = vld [vmem:[%s1194_s20 + $0x188] sm:$0xff] }
  0x1d   : > { %967 = vmatprep.subr.bf16.mxu1 %v966_v37  ;;  %v970_v50 = vpack.c.bf16 %v224_v47, %v217_v44  ;;  %v216_v51 = vld [vmem:[%s1194_s20 + $0x160] sm:$0xff]  ;;  %v223_v52 = vld [vmem:[%s1194_s20 + $0x198] sm:$0xff]  ;;  %v229_v53 = vld [vmem:[%s1194_s20 + $0x1c8] sm:$0xff]  ;;  %v906_v57 = vpack.c.bf16 %v221_v49, %v214_v48 }
  0x1e   : > { %v236_v54 = vld [vmem:[%s1194_s20 + $0x200] sm:$0xff]  ;;  %v231_v55 = vld [vmem:[%s1194_s20 + $0x1d8] sm:$0xff]  ;;  %v238_v56 = vld [vmem:[%s1194_s20 + $0x210] sm:$0xff]  ;;  %v972_v58 = vpack.c.bf16 %v223_v52, %v216_v51 }
  0x1f   : > { %903 = vmatpush1.bf16.msra.mxu0 %v902_v41  ;;  %v908_v59 = vpack.c.bf16 %v236_v54, %v229_v53  ;;  %v228_v60 = vld [vmem:[%s1194_s20 + $0x1c0] sm:$0xff]  ;;  %v235_v61 = vld [vmem:[%s1194_s20 + $0x1f8] sm:$0xff]  ;;  %v230_v62 = vld [vmem:[%s1194_s20 + $0x1d0] sm:$0xff]  ;;  %v974_v63 = vpack.c.bf16 %v238_v56, %v231_v55 }
  0x20   : > { %969 = vmatpush1.bf16.msra.mxu1 %v968_v45  ;;  %905 = vmatprep.subr.bf16.mxu0 %v904_v46  ;;  %v237_v0 = vld [vmem:[%s1194_s20 + $0x208] sm:$0xff]  ;;  %v243_v4 = vld [vmem:[%s1194_s20 + $0x238] sm:$0xff]  ;;  %v250_v6 = vld [vmem:[%s1194_s20 + $0x270] sm:$0xff]  ;;  %v910_v9 = vpack.c.bf16 %v235_v61, %v228_v60 }
  0x21   : > { %971 = vmatprep.subr.bf16.mxu1 %v970_v50  ;;  %v245_v7 = vld [vmem:[%s1194_s20 + $0x248] sm:$0xff]  ;;  %v252_v8 = vld [vmem:[%s1194_s20 + $0x280] sm:$0xff]  ;;  %v976_v10 = vpack.c.bf16 %v237_v0, %v230_v62  ;;  %v912_v11 = vpack.c.bf16 %v250_v6, %v243_v4  ;;  %v242_v12 = vld [vmem:[%s1194_s20 + $0x230] sm:$0xff] }
  0x22   : > { %v249_v13 = vld [vmem:[%s1194_s20 + $0x268] sm:$0xff]  ;;  %v244_v14 = vld [vmem:[%s1194_s20 + $0x240] sm:$0xff]  ;;  %v978_v15 = vpack.c.bf16 %v252_v8, %v245_v7  ;;  %v251_v16 = vld [vmem:[%s1194_s20 + $0x278] sm:$0xff] }
  0x23   : > { %907 = vmatpush1.bf16.msra.mxu0 %v906_v57  ;;  %v257_v17 = vld [vmem:[%s1194_s20 + $0x2a8] sm:$0xff]  ;;  %v264_v18 = vld [vmem:[%s1194_s20 + $0x2e0] sm:$0xff]  ;;  %v259_v19 = vld [vmem:[%s1194_s20 + $0x2b8] sm:$0xff]  ;;  %v914_v21 = vpack.c.bf16 %v249_v13, %v242_v12  ;;  %v980_v22 = vpack.c.bf16 %v251_v16, %v244_v14 }
  0x24   : > { %973 = vmatpush1.bf16.msra.mxu1 %v972_v58  ;;  %909 = vmatprep.subr.bf16.mxu0 %v908_v59  ;;  %v266_v20 = vld [vmem:[%s1194_s20 + $0x2f0] sm:$0xff]  ;;  %v916_v23 = vpack.c.bf16 %v264_v18, %v257_v17  ;;  %v256_v24 = vld [vmem:[%s1194_s20 + $0x2a0] sm:$0xff]  ;;  %v263_v25 = vld [vmem:[%s1194_s20 + $0x2d8] sm:$0xff] }
  0x25   : > { %975 = vmatprep.subr.bf16.mxu1 %v974_v63  ;;  %v258_v26 = vld [vmem:[%s1194_s20 + $0x2b0] sm:$0xff]  ;;  %v982_v27 = vpack.c.bf16 %v266_v20, %v259_v19  ;;  %v265_v28 = vld [vmem:[%s1194_s20 + $0x2e8] sm:$0xff]  ;;  %v271_v29 = vld [vmem:[%s1194_s20 + $0x318] sm:$0xff]  ;;  %v918_v33 = vpack.c.bf16 %v263_v25, %v256_v24 }
  0x26   : > { %v278_v30 = vld [vmem:[%s1194_s20 + $0x350] sm:$0xff]  ;;  %v273_v31 = vld [vmem:[%s1194_s20 + $0x328] sm:$0xff]  ;;  %v280_v32 = vld [vmem:[%s1194_s20 + $0x360] sm:$0xff]  ;;  %v984_v34 = vpack.c.bf16 %v265_v28, %v258_v26 }
  0x27   : > { %911 = vmatpush1.bf16.msra.mxu0 %v910_v9  ;;  %v920_v35 = vpack.c.bf16 %v278_v30, %v271_v29  ;;  %v270_v36 = vld [vmem:[%s1194_s20 + $0x310] sm:$0xff]  ;;  %v277_v37 = vld [vmem:[%s1194_s20 + $0x348] sm:$0xff]  ;;  %v272_v38 = vld [vmem:[%s1194_s20 + $0x320] sm:$0xff]  ;;  %v986_v39 = vpack.c.bf16 %v280_v32, %v273_v31 }
  0x28   : > { %977 = vmatpush1.bf16.msra.mxu1 %v976_v10  ;;  %913 = vmatprep.subr.bf16.mxu0 %v912_v11  ;;  %v279_v40 = vld [vmem:[%s1194_s20 + $0x358] sm:$0xff]  ;;  %v285_v41 = vld [vmem:[%s1194_s20 + $0x388] sm:$0xff]  ;;  %v292_v42 = vld [vmem:[%s1194_s20 + $0x3c0] sm:$0xff]  ;;  %v922_v45 = vpack.c.bf16 %v277_v37, %v270_v36 }
  0x29   : > { %979 = vmatprep.subr.bf16.mxu1 %v978_v15  ;;  %v287_v43 = vld [vmem:[%s1194_s20 + $0x398] sm:$0xff]  ;;  %v294_v44 = vld [vmem:[%s1194_s20 + $0x3d0] sm:$0xff]  ;;  %v988_v46 = vpack.c.bf16 %v279_v40, %v272_v38  ;;  %v924_v47 = vpack.c.bf16 %v292_v42, %v285_v41  ;;  %v284_v48 = vld [vmem:[%s1194_s20 + $0x380] sm:$0xff] }
  0x2a   : > { %v291_v49 = vld [vmem:[%s1194_s20 + $0x3b8] sm:$0xff]  ;;  %v286_v50 = vld [vmem:[%s1194_s20 + $0x390] sm:$0xff]  ;;  %v990_v51 = vpack.c.bf16 %v294_v44, %v287_v43  ;;  %v293_v52 = vld [vmem:[%s1194_s20 + $0x3c8] sm:$0xff] }
  0x2b   : > { %915 = vmatpush1.bf16.msra.mxu0 %v914_v21  ;;  %v299_v53 = vld [vmem:[%s1194_s20 + $0x3f8] sm:$0xff]  ;;  %v306_v54 = vld [vmem:[%s1194_s20 + $0x430] sm:$0xff]  ;;  %v301_v55 = vld [vmem:[%s1194_s20 + $0x408] sm:$0xff]  ;;  %v926_v57 = vpack.c.bf16 %v291_v49, %v284_v48  ;;  %v992_v58 = vpack.c.bf16 %v293_v52, %v286_v50 }
  0x2c   : > { %981 = vmatpush1.bf16.msra.mxu1 %v980_v22  ;;  %917 = vmatprep.subr.bf16.mxu0 %v916_v23  ;;  %v308_v56 = vld [vmem:[%s1194_s20 + $0x440] sm:$0xff]  ;;  %v928_v59 = vpack.c.bf16 %v306_v54, %v299_v53  ;;  %v298_v60 = vld [vmem:[%s1194_s20 + $0x3f0] sm:$0xff]  ;;  %v305_v61 = vld [vmem:[%s1194_s20 + $0x428] sm:$0xff] }
  0x2d   : > { %983 = vmatprep.subr.bf16.mxu1 %v982_v27  ;;  %v300_v62 = vld [vmem:[%s1194_s20 + $0x400] sm:$0xff]  ;;  %v994_v63 = vpack.c.bf16 %v308_v56, %v301_v55  ;;  %v307_v0 = vld [vmem:[%s1194_s20 + $0x438] sm:$0xff]  ;;  %v313_v4 = vld [vmem:[%s1194_s20 + $0x468] sm:$0xff]  ;;  %v930_v9 = vpack.c.bf16 %v305_v61, %v298_v60 }
  0x2e   : > { %v320_v6 = vld [vmem:[%s1194_s20 + $0x4a0] sm:$0xff]  ;;  %v315_v7 = vld [vmem:[%s1194_s20 + $0x478] sm:$0xff]  ;;  %v322_v8 = vld [vmem:[%s1194_s20 + $0x4b0] sm:$0xff]  ;;  %v996_v10 = vpack.c.bf16 %v307_v0, %v300_v62 }
  0x2f   : > { %919 = vmatpush1.bf16.msra.mxu0 %v918_v33  ;;  %v932_v11 = vpack.c.bf16 %v320_v6, %v313_v4  ;;  %v312_v12 = vld [vmem:[%s1194_s20 + $0x460] sm:$0xff]  ;;  %v319_v13 = vld [vmem:[%s1194_s20 + $0x498] sm:$0xff]  ;;  %v314_v14 = vld [vmem:[%s1194_s20 + $0x470] sm:$0xff]  ;;  %v998_v15 = vpack.c.bf16 %v322_v8, %v315_v7 }
  0x30   : > { %985 = vmatpush1.bf16.msra.mxu1 %v984_v34  ;;  %921 = vmatprep.subr.bf16.mxu0 %v920_v35  ;;  %v321_v16 = vld [vmem:[%s1194_s20 + $0x4a8] sm:$0xff]  ;;  %v327_v17 = vld [vmem:[%s1194_s20 + $0x4d8] sm:$0xff]  ;;  %v334_v18 = vld [vmem:[%s1194_s20 + $0x510] sm:$0xff]  ;;  %v934_v21 = vpack.c.bf16 %v319_v13, %v312_v12 }
  0x31   : > { %987 = vmatprep.subr.bf16.mxu1 %v986_v39  ;;  %v329_v19 = vld [vmem:[%s1194_s20 + $0x4e8] sm:$0xff]  ;;  %v336_v20 = vld [vmem:[%s1194_s20 + $0x520] sm:$0xff]  ;;  %v1000_v22 = vpack.c.bf16 %v321_v16, %v314_v14  ;;  %v936_v23 = vpack.c.bf16 %v334_v18, %v327_v17  ;;  %v326_v24 = vld [vmem:[%s1194_s20 + $0x4d0] sm:$0xff] }
  0x32   : > { %v333_v25 = vld [vmem:[%s1194_s20 + $0x508] sm:$0xff]  ;;  %v328_v26 = vld [vmem:[%s1194_s20 + $0x4e0] sm:$0xff]  ;;  %v1002_v27 = vpack.c.bf16 %v336_v20, %v329_v19  ;;  %v335_v28 = vld [vmem:[%s1194_s20 + $0x518] sm:$0xff]  ;;  %v404_v20 = vsub.s32 0, %v1182_v2 }
  0x33   : > { %923 = vmatpush1.bf16.msra.mxu0 %v922_v45  ;;  %v341_v29 = vld [vmem:[%s1194_s20 + $0x548] sm:$0xff]  ;;  %v348_v30 = vld [vmem:[%s1194_s20 + $0x580] sm:$0xff]  ;;  %v343_v31 = vld [vmem:[%s1194_s20 + $0x558] sm:$0xff]  ;;  %v938_v33 = vpack.c.bf16 %v333_v25, %v326_v24  ;;  %v1004_v34 = vpack.c.bf16 %v335_v28, %v328_v26 }
  0x34   : > { %989 = vmatpush1.bf16.msra.mxu1 %v988_v46  ;;  %925 = vmatprep.subr.bf16.mxu0 %v924_v47  ;;  %v350_v32 = vld [vmem:[%s1194_s20 + $0x590] sm:$0xff]  ;;  %v940_v35 = vpack.c.bf16 %v348_v30, %v341_v29  ;;  %v340_v36 = vld [vmem:[%s1194_s20 + $0x540] sm:$0xff]  ;;  %v347_v37 = vld [vmem:[%s1194_s20 + $0x578] sm:$0xff] }
  0x35   : > { %991 = vmatprep.subr.bf16.mxu1 %v990_v51  ;;  %v342_v38 = vld [vmem:[%s1194_s20 + $0x550] sm:$0xff]  ;;  %v1006_v39 = vpack.c.bf16 %v350_v32, %v343_v31  ;;  %v349_v40 = vld [vmem:[%s1194_s20 + $0x588] sm:$0xff]  ;;  %v355_v41 = vld [vmem:[%s1194_s20 + $0x5b8] sm:$0xff]  ;;  %v942_v45 = vpack.c.bf16 %v347_v37, %v340_v36 }
  0x36   : > { %v362_v42 = vld [vmem:[%s1194_s20 + $0x5f0] sm:$0xff]  ;;  %v357_v43 = vld [vmem:[%s1194_s20 + $0x5c8] sm:$0xff]  ;;  %v364_v44 = vld [vmem:[%s1194_s20 + $0x600] sm:$0xff]  ;;  %v1008_v46 = vpack.c.bf16 %v349_v40, %v342_v38 }
  0x37   : > { %927 = vmatpush1.bf16.msra.mxu0 %v926_v57  ;;  %v944_v47 = vpack.c.bf16 %v362_v42, %v355_v41  ;;  %v354_v48 = vld [vmem:[%s1194_s20 + $0x5b0] sm:$0xff]  ;;  %v361_v49 = vld [vmem:[%s1194_s20 + $0x5e8] sm:$0xff]  ;;  %v356_v50 = vld [vmem:[%s1194_s20 + $0x5c0] sm:$0xff]  ;;  %v1010_v51 = vpack.c.bf16 %v364_v44, %v357_v43 }
  0x38   : > { %993 = vmatpush1.bf16.msra.mxu1 %v992_v58  ;;  %929 = vmatprep.subr.bf16.mxu0 %v928_v59  ;;  %v363_v52 = vld [vmem:[%s1194_s20 + $0x5f8] sm:$0xff]  ;;  %v369_v53 = vld [vmem:[%s1194_s20 + $0x628] sm:$0xff]  ;;  %v376_v54 = vld [vmem:[%s1194_s20 + $0x660] sm:$0xff]  ;;  %v946_v57 = vpack.c.bf16 %v361_v49, %v354_v48 }
  0x39   : > { %995 = vmatprep.subr.bf16.mxu1 %v994_v63  ;;  %v371_v55 = vld [vmem:[%s1194_s20 + $0x638] sm:$0xff]  ;;  %v378_v56 = vld [vmem:[%s1194_s20 + $0x670] sm:$0xff]  ;;  %v1012_v58 = vpack.c.bf16 %v363_v52, %v356_v50  ;;  %v948_v59 = vpack.c.bf16 %v376_v54, %v369_v53  ;;  %v368_v60 = vld [vmem:[%s1194_s20 + $0x620] sm:$0xff] }
  0x3a   : > { %v375_v61 = vld [vmem:[%s1194_s20 + $0x658] sm:$0xff]  ;;  %v370_v62 = vld [vmem:[%s1194_s20 + $0x630] sm:$0xff]  ;;  %v1014_v63 = vpack.c.bf16 %v378_v56, %v371_v55  ;;  %v377_v0 = vld [vmem:[%s1194_s20 + $0x668] sm:$0xff] }
  0x3b   : > { %931 = vmatpush1.bf16.msra.mxu0 %v930_v9  ;;  %v383_v4 = vld [vmem:[%s1194_s20 + $0x698] sm:$0xff]  ;;  %v390_v6 = vld [vmem:[%s1194_s20 + $0x6d0] sm:$0x3]  ;;  %v385_v7 = vld [vmem:[%s1194_s20 + $0x6a8] sm:$0xff]  ;;  %v950_v9 = vpack.c.bf16 %v375_v61, %v368_v60 }
  0x3c   : > { %997 = vmatpush1.bf16.msra.mxu1 %v996_v10  ;;  %933 = vmatprep.subr.bf16.mxu0 %v932_v11  ;;  %v392_v8 = vld [vmem:[%s1194_s20 + $0x6e0] sm:$0x3]  ;;  %v1016_v11 = vpack.c.bf16 %v377_v0, %v370_v62  ;;  %v952_v12 = vpack.c.bf16 %v390_v6, %v383_v4  ;;  %v382_v13 = vld [vmem:[%s1194_s20 + $0x690] sm:$0xff]  ;;  %v389_v14 = vld [vmem:[%s1194_s20 + $0x6c8] sm:$0x3] }
  0x3d   : > { %999 = vmatprep.subr.bf16.mxu1 %v998_v15  ;;  %v384_v15 = vld [vmem:[%s1194_s20 + $0x6a0] sm:$0xff]  ;;  %v1018_v16 = vpack.c.bf16 %v392_v8, %v385_v7  ;;  %v391_v17 = vld [vmem:[%s1194_s20 + $0x6d8] sm:$0x3]  ;;  %v177_v18 = vld [vmem:[%s1194_s20 + $0x28] sm:$0xff] }
  0x3e   : > { %v184_v19 = vld [vmem:[%s1194_s20 + $0x60] sm:$0xff]  ;;  %v1021_v24 = vpack.c.bf16 %v391_v17, %v384_v15  ;;  %v191_v28 = vld [vmem:[%s1194_s20 + $0x98] sm:$0xff]  ;;  %v198_v29 = vld [vmem:[%s1194_s20 + $0xd0] sm:$0xff] }
  0x3f   : > { %935 = vmatpush1.bf16.msra.mxu0 %v934_v21  ;;  %v290_v21 = vld [vmem:[%s1194_s20 + $0x3b0] sm:$0xff]  ;;  %v1024_v25 = vpack.c.bf16 %v184_v19, %v177_v18  ;;  %v176_v26 = vld [vmem:[%s1194_s20 + $0x20] sm:$0xff]  ;;  %v185_v32 = vld [vmem:[%s1194_s20 + $0x68] sm:$0xff]  ;;  %v1028_v37 = vpack.c.bf16 %v198_v29, %v191_v28 }
  0x40   : > { %1001 = vmatpush1.bf16.msra.mxu1 %v1000_v22  ;;  %937 = vmatprep.subr.bf16.mxu0 %v936_v23  ;;  %v297_v22 = vld [vmem:[%s1194_s20 + $0x3e8] sm:$0xff]  ;;  %v955_v23 = vpack.c.bf16 %v389_v14, %v382_v13  ;;  %v178_v31 = vld [vmem:[%s1194_s20 + $0x30] sm:$0xff]  ;;  %v212_v41 = vld [vmem:[%s1194_s20 + $0x140] sm:$0xff] }
  0x41   : > { %1003 = vmatprep.subr.bf16.mxu1 %v1002_v27  ;;  %v183_v27 = vld [vmem:[%s1194_s20 + $0x58] sm:$0xff]  ;;  %v1090_v30 = vpack.c.bf16 %v297_v22, %v290_v21  ;;  %v190_v38 = vld [vmem:[%s1194_s20 + $0x90] sm:$0xff]  ;;  %v205_v40 = vld [vmem:[%s1194_s20 + $0x108] sm:$0xff] }
  0x42   : > { %v1026_v36 = vpack.c.bf16 %v183_v27, %v176_v26  ;;  %v192_v43 = vld [vmem:[%s1194_s20 + $0xa0] sm:$0xff]  ;;  %v199_v44 = vld [vmem:[%s1194_s20 + $0xd8] sm:$0xff]  ;;  %v1032_v48 = vpack.c.bf16 %v212_v41, %v205_v40  ;;  %v226_v53 = vld [vmem:[%s1194_s20 + $0x1b0] sm:$0xff] }
  0x43   : > { %939 = vmatpush1.bf16.msra.mxu0 %v938_v33  ;;  %v1353_v33 = vrot.slane %v1187_v3, %v404_v20  ;;  %v1092_v3 = vpack.c.bf16 %v185_v32, %v178_v31  ;;  %v204_v49 = vld [vmem:[%s1194_s20 + $0x100] sm:$0xff]  ;;  %v211_v50 = vld [vmem:[%s1194_s20 + $0x138] sm:$0xff]  ;;  %v1096_v52 = vpack.c.bf16 %v199_v44, %v192_v43  ;;  %v206_v55 = vld [vmem:[%s1194_s20 + $0x110] sm:$0xff] }
  0x44   : > { %1005 = vmatpush1.bf16.msra.mxu1 %v1004_v34  ;;  %941 = vmatprep.subr.bf16.mxu0 %v940_v35  ;;  %v304_v34 = vld [vmem:[%s1194_s20 + $0x420] sm:$0xff]  ;;  %v311_v35 = vld [vmem:[%s1194_s20 + $0x458] sm:$0xff]  ;;  %v213_v56 = vld [vmem:[%s1194_s20 + $0x148] sm:$0xff] }
  0x45   : > { %1007 = vmatprep.subr.bf16.mxu1 %v1006_v39  ;;  %v197_v39 = vld [vmem:[%s1194_s20 + $0xc8] sm:$0xff]  ;;  %v1094_v42 = vpack.c.bf16 %v311_v35, %v304_v34  ;;  %v218_v60 = vld [vmem:[%s1194_s20 + $0x170] sm:$0xff]  ;;  %v240_v0 = vld [vmem:[%s1194_s20 + $0x220] sm:$0xff]  ;;  %v1100_v4 = vpack.c.bf16 %v213_v56, %v206_v55 }
  0x46   : > { %v225_v62 = vld [vmem:[%s1194_s20 + $0x1a8] sm:$0xff]  ;;  %v220_v7 = vld [vmem:[%s1194_s20 + $0x180] sm:$0xff]  ;;  %v239_v15 = vld [vmem:[%s1194_s20 + $0x218] sm:$0xff] }
  0x47   : > { %943 = vmatpush1.bf16.msra.mxu0 %v942_v45  ;;  %v318_v45 = vld [vmem:[%s1194_s20 + $0x490] sm:$0xff]  ;;  %v396_v8 = vld [vmem:[#allocation2] sm:$0x1]  ;;  %v241_v22 = vld [vmem:[%s1194_s20 + $0x228] sm:$0xff] }
  0x48   : > { %1009 = vmatpush1.bf16.msra.mxu1 %v1008_v46  ;;  %945 = vmatprep.subr.bf16.mxu0 %v944_v47  ;;  %v325_v46 = vld [vmem:[%s1194_s20 + $0x4c8] sm:$0xff]  ;;  %v1030_v47 = vpack.c.bf16 %v197_v39, %v190_v38  ;;  %v232_v14 = vld [vmem:[%s1194_s20 + $0x1e0] sm:$0xff]  ;;  %v254_v18 = vld [vmem:[%s1194_s20 + $0x290] sm:$0xff] }
  0x49   : > { %1011 = vmatprep.subr.bf16.mxu1 %v1010_v51  ;;  %v219_v51 = vld [vmem:[%s1194_s20 + $0x178] sm:$0xff]  ;;  %v1098_v54 = vpack.c.bf16 %v325_v46, %v318_v45  ;;  %399 = vperm.xlu0 %1136, %v396_v8   ;;  %v234_v21 = vld [vmem:[%s1194_s20 + $0x1f0] sm:$0xff]  ;;  %v253_v28 = vld [vmem:[%s1194_s20 + $0x288] sm:$0xff] }
  0x4a   : > { %v1036_v61 = vpack.c.bf16 %v226_v53, %v219_v51  ;;  %v246_v27 = vld [vmem:[%s1194_s20 + $0x250] sm:$0xff]  ;;  %v261_v29 = vld [vmem:[%s1194_s20 + $0x2c8] sm:$0xff]  ;;  %v268_v31 = vld [vmem:[%s1194_s20 + $0x300] sm:$0xff] }
  0x4b   : > { %947 = vmatpush1.bf16.msra.mxu0 %v946_v57  ;;  %v332_v57 = vld [vmem:[%s1194_s20 + $0x500] sm:$0xff]  ;;  %v255_v35 = vld [vmem:[%s1194_s20 + $0x298] sm:$0xff]  ;;  %v1046_v38 = vpack.c.bf16 %v253_v28, %v246_v27  ;;  %v1048_v39 = vpack.c.bf16 %v268_v31, %v261_v29  ;;  %v282_v43 = vld [vmem:[%s1194_s20 + $0x370] sm:$0xff] }
  0x4c   : > { %1013 = vmatpush1.bf16.msra.mxu1 %v1012_v58  ;;  %949 = vmatprep.subr.bf16.mxu0 %v948_v59  ;;  %v339_v58 = vld [vmem:[%s1194_s20 + $0x538] sm:$0xff]  ;;  %v1034_v59 = vpack.c.bf16 %v211_v50, %v204_v49  ;;  %v248_v34 = vld [vmem:[%s1194_s20 + $0x260] sm:$0xff]  ;;  %v262_v45 = vld [vmem:[%s1194_s20 + $0x2d0] sm:$0xff] }
  0x4d   : > { %1015 = vmatprep.subr.bf16.mxu1 %v1014_v63  ;;  %v233_v63 = vld [vmem:[%s1194_s20 + $0x1e8] sm:$0xff]  ;;  %v1102_v6 = vpack.c.bf16 %v339_v58, %v332_v57  ;;  %v260_v40 = vld [vmem:[%s1194_s20 + $0x2c0] sm:$0xff]  ;;  %v275_v41 = vld [vmem:[%s1194_s20 + $0x338] sm:$0xff] }
  0x4e   : > { %v1040_v13 = vpack.c.bf16 %v240_v0, %v233_v63  ;;  %v269_v46 = vld [vmem:[%s1194_s20 + $0x308] sm:$0xff]  ;;  %v1052_v50 = vpack.c.bf16 %v282_v43, %v275_v41  ;;  %v274_v51 = vld [vmem:[%s1194_s20 + $0x330] sm:$0xff]  ;;  %v296_v55 = vld [vmem:[%s1194_s20 + $0x3e0] sm:$0xff] }
  0x4f   : > { %951 = vmatpush1.bf16.msra.mxu0 %v950_v9  ;;  %v346_v9 = vld [vmem:[%s1194_s20 + $0x570] sm:$0xff]  ;;  %v289_v53 = vld [vmem:[%s1194_s20 + $0x3a8] sm:$0xff]  ;;  %v276_v57 = vld [vmem:[%s1194_s20 + $0x340] sm:$0xff] }
  0x50   : > { %1017 = vmatpush1.bf16.msra.mxu1 %v1016_v11  ;;  %954 = vmatprep.subr.msk.bf16.mxu0 %vm1327_vm3, %v952_v12  ;;  %v353_v11 = vld [vmem:[%s1194_s20 + $0x5a8] sm:$0xff]  ;;  %v1038_v12 = vpack.c.bf16 %v225_v62, %v218_v60  ;;  %v283_v58 = vld [vmem:[%s1194_s20 + $0x378] sm:$0xff]  ;;  %v1056_v60 = vpack.c.bf16 %v296_v55, %v289_v53  ;;  %v344_v27 = vld [vmem:[%s1194_s20 + $0x560] sm:$0xff] }
  0x51   : > { %1020 = vmatprep.subr.msk.bf16.mxu1 %vm1327_vm3, %v1018_v16  ;;  %v247_v16 = vld [vmem:[%s1194_s20 + $0x258] sm:$0xff]  ;;  %v1106_v19 = vpack.c.bf16 %v353_v11, %v346_v9  ;;  %v1121_v63 = vpack.c.bf16 %v283_v58, %v276_v57  ;;  %v309_v8 = vld [vmem:[%s1194_s20 + $0x448] sm:$0xff]  ;;  %v324_v11 = vld [vmem:[%s1194_s20 + $0x4c0] sm:$0xff] }
  0x52   : > { %v1044_v26 = vpack.c.bf16 %v254_v18, %v247_v16  ;;  %v295_v62 = vld [vmem:[%s1194_s20 + $0x3d8] sm:$0xff]  ;;  %v317_v9 = vld [vmem:[%s1194_s20 + $0x488] sm:$0xff] }
  0x53   : > { %957 = vmatpush1.bf16.msk.msra.mxu0 %vm1327_vm3, %v955_v23  ;;  %v360_v23 = vld [vmem:[%s1194_s20 + $0x5e0] sm:$0xff]  ;;  %v303_v0 = vld [vmem:[%s1194_s20 + $0x418] sm:$0xff] }
  0x54   : > { %1023 = vmatpush1.bf16.msk.msra.mxu1 %vm1327_vm3, %v1021_v24  ;;  %1025 = vmatprep.subr.bf16.mxu0 %v1024_v25  ;;  %v367_v24 = vld [vmem:[%s1194_s20 + $0x618] sm:$0xff]  ;;  %v1042_v25 = vpack.c.bf16 %v239_v15, %v232_v14  ;;  %v316_v14 = vld [vmem:[%s1194_s20 + $0x480] sm:$0xff] }
  0x55   : > { %1091 = vmatprep.subr.bf16.mxu1 %v1090_v30  ;;  %v1108_v30 = vpack.c.bf16 %v241_v22, %v234_v21  ;;  %v1110_v32 = vpack.c.bf16 %v367_v24, %v360_v23  ;;  %v323_v15 = vld [vmem:[%s1194_s20 + $0x4b8] sm:$0xff]  ;;  %v330_v21 = vld [vmem:[%s1194_s20 + $0x4f0] sm:$0xff]  ;;  %v337_v22 = vld [vmem:[%s1194_s20 + $0x528] sm:$0xff] }
  0x56   : > { %506 = vmatmul.mubr.f32.vlgmr.msra.gmra.mrb[0].mxu0 %v1353_v33  ;;  %v331_v16 = vld [vmem:[%s1194_s20 + $0x4f8] sm:$0xff]  ;;  %v1066_v18 = vpack.c.bf16 %v323_v15, %v316_v14  ;;  %v345_v23 = vld [vmem:[%s1194_s20 + $0x568] sm:$0xff]  ;;  %v352_v24 = vld [vmem:[%s1194_s20 + $0x5a0] sm:$0xff] }
  0x57   : > { %577 = vmatmul.mubr.f32.vlgmr.msra.gmra.mrb[0].mxu1 %v1353_v33  ;;  %1027 = vmatpush1.bf16.msra.mxu0 %v1026_v36  ;;  %v374_v36 = vld [vmem:[%s1194_s20 + $0x650] sm:$0xff]  ;;  %v351_v28 = vld [vmem:[%s1194_s20 + $0x598] sm:$0xff] }
  0x58   : > { %1029 = vmatprep.subr.bf16.mxu0 %v1028_v37  ;;  %1093 = vmatpush3.bf16.msra.mxu1 %v1092_v3  ;;  %v381_v37 = vld [vmem:[%s1194_s20 + $0x688] sm:$0xff]  ;;  %v267_v3 = vld [vmem:[%s1194_s20 + $0x2f8] sm:$0xff]  ;;  %v1074_v31 = vpack.c.bf16 %v351_v28, %v344_v27 }
  0x59   : > { %1095 = vmatprep.subr.bf16.mxu1 %v1094_v42  ;;  %854 = vmatprep.mubr.msk.f32.mxu1 %vm416_vm0, %v1197_v5  ;;  %v1112_v42 = vpack.c.bf16 %v255_v35, %v248_v34  ;;  %v1114_v44 = vpack.c.bf16 %v381_v37, %v374_v36  ;;  %v1050_v49 = vpack.c.bf16 %v267_v3, %v260_v40  ;;  %v359_v29 = vld [vmem:[%s1194_s20 + $0x5d8] sm:$0xff]  ;;  %v358_v34 = vld [vmem:[%s1194_s20 + $0x5d0] sm:$0xff]  ;;  %v365_v35 = vld [vmem:[%s1194_s20 + $0x608] sm:$0xff] }
  0x5a   : > { %852 = vmatprep.mubr.msk.f32.mxu0 %vm416_vm0, %v1197_v5  ;;  %v227_v5 = vld [vmem:[%s1194_s20 + $0x1b8] sm:$0xff]  ;;  %v373_v36 = vld [vmem:[%s1194_s20 + $0x648] sm:$0xff]  ;;  %v380_v37 = vld [vmem:[%s1194_s20 + $0x680] sm:$0xff] }
  0x5b   : > { %1031 = vmatpush1.bf16.msra.mxu0 %v1030_v47  ;;  %v1104_v17 = vpack.c.bf16 %v227_v5, %v220_v7  ;;  %v388_v47 = vld [vmem:[%s1194_s20 + $0x6c0] sm:$0xff]  ;;  %v302_v5 = vld [vmem:[%s1194_s20 + $0x410] sm:$0xff]  ;;  %v379_v3 = vld [vmem:[%s1194_s20 + $0x678] sm:$0xff] }
  0x5c   : > { %1033 = vmatprep.subr.bf16.mxu0 %v1032_v48  ;;  %1097 = vmatpush3.bf16.msra.mxu1 %v1096_v52  ;;  %v395_v48 = vld [vmem:[%s1194_s20 + $0x6f8] sm:$0x3]  ;;  %v281_v52 = vld [vmem:[%s1194_s20 + $0x368] sm:$0xff]  ;;  %v372_v40 = vld [vmem:[%s1194_s20 + $0x640] sm:$0xff] }
  0x5d   : > { %1099 = vmatprep.subr.bf16.mxu1 %v1098_v54  ;;  %v1116_v54 = vpack.c.bf16 %v269_v46, %v262_v45  ;;  %v1118_v56 = vpack.c.bf16 %v395_v48, %v388_v47  ;;  %v387_v41 = vld [vmem:[%s1194_s20 + $0x6b8] sm:$0xff]  ;;  %v1082_v43 = vpack.c.bf16 %v379_v3, %v372_v40  ;;  %v386_v45 = vld [vmem:[%s1194_s20 + $0x6b0] sm:$0xff]  ;;  %v393_v46 = vld [vmem:[%s1194_s20 + $0x6e8] sm:$0x3]  ;;  %v1147_v48 = vmov 1966171168  }
  0x5e   : > { %v1087_v47 = vpack.c.bf16 %v393_v46, %v386_v45 }
  0x5f   : > { %1035 = vmatpush1.bf16.msra.mxu0 %v1034_v59  ;;  %v1054_v59 = vpack.c.bf16 %v281_v52, %v274_v51 }
  0x60   : > { %1037 = vmatprep.subr.bf16.mxu0 %v1036_v61  ;;  %1101 = vmatpush3.bf16.msra.mxu1 %v1100_v4  ;;  %v288_v61 = vld [vmem:[%s1194_s20 + $0x3a0] sm:$0xff]  ;;  %v310_v4 = vld [vmem:[%s1194_s20 + $0x450] sm:$0xff] }
  0x61   : > { %1103 = vmatprep.subr.bf16.mxu1 %v1102_v6  ;;  %v1058_v6 = vpack.c.bf16 %v295_v62, %v288_v61  ;;  %v1060_v7 = vpack.c.bf16 %v310_v4, %v303_v0 }
  0x63   : > { %1039 = vmatpush1.bf16.msra.mxu0 %v1038_v12  ;;  %v1062_v12 = vpack.c.bf16 %v309_v8, %v302_v5 }
  0x64   : > { %1041 = vmatprep.subr.bf16.mxu0 %v1040_v13  ;;  %1105 = vmatpush3.bf16.msra.mxu1 %v1104_v17  ;;  %v1064_v13 = vpack.c.bf16 %v324_v11, %v317_v9  ;;  %v338_v17 = vld [vmem:[%s1194_s20 + $0x530] sm:$0xff] }
  0x65   : > { %1107 = vmatprep.subr.bf16.mxu1 %v1106_v19  ;;  %v1068_v19 = vpack.c.bf16 %v338_v17, %v331_v16 }
  0x67   : > { %1043 = vmatpush1.bf16.msra.mxu0 %v1042_v25  ;;  %v1070_v25 = vpack.c.bf16 %v337_v22, %v330_v21 }
  0x68   : > { %1045 = vmatprep.subr.bf16.mxu0 %v1044_v26  ;;  %1109 = vmatpush3.bf16.msra.mxu1 %v1108_v30  ;;  %v1072_v26 = vpack.c.bf16 %v352_v24, %v345_v23  ;;  %v366_v30 = vld [vmem:[%s1194_s20 + $0x610] sm:$0xff] }
  0x69   : > { %1111 = vmatprep.subr.bf16.mxu1 %v1110_v32  ;;  %v1076_v32 = vpack.c.bf16 %v366_v30, %v359_v29 }
  0x6b   : > { %1047 = vmatpush1.bf16.msra.mxu0 %v1046_v38  ;;  %v1078_v38 = vpack.c.bf16 %v365_v35, %v358_v34 }
  0x6c   : > { %1049 = vmatprep.subr.bf16.mxu0 %v1048_v39  ;;  %1113 = vmatpush3.bf16.msra.mxu1 %v1112_v42  ;;  %v1080_v39 = vpack.c.bf16 %v380_v37, %v373_v36  ;;  %v394_v42 = vld [vmem:[%s1194_s20 + $0x6f0] sm:$0x3] }
  0x6d   : > { %1115 = vmatprep.subr.bf16.mxu1 %v1114_v44  ;;  %v1084_v44 = vpack.c.bf16 %v394_v42, %v387_v41 }
  0x6f   : > { %1051 = vmatpush1.bf16.msra.mxu0 %v1050_v49  ;;  %v735_v49 = vunpack.c.l.s4 %v1147_v48 }
  0x70   : > { %1053 = vmatprep.subr.bf16.mxu0 %v1052_v50  ;;  %1117 = vmatpush3.bf16.msra.mxu1 %v1116_v54 }
  0x71   : > { %1120 = vmatprep.subr.msk.bf16.mxu1 %vm1327_vm3, %v1118_v56  ;;  %v736_v52 = vunpack.c.0.s8 %v735_v49 }
  0x73   : > { %1055 = vmatpush1.bf16.msra.mxu0 %v1054_v59  ;;  %v739_v57 = vsub.s32 %v736_v52, %v1182_v2 }
  0x74   : > { %1057 = vmatprep.subr.bf16.mxu0 %v1056_v60  ;;  %1122 = vmatpush3.bf16.msra.mxu1 %v1121_v63 }
  0x77   : > { %1059 = vmatpush1.bf16.msra.mxu0 %v1058_v6  ;;  %719 = vmatmul.mubr.f32.vlgmr.msra.gmra.mrb[2].mxu1 %v1353_v33 }
  0x78   : > { %1061 = vmatprep.subr.bf16.mxu0 %v1060_v7 }
  0x7b   : > { %1063 = vmatpush1.bf16.msra.mxu0 %v1062_v12 }
  0x7c   : > { %1065 = vmatprep.subr.bf16.mxu0 %v1064_v13 }
  0x7f   : > { %1067 = vmatpush1.bf16.msra.mxu0 %v1066_v18 }
  0x80   : > { %1069 = vmatprep.subr.bf16.mxu0 %v1068_v19 }
  0x83   : > { %1071 = vmatpush1.bf16.msra.mxu0 %v1070_v25 }
  0x84   : > { %1073 = vmatprep.subr.bf16.mxu0 %v1072_v26 }
  0x87   : > { %1075 = vmatpush1.bf16.msra.mxu0 %v1074_v31 }
  0x88   : > { %1077 = vmatprep.subr.bf16.mxu0 %v1076_v32 }
  0x8b   : > { %1079 = vmatpush1.bf16.msra.mxu0 %v1078_v38 }
  0x8c   : > { %1081 = vmatprep.subr.bf16.mxu0 %v1080_v39 }
  0x8f   : > { %1083 = vmatpush1.bf16.msra.mxu0 %v1082_v43 }
  0x90   : > { %1086 = vmatprep.subr.msk.bf16.mxu0 %vm1327_vm3, %v1084_v44 }
  0x93   : > { %1089 = vmatpush1.bf16.msk.msra.mxu0 %vm1327_vm3, %v1087_v47 }
  0x96   : > { %648 = vmatmul.mubr.f32.vlgmr.msra.gmra.mrb[2].mxu0 %v1353_v33 }
  0xc8   : > { %v400_v50 = vpop.permute.xlu0 %399 }
  0xc9   : > { %v405_v51 = vrot.slane %v400_v50, %v404_v20 }
 0x129   : > { %v507_v53 = vpop.f32.mrb[0].mxu0 }
 0x12a   : > { %v508_v54 = vadd.f32 %v507_v53, %v405_v51  ;;  %v578_v55 = vpop.f32.mrb[0].mxu1  ;;  %v509_v56 = vpop.f32.mrb[1].mxu0 }
 0x12b   : > { %v579_v58 = vadd.f32 %v578_v55, %v405_v51  ;;  %v510_v59 = vadd.f32 %v509_v56, %v405_v51  ;;  %v580_v60 = vpop.f32.mrb[1].mxu1 }
 0x12c   : > { %v581_v10 = vadd.f32 %v580_v60, %v405_v51 }
 0x12d   : > { %v731_v61 = vcombine.low %v508_v54, %v510_v59 }
 0x12e   : > { %v732_v62 = vcombine.low %v579_v58, %v581_v10 }
 0x12f   : > { %v740_v33 = vrot.slane %v731_v61, %v739_v57 }
 0x130   : > { %v747_v63 = vrot.slane %v732_v62, %v739_v57 }
 0x132   : > { %v762_v0 = vcombine.low %v740_v33, %v747_v63 }
 0x134   : > { %v770_v4 = vrot.slane %v762_v0, %v739_v57 }
 0x14a   : > { %v889_v6 = vpop.f32.mrb[2].mxu1 }
 0x14b   : > { %v890_v20 = vpop.f32.mrb[3].mxu1 }
 0x14c   : > { %v891_v7 = vadd.f32 %v890_v20, %v889_v6 }
 0x14e   : > { %v721_v5 = vadd.f32 %v891_v7, %v405_v51 }
 0x150   : > { %v761_v8 = vrot.slane %v721_v5, %v739_v57 }
 0x169   : > { %v649_v9 = vpop.f32.mrb[2].mxu0 }
 0x16a   : > { %v650_v11 = vadd.f32 %v649_v9, %v405_v51  ;;  %v651_v12 = vpop.f32.mrb[3].mxu0 }
 0x16b   : > { %v652_v2 = vadd.f32 %v651_v12, %v405_v51 }
 0x16d   : > { %v733_v13 = vcombine.low %v650_v11, %v652_v2 }
 0x16f   : > { %v754_v14 = vrot.slane %v733_v13, %v739_v57 }
 0x171   : > { %v763_v15 = vcombine.low %v754_v14, %v761_v8 }
 0x173   : > { %v777_v16 = vrot.slane %v763_v15, %v739_v57 }
 0x175   : > { %v778_v17 = vcombine.low %v770_v4, %v777_v16 }
 0x177   : > { %784 = vst.msk [vmem:[%s170_s24] sm:$0x7f] %vm782_vm4, %v778_v17 }
 0x178 PF: > { %s15_s14 = sadd.s32 1, %s1143_s14  }
 0x179   : > { %p12_p4 = scmp.ge.s32.totalorder %s15_s14, 4  }
 0x17b   :  { %14 = sbr.rel (!%p12_p4) target bundleno = 3 (0x3), region = 62 }

</bundles_post_ra>
